<compile_context>
chip_gen: v7x
topology: tpu7x:2x2x1
jax: 0.10.0
libtpu: 0.0.40
codegen_flags: <defaults>
</compile_context>

<pallas_src>
import functools
import math

import jax
import jax.numpy as jnp
from jax import lax
from jax.experimental import pallas as pl
from jax.experimental.pallas import tpu as pltpu

BN_EPS = 1e-5


def _compiler_params():
    # All grids here are 1-D and data-independent per step (BN stats are per-tile partials
    # reduced outside the kernel), so the axis can be "parallel" (megacore on v7x).
    return pltpu.CompilerParams(
        dimension_semantics=("parallel",),
        vmem_limit_bytes=32 * 1024 * 1024,  # explicit; fits v7x's 64 MiB physical with headroom
    )


def _pick_row_tile(m, target=512):
    # Largest multiple-of-8 divisor of m that is <= target (>=512 rows amortizes the
    # ~0.35us/grid-step overhead at realistic shapes); fall back to a single tile.
    cands = [d for d in range(8, min(target, m) + 1, 8) if m % d == 0]
    return cands[-1] if cands else m


# ----------------------------------------------------------------------------
# Stage 1: fused conv1 of all 4 branches (one 1x1 matmul) + bn1 partial stats
# ----------------------------------------------------------------------------
def _s1_kernel(x_ref, w1_ref, t1_ref, s1_ref):
    x = x_ref[...].astype(jnp.bfloat16)                                   # (tm, cin)
    t = jnp.dot(x, w1_ref[...], preferred_element_type=jnp.float32)      # (tm, p) f32 acc
    t1_ref[...] = t.astype(jnp.bfloat16)
    # single-traversal stats: sum and sum-of-squares (f32)
    s1_ref[0] = jnp.concatenate(
        [jnp.sum(t, axis=0, keepdims=True),
         jnp.sum(t * t, axis=0, keepdims=True)], axis=0)


def _stage1(x2d, w1, tm):
    m, cin = x2d.shape
    p = w1.shape[1]
    nt = m // tm
    return pl.pallas_call(
        _s1_kernel,
        grid=(nt,),
        in_specs=[pl.BlockSpec((tm, cin), lambda i: (i, 0)),
                  pl.BlockSpec((cin, p), lambda i: (0, 0))],
        out_specs=[pl.BlockSpec((tm, p), lambda i: (i, 0)),
                   pl.BlockSpec((1, 2, p), lambda i: (i, 0, 0))],
        out_shape=[jax.ShapeDtypeStruct((m, p), jnp.bfloat16),
                   jax.ShapeDtypeStruct((nt, 2, p), jnp.float32)],
        compiler_params=_compiler_params(),
        cost_estimate=pl.CostEstimate(
            flops=2 * m * cin * p, transcendentals=0,
            bytes_accessed=m * cin * 4 + cin * p * 2 + m * p * 2 + nt * 2 * p * 4),
    )(x2d, w1)


# ----------------------------------------------------------------------------
# Stage 2: bn1(+relu) -> fused grouped 3x3 (im2col, one K=9*planes matmul) + bn2 stats
# One image per grid step; halo handled in a VMEM pad scratch (only the ring is zeroed).
# ----------------------------------------------------------------------------
def _s2_kernel(t1_ref, sc1_ref, bi1_ref, w2_ref, a2_ref, s2_ref, pad_ref, col_ref):
    _, h, w, p = t1_ref.shape
    m = h * w
    sc = sc1_ref[...].reshape(1, 1, p)
    bi = bi1_ref[...].reshape(1, 1, p)
    y1 = jnp.maximum(t1_ref[0].astype(jnp.float32) * sc + bi, 0.0).astype(jnp.bfloat16)

    # interior written once; only the 1-wide halo ring is zeroed (no full-buffer memset)
    pad_ref[1:h + 1, 1:w + 1, :] = y1
    pad_ref[0:1, :, :] = jnp.zeros((1, w + 2, p), jnp.bfloat16)
    pad_ref[h + 1:h + 2, :, :] = jnp.zeros((1, w + 2, p), jnp.bfloat16)
    pad_ref[1:h + 1, 0:1, :] = jnp.zeros((h, 1, p), jnp.bfloat16)
    pad_ref[1:h + 1, w + 1:w + 2, :] = jnp.zeros((h, 1, p), jnp.bfloat16)

    # im2col: the 9 shifted windows concatenated along K -> one deep MXU matmul (K = 9*p)
    # instead of 9 shallow K=p dots.
    for t in range(9):
        kh, kw = divmod(t, 3)
        col_ref[:, t * p:(t + 1) * p] = pad_ref[kh:kh + h, kw:kw + w, :].reshape(m, p)
    acc = jnp.dot(col_ref[...], w2_ref[...], preferred_element_type=jnp.float32)  # (m, p)

    a2_ref[...] = acc.astype(jnp.bfloat16)
    s2_ref[0] = jnp.concatenate(
        [jnp.sum(acc, axis=0, keepdims=True),
         jnp.sum(acc * acc, axis=0, keepdims=True)], axis=0)
    # TODO(synk): for very large H*W per image, row-tile this stage with a 1-row halo via
    # manual pltpu.make_async_copy instead of one whole image per grid step.
    # TODO(synk): at planes>=512 replace the dense block-diagonal w2 (only ~4% nonzero here)
    # with per-group contractions; at planes=64 per-group K is 1-4 channels - too shallow for
    # the MXU - so the collapsed dense K=9*planes matmul is the better trade.


def _stage2(t1_img, scale1, bias1, w2cat):
    n, h, w, p = t1_img.shape
    m_img = h * w
    m = n * m_img
    return pl.pallas_call(
        _s2_kernel,
        grid=(n,),
        in_specs=[pl.BlockSpec((1, h, w, p), lambda i: (i, 0, 0, 0)),
                  pl.BlockSpec((1, p), lambda i: (0, 0)),
                  pl.BlockSpec((1, p), lambda i: (0, 0)),
                  pl.BlockSpec((9 * p, p), lambda i: (0, 0))],
        out_specs=[pl.BlockSpec((m_img, p), lambda i: (i, 0)),
                   pl.BlockSpec((1, 2, p), lambda i: (i, 0, 0))],
        out_shape=[jax.ShapeDtypeStruct((m, p), jnp.bfloat16),
                   jax.ShapeDtypeStruct((n, 2, p), jnp.float32)],
        scratch_shapes=[pltpu.VMEM((h + 2, w + 2, p), jnp.bfloat16),
                        pltpu.VMEM((m_img, 9 * p), jnp.bfloat16)],
        compiler_params=_compiler_params(),
        cost_estimate=pl.CostEstimate(
            flops=2 * m * 9 * p * p, transcendentals=0,
            bytes_accessed=2 * m * p * 2 + 9 * p * p * 2 + n * 2 * p * 4),
    )(t1_img, scale1, bias1, w2cat)


# ----------------------------------------------------------------------------
# Stage 3: bn2(+relu) -> conv3 (1x1 to 2*planes) + bn3 partial stats
# ----------------------------------------------------------------------------
def _s3_kernel(a2_ref, sc2_ref, bi2_ref, w3_ref, z_ref, s3_ref):
    y2 = jnp.maximum(a2_ref[...].astype(jnp.float32) * sc2_ref[...] + bi2_ref[...], 0.0)
    z = jnp.dot(y2.astype(jnp.bfloat16), w3_ref[...],
                preferred_element_type=jnp.float32)                       # (tm, 2p)
    z_ref[...] = z.astype(jnp.bfloat16)
    s3_ref[0] = jnp.concatenate(
        [jnp.sum(z, axis=0, keepdims=True),
         jnp.sum(z * z, axis=0, keepdims=True)], axis=0)


def _stage3(a2_flat, scale2, bias2, w3, tm):
    m, p = a2_flat.shape
    p2 = w3.shape[1]
    nt = m // tm
    return pl.pallas_call(
        _s3_kernel,
        grid=(nt,),
        in_specs=[pl.BlockSpec((tm, p), lambda i: (i, 0)),
                  pl.BlockSpec((1, p), lambda i: (0, 0)),
                  pl.BlockSpec((1, p), lambda i: (0, 0)),
                  pl.BlockSpec((p, p2), lambda i: (0, 0))],
        out_specs=[pl.BlockSpec((tm, p2), lambda i: (i, 0)),
                   pl.BlockSpec((1, 2, p2), lambda i: (i, 0, 0))],
        out_shape=[jax.ShapeDtypeStruct((m, p2), jnp.bfloat16),
                   jax.ShapeDtypeStruct((nt, 2, p2), jnp.float32)],
        compiler_params=_compiler_params(),
        cost_estimate=pl.CostEstimate(
            flops=2 * m * p * p2, transcendentals=0,
            bytes_accessed=m * p * 2 + p * p2 * 2 + m * p2 * 2 + nt * 2 * p2 * 4),
    )(a2_flat, scale2, bias2, w3)


# ----------------------------------------------------------------------------
# Stage 4: bn3 (affine) + residual add + relu  (lane-dense 2*planes = 128 output)
# ----------------------------------------------------------------------------
def _s4_kernel(x_ref, z_ref, sc3_ref, bi3_ref, o_ref):
    o = x_ref[...] + z_ref[...].astype(jnp.float32) * sc3_ref[...] + bi3_ref[...]
    o_ref[...] = jnp.maximum(o, 0.0).astype(o_ref.dtype)


def _stage4(x2d, z_flat, scale3, bias3, tm, out_dtype):
    m, c = x2d.shape
    nt = m // tm
    return pl.pallas_call(
        _s4_kernel,
        grid=(nt,),
        in_specs=[pl.BlockSpec((tm, c), lambda i: (i, 0)),
                  pl.BlockSpec((tm, c), lambda i: (i, 0)),
                  pl.BlockSpec((1, c), lambda i: (0, 0)),
                  pl.BlockSpec((1, c), lambda i: (0, 0))],
        out_specs=pl.BlockSpec((tm, c), lambda i: (i, 0)),
        out_shape=jax.ShapeDtypeStruct((m, c), out_dtype),
        compiler_params=_compiler_params(),
        cost_estimate=pl.CostEstimate(
            flops=4 * m * c, transcendentals=0,
            bytes_accessed=m * c * 4 + m * c * 2 + m * c * 4),
    )(x2d, z_flat, scale3, bias3)


# ----------------------------------------------------------------------------
# Host glue: reduce per-tile (sum, sumsq) partials -> fused BN scale/bias (f32)
# ----------------------------------------------------------------------------
def _bn_affine(partials, count, gamma, beta):
    s = jnp.sum(partials[:, 0, :], axis=0)
    ss = jnp.sum(partials[:, 1, :], axis=0)
    mean = s / count
    var = jnp.maximum(ss / count - mean * mean, 0.0)     # biased var (PyTorch training-mode)
    scale = gamma * lax.rsqrt(var + BN_EPS)              # (1, C)
    bias = beta - mean * scale                           # (1, C)
    return scale, bias


# ----------------------------------------------------------------------------
# Parameter construction (deterministic, synthetic) + branch/tap fusion at init
# ----------------------------------------------------------------------------
def _expand_grouped_weight(w_g, groups):
    """PyTorch grouped-conv weight (Cout, Cin/groups, 3, 3) -> dense block-diagonal
    weight of shape (3, 3, Cin, Cout)."""
    cout, cpg_in, kh, kw = w_g.shape
    cin = cpg_in * groups
    cpg_out = cout // groups
    dense = jnp.zeros((kh, kw, cin, cout), jnp.float32)
    for g in range(groups):
        block = w_g[g * cpg_out:(g + 1) * cpg_out]            # (cpg_out, cpg_in, 3, 3)
        block = jnp.transpose(block, (2, 3, 1, 0))            # (3, 3, cpg_in, cpg_out)
        dense = dense.at[:, :, g * cpg_in:(g + 1) * cpg_in,
                         g * cpg_out:(g + 1) * cpg_out].set(block)
    return dense


def init_params(key, inplanes, planes, groups=8):
    k0 = int(math.log2(planes)) - 6
    group_planlist = [2 ** k0] + [2 ** i for i in range(k0, int(math.log2(planes)) - 3)]
    branch_channels = [gp * groups for gp in group_planlist]   # sums to `planes`
    assert sum(branch_channels) == planes

    keys = iter(jax.random.split(key, 4 * len(branch_channels) + 8))
    w1s, g1s, b1s = [], [], []
    w2_dense = jnp.zeros((3, 3, planes, planes), jnp.float32)
    off = 0
    for c in branch_channels:
        w1s.append(0.1 * jax.random.normal(next(keys), (inplanes, c), jnp.float32))
        g1s.append(1.0 + 0.1 * jax.random.normal(next(keys), (1, c), jnp.float32))
        b1s.append(0.1 * jax.random.normal(next(keys), (1, c), jnp.float32))
        w2_grouped = 0.1 * jax.random.normal(next(keys), (c, c // groups, 3, 3), jnp.float32)
        w2_dense = w2_dense.at[:, :, off:off + c, off:off + c].set(
            _expand_grouped_weight(w2_grouped, groups))
        off += c

    # Branch fusion: concatenating per-channel weights / BN params matches the per-branch
    # formulation exactly (same channel order as torch.cat(..., dim=1)). The 9 conv taps are
    # stacked along K so the kernel can do one deep matmul against the im2col slab.
    return {
        "w1": jnp.concatenate(w1s, axis=1).astype(jnp.bfloat16),            # (Cin, P)
        "g1": jnp.concatenate(g1s, axis=1),                                 # (1, P) f32
        "b1": jnp.concatenate(b1s, axis=1),
        "w2": w2_dense.reshape(9 * planes, planes).astype(jnp.bfloat16),    # (9P, P)
        "g2": 1.0 + 0.1 * jax.random.normal(next(keys), (1, planes), jnp.float32),
        "b2": 0.1 * jax.random.normal(next(keys), (1, planes), jnp.float32),
        "w3": (0.1 * jax.random.normal(next(keys), (planes, 2 * planes),
                                       jnp.float32)).astype(jnp.bfloat16),  # (P, 2P)
        "g3": 1.0 + 0.1 * jax.random.normal(next(keys), (1, 2 * planes), jnp.float32),
        "b3": 0.1 * jax.random.normal(next(keys), (1, 2 * planes), jnp.float32),
    }


# ----------------------------------------------------------------------------
# Forward pass
# ----------------------------------------------------------------------------
def fanext_bottleneck_v3(x, params, *, stride=1, data_format="NCHW", row_tile=None,
                         out_dtype=jnp.float32):
    # downsample=None in the module => residual = x, which requires stride=1 and
    # inplanes == 2*planes.
    # TODO(synk): stride>1 / downsample path not implemented (never valid with downsample=None).
    assert stride == 1
    if data_format == "NCHW":
        # In a full NHWC network pass data_format="NHWC" and skip this HBM round trip.
        x = jnp.transpose(x, (0, 2, 3, 1))
    x = x.astype(jnp.float32)
    n, h, w, cin = x.shape
    p = params["g1"].shape[-1]
    cout = params["g3"].shape[-1]
    assert cin == cout, "residual add needs inplanes == 2*planes"

    m = n * h * w
    tm = row_tile if row_tile is not None else _pick_row_tile(m)
    assert m % tm == 0 and (tm % 8 == 0 or tm == m)
    x2d = x.reshape(m, cin)                       # contiguous reshape (free)

    # stage 1: conv1 (all branches) + bn1 partial stats
    t1_flat, s1 = _stage1(x2d, params["w1"], tm)
    sc1, bi1 = _bn_affine(s1, m, params["g1"], params["b1"])

    # stage 2: bn1+relu -> grouped 3x3 (halo + im2col) + bn2 partial stats
    a2_flat, s2 = _stage2(t1_flat.reshape(n, h, w, p), sc1, bi1, params["w2"])
    sc2, bi2 = _bn_affine(s2, m, params["g2"], params["b2"])

    # stage 3: bn2+relu -> conv3 + bn3 partial stats
    z_flat, s3 = _stage3(a2_flat, sc2, bi2, params["w3"], tm)
    sc3, bi3 = _bn_affine(s3, m, params["g3"], params["b3"])

    # stage 4: bn3 + residual add + relu
    out2d = _stage4(x2d, z_flat, sc3, bi3, tm, out_dtype)

    out = out2d.reshape(n, h, w, cout)
    if data_format == "NCHW":
        out = jnp.transpose(out, (0, 3, 1, 2))
    return out


# ----------------------------------------------------------------------------
# Pure-JAX f32 reference (same fused weights, f32 activations) for a loose check
# ----------------------------------------------------------------------------
def _reference_forward(x_nhwc, params):
    p = params["g1"].shape[-1]
    w1 = params["w1"].astype(jnp.float32)
    w2 = params["w2"].astype(jnp.float32).reshape(3, 3, p, p)
    w3 = params["w3"].astype(jnp.float32)

    def bn(v, g, b):
        mu = jnp.mean(v, axis=(0, 1, 2), keepdims=True)
        var = jnp.mean(jnp.square(v - mu), axis=(0, 1, 2), keepdims=True)
        return (v - mu) * lax.rsqrt(var + BN_EPS) * g.reshape(1, 1, 1, -1) + b.reshape(1, 1, 1, -1)

    t = jnp.einsum("nhwc,cp->nhwp", x_nhwc, w1)
    y1 = jax.nn.relu(bn(t, params["g1"], params["b1"]))
    a2 = lax.conv_general_dilated(y1, w2, window_strides=(1, 1), padding="SAME",
                                  dimension_numbers=("NHWC", "HWIO", "NHWC"))
    y2 = jax.nn.relu(bn(a2, params["g2"], params["b2"]))
    z = bn(jnp.einsum("nhwp,pq->nhwq", y2, w3), params["g3"], params["b3"])
    return jax.nn.relu(x_nhwc + z)


if __name__ == "__main__":
    inplanes, planes = 128, 64        # planes=64 is the smallest valid (log2(planes) >= 6)
    N, H, W = 2, 16, 16

    key = jax.random.PRNGKey(0)
    kx, kp = jax.random.split(key)
    x = jax.random.normal(kx, (N, inplanes, H, W), jnp.float32)   # PyTorch-style NCHW input
    params = init_params(kp, inplanes, planes)

    # row_tile=128 exercises a 4-step pipelined grid at this demo size; production uses the
    # default (>=512 rows per step) picked by _pick_row_tile.
    fwd = jax.jit(functools.partial(fanext_bottleneck_v3, stride=1, row_tile=128))
    out = fwd(x, params)
    jax.block_until_ready(out)

    assert out.shape == (N, 2 * planes, H, W)
    assert bool(jnp.all(jnp.isfinite(out)))

    # loose check vs. an f32 reference (kernel uses bf16 activations/weights on the MXU)
    ref = jnp.transpose(_reference_forward(jnp.transpose(x, (0, 2, 3, 1)), params),
                        (0, 3, 1, 2))
    err = float(jnp.max(jnp.abs(out - ref)))
    assert err < 1e-1, f"max abs err vs f32 reference: {err}"
    print("KERNEL_OK")
</pallas_src>

<mosaic_0001>
module attributes {stable_mosaic.version = 11 : i64} {
  func.func @_s1_kernel(%arg0: i32, %arg1: memref<128x128xf32, #tpu.memory_space<vmem>>, %arg2: memref<128x64xbf16, #tpu.memory_space<vmem>>, %arg3: memref<128x64xbf16, #tpu.memory_space<vmem>>, %arg4: memref<1x2x64xf32, #tpu.memory_space<vmem>>) attributes {dimension_semantics = [#tpu.dimension_semantics<parallel>], iteration_bounds = array<i64: 4>, scalar_prefetch = 0 : i64, scratch_operands = 0 : i64, tpu.core_type = #tpu.core_type<tc>, window_params = [{transform_indices = @transform_0, window_bounds = array<i64: 128, 128>}, {pipeline_mode = #tpu.pipeline_mode<synchronous>, transform_indices = @transform_1, window_bounds = array<i64: 128, 64>}, {transform_indices = @transform_2, window_bounds = array<i64: 128, 64>}, {transform_indices = @transform_3, window_bounds = array<i64: 1, 2, 64>}]} {
    %c0 = arith.constant 0 : index
    %c0_0 = arith.constant 0 : index
    %0 = vector.load %arg1[%c0, %c0_0] : memref<128x128xf32, #tpu.memory_space<vmem>>, vector<128x128xf32>
    %1 = arith.truncf %0 : vector<128x128xf32> to vector<128x128xbf16>
    %c0_1 = arith.constant 0 : index
    %c0_2 = arith.constant 0 : index
    %2 = vector.load %arg2[%c0_1, %c0_2] : memref<128x64xbf16, #tpu.memory_space<vmem>>, vector<128x64xbf16>
    %cst = arith.constant dense<0.000000e+00> : vector<128x64xf32>
    %3 = tpu.matmul %1, %2, %cst {dimension_numbers = #tpu.dot_dimension_numbers<[1], [0], [0], [1], [0, 0, 1, 1], [], []>} : vector<128x128xbf16>, vector<128x64xbf16>, vector<128x64xf32> -> vector<128x64xf32>
    %4 = arith.truncf %3 : vector<128x64xf32> to vector<128x64xbf16>
    %c0_3 = arith.constant 0 : index
    %c0_4 = arith.constant 0 : index
    %5 = vector.load %arg3[%c0_3, %c0_4] : memref<128x64xbf16, #tpu.memory_space<vmem>>, vector<128x64xbf16>
    tpu.vector_store %arg3[%c0_3, %c0_4], %4 {strides = array<i32>} : memref<128x64xbf16, #tpu.memory_space<vmem>>, vector<128x64xbf16>,
    %cst_5 = arith.constant dense<0.000000e+00> : vector<64xf32>
    %6 = vector.multi_reduction <add>, %3, %cst_5 [0] : vector<128x64xf32> to vector<64xf32>
    %7 = vector.shape_cast %6 : vector<64xf32> to vector<1x64xf32>
    %8 = arith.mulf %3, %3 : vector<128x64xf32>
    %cst_6 = arith.constant dense<0.000000e+00> : vector<64xf32>
    %9 = vector.multi_reduction <add>, %8, %cst_6 [0] : vector<128x64xf32> to vector<64xf32>
    %10 = vector.shape_cast %9 : vector<64xf32> to vector<1x64xf32>
    %11 = tpu.concatenate %7, %10 in 0 : vector<1x64xf32>, vector<1x64xf32> -> vector<2x64xf32>
    %c0_7 = arith.constant 0 : index
    %c0_8 = arith.constant 0 : index
    %c0_9 = arith.constant 0 : index
    %12 = vector.load %arg4[%c0_7, %c0_8, %c0_9] : memref<1x2x64xf32, #tpu.memory_space<vmem>>, vector<1x2x64xf32>
    %13 = vector.shape_cast %12 : vector<1x2x64xf32> to vector<2x64xf32>
    %14 = vector.shape_cast %11 : vector<2x64xf32> to vector<1x2x64xf32>
    tpu.vector_store %arg4[%c0_7, %c0_8, %c0_9], %14 {strides = array<i32>} : memref<1x2x64xf32, #tpu.memory_space<vmem>>, vector<1x2x64xf32>,
    return
  }
  func.func @transform_0(%arg0: i32) -> (i32, i32) {
    %c0_i32 = arith.constant 0 : i32
    %c0_i32_0 = arith.constant 0 : i32
    return %arg0, %c0_i32 : i32, i32
  }
  func.func @transform_1(%arg0: i32) -> (i32, i32) {
    %c0_i32 = arith.constant 0 : i32
    %c0_i32_0 = arith.constant 0 : i32
    %c0_i32_1 = arith.constant 0 : i32
    return %c0_i32, %c0_i32_0 : i32, i32
  }
  func.func @transform_2(%arg0: i32) -> (i32, i32) {
    %c0_i32 = arith.constant 0 : i32
    %c0_i32_0 = arith.constant 0 : i32
    return %arg0, %c0_i32 : i32, i32
  }
  func.func @transform_3(%arg0: i32) -> (i32, i32, i32) {
    %c0_i32 = arith.constant 0 : i32
    %c0_i32_0 = arith.constant 0 : i32
    %c0_i32_1 = arith.constant 0 : i32
    return %arg0, %c0_i32, %c0_i32_0 : i32, i32, i32
  }
}

module attributes {stable_mosaic.version = 11 : i64} {
  func.func @_s2_kernel(%arg0: i32, %arg1: memref<1x16x16x64xbf16, #tpu.memory_space<vmem>>, %arg2: memref<1x64xf32, #tpu.memory_space<vmem>>, %arg3: memref<1x64xf32, #tpu.memory_space<vmem>>, %arg4: memref<576x64xbf16, #tpu.memory_space<vmem>>, %arg5: memref<256x64xbf16, #tpu.memory_space<vmem>>, %arg6: memref<1x2x64xf32, #tpu.memory_space<vmem>>, %arg7: memref<18x18x64xbf16, #tpu.memory_space<vmem>>, %arg8: memref<256x576xbf16, #tpu.memory_space<vmem>>) attributes {dimension_semantics = [#tpu.dimension_semantics<parallel>], iteration_bounds = array<i64: 2>, scalar_prefetch = 0 : i64, scratch_operands = 2 : i64, tpu.core_type = #tpu.core_type<tc>, window_params = [{transform_indices = @transform_0, window_bounds = array<i64: 1, 16, 16, 64>}, {pipeline_mode = #tpu.pipeline_mode<synchronous>, transform_indices = @transform_1, window_bounds = array<i64: 1, 64>}, {pipeline_mode = #tpu.pipeline_mode<synchronous>, transform_indices = @transform_2, window_bounds = array<i64: 1, 64>}, {pipeline_mode = #tpu.pipeline_mode<synchronous>, transform_indices = @transform_3, window_bounds = array<i64: 576, 64>}, {transform_indices = @transform_4, window_bounds = array<i64: 256, 64>}, {transform_indices = @transform_5, window_bounds = array<i64: 1, 2, 64>}]} {
    %c0 = arith.constant 0 : index
    %c0_0 = arith.constant 0 : index
    %0 = vector.load %arg2[%c0, %c0_0] : memref<1x64xf32, #tpu.memory_space<vmem>>, vector<1x64xf32>
    %1 = vector.shape_cast %0 : vector<1x64xf32> to vector<1x1x64xf32>
    %c0_1 = arith.constant 0 : index
    %c0_2 = arith.constant 0 : index
    %2 = vector.load %arg3[%c0_1, %c0_2] : memref<1x64xf32, #tpu.memory_space<vmem>>, vector<1x64xf32>
    %3 = vector.shape_cast %2 : vector<1x64xf32> to vector<1x1x64xf32>
    %c0_3 = arith.constant 0 : index
    %c0_4 = arith.constant 0 : index
    %c0_5 = arith.constant 0 : index
    %c0_6 = arith.constant 0 : index
    %4 = vector.load %arg1[%c0_3, %c0_4, %c0_5, %c0_6] : memref<1x16x16x64xbf16, #tpu.memory_space<vmem>>, vector<1x16x16x64xbf16>
    %5 = vector.shape_cast %4 : vector<1x16x16x64xbf16> to vector<16x16x64xbf16>
    %6 = arith.extf %5 : vector<16x16x64xbf16> to vector<16x16x64xf32>
    %7 = vector.broadcast %1 : vector<1x1x64xf32> to vector<16x16x64xf32>
    %8 = arith.mulf %6, %7 : vector<16x16x64xf32>
    %9 = vector.broadcast %3 : vector<1x1x64xf32> to vector<16x16x64xf32>
    %10 = arith.addf %8, %9 : vector<16x16x64xf32>
    %cst = arith.constant 0.000000e+00 : f32
    %11 = vector.broadcast %cst : f32 to vector<16x16x64xf32>
    %12 = arith.maximumf %10, %11 : vector<16x16x64xf32>
    %13 = arith.truncf %12 : vector<16x16x64xf32> to vector<16x16x64xbf16>
    %c1 = arith.constant 1 : index
    %c1_7 = arith.constant 1 : index
    %c0_8 = arith.constant 0 : index
    %14 = vector.load %arg7[%c1, %c1_7, %c0_8] : memref<18x18x64xbf16, #tpu.memory_space<vmem>>, vector<16x16x64xbf16>
    tpu.vector_store %arg7[%c1, %c1_7, %c0_8], %13 {strides = array<i32>} : memref<18x18x64xbf16, #tpu.memory_space<vmem>>, vector<16x16x64xbf16>,
    %cst_9 = arith.constant 0.000000e+00 : bf16
    %15 = vector.broadcast %cst_9 : bf16 to vector<1x18x64xbf16>
    %c0_10 = arith.constant 0 : index
    %c0_11 = arith.constant 0 : index
    %c0_12 = arith.constant 0 : index
    %16 = vector.load %arg7[%c0_10, %c0_11, %c0_12] : memref<18x18x64xbf16, #tpu.memory_space<vmem>>, vector<1x18x64xbf16>
    tpu.vector_store %arg7[%c0_10, %c0_11, %c0_12], %15 {strides = array<i32>} : memref<18x18x64xbf16, #tpu.memory_space<vmem>>, vector<1x18x64xbf16>,
    %cst_13 = arith.constant 0.000000e+00 : bf16
    %17 = vector.broadcast %cst_13 : bf16 to vector<1x18x64xbf16>
    %c17 = arith.constant 17 : index
    %c0_14 = arith.constant 0 : index
    %c0_15 = arith.constant 0 : index
    %18 = vector.load %arg7[%c17, %c0_14, %c0_15] : memref<18x18x64xbf16, #tpu.memory_space<vmem>>, vector<1x18x64xbf16>
    tpu.vector_store %arg7[%c17, %c0_14, %c0_15], %17 {strides = array<i32>} : memref<18x18x64xbf16, #tpu.memory_space<vmem>>, vector<1x18x64xbf16>,
    %cst_16 = arith.constant 0.000000e+00 : bf16
    %19 = vector.broadcast %cst_16 : bf16 to vector<16x1x64xbf16>
    %c1_17 = arith.constant 1 : index
    %c0_18 = arith.constant 0 : index
    %c0_19 = arith.constant 0 : index
    %20 = vector.load %arg7[%c1_17, %c0_18, %c0_19] : memref<18x18x64xbf16, #tpu.memory_space<vmem>>, vector<16x1x64xbf16>
    tpu.vector_store %arg7[%c1_17, %c0_18, %c0_19], %19 {strides = array<i32>} : memref<18x18x64xbf16, #tpu.memory_space<vmem>>, vector<16x1x64xbf16>,
    %cst_20 = arith.constant 0.000000e+00 : bf16
    %21 = vector.broadcast %cst_20 : bf16 to vector<16x1x64xbf16>
    %c1_21 = arith.constant 1 : index
    %c17_22 = arith.constant 17 : index
    %c0_23 = arith.constant 0 : index
    %22 = vector.load %arg7[%c1_21, %c17_22, %c0_23] : memref<18x18x64xbf16, #tpu.memory_space<vmem>>, vector<16x1x64xbf16>
    tpu.vector_store %arg7[%c1_21, %c17_22, %c0_23], %21 {strides = array<i32>} : memref<18x18x64xbf16, #tpu.memory_space<vmem>>, vector<16x1x64xbf16>,
    %c0_24 = arith.constant 0 : index
    %c0_25 = arith.constant 0 : index
    %c0_26 = arith.constant 0 : index
    %23 = vector.load %arg7[%c0_24, %c0_25, %c0_26] : memref<18x18x64xbf16, #tpu.memory_space<vmem>>, vector<16x16x64xbf16>
    %24 = vector.shape_cast %23 : vector<16x16x64xbf16> to vector<256x64xbf16>
    %c0_27 = arith.constant 0 : index
    %c0_28 = arith.constant 0 : index
    %25 = vector.load %arg8[%c0_27, %c0_28] : memref<256x576xbf16, #tpu.memory_space<vmem>>, vector<256x64xbf16>
    tpu.vector_store %arg8[%c0_27, %c0_28], %24 {strides = array<i32>} : memref<256x576xbf16, #tpu.memory_space<vmem>>, vector<256x64xbf16>,
    %c0_29 = arith.constant 0 : index
    %c1_30 = arith.constant 1 : index
    %c0_31 = arith.constant 0 : index
    %26 = vector.load %arg7[%c0_29, %c1_30, %c0_31] : memref<18x18x64xbf16, #tpu.memory_space<vmem>>, vector<16x16x64xbf16>
    %27 = vector.shape_cast %26 : vector<16x16x64xbf16> to vector<256x64xbf16>
    %c0_32 = arith.constant 0 : index
    %c64 = arith.constant 64 : index
    %28 = vector.load %arg8[%c0_32, %c64] : memref<256x576xbf16, #tpu.memory_space<vmem>>, vector<256x64xbf16>
    tpu.vector_store %arg8[%c0_32, %c64], %27 {strides = array<i32>} : memref<256x576xbf16, #tpu.memory_space<vmem>>, vector<256x64xbf16>,
    %c0_33 = arith.constant 0 : index
    %c2 = arith.constant 2 : index
    %c0_34 = arith.constant 0 : index
    %29 = vector.load %arg7[%c0_33, %c2, %c0_34] : memref<18x18x64xbf16, #tpu.memory_space<vmem>>, vector<16x16x64xbf16>
    %30 = vector.shape_cast %29 : vector<16x16x64xbf16> to vector<256x64xbf16>
    %c0_35 = arith.constant 0 : index
    %c128 = arith.constant 128 : index
    %31 = vector.load %arg8[%c0_35, %c128] : memref<256x576xbf16, #tpu.memory_space<vmem>>, vector<256x64xbf16>
    tpu.vector_store %arg8[%c0_35, %c128], %30 {strides = array<i32>} : memref<256x576xbf16, #tpu.memory_space<vmem>>, vector<256x64xbf16>,
    %c1_36 = arith.constant 1 : index
    %c0_37 = arith.constant 0 : index
    %c0_38 = arith.constant 0 : index
    %32 = vector.load %arg7[%c1_36, %c0_37, %c0_38] : memref<18x18x64xbf16, #tpu.memory_space<vmem>>, vector<16x16x64xbf16>
    %33 = vector.shape_cast %32 : vector<16x16x64xbf16> to vector<256x64xbf16>
    %c0_39 = arith.constant 0 : index
    %c192 = arith.constant 192 : index
    %34 = vector.load %arg8[%c0_39, %c192] : memref<256x576xbf16, #tpu.memory_space<vmem>>, vector<256x64xbf16>
    tpu.vector_store %arg8[%c0_39, %c192], %33 {strides = array<i32>} : memref<256x576xbf16, #tpu.memory_space<vmem>>, vector<256x64xbf16>,
    %c1_40 = arith.constant 1 : index
    %c1_41 = arith.constant 1 : index
    %c0_42 = arith.constant 0 : index
    %35 = vector.load %arg7[%c1_40, %c1_41, %c0_42] : memref<18x18x64xbf16, #tpu.memory_space<vmem>>, vector<16x16x64xbf16>
    %36 = vector.shape_cast %35 : vector<16x16x64xbf16> to vector<256x64xbf16>
    %c0_43 = arith.constant 0 : index
    %c256 = arith.constant 256 : index
    %37 = vector.load %arg8[%c0_43, %c256] : memref<256x576xbf16, #tpu.memory_space<vmem>>, vector<256x64xbf16>
    tpu.vector_store %arg8[%c0_43, %c256], %36 {strides = array<i32>} : memref<256x576xbf16, #tpu.memory_space<vmem>>, vector<256x64xbf16>,
    %c1_44 = arith.constant 1 : index
    %c2_45 = arith.constant 2 : index
    %c0_46 = arith.constant 0 : index
    %38 = vector.load %arg7[%c1_44, %c2_45, %c0_46] : memref<18x18x64xbf16, #tpu.memory_space<vmem>>, vector<16x16x64xbf16>
    %39 = vector.shape_cast %38 : vector<16x16x64xbf16> to vector<256x64xbf16>
    %c0_47 = arith.constant 0 : index
    %c320 = arith.constant 320 : index
    %40 = vector.load %arg8[%c0_47, %c320] : memref<256x576xbf16, #tpu.memory_space<vmem>>, vector<256x64xbf16>
    tpu.vector_store %arg8[%c0_47, %c320], %39 {strides = array<i32>} : memref<256x576xbf16, #tpu.memory_space<vmem>>, vector<256x64xbf16>,
    %c2_48 = arith.constant 2 : index
    %c0_49 = arith.constant 0 : index
    %c0_50 = arith.constant 0 : index
    %41 = vector.load %arg7[%c2_48, %c0_49, %c0_50] : memref<18x18x64xbf16, #tpu.memory_space<vmem>>, vector<16x16x64xbf16>
    %42 = vector.shape_cast %41 : vector<16x16x64xbf16> to vector<256x64xbf16>
    %c0_51 = arith.constant 0 : index
    %c384 = arith.constant 384 : index
    %43 = vector.load %arg8[%c0_51, %c384] : memref<256x576xbf16, #tpu.memory_space<vmem>>, vector<256x64xbf16>
    tpu.vector_store %arg8[%c0_51, %c384], %42 {strides = array<i32>} : memref<256x576xbf16, #tpu.memory_space<vmem>>, vector<256x64xbf16>,
    %c2_52 = arith.constant 2 : index
    %c1_53 = arith.constant 1 : index
    %c0_54 = arith.constant 0 : index
    %44 = vector.load %arg7[%c2_52, %c1_53, %c0_54] : memref<18x18x64xbf16, #tpu.memory_space<vmem>>, vector<16x16x64xbf16>
    %45 = vector.shape_cast %44 : vector<16x16x64xbf16> to vector<256x64xbf16>
    %c0_55 = arith.constant 0 : index
    %c448 = arith.constant 448 : index
    %46 = vector.load %arg8[%c0_55, %c448] : memref<256x576xbf16, #tpu.memory_space<vmem>>, vector<256x64xbf16>
    tpu.vector_store %arg8[%c0_55, %c448], %45 {strides = array<i32>} : memref<256x576xbf16, #tpu.memory_space<vmem>>, vector<256x64xbf16>,
    %c2_56 = arith.constant 2 : index
    %c2_57 = arith.constant 2 : index
    %c0_58 = arith.constant 0 : index
    %47 = vector.load %arg7[%c2_56, %c2_57, %c0_58] : memref<18x18x64xbf16, #tpu.memory_space<vmem>>, vector<16x16x64xbf16>
    %48 = vector.shape_cast %47 : vector<16x16x64xbf16> to vector<256x64xbf16>
    %c0_59 = arith.constant 0 : index
    %c512 = arith.constant 512 : index
    %49 = vector.load %arg8[%c0_59, %c512] : memref<256x576xbf16, #tpu.memory_space<vmem>>, vector<256x64xbf16>
    tpu.vector_store %arg8[%c0_59, %c512], %48 {strides = array<i32>} : memref<256x576xbf16, #tpu.memory_space<vmem>>, vector<256x64xbf16>,
    %c0_60 = arith.constant 0 : index
    %c0_61 = arith.constant 0 : index
    %50 = vector.load %arg8[%c0_60, %c0_61] : memref<256x576xbf16, #tpu.memory_space<vmem>>, vector<256x576xbf16>
    %c0_62 = arith.constant 0 : index
    %c0_63 = arith.constant 0 : index
    %51 = vector.load %arg4[%c0_62, %c0_63] : memref<576x64xbf16, #tpu.memory_space<vmem>>, vector<576x64xbf16>
    %cst_64 = arith.constant dense<0.000000e+00> : vector<256x64xf32>
    %52 = tpu.matmul %50, %51, %cst_64 {dimension_numbers = #tpu.dot_dimension_numbers<[1], [0], [0], [1], [0, 0, 1, 1], [], []>} : vector<256x576xbf16>, vector<576x64xbf16>, vector<256x64xf32> -> vector<256x64xf32>
    %53 = arith.truncf %52 : vector<256x64xf32> to vector<256x64xbf16>
    %c0_65 = arith.constant 0 : index
    %c0_66 = arith.constant 0 : index
    %54 = vector.load %arg5[%c0_65, %c0_66] : memref<256x64xbf16, #tpu.memory_space<vmem>>, vector<256x64xbf16>
    tpu.vector_store %arg5[%c0_65, %c0_66], %53 {strides = array<i32>} : memref<256x64xbf16, #tpu.memory_space<vmem>>, vector<256x64xbf16>,
    %cst_67 = arith.constant dense<0.000000e+00> : vector<64xf32>
    %55 = vector.multi_reduction <add>, %52, %cst_67 [0] : vector<256x64xf32> to vector<64xf32>
    %56 = vector.shape_cast %55 : vector<64xf32> to vector<1x64xf32>
    %57 = arith.mulf %52, %52 : vector<256x64xf32>
    %cst_68 = arith.constant dense<0.000000e+00> : vector<64xf32>
    %58 = vector.multi_reduction <add>, %57, %cst_68 [0] : vector<256x64xf32> to vector<64xf32>
    %59 = vector.shape_cast %58 : vector<64xf32> to vector<1x64xf32>
    %60 = tpu.concatenate %56, %59 in 0 : vector<1x64xf32>, vector<1x64xf32> -> vector<2x64xf32>
    %c0_69 = arith.constant 0 : index
    %c0_70 = arith.constant 0 : index
    %c0_71 = arith.constant 0 : index
    %61 = vector.load %arg6[%c0_69, %c0_70, %c0_71] : memref<1x2x64xf32, #tpu.memory_space<vmem>>, vector<1x2x64xf32>
    %62 = vector.shape_cast %61 : vector<1x2x64xf32> to vector<2x64xf32>
    %63 = vector.shape_cast %60 : vector<2x64xf32> to vector<1x2x64xf32>
    tpu.vector_store %arg6[%c0_69, %c0_70, %c0_71], %63 {strides = array<i32>} : memref<1x2x64xf32, #tpu.memory_space<vmem>>, vector<1x2x64xf32>,
    return
  }
  func.func @transform_0(%arg0: i32) -> (i32, i32, i32, i32) {
    %c0_i32 = arith.constant 0 : i32
    %c0_i32_0 = arith.constant 0 : i32
    %c0_i32_1 = arith.constant 0 : i32
    %c0_i32_2 = arith.constant 0 : i32
    return %arg0, %c0_i32, %c0_i32_0, %c0_i32_1 : i32, i32, i32, i32
  }
  func.func @transform_1(%arg0: i32) -> (i32, i32) {
    %c0_i32 = arith.constant 0 : i32
    %c0_i32_0 = arith.constant 0 : i32
    %c0_i32_1 = arith.constant 0 : i32
    return %c0_i32, %c0_i32_0 : i32, i32
  }
  func.func @transform_2(%arg0: i32) -> (i32, i32) {
    %c0_i32 = arith.constant 0 : i32
    %c0_i32_0 = arith.constant 0 : i32
    %c0_i32_1 = arith.constant 0 : i32
    return %c0_i32, %c0_i32_0 : i32, i32
  }
  func.func @transform_3(%arg0: i32) -> (i32, i32) {
    %c0_i32 = arith.constant 0 : i32
    %c0_i32_0 = arith.constant 0 : i32
    %c0_i32_1 = arith.constant 0 : i32
    return %c0_i32, %c0_i32_0 : i32, i32
  }
  func.func @transform_4(%arg0: i32) -> (i32, i32) {
    %c0_i32 = arith.constant 0 : i32
    %c0_i32_0 = arith.constant 0 : i32
    return %arg0, %c0_i32 : i32, i32
  }
  func.func @transform_5(%arg0: i32) -> (i32, i32, i32) {
    %c0_i32 = arith.constant 0 : i32
    %c0_i32_0 = arith.constant 0 : i32
    %c0_i32_1 = arith.constant 0 : i32
    return %arg0, %c0_i32, %c0_i32_0 : i32, i32, i32
  }
}

module attributes {stable_mosaic.version = 11 : i64} {
  func.func @_s3_kernel(%arg0: i32, %arg1: memref<128x64xbf16, #tpu.memory_space<vmem>>, %arg2: memref<1x64xf32, #tpu.memory_space<vmem>>, %arg3: memref<1x64xf32, #tpu.memory_space<vmem>>, %arg4: memref<64x128xbf16, #tpu.memory_space<vmem>>, %arg5: memref<128x128xbf16, #tpu.memory_space<vmem>>, %arg6: memref<1x2x128xf32, #tpu.memory_space<vmem>>) attributes {dimension_semantics = [#tpu.dimension_semantics<parallel>], iteration_bounds = array<i64: 4>, scalar_prefetch = 0 : i64, scratch_operands = 0 : i64, tpu.core_type = #tpu.core_type<tc>, window_params = [{transform_indices = @transform_0, window_bounds = array<i64: 128, 64>}, {pipeline_mode = #tpu.pipeline_mode<synchronous>, transform_indices = @transform_1, window_bounds = array<i64: 1, 64>}, {pipeline_mode = #tpu.pipeline_mode<synchronous>, transform_indices = @transform_2, window_bounds = array<i64: 1, 64>}, {pipeline_mode = #tpu.pipeline_mode<synchronous>, transform_indices = @transform_3, window_bounds = array<i64: 64, 128>}, {transform_indices = @transform_4, window_bounds = array<i64: 128, 128>}, {transform_indices = @transform_5, window_bounds = array<i64: 1, 2, 128>}]} {
    %c0 = arith.constant 0 : index
    %c0_0 = arith.constant 0 : index
    %0 = vector.load %arg1[%c0, %c0_0] : memref<128x64xbf16, #tpu.memory_space<vmem>>, vector<128x64xbf16>
    %1 = arith.extf %0 : vector<128x64xbf16> to vector<128x64xf32>
    %c0_1 = arith.constant 0 : index
    %c0_2 = arith.constant 0 : index
    %2 = vector.load %arg2[%c0_1, %c0_2] : memref<1x64xf32, #tpu.memory_space<vmem>>, vector<1x64xf32>
    %3 = vector.broadcast %2 : vector<1x64xf32> to vector<128x64xf32>
    %4 = arith.mulf %1, %3 : vector<128x64xf32>
    %c0_3 = arith.constant 0 : index
    %c0_4 = arith.constant 0 : index
    %5 = vector.load %arg3[%c0_3, %c0_4] : memref<1x64xf32, #tpu.memory_space<vmem>>, vector<1x64xf32>
    %6 = vector.broadcast %5 : vector<1x64xf32> to vector<128x64xf32>
    %7 = arith.addf %4, %6 : vector<128x64xf32>
    %cst = arith.constant 0.000000e+00 : f32
    %8 = vector.broadcast %cst : f32 to vector<128x64xf32>
    %9 = arith.maximumf %7, %8 : vector<128x64xf32>
    %10 = arith.truncf %9 : vector<128x64xf32> to vector<128x64xbf16>
    %c0_5 = arith.constant 0 : index
    %c0_6 = arith.constant 0 : index
    %11 = vector.load %arg4[%c0_5, %c0_6] : memref<64x128xbf16, #tpu.memory_space<vmem>>, vector<64x128xbf16>
    %cst_7 = arith.constant dense<0.000000e+00> : vector<128x128xf32>
    %12 = tpu.matmul %10, %11, %cst_7 {dimension_numbers = #tpu.dot_dimension_numbers<[1], [0], [0], [1], [0, 0, 1, 1], [], []>} : vector<128x64xbf16>, vector<64x128xbf16>, vector<128x128xf32> -> vector<128x128xf32>
    %13 = arith.truncf %12 : vector<128x128xf32> to vector<128x128xbf16>
    %c0_8 = arith.constant 0 : index
    %c0_9 = arith.constant 0 : index
    %14 = vector.load %arg5[%c0_8, %c0_9] : memref<128x128xbf16, #tpu.memory_space<vmem>>, vector<128x128xbf16>
    tpu.vector_store %arg5[%c0_8, %c0_9], %13 {strides = array<i32>} : memref<128x128xbf16, #tpu.memory_space<vmem>>, vector<128x128xbf16>,
    %cst_10 = arith.constant dense<0.000000e+00> : vector<128xf32>
    %15 = vector.multi_reduction <add>, %12, %cst_10 [0] : vector<128x128xf32> to vector<128xf32>
    %16 = vector.shape_cast %15 : vector<128xf32> to vector<1x128xf32>
    %17 = arith.mulf %12, %12 : vector<128x128xf32>
    %cst_11 = arith.constant dense<0.000000e+00> : vector<128xf32>
    %18 = vector.multi_reduction <add>, %17, %cst_11 [0] : vector<128x128xf32> to vector<128xf32>
    %19 = vector.shape_cast %18 : vector<128xf32> to vector<1x128xf32>
    %20 = tpu.concatenate %16, %19 in 0 : vector<1x128xf32>, vector<1x128xf32> -> vector<2x128xf32>
    %c0_12 = arith.constant 0 : index
    %c0_13 = arith.constant 0 : index
    %c0_14 = arith.constant 0 : index
    %21 = vector.load %arg6[%c0_12, %c0_13, %c0_14] : memref<1x2x128xf32, #tpu.memory_space<vmem>>, vector<1x2x128xf32>
    %22 = vector.shape_cast %21 : vector<1x2x128xf32> to vector<2x128xf32>
    %23 = vector.shape_cast %20 : vector<2x128xf32> to vector<1x2x128xf32>
    tpu.vector_store %arg6[%c0_12, %c0_13, %c0_14], %23 {strides = array<i32>} : memref<1x2x128xf32, #tpu.memory_space<vmem>>, vector<1x2x128xf32>,
    return
  }
  func.func @transform_0(%arg0: i32) -> (i32, i32) {
    %c0_i32 = arith.constant 0 : i32
    %c0_i32_0 = arith.constant 0 : i32
    return %arg0, %c0_i32 : i32, i32
  }
  func.func @transform_1(%arg0: i32) -> (i32, i32) {
    %c0_i32 = arith.constant 0 : i32
    %c0_i32_0 = arith.constant 0 : i32
    %c0_i32_1 = arith.constant 0 : i32
    return %c0_i32, %c0_i32_0 : i32, i32
  }
  func.func @transform_2(%arg0: i32) -> (i32, i32) {
    %c0_i32 = arith.constant 0 : i32
    %c0_i32_0 = arith.constant 0 : i32
    %c0_i32_1 = arith.constant 0 : i32
    return %c0_i32, %c0_i32_0 : i32, i32
  }
  func.func @transform_3(%arg0: i32) -> (i32, i32) {
    %c0_i32 = arith.constant 0 : i32
    %c0_i32_0 = arith.constant 0 : i32
    %c0_i32_1 = arith.constant 0 : i32
    return %c0_i32, %c0_i32_0 : i32, i32
  }
  func.func @transform_4(%arg0: i32) -> (i32, i32) {
    %c0_i32 = arith.constant 0 : i32
    %c0_i32_0 = arith.constant 0 : i32
    return %arg0, %c0_i32 : i32, i32
  }
  func.func @transform_5(%arg0: i32) -> (i32, i32, i32) {
    %c0_i32 = arith.constant 0 : i32
    %c0_i32_0 = arith.constant 0 : i32
    %c0_i32_1 = arith.constant 0 : i32
    return %arg0, %c0_i32, %c0_i32_0 : i32, i32, i32
  }
}

module attributes {stable_mosaic.version = 11 : i64} {
  func.func @_s4_kernel(%arg0: i32, %arg1: memref<128x128xf32, #tpu.memory_space<vmem>>, %arg2: memref<128x128xbf16, #tpu.memory_space<vmem>>, %arg3: memref<1x128xf32, #tpu.memory_space<vmem>>, %arg4: memref<1x128xf32, #tpu.memory_space<vmem>>, %arg5: memref<128x128xf32, #tpu.memory_space<vmem>>) attributes {dimension_semantics = [#tpu.dimension_semantics<parallel>], iteration_bounds = array<i64: 4>, scalar_prefetch = 0 : i64, scratch_operands = 0 : i64, tpu.core_type = #tpu.core_type<tc>, window_params = [{transform_indices = @transform_0, window_bounds = array<i64: 128, 128>}, {transform_indices = @transform_1, window_bounds = array<i64: 128, 128>}, {pipeline_mode = #tpu.pipeline_mode<synchronous>, transform_indices = @transform_2, window_bounds = array<i64: 1, 128>}, {pipeline_mode = #tpu.pipeline_mode<synchronous>, transform_indices = @transform_3, window_bounds = array<i64: 1, 128>}, {transform_indices = @transform_4, window_bounds = array<i64: 128, 128>}]} {
    %c0 = arith.constant 0 : index
    %c0_0 = arith.constant 0 : index
    %0 = vector.load %arg1[%c0, %c0_0] : memref<128x128xf32, #tpu.memory_space<vmem>>, vector<128x128xf32>
    %c0_1 = arith.constant 0 : index
    %c0_2 = arith.constant 0 : index
    %1 = vector.load %arg2[%c0_1, %c0_2] : memref<128x128xbf16, #tpu.memory_space<vmem>>, vector<128x128xbf16>
    %2 = arith.extf %1 : vector<128x128xbf16> to vector<128x128xf32>
    %c0_3 = arith.constant 0 : index
    %c0_4 = arith.constant 0 : index
    %3 = vector.load %arg3[%c0_3, %c0_4] : memref<1x128xf32, #tpu.memory_space<vmem>>, vector<1x128xf32>
    %4 = vector.broadcast %3 : vector<1x128xf32> to vector<128x128xf32>
    %5 = arith.mulf %2, %4 : vector<128x128xf32>
    %6 = arith.addf %0, %5 : vector<128x128xf32>
    %c0_5 = arith.constant 0 : index
    %c0_6 = arith.constant 0 : index
    %7 = vector.load %arg4[%c0_5, %c0_6] : memref<1x128xf32, #tpu.memory_space<vmem>>, vector<1x128xf32>
    %8 = vector.broadcast %7 : vector<1x128xf32> to vector<128x128xf32>
    %9 = arith.addf %6, %8 : vector<128x128xf32>
    %cst = arith.constant 0.000000e+00 : f32
    %10 = vector.broadcast %cst : f32 to vector<128x128xf32>
    %11 = arith.maximumf %9, %10 : vector<128x128xf32>
    %c0_7 = arith.constant 0 : index
    %c0_8 = arith.constant 0 : index
    %12 = vector.load %arg5[%c0_7, %c0_8] : memref<128x128xf32, #tpu.memory_space<vmem>>, vector<128x128xf32>
    tpu.vector_store %arg5[%c0_7, %c0_8], %11 {strides = array<i32>} : memref<128x128xf32, #tpu.memory_space<vmem>>, vector<128x128xf32>,
    return
  }
  func.func @transform_0(%arg0: i32) -> (i32, i32) {
    %c0_i32 = arith.constant 0 : i32
    %c0_i32_0 = arith.constant 0 : i32
    return %arg0, %c0_i32 : i32, i32
  }
  func.func @transform_1(%arg0: i32) -> (i32, i32) {
    %c0_i32 = arith.constant 0 : i32
    %c0_i32_0 = arith.constant 0 : i32
    return %arg0, %c0_i32 : i32, i32
  }
  func.func @transform_2(%arg0: i32) -> (i32, i32) {
    %c0_i32 = arith.constant 0 : i32
    %c0_i32_0 = arith.constant 0 : i32
    %c0_i32_1 = arith.constant 0 : i32
    return %c0_i32, %c0_i32_0 : i32, i32
  }
  func.func @transform_3(%arg0: i32) -> (i32, i32) {
    %c0_i32 = arith.constant 0 : i32
    %c0_i32_0 = arith.constant 0 : i32
    %c0_i32_1 = arith.constant 0 : i32
    return %c0_i32, %c0_i32_0 : i32, i32
  }
  func.func @transform_4(%arg0: i32) -> (i32, i32) {
    %c0_i32 = arith.constant 0 : i32
    %c0_i32_0 = arith.constant 0 : i32
    return %arg0, %c0_i32 : i32, i32
  }
}

</mosaic_0001>

<bundles_post_ra>
// kernel: fanext_bottleneck_v3.4
= control target key start
LH: loop header
LB: loop body
LE: loop exit
PB: predicated region body
PF: predicated region fallthrough
CT: control target
= control target key end

     0   :  { %9 = vsyncpa [#allocation3], 0  ;;  %s1183_s0 = inlined_call_operand.hbm [shape: f32[512,128], index: 0, kind: input, shape index: {}]   ;;  %s1184_s1 = inlined_call_operand.vmem [shape: bf16[128,64], index: 1, kind: input, shape index: {}]   ;;  %s1185_s2 = inlined_call_operand.vmem [shape: bf16[512,64], index: 2, kind: output, shape index: {0}]   ;;  %s1186_s3 = inlined_call_operand.vmem [shape: f32[4,2,64], index: 3, kind: output, shape index: {1}]  }
   0x1   :  { %11 = vsyncpa [#allocation3 + $0x1], 0  ;;  %s921_s12 = smov 0   ;;  %s923_s13 = smov 0  }
   0x2   :  { %s925_s14 = smov 0   ;;  %s927_s15 = smov 0  }
   0x3 LB: > { %s940_s16 = sadd.s32 4294967295, %s896_s15   ;;  %s943_s17 = sadd.s32 1, %s896_s15   ;;  %s896_s15 = sphi %s927_s15, %s1193_s15   ;;  %s892_s14 = sphi %s925_s14, %s1192_s14   ;;  %s888_s13 = sphi %s923_s13, %s1191_s13   ;;  %s884_s12 = sphi %s921_s12, %s1190_s12  }
   0x4   : > { %s21_s18 = ssub.s32 %s896_s15, %s943_s17  ;;  %s24_s19 = sadd.s32 1, %s892_s14 }
   0x5   : > { %p22_p0 = scmp.eq.s32.totalorder %s21_s18, 0  ;;  %p31_p1 = scmp.ne.s32.totalorder %s892_s14, %s888_s13 }
   0x6   : > { %p32_p2 = scmp.eq.s32.totalorder %s896_s15, 0  ;;  %p37_p3 = scmp.ne.s32.totalorder %s888_s13, %s884_s12 }
   0x7   : > { %s953_s20 = scalar_select %p22_p0, %s892_s14, %s24_s19  }
   0x8   : > { %p33_p4 = por %p32_p2, %p31_p1  ;;  %p38_p5 = scmp.eq.s32.totalorder %s940_s16, 0 }
   0x9   : > { %p789_p6 = scmp.lt.s32.totalorder %s896_s15, 4  ;;  %s137_s22 = sand.u32 1, %s892_s14  }
   0xa   : > { %p957_p7 = por %p38_p5, %p37_p3  ;;  %s668_s23 = sshll.u32 %s137_s22, 7 }
   0xb   : > { %s702_s24 = sshll.u32 %s896_s15, 11  ;;  %s141_s28 = scalar_lea.vmem [#allocation2], %s668_s23 }
   0xc   : > { %s966_s27 = scalar_lea.hbm %s1183_s0, %s702_s24  ;;  %s148_s29 = sshll.u32 %s141_s28, 4  ;;  %s968_s29 = int_to_ptr.vmem [resolvable:$true] %s148_s29 }
   0xd   : > { %p970_p8 = pnand %p789_p6, %p33_p4  ;;  %s975_s4 = scalar_lea.sflag [#allocation3], %s137_s22 }
   0xe   : > { %s832_s5 = scalar_lea.hbm %s966_s27, 2048  ;;  %s837_s8 = scalar_lea.hbm %s1183_s0, 8192 }
   0xf   : > { %p833_p10 = scmp.ne.s32.totalorder %s966_s27, %s832_s5  ;;  %p834_p11 = pneg %p970_p8 }
  0x10   : > { %p838_p0 = scmp.lt.u32.totalorder %s966_s27, %s1183_s0  ;;  %p839_p1 = scmp.lt.u32.totalorder %s837_s8, %s832_s5 }
  0x11   : > { %p835_p12 = pnand %p834_p11, %p833_p10  ;;  %p841_p3 = scmp.lt.u32.totalorder %s832_s5, %s966_s27 }
  0x12   : > { %p840_p2 = por %p839_p1, %p838_p0 }
  0x13   : > { %p836_p13 = pneg %p835_p12 }
  0x14   : > { %p842_p4 = por %p841_p3, %p840_p2 }
  0x16   : > { %p843_p5 = pnand %p842_p4, %p836_p13 }
  0x18   : > { %846 = shalt.err (!%p843_p5)
}
  0x19   : > { %s847_s11 = scalar_lea.vmem %s968_s29, 2048  ;;  %s898_s12 = smov [#allocation2]  }
  0x1a   : > { %p848_p6 = scmp.ne.s32.totalorder %s968_s29, %s847_s11  ;;  %s852_s18 = sshll.u32 %s898_s12, 4  ;;  %s853_s18 = int_to_ptr.vmem [resolvable:$false] %s852_s18 }
  0x1b   : > { %s854_s19 = scalar_lea.vmem %s853_s18, 4096  ;;  %p855_p9 = scmp.lt.s32.totalorder %s968_s29, %s853_s18 }
  0x1c   : > { %p850_p10 = pnand %p848_p6, %p834_p11  ;;  %p856_p0 = scmp.lt.s32.totalorder %s854_s19, %s847_s11 }
  0x1e   : > { %p851_p12 = pneg %p850_p10  ;;  %p857_p1 = por %p856_p0, %p855_p9 }
  0x20   : > { %p858_p2 = pnand %p857_p1, %p851_p12 }
  0x22   : > { %861 = shalt.err (!%p858_p2)
}
  0x23   : > { %s899_s22 = smov 128   ;;  %s900_s23 = smov 8  }
  0x24   : > { %788 = dma.hbm_to_vmem [thread:$0]  (!%p970_p8), %s966_s27, 2048, %s968_s29, %s975_s4, %s899_s22, %s899_s22, %s900_s23  }
  0x25   : > { %p156_p11 = scmp.lt.s32.totalorder %s896_s15, 5  ;;  %p1189_p13 = scmp.ge.s32.totalorder %s896_s15, 1 }
  0x27   : > { %p157_p3 = pnand %p1189_p13, %p156_p11 }
  0x28   : > { %s162_s24 = sand.u32 (!%p157_p3), 1, %s888_s13  }
  0x29   : > { %160 = sbr.rel (%p157_p3) target bundleno = 344 (0x158), region = 28  ;;  %s672_s25 = sshll.u32 (!%p157_p3), %s162_s24, 7 }
  0x2a   : > { %s163_s26 = scalar_lea.sflag (!%p157_p3), [#allocation3], %s162_s24  ;;  %s1007_s28 = scalar_lea.vmem (!%p157_p3), [#allocation2], %s672_s25 }
  0x30   : > { %879 = dma.done.wait (%p957_p7), %s163_s26, 2048  }
  0x31   : > { %881 = vsyncadd (%p957_p7), %s163_s26, 4294965248  ;;  %v824_v0 = vld [vmem:[%s1184_s1] sm:$0xff]   ;;  %v825_v1 = vld [vmem:[%s1184_s1 + $0x8] sm:$0xff]   ;;  %s673_s22 = sshll.u32 %s940_s16, 4  ;;  %vm454_vm0 = vcmask 519168   ;;  %vm471_vm1 = vcmask 523264  }
  0x32   : > { %735 = vmatprep.subr.bf16.mxu0 %v824_v0  ;;  %767 = vmatprep.subr.bf16.mxu1 %v824_v0  ;;  %v826_v2 = vld [vmem:[%s1184_s1 + $0x10] sm:$0xff]   ;;  %v827_v3 = vld [vmem:[%s1184_s1 + $0x18] sm:$0xff]   ;;  %v205_v4 = vld [vmem:[%s1007_s28] sm:$0xff]  ;;  %p195_p7 = scmp.lt.s32.totalorder %s673_s22, 63  ;;  %p200_p8 = scmp.lt.s32.totalorder %s940_s16, 3  ;;  %vm562_vm2 = vcmask 1040384  }
  0x33   : > { %736 = vmatpush3.bf16.msra.mxu0 %v824_v0  ;;  %775 = vmatpush3.bf16.msra.mxu1 %v824_v0  ;;  %v206_v5 = vld [vmem:[%s1007_s28 + $0x8] sm:$0xff]  ;;  %v213_v7 = vld [vmem:[%s1007_s28 + $0x40] sm:$0xff]  ;;  %v830_v12 = vld [vmem:[%s1184_s1 + $0x30] sm:$0xff]   ;;  %vm564_vm3 = vcmask 517120  }
  0x34   : > { %737 = vmatprep.subr.bf16.mxu0 %v825_v1  ;;  %768 = vmatprep.subr.bf16.mxu1 %v825_v1  ;;  %v221_v6 = vpack.c.bf16 %v206_v5, %v205_v4  ;;  %v214_v8 = vld [vmem:[%s1007_s28 + $0x48] sm:$0xff]  ;;  %v828_v9 = vld [vmem:[%s1184_s1 + $0x20] sm:$0xff]   ;;  %v831_v13 = vld [vmem:[%s1184_s1 + $0x38] sm:$0xff]   ;;  %s1195_s22 = smov (!%p195_p7, %s673_s22), 63  ;;  %s1197_s16 = smov (!%p200_p8, %s940_s16), 3 }
  0x35   : > { %v225_v10 = vpack.c.bf16 %v214_v8, %v213_v7  ;;  %v829_v11 = vld [vmem:[%s1184_s1 + $0x28] sm:$0xff]   ;;  %v207_v14 = vld [vmem:[%s1007_s28 + $0x10] sm:$0xff]  ;;  %v208_v15 = vld [vmem:[%s1007_s28 + $0x18] sm:$0xff]  ;;  %s674_s23 = sshll.u32 %s1195_s22, 2 }
  0x36   : > { %751 = vmatprep.mubr.bf16.mxu0 %v221_v6  ;;  %v209_v16 = vld [vmem:[%s1007_s28 + $0x20] sm:$0xff]  ;;  %v215_v17 = vld [vmem:[%s1007_s28 + $0x50] sm:$0xff]  ;;  %v216_v18 = vld [vmem:[%s1007_s28 + $0x58] sm:$0xff]  ;;  %v222_v22 = vpack.c.bf16 %v208_v15, %v207_v14  ;;  %s1057_s26 = scalar_lea.vmem %s1185_s2, %s674_s23 }
  0x37   : > { %738 = vmatpush3.bf16.msra.mxu0 %v825_v1  ;;  %776 = vmatpush3.bf16.msra.mxu1 %v825_v1  ;;  %v210_v19 = vld [vmem:[%s1007_s28 + $0x28] sm:$0xff]  ;;  %v217_v20 = vld [vmem:[%s1007_s28 + $0x60] sm:$0xff]  ;;  %v226_v23 = vpack.c.bf16 %v216_v18, %v215_v17  ;;  %v211_v26 = vld [vmem:[%s1007_s28 + $0x30] sm:$0xff] }
  0x38   : > { %739 = vmatprep.subr.bf16.mxu0 %v826_v2  ;;  %769 = vmatprep.subr.bf16.mxu1 %v826_v2  ;;  %v218_v21 = vld [vmem:[%s1007_s28 + $0x68] sm:$0xff]  ;;  %v223_v24 = vpack.c.bf16 %v210_v19, %v209_v16  ;;  %v212_v27 = vld [vmem:[%s1007_s28 + $0x38] sm:$0xff]  ;;  %v219_v28 = vld [vmem:[%s1007_s28 + $0x70] sm:$0xff] }
  0x39   : > { %759 = vmatprep.mubr.bf16.mxu1 %v225_v10  ;;  %v227_v25 = vpack.c.bf16 %v218_v21, %v217_v20  ;;  %v220_v29 = vld [vmem:[%s1007_s28 + $0x78] sm:$0xff]  ;;  %v224_v30 = vpack.c.bf16 %v212_v27, %v211_v26  ;;  %s675_s28 = sshll.u32 %s1197_s16, 1 }
  0x3a   : > { %v228_v31 = vpack.c.bf16 %v220_v29, %v219_v28  ;;  %s203_s15 = scalar_lea.vmem %s1186_s3, %s675_s28 }
  0x3b   : > { %740 = vmatpush3.bf16.msra.mxu0 %v826_v2  ;;  %777 = vmatpush3.bf16.msra.mxu1 %v826_v2 }
  0x3c   : > { %741 = vmatprep.subr.bf16.mxu0 %v827_v3  ;;  %770 = vmatprep.subr.bf16.mxu1 %v827_v3 }
  0x3f   : > { %742 = vmatpush3.bf16.msra.mxu0 %v827_v3  ;;  %778 = vmatpush3.bf16.msra.mxu1 %v827_v3 }
  0x40   : > { %743 = vmatprep.subr.bf16.mxu0 %v828_v9  ;;  %771 = vmatprep.subr.bf16.mxu1 %v828_v9 }
  0x43   : > { %744 = vmatpush3.bf16.msra.mxu0 %v828_v9  ;;  %779 = vmatpush3.bf16.msra.mxu1 %v828_v9 }
  0x44   : > { %745 = vmatprep.subr.bf16.mxu0 %v829_v11  ;;  %772 = vmatprep.subr.bf16.mxu1 %v829_v11 }
  0x47   : > { %746 = vmatpush3.bf16.msra.mxu0 %v829_v11  ;;  %780 = vmatpush3.bf16.msra.mxu1 %v829_v11 }
  0x48   : > { %747 = vmatprep.subr.bf16.mxu0 %v830_v12  ;;  %773 = vmatprep.subr.bf16.mxu1 %v830_v12 }
  0x4b   : > { %748 = vmatpush3.bf16.msra.mxu0 %v830_v12  ;;  %781 = vmatpush3.bf16.msra.mxu1 %v830_v12 }
  0x4c   : > { %749 = vmatprep.subr.bf16.mxu0 %v831_v13  ;;  %774 = vmatprep.subr.bf16.mxu1 %v831_v13 }
  0x4f   : > { %750 = vmatpush3.bf16.msra.mxu0 %v831_v13  ;;  %782 = vmatpush3.bf16.msra.mxu1 %v831_v13 }
  0x52   : > { %752 = vmatmul.mubr.bf16.vlgmr.msra.gmra.mrb[0].mxu0 %v222_v22  ;;  %760 = vmatmul.mubr.bf16.vlgmr.msra.gmra.mrb[0].mxu1 %v226_v23 }
  0x53   : > { %755 = vmatprep.mubr.bf16.mxu0 %v223_v24  ;;  %763 = vmatprep.mubr.bf16.mxu1 %v227_v25 }
  0x5a   : > { %756 = vmatmul.mubr.bf16.gmra.mrb[4].mxu0 %v224_v30  ;;  %764 = vmatmul.mubr.bf16.gmra.mrb[4].mxu1 %v228_v31 }
 0x125   : > { %v753_v32 = vpop.f32.mrb[0].mxu0  ;;  %v1059_v33 = vpop.f32.mrb[0].mxu1 }
 0x126   : > { %v705_v34 = vpack.c.bf16 %v753_v32, %v753_v32  ;;  %v327_v35 = vpop.f32.mrb[1].mxu0  ;;  %v713_v36 = vpack.c.bf16 %v1059_v33, %v1059_v33  ;;  %v1063_v37 = vpop.f32.mrb[1].mxu1  ;;  %v511_v42 = vmul.f32 %v753_v32, %v753_v32  ;;  %v475_v53 = vsel %vm471_vm1, %v753_v32, 0.0 }
 0x127   : > { %v703_v38 = vpack.c.bf16 %v327_v35, %v327_v35  ;;  %v509_v39 = vmul.f32 %v327_v35, %v327_v35  ;;  %v754_v40 = vpop.f32.mrb[2].mxu0  ;;  %v1065_v41 = vpop.f32.mrb[2].mxu1  ;;  %v472_v46 = vsel %vm471_vm1, %v327_v35, 0.0  ;;  %v711_v52 = vpack.c.bf16 %v1063_v37, %v1063_v37 }
 0x128   : > { %457 = vst.msk [vmem:[%s1057_s26 + $0x8] sm:$0xf] %vm454_vm0, %v705_v34  ;;  %v706_v43 = vpack.c.bf16 %v754_v40, %v754_v40  ;;  %v330_v44 = vpop.f32.mrb[3].mxu0  ;;  %465 = vst.msk [vmem:[%s1057_s26 + $0x28] sm:$0xf] %vm454_vm0, %v713_v36  ;;  %v1071_v45 = vpop.f32.mrb[3].mxu1  ;;  %v512_v50 = vmul.f32 %v754_v40, %v754_v40  ;;  %v714_v56 = vpack.c.bf16 %v1065_v41, %v1065_v41 }
 0x129   : > { %455 = vst.msk [vmem:[%s1057_s26] sm:$0xf] %vm454_vm0, %v703_v38  ;;  %v704_v47 = vpack.c.bf16 %v330_v44, %v330_v44  ;;  %v473_v48 = vsel %vm471_vm1, %v330_v44, 0.0  ;;  %v510_v49 = vmul.f32 %v330_v44, %v330_v44  ;;  %v525_v54 = vsel %vm471_vm1, %v509_v39, 0.0  ;;  %463 = vst.msk [vmem:[%s1057_s26 + $0x20] sm:$0xf] %vm454_vm0, %v711_v52 }
 0x12a   : > { %458 = vst.msk [vmem:[%s1057_s26 + $0xc] sm:$0xf] %vm454_vm0, %v706_v43  ;;  %v474_v51 = vadd.f32 %v473_v48, %v472_v46  ;;  %v528_v59 = vsel %vm471_vm1, %v511_v42, 0.0  ;;  %466 = vst.msk [vmem:[%s1057_s26 + $0x2c] sm:$0xf] %vm454_vm0, %v714_v56  ;;  %v712_v61 = vpack.c.bf16 %v1071_v45, %v1071_v45  ;;  %v477_v63 = vsel %vm471_vm1, %v754_v40, 0.0 }
 0x12b   : > { %456 = vst.msk [vmem:[%s1057_s26 + $0x4] sm:$0xf] %vm454_vm0, %v704_v47  ;;  %v526_v55 = vsel %vm471_vm1, %v510_v49, 0.0  ;;  %v530_v0 = vsel %vm471_vm1, %v512_v50, 0.0  ;;  %v517_v23 = vmul.f32 %v1063_v37, %v1063_v37  ;;  %v487_v34 = vsel %vm471_vm1, %v1063_v37, 0.0 }
 0x12c   : > { %v476_v57 = vadd.f32 %v475_v53, %v474_v51  ;;  %v527_v58 = vadd.f32 %v526_v55, %v525_v54  ;;  %464 = vst.msk [vmem:[%s1057_s26 + $0x24] sm:$0xf] %vm454_vm0, %v712_v61  ;;  %v518_v43 = vmul.f32 %v1071_v45, %v1071_v45  ;;  %v519_v37 = vmul.f32 %v1059_v33, %v1059_v33 }
 0x12d   : > { %v757_v60 = vpop.f32.mrb[4].mxu0  ;;  %v1095_v62 = vpop.f32.mrb[4].mxu1  ;;  %v540_v42 = vsel %vm471_vm1, %v517_v23, 0.0  ;;  %v489_v47 = vsel %vm471_vm1, %v1071_v45, 0.0  ;;  %v491_v50 = vsel %vm471_vm1, %v1059_v33, 0.0  ;;  %v520_v51 = vmul.f32 %v1065_v41, %v1065_v41 }
 0x12e   : > { %v529_v1 = vadd.f32 %v528_v59, %v527_v58  ;;  %v709_v2 = vpack.c.bf16 %v757_v60, %v757_v60  ;;  %v343_v3 = vpop.f32.mrb[5].mxu0  ;;  %v375_v4 = vpop.f32.mrb[5].mxu1  ;;  %v478_v6 = vadd.f32 %v477_v63, %v476_v57  ;;  %v515_v18 = vmul.f32 %v757_v60, %v757_v60 }
 0x12f   : > { %v707_v5 = vpack.c.bf16 %v343_v3, %v343_v3  ;;  %v479_v7 = vsel %vm471_vm1, %v343_v3, 0.0  ;;  %v513_v8 = vmul.f32 %v343_v3, %v343_v3  ;;  %v758_v9 = vpop.f32.mrb[6].mxu0  ;;  %v1102_v10 = vpop.f32.mrb[6].mxu1  ;;  %v717_v24 = vpack.c.bf16 %v1095_v62, %v1095_v62 }
 0x130   : > { %461 = vst.msk [vmem:[%s1057_s26 + $0x18] sm:$0xf] %vm454_vm0, %v709_v2  ;;  %v531_v11 = vadd.f32 %v530_v0, %v529_v1  ;;  %v710_v12 = vpack.c.bf16 %v758_v9, %v758_v9  ;;  %v346_v13 = vpop.f32.mrb[7].mxu0  ;;  %v378_v14 = vpop.f32.mrb[7].mxu1  ;;  %v480_v15 = vadd.f32 %v479_v7, %v478_v6  ;;  %v483_v25 = vsel %vm471_vm1, %v757_v60, 0.0 }
 0x131   : > { %459 = vst.msk [vmem:[%s1057_s26 + $0x10] sm:$0xf] %vm454_vm0, %v707_v5  ;;  %v532_v16 = vsel %vm471_vm1, %v513_v8, 0.0  ;;  %v708_v17 = vpack.c.bf16 %v346_v13, %v346_v13  ;;  %v481_v20 = vsel %vm471_vm1, %v346_v13, 0.0  ;;  %v514_v21 = vmul.f32 %v346_v13, %v346_v13  ;;  %469 = vst.msk [vmem:[%s1057_s26 + $0x38] sm:$0xf] %vm454_vm0, %v717_v24 }
 0x132   : > { %v533_v19 = vadd.f32 %v532_v16, %v531_v11  ;;  %462 = vst.msk [vmem:[%s1057_s26 + $0x1c] sm:$0xf] %vm454_vm0, %v710_v12  ;;  %v482_v22 = vadd.f32 %v481_v20, %v480_v15  ;;  %v516_v26 = vmul.f32 %v758_v9, %v758_v9  ;;  %v715_v28 = vpack.c.bf16 %v375_v4, %v375_v4 }
 0x133   : > { %460 = vst.msk [vmem:[%s1057_s26 + $0x14] sm:$0xf] %vm454_vm0, %v708_v17  ;;  %v534_v27 = vsel %vm471_vm1, %v514_v21, 0.0  ;;  %v536_v31 = vsel %vm471_vm1, %v515_v18, 0.0  ;;  %v485_v32 = vsel %vm471_vm1, %v758_v9, 0.0  ;;  %v718_v35 = vpack.c.bf16 %v1102_v10, %v1102_v10 }
 0x134   : > { %v484_v29 = vadd.f32 %v483_v25, %v482_v22  ;;  %v535_v30 = vadd.f32 %v534_v27, %v533_v19  ;;  %467 = vst.msk [vmem:[%s1057_s26 + $0x30] sm:$0xf] %vm454_vm0, %v715_v28  ;;  %v716_v39 = vpack.c.bf16 %v378_v14, %v378_v14  ;;  %v538_v40 = vsel %vm471_vm1, %v516_v26, 0.0 }
 0x135   : > { %470 = vst.msk [vmem:[%s1057_s26 + $0x3c] sm:$0xf] %vm454_vm0, %v718_v35  ;;  %v542_v52 = vsel %vm471_vm1, %v518_v43, 0.0  ;;  %v521_v53 = vmul.f32 %v375_v4, %v375_v4  ;;  %v544_v56 = vsel %vm471_vm1, %v519_v37, 0.0  ;;  %v493_v57 = vsel %vm471_vm1, %v1065_v41, 0.0 }
 0x136   : > { %v537_v36 = vadd.f32 %v536_v31, %v535_v30  ;;  %v486_v38 = vadd.f32 %v485_v32, %v484_v29  ;;  %468 = vst.msk [vmem:[%s1057_s26 + $0x34] sm:$0xf] %vm454_vm0, %v716_v39  ;;  %v495_v45 = vsel %vm471_vm1, %v375_v4, 0.0  ;;  %v546_v60 = vsel %vm471_vm1, %v520_v51, 0.0 }
 0x137   : > { %v548_v33 = vsel %vm471_vm1, %v521_v53, 0.0  ;;  %v522_v61 = vmul.f32 %v378_v14, %v378_v14  ;;  %v523_v1 = vmul.f32 %v1095_v62, %v1095_v62  ;;  %v497_v2 = vsel %vm471_vm1, %v378_v14, 0.0 }
 0x138   : > { %v488_v44 = vadd.f32 %v487_v34, %v486_v38  ;;  %v539_v46 = vadd.f32 %v538_v40, %v537_v36  ;;  %v499_v41 = vsel %vm471_vm1, %v1095_v62, 0.0  ;;  %v524_v4 = vmul.f32 %v1102_v10, %v1102_v10 }
 0x139   : > { %v550_v6 = vsel %vm471_vm1, %v522_v61, 0.0  ;;  %v552_v9 = vsel %vm471_vm1, %v523_v1, 0.0  ;;  %v501_v11 = vsel %vm471_vm1, %v1102_v10, 0.0 }
 0x13a   : > { %v541_v48 = vadd.f32 %v540_v42, %v539_v46  ;;  %v490_v49 = vadd.f32 %v489_v47, %v488_v44  ;;  %v554_v14 = vsel %vm471_vm1, %v524_v4, 0.0 }
 0x13c   : > { %v492_v54 = vadd.f32 %v491_v50, %v490_v49  ;;  %v543_v55 = vadd.f32 %v542_v52, %v541_v48 }
 0x13e   : > { %v545_v58 = vadd.f32 %v544_v56, %v543_v55  ;;  %v494_v59 = vadd.f32 %v493_v57, %v492_v54 }
 0x140   : > { %v496_v63 = vadd.f32 %v495_v45, %v494_v59  ;;  %v547_v0 = vadd.f32 %v546_v60, %v545_v58 }
 0x142   : > { %v549_v3 = vadd.f32 %v548_v33, %v547_v0  ;;  %v498_v5 = vadd.f32 %v497_v2, %v496_v63 }
 0x144   : > { %v500_v7 = vadd.f32 %v499_v41, %v498_v5  ;;  %v551_v8 = vadd.f32 %v550_v6, %v549_v3 }
 0x146   : > { %v502_v12 = vadd.f32 %v501_v11, %v500_v7  ;;  %v553_v13 = vadd.f32 %v552_v9, %v551_v8 }
 0x148   : > { %v503_v15 = vrot.slane %v502_v12, 4  ;;  %v555_v16 = vadd.f32 %v554_v14, %v553_v13 }
 0x14a   : > { %v504_v62 = vadd.f32 %v503_v15, %v502_v12  ;;  %v556_v17 = vrot.slane %v555_v16, 4 }
 0x14c   : > { %v505_v18 = vrot.slane %v504_v62, 2  ;;  %v557_v19 = vadd.f32 %v556_v17, %v555_v16 }
 0x14e   : > { %v506_v20 = vadd.f32 %v505_v18, %v504_v62  ;;  %v558_v21 = vrot.slane %v557_v19, 2 }
 0x150   : > { %v507_v22 = vrot.slane %v506_v20, 1  ;;  %v559_v23 = vadd.f32 %v558_v21, %v557_v19 }
 0x152   : > { %v560_v24 = vrot.slane %v559_v23, 1  ;;  %v508_v10 = vadd.f32 %v507_v22, %v506_v20 }
 0x154   : > { %v561_v25 = vadd.f32 %v560_v24, %v559_v23 }
 0x156   : > { %v563_v26 = vsel %vm562_vm2, %v508_v10, %v561_v25 }
 0x157   : > { %565 = vst.msk [vmem:[%s203_s15] sm:$0x3] %vm564_vm3, %v563_v26 }
 0x158 PF: > { %p14_p9 = scmp.ge.s32.totalorder %s943_s17, 6   ;;  %s1190_s12 = smov %s888_s13 }
 0x159   : > { %s1191_s13 = smov %s892_s14  ;;  %s1192_s14 = smov %s953_s20 }
 0x15a   : > { %s1193_s15 = smov %s943_s17  ;;  %16 = sbr.rel (!%p14_p9) target bundleno = 3 (0x3), region = 80 }
 0x161   :  { %602 = vsyncpa [#allocation3], 1 }
 0x162   :  { %604 = vsyncpa [#allocation3 + $0x1], 1 }

// kernel: fanext_bottleneck_v3.6
= control target key start
LH: loop header
LB: loop body
LE: loop exit
PB: predicated region body
PF: predicated region fallthrough
CT: control target
= control target key end

     0   :  { %s962_s18 = smov 0   ;;  %s1076_s0 = inlined_call_operand.vmem [shape: bf16[512,64], index: 0, kind: input, shape index: {}]   ;;  %s1077_s1 = inlined_call_operand.vmem [shape: f32[1,64], index: 1, kind: input, shape index: {}]   ;;  %s1078_s2 = inlined_call_operand.vmem [shape: f32[1,64], index: 2, kind: input, shape index: {}]   ;;  %s1079_s3 = inlined_call_operand.vmem [shape: bf16[64,128], index: 3, kind: input, shape index: {}]   ;;  %s1080_s4 = inlined_call_operand.vmem [shape: bf16[512,128], index: 4, kind: output, shape index: {0}]   ;;  %s1081_s5 = inlined_call_operand.vmem [shape: f32[4,2,128], index: 5, kind: output, shape index: {1}]  }
   0x1 LB: > { %s968_s19 = sadd.s32 4294967295, %s930_s18   ;;  %p728_p0 = scmp.ge.s32.totalorder %s930_s18, 1  ;;  %s930_s18 = sphi %s962_s18, %s16_s18  }
   0x2   : > { %p191_p1 = scmp.lt.s32.totalorder %s930_s18, 5 }
   0x4   : > { %p192_p2 = pnand %p728_p0, %p191_p1 }
   0x5   : > { %v920_v0 = vld [vmem:[%s1079_s3] sm:$0xff] (!%p192_p2)   ;;  %s729_s22 = sshll.u32 (!%p192_p2), %s968_s19, 4  ;;  %v921_v1 = vld [vmem:[%s1079_s3 + $0x8] sm:$0xff] (!%p192_p2)   ;;  %v922_v2 = vld [vmem:[%s1079_s3 + $0x10] sm:$0xff] (!%p192_p2)   ;;  %vm374_vm0 = vcmask (!%p192_p2), 523264   ;;  %p235_p4 = scmp.lt.s32.totalorder (!%p192_p2), %s968_s19, 3 }
   0x6   : > { %195 = sbr.rel (%p192_p2) target bundleno = 289 (0x121), region = 36  ;;  %p224_p3 = scmp.lt.s32.totalorder (!%p192_p2), %s729_s22, 63  ;;  %880 = vmatprep.subr.bf16.mxu0 (!%p192_p2), %v920_v0  ;;  %904 = vmatprep.subr.bf16.mxu1 (!%p192_p2), %v920_v0  ;;  %v995_v3 = vld [vmem:[%s1077_s1] ss:$0 sm:$0xff] (!%p192_p2)  ;;  %v923_v7 = vld [vmem:[%s1079_s3 + $0x18] sm:$0xff] (!%p192_p2)   ;;  %vm634_vm1 = vcmask (!%p192_p2), 1040384  }
   0x7   : > { %881 = vmatpush3.bf16.msra.mxu0 (!%p192_p2), %v920_v0  ;;  %908 = vmatpush3.bf16.msra.mxu1 (!%p192_p2), %v920_v0  ;;  %v1008_v14 = vld [vmem:[%s1078_s2] ss:$0 sm:$0xff] (!%p192_p2) }
   0x8   : > { %882 = vmatprep.subr.bf16.mxu0 (!%p192_p2), %v921_v1  ;;  %905 = vmatprep.subr.bf16.mxu1 (!%p192_p2), %v921_v1 }
   0xb   : > { %883 = vmatpush3.bf16.msra.mxu0 (!%p192_p2), %v921_v1  ;;  %909 = vmatpush3.bf16.msra.mxu1 (!%p192_p2), %v921_v1 }
   0xc   : > { %884 = vmatprep.subr.bf16.mxu0 (!%p192_p2), %v922_v2  ;;  %906 = vmatprep.subr.bf16.mxu1 (!%p192_p2), %v922_v2 }
   0xd   : > { %s1083_s22 = smov (!%p224_p3, %s729_s22), 63  ;;  %s1085_s19 = smov (!%p235_p4, %s968_s19), 3 }
   0xe   : > { %s730_s27 = sshll.u32 %s1083_s22, 2  ;;  %s733_s15 = sshll.u32 %s1085_s19, 1 }
   0xf   : > { %s990_s30 = scalar_lea.vmem %s1076_s0, %s730_s27  ;;  %885 = vmatpush3.bf16.msra.mxu0 %v922_v2  ;;  %910 = vmatpush3.bf16.msra.mxu1 %v922_v2  ;;  %s1058_s14 = scalar_lea.vmem %s1080_s4, %s730_s27 }
  0x10   : > { %v783_v4 = vld [vmem:[%s990_s30] sm:$0xff]   ;;  %v854_v5 = vld [vmem:[%s990_s30 + $0x8] sm:$0xff]   ;;  %v855_v6 = vld [vmem:[%s990_s30 + $0x10] sm:$0xff]   ;;  %886 = vmatprep.subr.bf16.mxu0 %v923_v7  ;;  %907 = vmatprep.subr.bf16.mxu1 %v923_v7  ;;  %s238_s20 = scalar_lea.vmem %s1081_s5, %s733_s15 }
  0x11   : > { %v784_v8 = vunpack.c.l.bf16 %v783_v4  ;;  %v785_v9 = vunpack.c.h.bf16 %v783_v4  ;;  %v788_v10 = vunpack.c.l.bf16 %v854_v5  ;;  %v789_v11 = vunpack.c.h.bf16 %v854_v5  ;;  %v856_v12 = vld [vmem:[%s990_s30 + $0x18] sm:$0xff]   ;;  %v857_v13 = vld [vmem:[%s990_s30 + $0x20] sm:$0xff]   ;;  %v858_v39 = vld [vmem:[%s990_s30 + $0x28] sm:$0xff]  }
  0x12   : > { %v792_v15 = vunpack.c.l.bf16 %v855_v6  ;;  %v793_v16 = vunpack.c.h.bf16 %v855_v6  ;;  %v796_v17 = vunpack.c.l.bf16 %v856_v12  ;;  %v797_v18 = vunpack.c.h.bf16 %v856_v12  ;;  %v859_v44 = vld [vmem:[%s990_s30 + $0x30] sm:$0xff]   ;;  %v860_v49 = vld [vmem:[%s990_s30 + $0x38] sm:$0xff]  }
  0x13   : > { %v279_v19 = vmul.f32 %v784_v8, %v995_v3  ;;  %v280_v20 = vmul.f32 %v785_v9, %v995_v3  ;;  %v281_v21 = vmul.f32 %v788_v10, %v995_v3  ;;  %v282_v22 = vmul.f32 %v789_v11, %v995_v3  ;;  %887 = vmatpush3.bf16.msra.mxu0 %v923_v7 }
  0x14   : > { %v283_v23 = vmul.f32 %v792_v15, %v995_v3  ;;  %v284_v24 = vmul.f32 %v793_v16, %v995_v3  ;;  %v285_v25 = vmul.f32 %v796_v17, %v995_v3  ;;  %v800_v26 = vunpack.c.l.bf16 %v857_v13  ;;  %911 = vmatpush3.bf16.msra.mxu1 %v923_v7 }
  0x15   : > { %v302_v27 = vadd.f32 %v1008_v14, %v279_v19  ;;  %v303_v28 = vadd.f32 %v1008_v14, %v280_v20  ;;  %v304_v29 = vadd.f32 %v1008_v14, %v281_v21  ;;  %v305_v30 = vadd.f32 %v1008_v14, %v282_v22 }
  0x16   : > { %v306_v31 = vadd.f32 %v1008_v14, %v283_v23  ;;  %v307_v32 = vadd.f32 %v1008_v14, %v284_v24  ;;  %v286_v33 = vmul.f32 %v797_v18, %v995_v3  ;;  %v308_v34 = vadd.f32 %v1008_v14, %v285_v25 }
  0x17   : > { %v318_v35 = vmax.f32 %v302_v27, 0.0  ;;  %v319_v36 = vmax.f32 %v303_v28, 0.0  ;;  %v320_v37 = vmax.f32 %v304_v29, 0.0  ;;  %v321_v38 = vmax.f32 %v305_v30, 0.0 }
  0x18   : > { %v322_v40 = vmax.f32 %v306_v31, 0.0  ;;  %v323_v41 = vmax.f32 %v307_v32, 0.0  ;;  %v309_v42 = vadd.f32 %v1008_v14, %v286_v33  ;;  %v324_v43 = vmax.f32 %v308_v34, 0.0 }
  0x19   : > { %v334_v45 = vpack.c.bf16 %v319_v36, %v318_v35  ;;  %v335_v46 = vpack.c.bf16 %v321_v38, %v320_v37  ;;  %v801_v47 = vunpack.c.h.bf16 %v857_v13  ;;  %v287_v48 = vmul.f32 %v800_v26, %v995_v3 }
  0x1a   : > { %v336_v50 = vpack.c.bf16 %v323_v41, %v322_v40  ;;  %v325_v51 = vmax.f32 %v309_v42, 0.0  ;;  %v804_v52 = vunpack.c.l.bf16 %v858_v39  ;;  %v805_v53 = vunpack.c.h.bf16 %v858_v39 }
  0x1b   : > { %888 = vmatprep.mubr.msk.bf16.mxu0 %vm374_vm0, %v334_v45  ;;  %v288_v54 = vmul.f32 %v801_v47, %v995_v3  ;;  %v310_v55 = vadd.f32 %v1008_v14, %v287_v48  ;;  %v808_v56 = vunpack.c.l.bf16 %v859_v44  ;;  %v809_v57 = vunpack.c.h.bf16 %v859_v44 }
  0x1c   : > { %889 = vmatmul.mubr.msk.bf16.vlgmr.msra.gmra.mrb[0].mxu0 %vm374_vm0, %v335_v46  ;;  %v289_v58 = vmul.f32 %v804_v52, %v995_v3  ;;  %v290_v59 = vmul.f32 %v805_v53, %v995_v3  ;;  %v812_v60 = vunpack.c.l.bf16 %v860_v49  ;;  %v813_v4 = vunpack.c.h.bf16 %v860_v49 }
  0x1d   : > { %892 = vmatprep.mubr.msk.bf16.mxu0 %vm374_vm0, %v336_v50  ;;  %v311_v61 = vadd.f32 %v1008_v14, %v288_v54  ;;  %v326_v62 = vmax.f32 %v310_v55, 0.0  ;;  %v291_v63 = vmul.f32 %v808_v56, %v995_v3  ;;  %v292_v0 = vmul.f32 %v809_v57, %v995_v3 }
  0x1e   : > { %v312_v1 = vadd.f32 %v1008_v14, %v289_v58  ;;  %v313_v2 = vadd.f32 %v1008_v14, %v290_v59  ;;  %v293_v5 = vmul.f32 %v812_v60, %v995_v3  ;;  %v337_v6 = vpack.c.bf16 %v325_v51, %v324_v43 }
  0x1f   : > { %v327_v7 = vmax.f32 %v311_v61, 0.0  ;;  %v314_v8 = vadd.f32 %v1008_v14, %v291_v63  ;;  %v315_v9 = vadd.f32 %v1008_v14, %v292_v0  ;;  %v294_v12 = vmul.f32 %v813_v4, %v995_v3 }
  0x20   : > { %v328_v10 = vmax.f32 %v312_v1, 0.0  ;;  %v329_v11 = vmax.f32 %v313_v2, 0.0  ;;  %v316_v13 = vadd.f32 %v1008_v14, %v293_v5 }
  0x21   : > { %v338_v15 = vpack.c.bf16 %v327_v7, %v326_v62  ;;  %v330_v16 = vmax.f32 %v314_v8, 0.0  ;;  %v331_v17 = vmax.f32 %v315_v9, 0.0  ;;  %v317_v19 = vadd.f32 %v1008_v14, %v294_v12 }
  0x22   : > { %v339_v18 = vpack.c.bf16 %v329_v11, %v328_v10  ;;  %v332_v21 = vmax.f32 %v316_v13, 0.0 }
  0x23   : > { %896 = vmatprep.mubr.msk.bf16.mxu1 %vm374_vm0, %v338_v15  ;;  %v340_v20 = vpack.c.bf16 %v331_v17, %v330_v16  ;;  %v333_v22 = vmax.f32 %v317_v19, 0.0 }
  0x24   : > { %893 = vmatmul.mubr.msk.bf16.gmra.mrb[4].mxu0 %vm374_vm0, %v337_v6  ;;  %897 = vmatmul.mubr.msk.bf16.vlgmr.msra.gmra.mrb[0].mxu1 %vm374_vm0, %v339_v18 }
  0x25   : > { %900 = vmatprep.mubr.msk.bf16.mxu1 %vm374_vm0, %v340_v20  ;;  %v341_v3 = vpack.c.bf16 %v333_v22, %v332_v21 }
  0x2c   : > { %901 = vmatmul.mubr.msk.bf16.gmra.mrb[4].mxu1 %vm374_vm0, %v341_v3 }
  0xef   : > { %v890_v23 = vpop.f32.mrb[0].mxu0 }
  0xf0   : > { %v433_v24 = vpop.f32.mrb[1].mxu0  ;;  %v599_v31 = vmul.f32 %v890_v23, %v890_v23 }
  0xf1   : > { %v891_v14 = vpop.f32.mrb[2].mxu0  ;;  %v597_v27 = vmul.f32 %v433_v24, %v433_v24 }
  0xf2   : > { %v822_v25 = vpack.c.bf16 %v891_v14, %v890_v23  ;;  %v436_v26 = vpop.f32.mrb[3].mxu0  ;;  %v600_v34 = vmul.f32 %v891_v14, %v891_v14 }
  0xf3   : > { %v817_v28 = vpack.c.bf16 %v436_v26, %v433_v24  ;;  %v576_v29 = vadd.f32 %v436_v26, %v433_v24  ;;  %v598_v30 = vmul.f32 %v436_v26, %v436_v26 }
  0xf4   : > { %861 = vst [vmem:[%s1058_s14 + $0x8] sm:$0xff] %v822_v25  }
  0xf5   : > { %818 = vst [vmem:[%s1058_s14] sm:$0xff] %v817_v28   ;;  %v577_v32 = vadd.f32 %v890_v23, %v576_v29  ;;  %v613_v33 = vadd.f32 %v598_v30, %v597_v27 }
  0xf7   : > { %v614_v35 = vadd.f32 %v613_v33, %v599_v31  ;;  %v894_v36 = vpop.f32.mrb[4].mxu0  ;;  %v578_v37 = vadd.f32 %v891_v14, %v577_v32  ;;  %v898_v38 = vpop.f32.mrb[0].mxu1 }
  0xf8   : > { %v449_v39 = vpop.f32.mrb[5].mxu0  ;;  %v465_v40 = vpop.f32.mrb[1].mxu1  ;;  %v603_v55 = vmul.f32 %v894_v36, %v894_v36  ;;  %v607_v10 = vmul.f32 %v898_v38, %v898_v38 }
  0xf9   : > { %v579_v41 = vadd.f32 %v578_v37, %v449_v39  ;;  %v601_v42 = vmul.f32 %v449_v39, %v449_v39  ;;  %v615_v43 = vadd.f32 %v614_v35, %v600_v34  ;;  %v895_v44 = vpop.f32.mrb[6].mxu0  ;;  %v899_v45 = vpop.f32.mrb[2].mxu1  ;;  %v605_v61 = vmul.f32 %v465_v40, %v465_v40 }
  0xfa   : > { %v832_v46 = vpack.c.bf16 %v895_v44, %v894_v36  ;;  %v452_v47 = vpop.f32.mrb[7].mxu0  ;;  %v842_v48 = vpack.c.bf16 %v899_v45, %v898_v38  ;;  %v468_v49 = vpop.f32.mrb[3].mxu1  ;;  %v604_v58 = vmul.f32 %v895_v44, %v895_v44  ;;  %v608_v13 = vmul.f32 %v899_v45, %v899_v45 }
  0xfb   : > { %v616_v50 = vadd.f32 %v615_v43, %v601_v42  ;;  %v827_v51 = vpack.c.bf16 %v452_v47, %v449_v39  ;;  %v580_v52 = vadd.f32 %v579_v41, %v452_v47  ;;  %v602_v53 = vmul.f32 %v452_v47, %v452_v47 }
  0xfc   : > { %863 = vst [vmem:[%s1058_s14 + $0x18] sm:$0xff] %v832_v46   ;;  %865 = vst [vmem:[%s1058_s14 + $0x28] sm:$0xff] %v842_v48   ;;  %v837_v54 = vpack.c.bf16 %v468_v49, %v465_v40  ;;  %v606_v8 = vmul.f32 %v468_v49, %v468_v49 }
  0xfd   : > { %862 = vst [vmem:[%s1058_s14 + $0x10] sm:$0xff] %v827_v51   ;;  %v581_v56 = vadd.f32 %v894_v36, %v580_v52  ;;  %v617_v57 = vadd.f32 %v616_v50, %v602_v53 }
  0xfe   : > { %864 = vst [vmem:[%s1058_s14 + $0x20] sm:$0xff] %v837_v54  }
  0xff   : > { %v618_v59 = vadd.f32 %v617_v57, %v603_v55  ;;  %v582_v60 = vadd.f32 %v895_v44, %v581_v56  ;;  %v902_v62 = vpop.f32.mrb[4].mxu1 }
 0x100   : > { %v481_v63 = vpop.f32.mrb[5].mxu1  ;;  %v611_v3 = vmul.f32 %v902_v62, %v902_v62 }
 0x101   : > { %v583_v0 = vadd.f32 %v582_v60, %v465_v40  ;;  %v619_v1 = vadd.f32 %v618_v59, %v604_v58  ;;  %v903_v2 = vpop.f32.mrb[6].mxu1  ;;  %v609_v17 = vmul.f32 %v481_v63, %v481_v63 }
 0x102   : > { %v852_v4 = vpack.c.bf16 %v903_v2, %v902_v62  ;;  %v484_v5 = vpop.f32.mrb[7].mxu1  ;;  %v612_v14 = vmul.f32 %v903_v2, %v903_v2 }
 0x103   : > { %v620_v6 = vadd.f32 %v619_v1, %v605_v61  ;;  %v584_v7 = vadd.f32 %v583_v0, %v468_v49  ;;  %v847_v9 = vpack.c.bf16 %v484_v5, %v481_v63  ;;  %v610_v22 = vmul.f32 %v484_v5, %v484_v5 }
 0x104   : > { %867 = vst [vmem:[%s1058_s14 + $0x38] sm:$0xff] %v852_v4  }
 0x105   : > { %v585_v11 = vadd.f32 %v898_v38, %v584_v7  ;;  %v621_v12 = vadd.f32 %v620_v6, %v606_v8  ;;  %866 = vst [vmem:[%s1058_s14 + $0x30] sm:$0xff] %v847_v9  }
 0x107   : > { %v622_v15 = vadd.f32 %v621_v12, %v607_v10  ;;  %v586_v16 = vadd.f32 %v899_v45, %v585_v11 }
 0x109   : > { %v587_v18 = vadd.f32 %v586_v16, %v481_v63  ;;  %v623_v19 = vadd.f32 %v622_v15, %v608_v13 }
 0x10b   : > { %v624_v20 = vadd.f32 %v623_v19, %v609_v17  ;;  %v588_v21 = vadd.f32 %v587_v18, %v484_v5 }
 0x10d   : > { %v589_v23 = vadd.f32 %v902_v62, %v588_v21  ;;  %v625_v24 = vadd.f32 %v624_v20, %v610_v22 }
 0x10f   : > { %v590_v25 = vadd.f32 %v903_v2, %v589_v23  ;;  %v626_v26 = vadd.f32 %v625_v24, %v611_v3 }
 0x111   : > { %v591_v27 = vrot.slane %v590_v25, 4  ;;  %v627_v28 = vadd.f32 %v626_v26, %v612_v14 }
 0x113   : > { %v592_v29 = vadd.f32 %v591_v27, %v590_v25  ;;  %v628_v30 = vrot.slane %v627_v28, 4 }
 0x115   : > { %v593_v31 = vrot.slane %v592_v29, 2  ;;  %v629_v32 = vadd.f32 %v628_v30, %v627_v28 }
 0x117   : > { %v594_v33 = vadd.f32 %v593_v31, %v592_v29  ;;  %v630_v34 = vrot.slane %v629_v32, 2 }
 0x119   : > { %v595_v35 = vrot.slane %v594_v33, 1  ;;  %v631_v36 = vadd.f32 %v630_v34, %v629_v32 }
 0x11b   : > { %v632_v37 = vrot.slane %v631_v36, 1  ;;  %v596_v38 = vadd.f32 %v595_v35, %v594_v33 }
 0x11d   : > { %v633_v39 = vadd.f32 %v632_v37, %v631_v36 }
 0x11f   : > { %v635_v40 = vsel %vm634_vm1, %v596_v38, %v633_v39 }
 0x120   : > { %636 = vst [vmem:[%s238_s20] sm:$0x3] %v635_v40 }
 0x121 PF: > { %s16_s18 = sadd.s32 1, %s930_s18  }
 0x122   : > { %p13_p5 = scmp.ge.s32.totalorder %s16_s18, 6  }
 0x124   :  { %15 = sbr.rel (!%p13_p5) target bundleno = 1 (0x1), region = 78 }

// kernel: fanext_bottleneck_v3.7
= control target key start
LH: loop header
LB: loop body
LE: loop exit
PB: predicated region body
PF: predicated region fallthrough
CT: control target
= control target key end

     0   :  { %9 = vsyncpa [#allocation3], 0  ;;  %s841_s0 = inlined_call_operand.vmem [shape: f32[512,128], index: 0, kind: input, shape index: {}]   ;;  %s842_s1 = inlined_call_operand.vmem [shape: bf16[512,128], index: 1, kind: input, shape index: {}]   ;;  %s843_s2 = inlined_call_operand.vmem [shape: f32[1,128], index: 2, kind: input, shape index: {}]   ;;  %s844_s3 = inlined_call_operand.vmem [shape: f32[1,128], index: 3, kind: input, shape index: {}]   ;;  %s845_s4 = inlined_call_operand.hbm [shape: f32[512,128], index: 4, kind: output, shape index: {}]  }
   0x1   :  { %11 = vsyncpa [#allocation3 + $0x1], 0  ;;  %s640_s15 = smov 0   ;;  %s642_s16 = smov 0  }
   0x2   :  { %s644_s17 = smov 0   ;;  %s646_s18 = smov 0  }
   0x3 LB: > { %s661_s19 = sadd.s32 4294967295, %s610_s18   ;;  %s451_s20 = sadd.s32 4294967294, %s610_s18   ;;  %s610_s18 = sphi %s646_s18, %s851_s18   ;;  %s606_s17 = sphi %s644_s17, %s850_s17   ;;  %s602_s16 = sphi %s642_s16, %s849_s16   ;;  %s598_s15 = sphi %s640_s15, %s848_s15  }
   0x4   : > { %s665_s21 = sadd.s32 1, %s610_s18   ;;  %s118_s22 = sadd.s32 1, %s606_s17 }
   0x5   : > { %s115_s23 = ssub.s32 %s610_s18, %s665_s21  ;;  %p128_p0 = scmp.ne.s32.totalorder %s606_s17, %s602_s16 }
   0x6   : > { %p116_p1 = scmp.eq.s32.totalorder %s115_s23, 0  ;;  %p129_p2 = scmp.eq.s32.totalorder %s661_s19, 3 }
   0x7   : > { %p134_p3 = scmp.ne.s32.totalorder %s602_s16, %s598_s15  ;;  %p135_p4 = scmp.eq.s32.totalorder %s451_s20, 3 }
   0x8   : > { %s676_s24 = scalar_select %p116_p1, %s606_s17, %s118_s22  }
   0x9   : > { %p678_p5 = por %p129_p2, %p128_p0  ;;  %p682_p6 = por %p135_p4, %p134_p3 }
   0xa   : > { %p454_p7 = scmp.ge.s32.totalorder %s610_s18, 1  ;;  %p177_p8 = scmp.lt.s32.totalorder %s610_s18, 5 }
   0xc   : > { %p178_p9 = pnand %p454_p7, %p177_p8 }
   0xd   : > { %s456_s27 = sshll.u32 (!%p178_p9), %s661_s19, 4  ;;  %v703_v1 = vld [vmem:[%s843_s2] ss:$0 sm:$0xff] (!%p178_p9)  ;;  %s205_s12 = sand.u32 (!%p178_p9), 1, %s602_s16  }
   0xe   : > { %181 = sbr.rel (%p178_p9) target bundleno = 63 (0x3f), region = 36  ;;  %p209_p10 = scmp.lt.s32.totalorder (!%p178_p9), %s456_s27, 63  ;;  %v718_v17 = vld [vmem:[%s844_s3] ss:$0 sm:$0xff] (!%p178_p9) }
   0xf   : > { %s726_s20 = sshll.u32 (!%p178_p9), %s205_s12, 7  ;;  %s467_s23 = sshll.u32 (!%p178_p9), %s661_s19, 11 }
  0x10   : > { %s746_s22 = scalar_lea.vmem (!%p178_p9), [#allocation2], %s726_s20  ;;  %s800_s30 = scalar_lea.sflag (!%p178_p9), [#allocation3], %s205_s12 }
  0x15   : > { %s853_s27 = smov (!%p209_p10, %s456_s27), 63 }
  0x16   : > { %s457_s28 = sshll.u32 %s853_s27, 3  ;;  %s459_s29 = sshll.u32 %s853_s27, 2 }
  0x17   : > { %s692_s6 = scalar_lea.vmem %s841_s0, %s457_s28  ;;  %s697_s9 = scalar_lea.vmem %s842_s1, %s459_s29 }
  0x18   : > { %v469_v0 = vld [vmem:[%s697_s9] sm:$0xff]   ;;  %v500_v4 = vld [vmem:[%s697_s9 + $0x8] sm:$0xff]   ;;  %v501_v9 = vld [vmem:[%s697_s9 + $0x10] sm:$0xff]   ;;  %s377_s27 = sshll.u32 %s746_s22, 4  ;;  %s788_s29 = scalar_lea.hbm %s845_s4, %s467_s23  ;;  %s790_s27 = int_to_ptr.vmem [resolvable:$true] %s377_s27 }
  0x19   : > { %v470_v2 = vunpack.c.l.bf16 %v469_v0  ;;  %v471_v3 = vunpack.c.h.bf16 %v469_v0  ;;  %v221_v5 = vld [vmem:[%s692_s6] sm:$0xff]  ;;  %v222_v6 = vld [vmem:[%s692_s6 + $0x8] sm:$0xff]  ;;  %v474_v7 = vunpack.c.l.bf16 %v500_v4  ;;  %v475_v8 = vunpack.c.h.bf16 %v500_v4  ;;  %v223_v12 = vld [vmem:[%s692_s6 + $0x10] sm:$0xff]  ;;  %s548_s5 = scalar_lea.vmem %s790_s27, 2048 }
  0x1a   : > { %v224_v13 = vld [vmem:[%s692_s6 + $0x18] sm:$0xff]  ;;  %v478_v14 = vunpack.c.l.bf16 %v501_v9  ;;  %v479_v15 = vunpack.c.h.bf16 %v501_v9  ;;  %v225_v20 = vld [vmem:[%s692_s6 + $0x20] sm:$0xff]  ;;  %v226_v21 = vld [vmem:[%s692_s6 + $0x28] sm:$0xff]  ;;  %p549_p11 = scmp.ne.s32.totalorder %s790_s27, %s548_s5 }
  0x1b   : > { %v276_v10 = vmul.f32 %v470_v2, %v703_v1  ;;  %v277_v11 = vmul.f32 %v471_v3, %v703_v1  ;;  %v502_v16 = vld [vmem:[%s697_s9 + $0x18] sm:$0xff]   ;;  %v278_v18 = vmul.f32 %v474_v7, %v703_v1  ;;  %v279_v19 = vmul.f32 %v475_v8, %v703_v1  ;;  %v227_v28 = vld [vmem:[%s692_s6 + $0x30] sm:$0xff]  ;;  %v503_v42 = vld [vmem:[%s697_s9 + $0x20] sm:$0xff]  }
  0x1c   : > { %v482_v22 = vunpack.c.l.bf16 %v502_v16  ;;  %v483_v23 = vunpack.c.h.bf16 %v502_v16  ;;  %v280_v26 = vmul.f32 %v478_v14, %v703_v1  ;;  %v281_v27 = vmul.f32 %v479_v15, %v703_v1  ;;  %v228_v29 = vld [vmem:[%s692_s6 + $0x38] sm:$0xff]  ;;  %v504_v47 = vld [vmem:[%s697_s9 + $0x28] sm:$0xff]   ;;  %v505_v52 = vld [vmem:[%s697_s9 + $0x30] sm:$0xff]   ;;  %p550_p12 = pnand %p549_p11, %p678_p5 }
  0x1d   : > { %v292_v24 = vadd.f32 %v276_v10, %v221_v5  ;;  %v293_v25 = vadd.f32 %v277_v11, %v222_v6  ;;  %v294_v30 = vadd.f32 %v278_v18, %v223_v12  ;;  %v295_v31 = vadd.f32 %v279_v19, %v224_v13  ;;  %v506_v57 = vld [vmem:[%s697_s9 + $0x38] sm:$0xff]   ;;  %v229_v60 = vld [vmem:[%s692_s6 + $0x40] sm:$0xff]  ;;  %v230_v61 = vld [vmem:[%s692_s6 + $0x48] sm:$0xff] }
  0x1e   : > { %v282_v32 = vmul.f32 %v482_v22, %v703_v1  ;;  %v283_v33 = vmul.f32 %v483_v23, %v703_v1  ;;  %v296_v36 = vadd.f32 %v280_v26, %v225_v20  ;;  %v297_v37 = vadd.f32 %v281_v27, %v226_v21  ;;  %v231_v3 = vld [vmem:[%s692_s6 + $0x50] sm:$0xff]  ;;  %v232_v4 = vld [vmem:[%s692_s6 + $0x58] sm:$0xff]  ;;  %v233_v9 = vld [vmem:[%s692_s6 + $0x60] sm:$0xff]  ;;  %p551_p13 = pneg %p550_p12 }
  0x1f   : > { %v315_v34 = vadd.f32 %v718_v17, %v292_v24  ;;  %v316_v35 = vadd.f32 %v718_v17, %v293_v25  ;;  %v317_v38 = vadd.f32 %v718_v17, %v294_v30  ;;  %v318_v39 = vadd.f32 %v718_v17, %v295_v31  ;;  %v234_v10 = vld [vmem:[%s692_s6 + $0x68] sm:$0xff]  ;;  %v235_v18 = vld [vmem:[%s692_s6 + $0x70] sm:$0xff]  ;;  %v236_v19 = vld [vmem:[%s692_s6 + $0x78] sm:$0xff]  ;;  %s612_s6 = smov [#allocation2]  }
  0x20   : > { %v298_v40 = vadd.f32 %v282_v32, %v227_v28  ;;  %v299_v41 = vadd.f32 %v283_v33, %v228_v29  ;;  %v319_v45 = vadd.f32 %v718_v17, %v296_v36  ;;  %v320_v46 = vadd.f32 %v718_v17, %v297_v37  ;;  %s552_s7 = sshll.u32 %s612_s6, 4  ;;  %s553_s7 = int_to_ptr.vmem [resolvable:$false] %s552_s7 }
  0x21   : > { %v331_v43 = vmax.f32 %v315_v34, 0.0  ;;  %v332_v44 = vmax.f32 %v316_v35, 0.0  ;;  %v333_v48 = vmax.f32 %v317_v38, 0.0  ;;  %v334_v49 = vmax.f32 %v318_v39, 0.0  ;;  %s554_s8 = scalar_lea.vmem %s553_s7, 4096  ;;  %p555_p0 = scmp.lt.s32.totalorder %s790_s27, %s553_s7 }
  0x22   : > { %v321_v50 = vadd.f32 %v718_v17, %v298_v40  ;;  %v322_v51 = vadd.f32 %v718_v17, %v299_v41  ;;  %v335_v53 = vmax.f32 %v319_v45, 0.0  ;;  %v336_v54 = vmax.f32 %v320_v46, 0.0  ;;  %p556_p1 = scmp.lt.s32.totalorder %s554_s8, %s548_s5 }
  0x23   : > { %347 = vst [vmem:[%s746_s22] sm:$0xff] %v331_v43  ;;  %348 = vst [vmem:[%s746_s22 + $0x8] sm:$0xff] %v332_v44  ;;  %v486_v55 = vunpack.c.l.bf16 %v503_v42  ;;  %v487_v56 = vunpack.c.h.bf16 %v503_v42  ;;  %v490_v62 = vunpack.c.l.bf16 %v504_v47  ;;  %v491_v63 = vunpack.c.h.bf16 %v504_v47 }
  0x24   : > { %349 = vst [vmem:[%s746_s22 + $0x10] sm:$0xff] %v333_v48  ;;  %350 = vst [vmem:[%s746_s22 + $0x18] sm:$0xff] %v334_v49  ;;  %v337_v58 = vmax.f32 %v321_v50, 0.0  ;;  %v338_v59 = vmax.f32 %v322_v51, 0.0  ;;  %v494_v5 = vunpack.c.l.bf16 %v505_v52  ;;  %v495_v6 = vunpack.c.h.bf16 %v505_v52  ;;  %p557_p2 = por %p556_p1, %p555_p0 }
  0x25   : > { %351 = vst [vmem:[%s746_s22 + $0x20] sm:$0xff] %v335_v53  ;;  %352 = vst [vmem:[%s746_s22 + $0x28] sm:$0xff] %v336_v54  ;;  %v284_v0 = vmul.f32 %v486_v55, %v703_v1  ;;  %v285_v2 = vmul.f32 %v487_v56, %v703_v1  ;;  %v286_v7 = vmul.f32 %v490_v62, %v703_v1  ;;  %v498_v11 = vunpack.c.l.bf16 %v506_v57 }
  0x26   : > { %353 = vst [vmem:[%s746_s22 + $0x30] sm:$0xff] %v337_v58  ;;  %354 = vst [vmem:[%s746_s22 + $0x38] sm:$0xff] %v338_v59  ;;  %v287_v8 = vmul.f32 %v491_v63, %v703_v1  ;;  %v499_v12 = vunpack.c.h.bf16 %v506_v57  ;;  %v288_v15 = vmul.f32 %v494_v5, %v703_v1  ;;  %v289_v16 = vmul.f32 %v495_v6, %v703_v1  ;;  %p558_p3 = pnand %p557_p2, %p551_p13 }
  0x27   : > { %v300_v13 = vadd.f32 %v284_v0, %v229_v60  ;;  %v301_v14 = vadd.f32 %v285_v2, %v230_v61  ;;  %v302_v20 = vadd.f32 %v286_v7, %v231_v3  ;;  %v290_v22 = vmul.f32 %v498_v11, %v703_v1 }
  0x28   : > { %v303_v21 = vadd.f32 %v287_v8, %v232_v4  ;;  %v291_v23 = vmul.f32 %v499_v12, %v703_v1  ;;  %v304_v26 = vadd.f32 %v288_v15, %v233_v9  ;;  %v305_v27 = vadd.f32 %v289_v16, %v234_v10 }
  0x29   : > { %v323_v24 = vadd.f32 %v718_v17, %v300_v13  ;;  %v324_v25 = vadd.f32 %v718_v17, %v301_v14  ;;  %v325_v28 = vadd.f32 %v718_v17, %v302_v20  ;;  %v306_v30 = vadd.f32 %v290_v22, %v235_v18 }
  0x2a   : > { %v326_v29 = vadd.f32 %v718_v17, %v303_v21  ;;  %v307_v31 = vadd.f32 %v291_v23, %v236_v19  ;;  %v327_v33 = vadd.f32 %v718_v17, %v304_v26  ;;  %v328_v34 = vadd.f32 %v718_v17, %v305_v27 }
  0x2b   : > { %v339_v32 = vmax.f32 %v323_v24, 0.0  ;;  %v340_v1 = vmax.f32 %v324_v25, 0.0  ;;  %v341_v35 = vmax.f32 %v325_v28, 0.0  ;;  %v329_v37 = vadd.f32 %v718_v17, %v306_v30 }
  0x2c   : > { %v342_v36 = vmax.f32 %v326_v29, 0.0  ;;  %v330_v38 = vadd.f32 %v718_v17, %v307_v31  ;;  %v343_v39 = vmax.f32 %v327_v33, 0.0  ;;  %v344_v40 = vmax.f32 %v328_v34, 0.0 }
  0x2d   : > { %355 = vst [vmem:[%s746_s22 + $0x40] sm:$0xff] %v339_v32  ;;  %356 = vst [vmem:[%s746_s22 + $0x48] sm:$0xff] %v340_v1  ;;  %v345_v41 = vmax.f32 %v329_v37, 0.0 }
  0x2e   : > { %357 = vst [vmem:[%s746_s22 + $0x50] sm:$0xff] %v341_v35  ;;  %358 = vst [vmem:[%s746_s22 + $0x58] sm:$0xff] %v342_v36  ;;  %v346_v42 = vmax.f32 %v330_v38, 0.0 }
  0x2f   : > { %359 = vst [vmem:[%s746_s22 + $0x60] sm:$0xff] %v343_v39  ;;  %360 = vst [vmem:[%s746_s22 + $0x68] sm:$0xff] %v344_v40 }
  0x30   : > { %361 = vst [vmem:[%s746_s22 + $0x70] sm:$0xff] %v345_v41  ;;  %362 = vst [vmem:[%s746_s22 + $0x78] sm:$0xff] %v346_v42 }
  0x31   : > { %561 = shalt.err (!%p558_p3)
}
  0x32   : > { %s562_s9 = scalar_lea.hbm %s788_s29, 2048  ;;  %s566_s12 = scalar_lea.hbm %s845_s4, 8192 }
  0x33   : > { %p563_p4 = scmp.ne.s32.totalorder %s788_s29, %s562_s9  ;;  %p567_p9 = scmp.lt.u32.totalorder %s788_s29, %s845_s4 }
  0x34   : > { %p568_p10 = scmp.lt.u32.totalorder %s566_s12, %s562_s9  ;;  %p570_p12 = scmp.lt.u32.totalorder %s562_s9, %s788_s29 }
  0x35   : > { %p564_p7 = pnand %p563_p4, %p678_p5 }
  0x36   : > { %p569_p11 = por %p568_p10, %p567_p9 }
  0x37   : > { %p565_p8 = pneg %p564_p7 }
  0x38   : > { %p571_p13 = por %p570_p12, %p569_p11 }
  0x3a   : > { %p572_p0 = pnand %p571_p13, %p565_p8 }
  0x3c   : > { %575 = shalt.err (!%p572_p0)
}
  0x3d   : > { %s613_s20 = smov 128   ;;  %s614_s22 = smov 8  }
  0x3e   : > { %507 = dma.vmem_to_hbm [thread:$0]  (%p678_p5), %s790_s27, 2048, %s788_s29, %s800_s30, %s613_s20, %s613_s20, %s614_s22  }
  0x3f PF: > { %p513_p1 = scmp.ge.s32.totalorder %s610_s18, 2  ;;  %s392_s23 = sand.u32 1, %s598_s15  }
  0x40   : > { %s393_s19 = scalar_lea.sflag [#allocation3], %s392_s23 }
  0x41   : > { %p510_p2 = pnand %p513_p1, %p682_p6 }
  0x43   : > { %593 = dma.done.wait (!%p510_p2), %s393_s19, 2048  }
  0x44   : > { %595 = vsyncadd (!%p510_p2), %s393_s19, 4294965248  ;;  %p14_p3 = scmp.ge.s32.totalorder %s665_s21, 6   ;;  %s848_s15 = smov %s602_s16 }
  0x45   : > { %s849_s16 = smov %s606_s17  ;;  %s850_s17 = smov %s676_s24 }
  0x46   : > { %s851_s18 = smov %s665_s21  ;;  %16 = sbr.rel (!%p14_p3) target bundleno = 3 (0x3), region = 74 }
  0x4d   :  { %398 = vsyncpa [#allocation3], 1 }
  0x4e   :  { %400 = vsyncpa [#allocation3 + $0x1], 1 }

// kernel: fanext_bottleneck_v3.5
= control target key start
LH: loop header
LB: loop body
LE: loop exit
PB: predicated region body
PF: predicated region fallthrough
CT: control target
= control target key end

     0   :  { %s6249_s18 = smov 0   ;;  %s8018_s0 = inlined_call_operand.vmem [shape: bf16[2,16,16,64], index: 0, kind: input, shape index: {}]   ;;  %s8019_s1 = inlined_call_operand.vmem [shape: f32[1,64], index: 1, kind: input, shape index: {}]   ;;  %s8020_s2 = inlined_call_operand.vmem [shape: f32[1,64], index: 2, kind: input, shape index: {}]   ;;  %s8021_s3 = inlined_call_operand.vmem [shape: bf16[576,64], index: 3, kind: input, shape index: {}]   ;;  %s8022_s4 = inlined_call_operand.vmem [shape: bf16[512,64], index: 4, kind: output, shape index: {0}]   ;;  %s8023_s5 = inlined_call_operand.vmem [shape: f32[2,2,64], index: 5, kind: output, shape index: {1}]  }
   0x1 LB: > { %s6255_s19 = sadd.s32 4294967295, %s6215_s18   ;;  %p5348_p0 = scmp.ge.s32.totalorder %s6215_s18, 1  ;;  %s6215_s18 = sphi %s6249_s18, %s16_s18  }
   0x2   : > { %p190_p1 = scmp.lt.s32.totalorder %s6215_s18, 3 }
   0x4   : > { %p191_p2 = pnand %p5348_p0, %p190_p1 }
   0x6   : > { %194 = sbr.rel (%p191_p2) target bundleno = 697 (0x2b9), region = 36 }
   0xd   : > { %p222_p3 = scmp.lt.s32.totalorder %s6255_s19, 1  ;;  %vm832_vm0 = vcmask 519168   ;;  %vm840_vm1 = vcmask 516096   ;;  %v6217_v0 = vmov 0   ;;  %v6278_v1 = vld [vmem:[%s8019_s1] ss:$0 sm:$0xff] }
   0xe   : > { %950 = vst.msk [vmem:[#allocation2] sm:$0xf] %vm832_vm0, %v6217_v0  ;;  %951 = vst.msk [vmem:[#allocation2 + $0x4] sm:$0xf] %vm832_vm0, %v6217_v0  ;;  %vm1248_vm2 = vsmask.f32 3328 }
   0xf   : > { %s6261_s20 = scalar_select %p222_p3, %s6255_s19, 1  ;;  %953 = vst.msk [vmem:[#allocation2 + $0x8] sm:$0x1] %vm840_vm1, %v6217_v0  ;;  %957 = vst.msk [vmem:[#allocation2 + $0xd4] sm:$0x1] %vm840_vm1, %v6217_v0  ;;  %vm1844_vm12 = vcmask 1042432  }
  0x10   : > { %955 = vst.msk [vmem:[#allocation2 + $0xcc] sm:$0xf] %vm832_vm0, %v6217_v0  ;;  %956 = vst.msk [vmem:[#allocation2 + $0xd0] sm:$0xf] %vm832_vm0, %v6217_v0  ;;  %vm1249_vm3 = vsmask.f32 7440 }
  0x11   : > { %s5666_s21 = sshll.u32 %s6261_s20, 7  ;;  %v6287_v10 = vld [vmem:[%s8020_s2] ss:$0 sm:$0xff]  ;;  %vm509_vm4 = vsmask.f32 4368  ;;  %vm6309_vm7 = vmor %vm1248_vm2, %vm1249_vm3  ;;  %s6218_s29 = smov 64  }
  0x12   : > { %s6273_s24 = scalar_lea.vmem %s8018_s0, %s5666_s21  ;;  %vm833_vm5 = vsmask.f32 7938  ;;  %vm508_vm6 = vsmask.f32 256  ;;  %vm1845_vm13 = vcmask 1046532   ;;  %vm1183_vm15 = vcmask 523264  }
  0x13   : > { %v5732_v2 = vld [vmem:[%s6273_s24] sm:$0xff]   ;;  %v5795_v8 = vld [vmem:[%s6273_s24 + $0x8] sm:$0xff]   ;;  %v5805_v9 = vld [vmem:[%s6273_s24 + $0x58] sm:$0xff]   ;;  %s5353_s7 = sshll.u32 %s6261_s20, 1  ;;  %vm5253_vm2 = vcmask 1040384  }
  0x14   : > { %v5806_v3 = vld [vmem:[%s6273_s24 + $0x60] sm:$0xff]   ;;  %v5733_v4 = vunpack.c.l.bf16 %v5732_v2  ;;  %v5734_v5 = vunpack.c.h.bf16 %v5732_v2  ;;  %v5737_v11 = vunpack.c.l.bf16 %v5795_v8  ;;  %v5738_v12 = vunpack.c.h.bf16 %v5795_v8  ;;  %vm6315_vm8 = vmor %vm508_vm6, %vm509_vm4  ;;  %v835_v2 = vld [vmem:[#allocation2 + $0xc] sm:$0xf]  ;;  %s236_s10 = scalar_lea.vmem %s8023_s5, %s5353_s7 }
  0x15   : > { %v5781_v6 = vunpack.c.l.bf16 %v5806_v3  ;;  %v5782_v7 = vunpack.c.h.bf16 %v5806_v3  ;;  %v5777_v13 = vunpack.c.l.bf16 %v5805_v9  ;;  %v5778_v14 = vunpack.c.h.bf16 %v5805_v9  ;;  %v1200_v19 = vld [vmem:[#allocation2] sm:$0xf]  ;;  %v1201_v20 = vld [vmem:[#allocation2 + $0x4] sm:$0xf]  ;;  %vm6321_vm9 = vmand %vm832_vm0, %vm833_vm5 }
  0x16   : > { %v310_v15 = vmul.f32 %v5733_v4, %v6278_v1  ;;  %v311_v16 = vmul.f32 %v5734_v5, %v6278_v1  ;;  %v1202_v21 = vld [vmem:[#allocation2 + $0x8] sm:$0x1]  ;;  %v312_v22 = vmul.f32 %v5737_v11, %v6278_v1  ;;  %v313_v23 = vmul.f32 %v5738_v12, %v6278_v1  ;;  %v922_v12 = vld [vmem:[#allocation2 + $0x9c] sm:$0xf]  ;;  %vm6342_vm10 = vmand %vm840_vm1, %vm508_vm6 }
  0x17   : > { %v334_v17 = vmul.f32 %v5781_v6, %v6278_v1  ;;  %v335_v18 = vmul.f32 %v5782_v7, %v6278_v1  ;;  %v6296_v24 = vmul.f32 %v5777_v13, %v6278_v1  ;;  %v6299_v25 = vmul.f32 %v5778_v14, %v6278_v1  ;;  %vm6380_vm11 = vmand %vm840_vm1, %vm833_vm5 }
  0x18   : > { %v348_v26 = vadd.f32 %v6287_v10, %v310_v15  ;;  %v349_v27 = vadd.f32 %v6287_v10, %v311_v16  ;;  %v1252_v28 = vshrl.u32 %v1200_v19, 16  ;;  %v1255_v29 = vshll.u32 %v1200_v19, 16  ;;  %vm6649_vm14 = vmor %vm1844_vm12, %vm1845_vm13 }
  0x19   : > { %v1261_v30 = vshll.u32 %v1201_v20, 16  ;;  %v1265_v31 = vshrl.u32 %v1201_v20, 16  ;;  %v1271_v32 = vshll.u32 %v1202_v21, 16  ;;  %v372_v33 = vadd.f32 %v6287_v10, %v334_v17  ;;  %v842_v21 = vld [vmem:[#allocation2 + $0x14] sm:$0x1] }
  0x1a   : > { %v380_v34 = vmax.f32 %v348_v26, 0.0  ;;  %v381_v35 = vmax.f32 %v349_v27, 0.0  ;;  %v1254_v36 = vrot.slane %v1252_v28, 4  ;;  %v1257_v37 = vrot.slane %v1255_v29, 5 }
  0x1b   : > { %v1263_v38 = vrot.slane %v1261_v30, 5  ;;  %v1267_v39 = vrot.slane %v1265_v31, 4  ;;  %v1273_v40 = vrot.slane %v1271_v32, 5  ;;  %v373_v41 = vadd.f32 %v6287_v10, %v335_v18  ;;  %v5807_v32 = vld [vmem:[%s6273_s24 + $0x68] sm:$0xff]  }
  0x1c   : > { %v5667_v42 = vpack.c.bf16 %v380_v34, %v380_v34  ;;  %v5668_v43 = vpack.c.bf16 %v381_v35, %v381_v35  ;;  %v1258_v44 = vor.u32 %v1257_v37, %v1254_v36  ;;  %v404_v45 = vmax.f32 %v372_v33, 0.0 }
  0x1d   : > { %v1268_v46 = vor.u32 %v1267_v39, %v1263_v38  ;;  %v405_v47 = vmax.f32 %v373_v41, 0.0  ;;  %v350_v48 = vadd.f32 %v6287_v10, %v312_v22  ;;  %v351_v49 = vadd.f32 %v6287_v10, %v313_v23 }
  0x1e   : > { %v512_v50 = vshrl.u32 %v5667_v42, 16  ;;  %v515_v51 = vshll.u32 %v5667_v42, 16  ;;  %v520_v52 = vshrl.u32 %v5668_v43, 16  ;;  %v523_v53 = vshll.u32 %v5668_v43, 16 }
  0x1f   : > { %v1259_v55 = vrot.slane %v1258_v44, 4  ;;  %v1269_v56 = vrot.slane %v1268_v46, 4  ;;  %v5691_v57 = vpack.c.bf16 %v404_v45, %v404_v45  ;;  %v5692_v58 = vpack.c.bf16 %v405_v47, %v405_v47  ;;  %v5796_v46 = vld [vmem:[%s6273_s24 + $0x10] sm:$0xff]  }
  0x20   : > { %v514_v60 = vrot.slane %v512_v50, 7  ;;  %v522_v61 = vrot.slane %v520_v52, 7  ;;  %v382_v62 = vmax.f32 %v350_v48, 0.0  ;;  %v383_v63 = vmax.f32 %v351_v49, 0.0 }
  0x21   : > { %v1264_v3 = vsel %vm6309_vm7, %v1259_v55, %v1263_v38  ;;  %v1274_v4 = vsel %vm6309_vm7, %v1269_v56, %v1273_v40  ;;  %v716_v5 = vshrl.u32 %v5691_v57, 16  ;;  %v719_v6 = vshll.u32 %v5691_v57, 16 }
  0x22   : > { %v517_v7 = vor.u32 %v515_v51, %v514_v60  ;;  %v518_v8 = vrot.slane %v514_v60, 4  ;;  %v525_v9 = vor.u32 %v523_v53, %v522_v61  ;;  %v527_v11 = vrot.slane %v522_v61, 4 }
  0x23   : > { %v5404_v13 = vcombine.low %v1264_v3, %v1274_v4  ;;  %v718_v14 = vrot.slane %v716_v5, 7  ;;  %v724_v15 = vshrl.u32 %v5692_v58, 16  ;;  %v727_v16 = vshll.u32 %v5692_v58, 16  ;;  %v915_v5 = vld [vmem:[#allocation2 + $0x90] sm:$0xf] }
  0x24   : > { %v526_v17 = vsel %vm6315_vm8, %v518_v8, %v525_v9  ;;  %v836_v18 = vsel %vm6321_vm9, %v517_v7, %v835_v2  ;;  %v5669_v19 = vpack.c.bf16 %v382_v62, %v382_v62  ;;  %v5670_v20 = vpack.c.bf16 %v383_v63, %v383_v63 }
  0x25   : > { %837 = vst [vmem:[#allocation2 + $0xc] sm:$0xf] %v836_v18  ;;  %839 = vst.msk [vmem:[#allocation2 + $0x10] sm:$0xf] %vm832_vm0, %v526_v17  ;;  %1683 = vrot.lane.b32.xlu1 %v5404_v13, %s6218_s29  ;;  %v721_v22 = vor.u32 %v719_v6, %v718_v14  ;;  %v722_v23 = vrot.slane %v718_v14, 4  ;;  %v6335_v26 = vrot.slane %v724_v15, 7  ;;  %v370_v27 = vadd.f32 %v6287_v10, %v6296_v24 }
  0x26   : > { %v529_v28 = vshrl.u32 %v5669_v19, 16  ;;  %v532_v29 = vshll.u32 %v5669_v19, 16  ;;  %v537_v30 = vshrl.u32 %v5670_v20, 16  ;;  %v540_v31 = vshll.u32 %v5670_v20, 16  ;;  %v845_v24 = vld [vmem:[#allocation2 + $0x18] sm:$0xf] }
  0x27   : > { %v729_v34 = vor.u32 %v727_v16, %v6335_v26  ;;  %v731_v35 = vrot.slane %v6335_v26, 4  ;;  %v923_v36 = vsel %vm6321_vm9, %v721_v22, %v922_v12  ;;  %v371_v37 = vadd.f32 %v6287_v10, %v6299_v25  ;;  %v919_v6 = vld [vmem:[#allocation2 + $0x98] sm:$0x1] }
  0x28   : > { %924 = vst [vmem:[#allocation2 + $0x9c] sm:$0xf] %v923_v36  ;;  %v531_v38 = vrot.slane %v529_v28, 7  ;;  %v6352_v39 = vrot.slane %v537_v30, 7  ;;  %v402_v40 = vmax.f32 %v370_v27, 0.0  ;;  %v843_v41 = vsel %vm6342_vm10, %v527_v11, %v842_v21 }
  0x29   : > { %v730_v42 = vsel %vm6315_vm8, %v722_v23, %v729_v34  ;;  %v403_v43 = vmax.f32 %v371_v37, 0.0  ;;  %844 = vst [vmem:[#allocation2 + $0x14] sm:$0x1] %v843_v41  ;;  %v5785_v44 = vunpack.c.l.bf16 %v5807_v32  ;;  %v5786_v45 = vunpack.c.h.bf16 %v5807_v32  ;;  %v849_v36 = vld [vmem:[#allocation2 + $0x20] sm:$0x1] }
  0x2a   : > { %925 = vst.msk [vmem:[#allocation2 + $0xa0] sm:$0xf] %vm832_vm0, %v730_v42  ;;  %v534_v47 = vor.u32 %v532_v29, %v531_v38  ;;  %v535_v25 = vrot.slane %v531_v38, 4  ;;  %v542_v48 = vor.u32 %v540_v31, %v6352_v39  ;;  %v544_v49 = vrot.slane %v6352_v39, 4  ;;  %v926_v29 = vld [vmem:[#allocation2 + $0xa4] sm:$0x1] }
  0x2b   : > { %v5689_v50 = vpack.c.bf16 %v402_v40, %v402_v40  ;;  %v5690_v51 = vpack.c.bf16 %v403_v43, %v403_v43  ;;  %v336_v52 = vmul.f32 %v5785_v44, %v6278_v1  ;;  %v337_v53 = vmul.f32 %v5786_v45, %v6278_v1  ;;  %v6413_v39 = vld [vmem:[%s6273_s24 + $0x70] sm:$0xff]  }
  0x2c   : > { %v958_v55 = vld [vmem:[#allocation2 + $0xc] sm:$0x1]  ;;  %v543_v56 = vsel %vm6315_vm8, %v535_v25, %v542_v48  ;;  %v846_v57 = vsel %vm6321_vm9, %v534_v47, %v845_v24  ;;  %v1204_v58 = vld [vmem:[#allocation2 + $0x10] sm:$0xf]  ;;  %v5741_v60 = vunpack.c.l.bf16 %v5796_v46  ;;  %v5742_v61 = vunpack.c.h.bf16 %v5796_v46  ;;  %v929_v48 = vld [vmem:[#allocation2 + $0xa8] sm:$0xf] }
  0x2d   : > { %v959_v62 = vsel %vm6342_vm10, 0, %v958_v55  ;;  %847 = vst [vmem:[#allocation2 + $0x18] sm:$0xf] %v846_v57  ;;  %848 = vst.msk [vmem:[#allocation2 + $0x1c] sm:$0xf] %vm832_vm0, %v543_v56  ;;  %v699_v63 = vshrl.u32 %v5689_v50, 16  ;;  %v374_v9 = vadd.f32 %v6287_v10, %v336_v52  ;;  %v375_v14 = vadd.f32 %v6287_v10, %v337_v53 }
  0x2e   : > { %v702_v2 = vshll.u32 %v5689_v50, 16  ;;  %v707_v3 = vshrl.u32 %v5690_v51, 16  ;;  %960 = vst [vmem:[#allocation2 + $0xc] sm:$0x1] %v959_v62  ;;  %v710_v4 = vshll.u32 %v5690_v51, 16  ;;  %v1285_v7 = vshll.u32 %v1204_v58, 16 }
  0x2f   : > { %v1289_v8 = vshrl.u32 %v1204_v58, 16  ;;  %v994_v11 = vld [vmem:[#allocation2 + $0x9c] sm:$0x1]  ;;  %v701_v12 = vrot.slane %v699_v63, 7  ;;  %v314_v15 = vmul.f32 %v5741_v60, %v6278_v1  ;;  %v406_v20 = vmax.f32 %v374_v9, 0.0 }
  0x30   : > { %v709_v13 = vrot.slane %v707_v3, 7  ;;  %v995_v16 = vsel %vm6342_vm10, 0, %v994_v11  ;;  %v1007_v17 = vld [vmem:[#allocation2 + $0x14] sm:$0x1]  ;;  %v6376_v18 = vrot.slane %v1285_v7, 5  ;;  %v8033_v21 = vmov 0 }
  0x31   : > { %v1291_v19 = vrot.slane %v1289_v8, 4  ;;  %v8034_v21 = vsel %vm6380_vm11, 4294967295, %v8033_v21  ;;  %996 = vst [vmem:[#allocation2 + $0x9c] sm:$0x1] %v995_v16  ;;  %v704_v22 = vor.u32 %v702_v2, %v701_v12  ;;  %v705_v23 = vrot.slane %v701_v12, 4  ;;  %v6416_v62 = vld [vmem:[%s6273_s24 + $0x18] sm:$0xff]  }
  0x32   : > { %8035 = vst [vmem:[#allocation4_spill] sm:$0xff] %v8034_v21  ;;  %v712_v27 = vor.u32 %v710_v4, %v709_v13  ;;  %v714_v28 = vrot.slane %v709_v13, 4  ;;  %v1008_v30 = vsel %vm6380_vm11, 0, %v1007_v17  ;;  %v407_v32 = vmax.f32 %v375_v14, 0.0  ;;  %v6409_v58 = vld [vmem:[#allocation2 + $0xa0] sm:$0xf] }
  0x33   : > { %v1292_v31 = vor.u32 %v1291_v19, %v6376_v18  ;;  %v5693_v34 = vpack.c.bf16 %v406_v20, %v406_v20  ;;  %v916_v37 = vsel %vm6321_vm9, %v704_v22, %v915_v5  ;;  %1009 = vst [vmem:[#allocation2 + $0x14] sm:$0x1] %v1008_v30  ;;  %v315_v40 = vmul.f32 %v5742_v61, %v6278_v1 }
  0x34   : > { %v713_v24 = vsel %vm6315_vm8, %v705_v23, %v712_v27  ;;  %v920_v38 = vsel %vm6342_vm10, %v714_v28, %v919_v6  ;;  %v961_v41 = vld [vmem:[#allocation2 + $0x18] sm:$0x1]  ;;  %917 = vst [vmem:[#allocation2 + $0x90] sm:$0xf] %v916_v37  ;;  %v5694_v43 = vpack.c.bf16 %v407_v32, %v407_v32  ;;  %v352_v45 = vadd.f32 %v6287_v10, %v314_v15 }
  0x35   : > { %918 = vst.msk [vmem:[#allocation2 + $0x94] sm:$0xf] %vm832_vm0, %v713_v24  ;;  %921 = vst [vmem:[#allocation2 + $0x98] sm:$0x1] %v920_v38  ;;  %v6395_v42 = vrot.slane %v1292_v31, 4  ;;  %v733_v44 = vshrl.u32 %v5693_v34, 16  ;;  %v353_v50 = vadd.f32 %v6287_v10, %v315_v40  ;;  %v927_v51 = vsel %vm6342_vm10, %v731_v35, %v926_v29 }
  0x36   : > { %v6120_v46 = vld [vmem:[#allocation2 + $0xc] sm:$0xff]   ;;  %v962_v47 = vsel %vm6342_vm10, 0, %v961_v41  ;;  %v850_v52 = vsel %vm6342_vm10, %v544_v49, %v849_v36  ;;  %v736_v57 = vshll.u32 %v5693_v34, 16  ;;  %928 = vst [vmem:[#allocation2 + $0xa4] sm:$0x1] %v927_v51  ;;  %v741_v26 = vshrl.u32 %v5694_v43, 16 }
  0x37   : > { %v1203_v25 = vld [vmem:[#allocation2 + $0xc] sm:$0xf]  ;;  %963 = vst [vmem:[#allocation2 + $0x18] sm:$0x1] %v962_v47  ;;  %v735_v56 = vrot.slane %v733_v44, 7  ;;  %2151 = vrot.lane.b32.xlu0 %v6120_v46, %s6218_s29  ;;  %v744_v60 = vshll.u32 %v5694_v43, 16  ;;  %v5789_v22 = vunpack.c.l.bf16 %v6413_v39  ;;  %v5790_v23 = vunpack.c.h.bf16 %v6413_v39 }
  0x38   : > { %v1276_v53 = vshrl.u32 %v1203_v25, 16  ;;  %v1279_v55 = vshll.u32 %v1203_v25, 16  ;;  %851 = vst [vmem:[#allocation2 + $0x20] sm:$0x1] %v850_v52  ;;  %v384_v35 = vmax.f32 %v352_v45, 0.0  ;;  %v385_v61 = vmax.f32 %v353_v50, 0.0 }
  0x39   : > { %v6121_v49 = vld [vmem:[#allocation2 + $0x9c] sm:$0xff]   ;;  %v738_v3 = vor.u32 %v736_v57, %v735_v56  ;;  %v739_v4 = vrot.slane %v735_v56, 4  ;;  %v6418_v5 = vrot.slane %v741_v26, 7  ;;  %v1573_v9 = vshll.u32 %v6409_v58, 16  ;;  %v852_v51 = vld [vmem:[#allocation2 + $0x24] sm:$0xf] }
  0x3a   : > { %v1278_v63 = vrot.slane %v1276_v53, 4  ;;  %v1281_v2 = vrot.slane %v1279_v55, 5  ;;  %v5671_v6 = vpack.c.bf16 %v384_v35, %v384_v35  ;;  %v5672_v7 = vpack.c.bf16 %v385_v61, %v385_v61  ;;  %v1239_v8 = vld [vmem:[#allocation2 + $0x9c] sm:$0xf]  ;;  %v1205_v11 = vld [vmem:[#allocation2 + $0x14] sm:$0x1] }
  0x3b   : > { %v930_v13 = vsel %vm6321_vm9, %v738_v3, %v929_v48  ;;  %v1564_v14 = vshrl.u32 %v1239_v8, 16  ;;  %v1567_v15 = vshll.u32 %v1239_v8, 16  ;;  %2175 = vrot.lane.b32.xlu0 %v6121_v49, %s6218_s29  ;;  %v991_v16 = vld [vmem:[#allocation2 + $0x90] sm:$0x1]  ;;  %v746_v20 = vor.u32 %v744_v60, %v6418_v5 }
  0x3c   : > { %v1282_v12 = vor.u32 %v1281_v2, %v1278_v63  ;;  %v1040_v17 = vld [vmem:[#allocation2 + $0x98] sm:$0x1]  ;;  %v1237_v19 = vld [vmem:[#allocation2 + $0x94] sm:$0xf]  ;;  %931 = vst [vmem:[#allocation2 + $0xa8] sm:$0xf] %v930_v13  ;;  %v5745_v27 = vunpack.c.l.bf16 %v6416_v62 }
  0x3d   : > { %v992_v28 = vsel %vm6342_vm10, 0, %v991_v16  ;;  %v1041_v29 = vsel %vm6380_vm11, 0, %v1040_v17  ;;  %v1549_v30 = vshll.u32 %v1237_v19, 16  ;;  %v1553_v31 = vshrl.u32 %v1237_v19, 16  ;;  %v1043_v44 = vld [vmem:[#allocation2 + $0xa4] sm:$0x1] }
  0x3e   : > { %v6122_v32 = vld [vmem:[#allocation2 + $0x18] sm:$0xff]   ;;  %993 = vst [vmem:[#allocation2 + $0x90] sm:$0x1] %v992_v28  ;;  %1042 = vst [vmem:[#allocation2 + $0x98] sm:$0x1] %v1041_v29  ;;  %v1283_v34 = vrot.slane %v1282_v12, 4  ;;  %v747_v24 = vsel %vm6315_vm8, %v739_v4, %v746_v20 }
  0x3f   : > { %v1295_v36 = vshll.u32 %v1205_v11, 16  ;;  %v748_v37 = vrot.slane %v6418_v5, 4  ;;  %v6435_v38 = vrot.slane %v1549_v30, 5  ;;  %v1555_v40 = vrot.slane %v1553_v31, 4  ;;  %932 = vst.msk [vmem:[#allocation2 + $0xac] sm:$0xf] %vm832_vm0, %v747_v24  ;;  %2153 = vrot.lane.b32.xlu0 %v6122_v32, %s6218_s29 }
  0x40   : > { %v546_v41 = vshrl.u32 %v5671_v6, 16  ;;  %v549_v43 = vshll.u32 %v5671_v6, 16  ;;  %v1288_v45 = vsel %vm6309_vm7, %v1283_v34, %v6376_v18  ;;  %v554_v47 = vshrl.u32 %v5672_v7, 16  ;;  %v1010_v26 = vld [vmem:[#allocation2 + $0x20] sm:$0x1] }
  0x41   : > { %v1297_v46 = vrot.slane %v1295_v36, 5  ;;  %v557_v25 = vshll.u32 %v5672_v7, 16  ;;  %v1556_v48 = vor.u32 %v1555_v40, %v6435_v38  ;;  %v1044_v52 = vsel %vm6380_vm11, 0, %v1043_v44  ;;  %v1207_v2 = vld [vmem:[#allocation2 + $0x1c] sm:$0xf] }
  0x42   : > { %v548_v50 = vrot.slane %v546_v41, 7  ;;  %v1566_v53 = vrot.slane %v1564_v14, 4  ;;  %v6448_v56 = vrot.slane %v554_v47, 7  ;;  %1045 = vst [vmem:[#allocation2 + $0xa4] sm:$0x1] %v1044_v52  ;;  %v1569_v57 = vrot.slane %v1567_v15, 5 }
  0x43   : > { %v1298_v55 = vsel %vm6309_vm7, %v6395_v42, %v1297_v46  ;;  %v6450_v18 = vrot.slane %v1573_v9, 5  ;;  %v6452_v60 = vrot.slane %v1556_v48, 4  ;;  %v997_v61 = vld [vmem:[#allocation2 + $0xa8] sm:$0x1]  ;;  %v1206_v7 = vld [vmem:[#allocation2 + $0x18] sm:$0xf]  ;;  %v338_v14 = vmul.f32 %v5789_v22, %v6278_v1 }
  0x44   : > { %v5405_v35 = vcombine.low %v1288_v45, %v1298_v55  ;;  %v551_v49 = vor.u32 %v549_v43, %v548_v50  ;;  %v552_v63 = vrot.slane %v548_v50, 4  ;;  %v998_v3 = vsel %vm6342_vm10, 0, %v997_v61 }
  0x45   : > { %v559_v4 = vor.u32 %v557_v25, %v6448_v56  ;;  %v561_v42 = vrot.slane %v6448_v56, 4  ;;  %v1570_v6 = vor.u32 %v1569_v57, %v1566_v53  ;;  %v1236_v8 = vld [vmem:[#allocation2 + $0x90] sm:$0xf]  ;;  %v1238_v9 = vld [vmem:[#allocation2 + $0x98] sm:$0x1]  ;;  %v1577_v12 = vshrl.u32 %v6409_v58, 16 }
  0x46   : > { %1685 = vrot.lane.b32.xlu0 %v5405_v35, %s6218_s29  ;;  %999 = vst [vmem:[#allocation2 + $0xa8] sm:$0x1] %v998_v3  ;;  %v853_v11 = vsel %vm6321_vm9, %v551_v49, %v852_v51  ;;  %v1011_v13 = vsel %vm6380_vm11, 0, %v1010_v26  ;;  %v1540_v15 = vshrl.u32 %v1236_v8, 16  ;;  %v1543_v16 = vshll.u32 %v1236_v8, 16 }
  0x47   : > { %v1559_v17 = vshll.u32 %v1238_v9, 16  ;;  %v560_v19 = vsel %vm6315_vm8, %v552_v63, %v559_v4  ;;  %854 = vst [vmem:[#allocation2 + $0x24] sm:$0xf] %v853_v11  ;;  %1012 = vst [vmem:[#allocation2 + $0x20] sm:$0x1] %v1011_v13  ;;  %v1571_v20 = vrot.slane %v1570_v6, 4  ;;  %v339_v50 = vmul.f32 %v5790_v23, %v6278_v1 }
  0x48   : > { %855 = vst.msk [vmem:[#allocation2 + $0x28] sm:$0xf] %vm832_vm0, %v560_v19  ;;  %v1579_v28 = vrot.slane %v1577_v12, 4  ;;  %v1300_v29 = vshrl.u32 %v1206_v7, 16  ;;  %v1303_v30 = vshll.u32 %v1206_v7, 16  ;;  %v1542_v58 = vrot.slane %v1540_v15, 4 }
  0x49   : > { %v1545_v31 = vrot.slane %v1543_v16, 5  ;;  %v1561_v32 = vrot.slane %v1559_v17, 5  ;;  %v1309_v34 = vshll.u32 %v1207_v2, 16  ;;  %v1241_v36 = vld [vmem:[#allocation2 + $0xa4] sm:$0x1]  ;;  %v1576_v22 = vsel %vm6309_vm7, %v1571_v20, %v6450_v18 }
  0x4a   : > { %v1580_v24 = vor.u32 %v1579_v28, %v6450_v18  ;;  %v1302_v40 = vrot.slane %v1300_v29, 4  ;;  %v1305_v41 = vrot.slane %v1303_v30, 5  ;;  %v1583_v45 = vshll.u32 %v1241_v36, 16  ;;  %v933_v57 = vld [vmem:[#allocation2 + $0xb0] sm:$0x1] }
  0x4b   : > { %v1546_v43 = vor.u32 %v1545_v31, %v1542_v58  ;;  %v1562_v44 = vsel %vm6309_vm7, %v6452_v60, %v1561_v32  ;;  %v1311_v46 = vrot.slane %v1309_v34, 5  ;;  %v1313_v48 = vshrl.u32 %v1207_v2, 16  ;;  %v6494_v11 = vld [vmem:[#allocation2 + $0xac] sm:$0xf]  ;;  %v859_v56 = vld [vmem:[#allocation2 + $0x30] sm:$0xf] }
  0x4c   : > { %v1581_v47 = vrot.slane %v1580_v24, 4  ;;  %v1306_v25 = vor.u32 %v1305_v41, %v1302_v40  ;;  %v1585_v52 = vrot.slane %v1583_v45, 5  ;;  %v376_v53 = vadd.f32 %v6287_v10, %v338_v14  ;;  %v856_v17 = vld [vmem:[#allocation2 + $0x2c] sm:$0x1] }
  0x4d   : > { %v1547_v51 = vrot.slane %v1546_v43, 4  ;;  %v5746_v55 = vunpack.c.h.bf16 %v6416_v62  ;;  %v1315_v60 = vrot.slane %v1313_v48, 4  ;;  %v377_v61 = vadd.f32 %v6287_v10, %v339_v50  ;;  %v1242_v3 = vld [vmem:[#allocation2 + $0xa8] sm:$0xf] }
  0x4e   : > { %v964_v18 = vld [vmem:[#allocation2 + $0x24] sm:$0x1]  ;;  %v1208_v26 = vld [vmem:[#allocation2 + $0x20] sm:$0x1]  ;;  %v1307_v35 = vrot.slane %v1306_v25, 4  ;;  %v316_v49 = vmul.f32 %v5745_v27, %v6278_v1  ;;  %v1586_v63 = vsel %vm6309_vm7, %v1581_v47, %v1585_v52  ;;  %v408_v8 = vmax.f32 %v376_v53, 0.0 }
  0x4f   : > { %v1552_v39 = vsel %vm6309_vm7, %v1547_v51, %v6435_v38  ;;  %v965_v23 = vsel %vm6342_vm10, 0, %v964_v18  ;;  %v1319_v2 = vshll.u32 %v1208_v26, 16  ;;  %v5417_v6 = vcombine.low %v1576_v22, %v1586_v63  ;;  %v6123_v12 = vld [vmem:[#allocation2 + $0xa8] sm:$0xff]   ;;  %v936_v25 = vld [vmem:[#allocation2 + $0xb4] sm:$0xf] }
  0x50   : > { %v5416_v4 = vcombine.low %v1552_v39, %v1562_v44  ;;  %966 = vst [vmem:[#allocation2 + $0x24] sm:$0x1] %v965_v23  ;;  %v1312_v7 = vsel %vm6309_vm7, %v1307_v35, %v1311_v46  ;;  %v1316_v62 = vor.u32 %v1315_v60, %v1311_v46  ;;  %v409_v9 = vmax.f32 %v377_v61, 0.0  ;;  %v1210_v53 = vld [vmem:[#allocation2 + $0x28] sm:$0xf] }
  0x51   : > { %v1321_v27 = vrot.slane %v1319_v2, 5  ;;  %v317_v38 = vmul.f32 %v5746_v55, %v6278_v1  ;;  %v354_v14 = vadd.f32 %v6287_v10, %v316_v49  ;;  %v934_v15 = vsel %vm6342_vm10, %v748_v37, %v933_v57 }
  0x52   : > { %1707 = vrot.lane.b32.xlu1 %v5416_v4, %s6218_s29  ;;  %v1317_v13 = vrot.slane %v1316_v62, 4  ;;  %v1588_v16 = vshrl.u32 %v1242_v3, 16  ;;  %v5695_v19 = vpack.c.bf16 %v408_v8, %v408_v8  ;;  %v5696_v20 = vpack.c.bf16 %v409_v9, %v409_v9  ;;  %935 = vst [vmem:[#allocation2 + $0xb0] sm:$0x1] %v934_v15  ;;  %v5809_v4 = vld [vmem:[%s6273_s24 + $0x78] sm:$0xff]  }
  0x53   : > { %v355_v28 = vadd.f32 %v6287_v10, %v317_v38  ;;  %v1591_v29 = vshll.u32 %v1242_v3, 16  ;;  %v386_v58 = vmax.f32 %v354_v14, 0.0  ;;  %v1597_v32 = vshll.u32 %v6494_v11, 16 }
  0x54   : > { %v1322_v30 = vsel %vm6309_vm7, %v1317_v13, %v1321_v27  ;;  %v1590_v31 = vrot.slane %v1588_v16, 4  ;;  %v750_v5 = vshrl.u32 %v5695_v19, 16  ;;  %v753_v36 = vshll.u32 %v5695_v19, 16  ;;  %v5798_v27 = vld [vmem:[%s6273_s24 + $0x20] sm:$0xff]   ;;  %v940_v13 = vld [vmem:[#allocation2 + $0xbc] sm:$0x1] }
  0x55   : > { %v5406_v34 = vcombine.low %v1312_v7, %v1322_v30  ;;  %v758_v22 = vshrl.u32 %v5696_v20, 16  ;;  %v761_v37 = vshll.u32 %v5696_v20, 16  ;;  %v387_v24 = vmax.f32 %v355_v28, 0.0 }
  0x56   : > { %2177 = vrot.lane.b32.xlu1 %v6123_v12, %s6218_s29  ;;  %v5673_v40 = vpack.c.bf16 %v386_v58, %v386_v58  ;;  %v1593_v41 = vrot.slane %v1591_v29, 5  ;;  %v752_v44 = vrot.slane %v750_v5, 7  ;;  %v6509_v46 = vrot.slane %v1597_v32, 5 }
  0x57   : > { %v6124_v43 = vld [vmem:[#allocation2 + $0x24] sm:$0xff]   ;;  %v6507_v45 = vrot.slane %v758_v22, 7  ;;  %v857_v47 = vsel %vm6342_vm10, %v561_v42, %v856_v17  ;;  %v5674_v48 = vpack.c.bf16 %v387_v24, %v387_v24  ;;  %v1601_v3 = vshrl.u32 %v6494_v11, 16  ;;  %v863_v17 = vld [vmem:[#allocation2 + $0x38] sm:$0x1] }
  0x58   : > { %v563_v50 = vshrl.u32 %v5673_v40, 16  ;;  %v566_v51 = vshll.u32 %v5673_v40, 16  ;;  %v1594_v52 = vor.u32 %v1593_v41, %v1590_v31  ;;  %858 = vst [vmem:[#allocation2 + $0x2c] sm:$0x1] %v857_v47  ;;  %2155 = vrot.lane.b32.xlu0 %v6124_v43, %s6218_s29  ;;  %v755_v55 = vor.u32 %v753_v36, %v752_v44  ;;  %v1209_v35 = vld [vmem:[#allocation2 + $0x24] sm:$0xf] }
  0x59   : > { %v756_v57 = vrot.slane %v752_v44, 4  ;;  %v763_v18 = vor.u32 %v761_v37, %v6507_v45  ;;  %v765_v26 = vrot.slane %v6507_v45, 4  ;;  %v571_v60 = vshrl.u32 %v5674_v48, 16  ;;  %v1046_v49 = vld [vmem:[#allocation2 + $0xb0] sm:$0x1]  ;;  %v6543_v24 = vld [vmem:[%s6273_s24 + $0x28] sm:$0xff]  }
  0x5a   : > { %1709 = vrot.lane.b32.xlu1 %v5417_v6, %s6218_s29  ;;  %v565_v42 = vrot.slane %v563_v50, 7  ;;  %v574_v61 = vshll.u32 %v5674_v48, 16  ;;  %v6519_v39 = vrot.slane %v1594_v52, 4  ;;  %v937_v63 = vsel %vm6321_vm9, %v755_v55, %v936_v25 }
  0x5b   : > { %v764_v23 = vsel %vm6315_vm8, %v756_v57, %v763_v18  ;;  %v1047_v2 = vsel %vm6380_vm11, 0, %v1046_v49  ;;  %938 = vst [vmem:[#allocation2 + $0xb4] sm:$0xf] %v937_v63  ;;  %v573_v62 = vrot.slane %v571_v60, 7  ;;  %v1603_v8 = vrot.slane %v1601_v3, 4 }
  0x5c   : > { %939 = vst.msk [vmem:[#allocation2 + $0xb8] sm:$0xf] %vm832_vm0, %v764_v23  ;;  %v568_v6 = vor.u32 %v566_v51, %v565_v42  ;;  %v569_v7 = vrot.slane %v565_v42, 4  ;;  %1048 = vst [vmem:[#allocation2 + $0xb0] sm:$0x1] %v1047_v2  ;;  %1687 = vrot.lane.b32.xlu0 %v5406_v34, %s6218_s29  ;;  %v1324_v9 = vshrl.u32 %v1209_v35, 16  ;;  %v5793_v34 = vunpack.c.l.bf16 %v5809_v4 }
  0x5d   : > { %v1327_v38 = vshll.u32 %v1209_v35, 16  ;;  %v1333_v12 = vshll.u32 %v1210_v53, 16  ;;  %v576_v14 = vor.u32 %v574_v61, %v573_v62  ;;  %v578_v15 = vrot.slane %v573_v62, 4 }
  0x5e   : > { %v860_v11 = vsel %vm6321_vm9, %v568_v6, %v859_v56  ;;  %v1337_v16 = vshrl.u32 %v1210_v53, 16  ;;  %v1604_v19 = vor.u32 %v1603_v8, %v6509_v46  ;;  %v1326_v28 = vrot.slane %v1324_v9, 4 }
  0x5f   : > { %861 = vst [vmem:[#allocation2 + $0x30] sm:$0xf] %v860_v11  ;;  %v1013_v20 = vld [vmem:[#allocation2 + $0x2c] sm:$0x1]  ;;  %v1329_v29 = vrot.slane %v1327_v38, 5  ;;  %v6535_v30 = vrot.slane %v1333_v12, 5  ;;  %v577_v58 = vsel %vm6315_vm8, %v569_v7, %v576_v14  ;;  %v5794_v22 = vunpack.c.h.bf16 %v5809_v4 }
  0x60   : > { %v1014_v31 = vsel %vm6380_vm11, 0, %v1013_v20  ;;  %v1339_v32 = vrot.slane %v1337_v16, 4  ;;  %862 = vst.msk [vmem:[#allocation2 + $0x34] sm:$0xf] %vm832_vm0, %v577_v58  ;;  %v1605_v5 = vrot.slane %v1604_v19, 4  ;;  %v5749_v37 = vunpack.c.l.bf16 %v5798_v27 }
  0x61   : > { %1015 = vst [vmem:[#allocation2 + $0x2c] sm:$0x1] %v1014_v31  ;;  %v1330_v36 = vor.u32 %v1329_v29, %v1326_v28  ;;  %v340_v41 = vmul.f32 %v5793_v34, %v6278_v1  ;;  %v5750_v43 = vunpack.c.h.bf16 %v5798_v27  ;;  %v941_v44 = vsel %vm6342_vm10, %v765_v26, %v940_v13 }
  0x62   : > { %v1340_v40 = vor.u32 %v1339_v32, %v6535_v30  ;;  %v1000_v45 = vld [vmem:[#allocation2 + $0xb4] sm:$0x1]  ;;  %v1600_v25 = vsel %vm6309_vm7, %v6519_v39, %v6509_v46  ;;  %v341_v48 = vmul.f32 %v5794_v22, %v6278_v1  ;;  %v318_v50 = vmul.f32 %v5749_v37, %v6278_v1  ;;  %942 = vst [vmem:[#allocation2 + $0xbc] sm:$0x1] %v941_v44  ;;  %v866_v44 = vld [vmem:[#allocation2 + $0x3c] sm:$0xf] }
  0x63   : > { %v1244_v47 = vld [vmem:[#allocation2 + $0xb0] sm:$0x1]  ;;  %v864_v51 = vsel %vm6342_vm10, %v578_v15, %v863_v17  ;;  %v1001_v52 = vsel %vm6342_vm10, 0, %v1000_v45  ;;  %v1331_v55 = vrot.slane %v1330_v36, 4  ;;  %v1246_v57 = vld [vmem:[#allocation2 + $0xb8] sm:$0xf]  ;;  %v5753_v18 = vunpack.c.l.bf16 %v6543_v24 }
  0x64   : > { %v1607_v53 = vshll.u32 %v1244_v47, 16  ;;  %865 = vst [vmem:[#allocation2 + $0x38] sm:$0x1] %v864_v51  ;;  %1002 = vst [vmem:[#allocation2 + $0xb4] sm:$0x1] %v1001_v52  ;;  %v378_v46 = vadd.f32 %v6287_v10, %v340_v41  ;;  %v379_v26 = vadd.f32 %v6287_v10, %v341_v48  ;;  %v319_v56 = vmul.f32 %v5750_v43, %v6278_v1 }
  0x65   : > { %v356_v35 = vadd.f32 %v6287_v10, %v318_v50  ;;  %v1341_v61 = vrot.slane %v1340_v40, 4  ;;  %v1621_v49 = vshll.u32 %v1246_v57, 16  ;;  %v1625_v39 = vshrl.u32 %v1246_v57, 16 }
  0x66   : > { %v967_v42 = vld [vmem:[#allocation2 + $0x30] sm:$0x1]  ;;  %v1609_v60 = vrot.slane %v1607_v53, 5  ;;  %v410_v63 = vmax.f32 %v378_v46, 0.0  ;;  %v411_v2 = vmax.f32 %v379_v26, 0.0  ;;  %v357_v3 = vadd.f32 %v6287_v10, %v319_v56 }
  0x67   : > { %v968_v23 = vsel %vm6342_vm10, 0, %v967_v42  ;;  %v1336_v1 = vsel %vm6309_vm7, %v1331_v55, %v6535_v30  ;;  %v388_v7 = vmax.f32 %v356_v35, 0.0  ;;  %v6572_v62 = vrot.slane %v1621_v49, 5  ;;  %v6575_v20 = vld [vmem:[#allocation2 + $0x34] sm:$0xf] }
  0x68   : > { %969 = vst [vmem:[#allocation2 + $0x30] sm:$0x1] %v968_v23  ;;  %v1610_v4 = vsel %vm6309_vm7, %v1605_v5, %v1609_v60  ;;  %v1211_v6 = vld [vmem:[#allocation2 + $0x2c] sm:$0x1]  ;;  %v5697_v8 = vpack.c.bf16 %v410_v63, %v410_v63  ;;  %v5698_v9 = vpack.c.bf16 %v411_v2, %v411_v2  ;;  %v5754_v38 = vunpack.c.h.bf16 %v6543_v24  ;;  %v943_v30 = vld [vmem:[#allocation2 + $0xc0] sm:$0xf] }
  0x69   : > { %v1343_v27 = vshll.u32 %v1211_v6, 16  ;;  %v5418_v12 = vcombine.low %v1600_v25, %v1610_v4  ;;  %v389_v13 = vmax.f32 %v357_v3, 0.0  ;;  %v5675_v10 = vpack.c.bf16 %v388_v7, %v388_v7  ;;  %v1049_v14 = vld [vmem:[#allocation2 + $0xbc] sm:$0x1]  ;;  %v3192_v63 = vld [vmem:[#allocation2 + $0x18] sm:$0xf] }
  0x6a   : > { %v1627_v15 = vrot.slane %v1625_v39, 4  ;;  %v767_v16 = vshrl.u32 %v5697_v8, 16  ;;  %v770_v17 = vshll.u32 %v5697_v8, 16  ;;  %v775_v19 = vshrl.u32 %v5698_v9, 16  ;;  %v6136_v24 = vld [vmem:[%s8021_s3 + $0x40] sm:$0xff]  }
  0x6b   : > { %v1345_v11 = vrot.slane %v1343_v27, 5  ;;  %v6125_v28 = vld [vmem:[#allocation2 + $0xb4] sm:$0xff]   ;;  %v778_v29 = vshll.u32 %v5698_v9, 16  ;;  %v5676_v58 = vpack.c.bf16 %v389_v13, %v389_v13  ;;  %v580_v31 = vshrl.u32 %v5675_v10, 16  ;;  %5810 = vmatprep.subr.bf16.mxu0 %v6136_v24  ;;  %6094 = vmatprep.subr.bf16.mxu1 %v6136_v24  ;;  %v3197_v24 = vld [vmem:[#allocation2 + $0x2c] sm:$0x1] }
  0x6c   : > { %v583_v32 = vshll.u32 %v5675_v10, 16  ;;  %v769_v5 = vrot.slane %v767_v16, 7  ;;  %v6579_v36 = vrot.slane %v775_v19, 7  ;;  %v1050_v22 = vsel %vm6380_vm11, 0, %v1049_v14  ;;  %v1245_v37 = vld [vmem:[#allocation2 + $0xb4] sm:$0xf]  ;;  %2179 = vrot.lane.b32.xlu1 %v6125_v28, %s6218_s29 }
  0x6d   : > { %v1346_v34 = vsel %vm6309_vm7, %v1341_v61, %v1345_v11  ;;  %v582_v40 = vrot.slane %v580_v31, 7  ;;  %v588_v41 = vshrl.u32 %v5676_v58, 16  ;;  %v591_v43 = vshll.u32 %v5676_v58, 16  ;;  %1051 = vst [vmem:[#allocation2 + $0xbc] sm:$0x1] %v1050_v22 }
  0x6e   : > { %v1357_v45 = vshll.u32 %v6575_v20, 16  ;;  %v5407_v25 = vcombine.low %v1336_v1, %v1346_v34  ;;  %v772_v48 = vor.u32 %v770_v17, %v769_v5  ;;  %v773_v50 = vrot.slane %v769_v5, 4  ;;  %v1016_v52 = vld [vmem:[#allocation2 + $0x38] sm:$0x1]  ;;  %v3193_v1 = vld [vmem:[#allocation2 + $0x1c] sm:$0xf] }
  0x6f   : > { %v6126_v47 = vld [vmem:[#allocation2 + $0x30] sm:$0xff]   ;;  %v780_v51 = vor.u32 %v778_v29, %v6579_v36  ;;  %v585_v53 = vor.u32 %v583_v32, %v582_v40  ;;  %v586_v55 = vrot.slane %v582_v40, 4  ;;  %v6586_v57 = vrot.slane %v588_v41, 7 }
  0x70   : > { %v1612_v46 = vshrl.u32 %v1245_v37, 16  ;;  %v1212_v26 = vld [vmem:[#allocation2 + $0x30] sm:$0xf]  ;;  %2157 = vrot.lane.b32.xlu0 %v6126_v47, %s6218_s29  ;;  %v944_v35 = vsel %vm6321_vm9, %v772_v48, %v943_v30  ;;  %v1615_v42 = vshll.u32 %v1245_v37, 16  ;;  %v1628_v60 = vor.u32 %v1627_v15, %v6572_v62  ;;  %1711 = vrot.lane.b32.xlu1 %v5418_v12, %s6218_s29  ;;  %v3194_v12 = vld [vmem:[#allocation2 + $0x20] sm:$0x1] }
  0x71   : > { %v781_v56 = vsel %vm6315_vm8, %v773_v50, %v780_v51  ;;  %945 = vst [vmem:[#allocation2 + $0xc0] sm:$0xf] %v944_v35  ;;  %v593_v61 = vor.u32 %v591_v43, %v6586_v57  ;;  %v595_v49 = vrot.slane %v6586_v57, 4  ;;  %v867_v39 = vsel %vm6321_vm9, %v585_v53, %v866_v44  ;;  %v2727_v44 = vld [vmem:[#allocation2 + $0xc] sm:$0xe] }
  0x72   : > { %946 = vst.msk [vmem:[#allocation2 + $0xc4] sm:$0xf] %vm832_vm0, %v781_v56  ;;  %v1614_v23 = vrot.slane %v1612_v46, 4  ;;  %868 = vst [vmem:[#allocation2 + $0x3c] sm:$0xf] %v867_v39  ;;  %v1617_v2 = vrot.slane %v1615_v42, 5 }
  0x73   : > { %v1629_v3 = vrot.slane %v1628_v60, 4  ;;  %v1017_v4 = vsel %vm6380_vm11, 0, %v1016_v52  ;;  %v1348_v6 = vshrl.u32 %v1212_v26, 16  ;;  %v594_v7 = vsel %vm6315_vm8, %v586_v55, %v593_v61  ;;  %v2728_v46 = vld [vmem:[#allocation2 + $0x10] sm:$0xf]  ;;  %v6139_v57 = vld [vmem:[%s8021_s3 + $0x8] sm:$0xff]  }
  0x74   : > { %1018 = vst [vmem:[#allocation2 + $0x38] sm:$0x1] %v1017_v4  ;;  %v1351_v27 = vshll.u32 %v1212_v26, 16  ;;  %v6604_v8 = vrot.slane %v1357_v45, 5  ;;  %v1361_v9 = vshrl.u32 %v6575_v20, 16  ;;  %1689 = vrot.lane.b32.xlu0 %v5407_v25, %s6218_s29  ;;  %v1618_v10 = vor.u32 %v1617_v2, %v1614_v23 }
  0x75   : > { %869 = vst.msk [vmem:[#allocation2 + $0x40] sm:$0xf] %vm832_vm0, %v594_v7  ;;  %v1247_v13 = vld [vmem:[#allocation2 + $0xbc] sm:$0x1]  ;;  %v1350_v14 = vrot.slane %v1348_v6, 4  ;;  %v3241_v15 = vshrl.u32 %v3192_v63, 16 }
  0x76   : > { %v3244_v11 = vshll.u32 %v3192_v63, 16  ;;  %v1631_v16 = vshll.u32 %v1247_v13, 16  ;;  %v1353_v17 = vrot.slane %v1351_v27, 5  ;;  %v1363_v19 = vrot.slane %v1361_v9, 4  ;;  %v6627_v42 = vld [vmem:[%s8019_s1] ss:$0 sm:$0xff] }
  0x77   : > { %v3250_v28 = vshll.u32 %v3193_v1, 16  ;;  %v1619_v29 = vrot.slane %v1618_v10, 4  ;;  %v3243_v30 = vrot.slane %v3241_v15, 4  ;;  %v3254_v31 = vshrl.u32 %v3193_v1, 16  ;;  %v2729_v61 = vld [vmem:[#allocation2 + $0x14] sm:$0x1] }
  0x78   : > { %v3246_v58 = vrot.slane %v3244_v11, 5  ;;  %v1633_v32 = vrot.slane %v1631_v16, 5  ;;  %v1354_v20 = vor.u32 %v1353_v17, %v1350_v14  ;;  %v1364_v34 = vor.u32 %v1363_v19, %v6604_v8  ;;  %v1003_v22 = vld [vmem:[#allocation2 + $0xc0] sm:$0x1]  ;;  %v870_v2 = vld [vmem:[#allocation2 + $0x44] sm:$0x1] }
  0x79   : > { %v3252_v5 = vrot.slane %v3250_v28, 5  ;;  %v1624_v37 = vsel %vm6309_vm7, %v1619_v29, %v6572_v62  ;;  %v3256_v41 = vrot.slane %v3254_v31, 4  ;;  %v3260_v43 = vshll.u32 %v3194_v12, 16  ;;  %v970_v47 = vld [vmem:[#allocation2 + $0x3c] sm:$0x1]  ;;  %v6137_v13 = vld [vmem:[%s8021_s3] sm:$0xff]  }
  0x7a   : > { %v3247_v40 = vor.u32 %v3246_v58, %v3243_v30  ;;  %v1004_v45 = vsel %vm6342_vm10, 0, %v1003_v22  ;;  %v1634_v25 = vsel %vm6309_vm7, %v1629_v3, %v1633_v32  ;;  %v1355_v48 = vrot.slane %v1354_v20, 4  ;;  %v6640_v4 = vld [vmem:[%s8020_s2] ss:$0 sm:$0xff]  ;;  %v3195_v1 = vld [vmem:[#allocation2 + $0x24] sm:$0xf]  ;;  %5811 = vmatpush3.bf16.msra.mxu0 %v6137_v13  ;;  %6102 = vmatpush3.bf16.msra.mxu1 %v6137_v13 }
  0x7b   : > { %v1365_v50 = vrot.slane %v1364_v34, 4  ;;  %1005 = vst [vmem:[#allocation2 + $0xc0] sm:$0x1] %v1004_v45  ;;  %v971_v51 = vsel %vm6342_vm10, 0, %v970_v47  ;;  %v6619_v52 = vcombine.low %v1624_v37, %v1634_v25  ;;  %v1214_v62 = vld [vmem:[#allocation2 + $0x38] sm:$0x1]  ;;  %v3257_v55 = vor.u32 %v3256_v41, %v3252_v5 }
  0x7c   : > { %v3248_v53 = vrot.slane %v3247_v40, 4  ;;  %972 = vst [vmem:[#allocation2 + $0x3c] sm:$0x1] %v971_v51  ;;  %v1360_v26 = vsel %vm6309_vm7, %v1355_v48, %v6604_v8  ;;  %v1367_v56 = vshll.u32 %v1214_v62, 16  ;;  %v3262_v35 = vrot.slane %v3260_v43, 5  ;;  %v6665_v16 = vld [vmem:[%s6273_s24 + $0x30] sm:$0xff]  }
  0x7d   : > { %v320_v60 = vmul.f32 %v6627_v42, %v5753_v18  ;;  %v3258_v23 = vrot.slane %v3257_v55, 4  ;;  %v321_v63 = vmul.f32 %v6627_v42, %v5754_v38  ;;  %v5484_v18 = vrot.slane %v2727_v44, 9  ;;  %v1216_v12 = vld [vmem:[#allocation2 + $0x40] sm:$0xf]  ;;  %v6138_v17 = vld [vmem:[%s8021_s3 + $0x48] sm:$0xff]   ;;  %v6141_v55 = vld [vmem:[%s8021_s3 + $0x10] sm:$0xff]  }
  0x7e   : > { %v3253_v39 = vsel %vm6309_vm7, %v3248_v53, %v3252_v5  ;;  %v1369_v3 = vrot.slane %v1367_v56, 5  ;;  %v2825_v8 = vrot.slane %v2728_v46, 5  ;;  %v2828_v9 = vrot.slane %v2729_v61, 5  ;;  %5812 = vmatprep.subr.bf16.mxu0 %v6138_v17  ;;  %6095 = vmatprep.subr.bf16.mxu1 %v6138_v17  ;;  %v3196_v48 = vld [vmem:[#allocation2 + $0x28] sm:$0xf] }
  0x7f   : > { %v358_v6 = vadd.f32 %v6640_v4, %v320_v60  ;;  %v3263_v38 = vsel %vm6309_vm7, %v3258_v23, %v3262_v35  ;;  %v359_v7 = vadd.f32 %v6640_v4, %v321_v63  ;;  %v871_v11 = vsel %vm6342_vm10, %v595_v49, %v870_v2  ;;  %v6140_v49 = vld [vmem:[%s8021_s3 + $0x50] sm:$0xff]   ;;  %5813 = vmatpush3.bf16.msra.mxu0 %v6139_v57  ;;  %v6142_v60 = vld [vmem:[%s8021_s3 + $0x58] sm:$0xff]  }
  0x80   : > { %v1370_v10 = vsel %vm6309_vm7, %v1365_v50, %v1369_v3  ;;  %v6658_v14 = vcombine.low %v3253_v39, %v3263_v38  ;;  %v6672_v29 = vsel %vm6649_vm14, %v5484_v18, %v2825_v8  ;;  %v2827_v30 = vrot.slane %v2825_v8, 4  ;;  %872 = vst [vmem:[#allocation2 + $0x44] sm:$0x1] %v871_v11  ;;  %5814 = vmatprep.subr.bf16.mxu0 %v6140_v49  ;;  %v873_v39 = vld [vmem:[#allocation2 + $0x48] sm:$0xf] }
  0x81   : > { %v390_v15 = vmax.f32 %v358_v6, 0.0  ;;  %v5408_v19 = vcombine.low %v1360_v26, %v1370_v10  ;;  %v391_v28 = vmax.f32 %v359_v7, 0.0  ;;  %v1381_v32 = vshll.u32 %v1216_v12, 16  ;;  %6103 = vmatpush3.bf16.msra.mxu1 %v6139_v57  ;;  %v2730_v13 = vld [vmem:[#allocation2 + $0x18] sm:$0xe] }
  0x82   : > { %v6127_v58 = vld [vmem:[#allocation2 + $0xc0] sm:$0xff]   ;;  %v1385_v20 = vshrl.u32 %v1216_v12, 16  ;;  %v3265_v34 = vshrl.u32 %v3195_v1, 16  ;;  %v6682_v37 = vsel %vm6649_vm14, %v2827_v30, %v2828_v9  ;;  %v3268_v41 = vshll.u32 %v3195_v1, 16  ;;  %6096 = vmatprep.subr.bf16.mxu1 %v6140_v49 }
  0x83   : > { %v5677_v31 = vpack.c.bf16 %v390_v15, %v390_v15  ;;  %v6128_v5 = vld [vmem:[#allocation2 + $0x3c] sm:$0xff]   ;;  %v5678_v22 = vpack.c.bf16 %v391_v28, %v391_v28  ;;  %v5757_v43 = vunpack.c.l.bf16 %v6665_v16  ;;  %2181 = vrot.lane.b32.xlu1 %v6127_v58, %s6218_s29  ;;  %v5500_v47 = vcombine.low %v6672_v29, %v6682_v37  ;;  %5815 = vmatpush3.bf16.msra.mxu0 %v6141_v55  ;;  %v6147_v37 = vld [vmem:[%s8021_s3 + $0x28] sm:$0xff]  }
  0x84   : > { %v1215_v40 = vld [vmem:[#allocation2 + $0x3c] sm:$0xf]  ;;  %2159 = vrot.lane.b32.xlu0 %v6128_v5, %s6218_s29  ;;  %v6689_v53 = vrot.slane %v1381_v32, 5  ;;  %v1387_v56 = vrot.slane %v1385_v20, 4  ;;  %v3267_v35 = vrot.slane %v3265_v34, 4  ;;  %v3270_v63 = vrot.slane %v3268_v41, 5  ;;  %5816 = vmatprep.subr.bf16.mxu0 %v6142_v60 }
  0x85   : > { %v597_v44 = vshrl.u32 %v5677_v31, 16  ;;  %v600_v45 = vshll.u32 %v5677_v31, 16  ;;  %v1372_v25 = vshrl.u32 %v1215_v40, 16  ;;  %v605_v50 = vshrl.u32 %v5678_v22, 16  ;;  %6104 = vmatpush3.bf16.msra.mxu1 %v6141_v55  ;;  %v6144_v28 = vld [vmem:[%s8021_s3 + $0x60] sm:$0xff]  }
  0x86   : > { %v608_v51 = vshll.u32 %v5678_v22, 16  ;;  %v1375_v62 = vshll.u32 %v1215_v40, 16  ;;  %v3274_v2 = vshll.u32 %v3196_v48, 16  ;;  %v1388_v1 = vor.u32 %v1387_v56, %v6689_v53  ;;  %v2732_v31 = vld [vmem:[#allocation2 + $0x20] sm:$0x1]  ;;  %6097 = vmatprep.subr.bf16.mxu1 %v6142_v60 }
  0x87   : > { %v599_v46 = vrot.slane %v597_v44, 7  ;;  %v1374_v26 = vrot.slane %v1372_v25, 4  ;;  %v6697_v61 = vrot.slane %v605_v50, 7  ;;  %1713 = vrot.lane.b32.xlu1 %v6619_v52, %s6218_s29  ;;  %v1019_v18 = vld [vmem:[#allocation2 + $0x44] sm:$0x1]  ;;  %v3278_v38 = vshrl.u32 %v3196_v48, 16 }
  0x88   : > { %v1377_v23 = vrot.slane %v1375_v62, 5  ;;  %1691 = vrot.lane.b32.xlu0 %v5408_v19, %s6218_s29  ;;  %v1020_v9 = vsel %vm6380_vm11, 0, %v1019_v18  ;;  %v6143_v52 = vld [vmem:[%s8021_s3 + $0x18] sm:$0xff]   ;;  %v6712_v15 = vrot.slane %v1388_v1, 4  ;;  %v3271_v11 = vor.u32 %v3270_v63, %v3267_v35  ;;  %v877_v22 = vld [vmem:[#allocation2 + $0x50] sm:$0x1] }
  0x89   : > { %v602_v3 = vor.u32 %v600_v45, %v599_v46  ;;  %v603_v6 = vrot.slane %v599_v46, 4  ;;  %v610_v7 = vor.u32 %v608_v51, %v6697_v61  ;;  %v612_v8 = vrot.slane %v6697_v61, 4  ;;  %1021 = vst [vmem:[#allocation2 + $0x44] sm:$0x1] %v1020_v9  ;;  %v2731_v19 = vld [vmem:[#allocation2 + $0x1c] sm:$0xf]  ;;  %5817 = vmatpush3.bf16.msra.mxu0 %v6143_v52  ;;  %6105 = vmatpush3.bf16.msra.mxu1 %v6143_v52 }
  0x8a   : > { %v1378_v12 = vor.u32 %v1377_v23, %v1374_v26  ;;  %v3276_v17 = vrot.slane %v3274_v2, 5  ;;  %v3280_v49 = vrot.slane %v3278_v38, 4  ;;  %v3284_v58 = vshll.u32 %v3197_v24, 16  ;;  %v3198_v25 = vld [vmem:[#allocation2 + $0x30] sm:$0xf]  ;;  %5818 = vmatprep.subr.bf16.mxu0 %v6144_v28  ;;  %v6146_v62 = vld [vmem:[%s8021_s3 + $0x68] sm:$0xff]   ;;  %6098 = vmatprep.subr.bf16.mxu1 %v6144_v28 }
  0x8b   : > { %v874_v10 = vsel %vm6321_vm9, %v602_v3, %v873_v39  ;;  %v611_v30 = vsel %vm6315_vm8, %v603_v6, %v610_v7  ;;  %3672 = vrot.lane.b32.xlu1 %v6658_v14, %s6218_s29  ;;  %v3272_v32 = vrot.slane %v3271_v11, 4  ;;  %v5758_v20 = vunpack.c.h.bf16 %v6665_v16  ;;  %v6145_v14 = vld [vmem:[%s8021_s3 + $0x20] sm:$0xff]   ;;  %v6737_v51 = vld [vmem:[#allocation2 + $0x34] sm:$0xf]  ;;  %v6752_v23 = vld [vmem:[%s6273_s24 + $0x38] sm:$0xff]  }
  0x8c   : > { %875 = vst [vmem:[#allocation2 + $0x48] sm:$0xf] %v874_v10  ;;  %v6719_v57 = vrot.slane %v1378_v12, 4  ;;  %876 = vst.msk [vmem:[#allocation2 + $0x4c] sm:$0xf] %vm832_vm0, %v611_v30  ;;  %v322_v34 = vmul.f32 %v6627_v42, %v5757_v43  ;;  %v5485_v5 = vrot.slane %v2730_v13, 9  ;;  %v3281_v41 = vor.u32 %v3280_v49, %v3276_v17 }
  0x8d   : > { %v3286_v44 = vrot.slane %v3284_v58, 5  ;;  %v2832_v45 = vrot.slane %v2731_v19, 5  ;;  %v3277_v16 = vsel %vm6309_vm7, %v3272_v32, %v3276_v17  ;;  %v323_v43 = vmul.f32 %v6627_v42, %v5758_v20  ;;  %5819 = vmatpush3.bf16.msra.mxu0 %v6145_v14  ;;  %6106 = vmatpush3.bf16.msra.mxu1 %v6145_v14  ;;  %v6149_v7 = vld [vmem:[%s8021_s3 + $0x70] sm:$0xff]  }
  0x8e   : > { %v1384_v40 = vsel %vm6309_vm7, %v6719_v57, %v6689_v53  ;;  %v360_v48 = vadd.f32 %v6640_v4, %v322_v34  ;;  %v2835_v50 = vrot.slane %v2732_v31, 5  ;;  %v3282_v55 = vrot.slane %v3281_v41, 4  ;;  %5820 = vmatprep.subr.bf16.mxu0 %v6146_v62  ;;  %6099 = vmatprep.subr.bf16.mxu1 %v6146_v62  ;;  %v6150_v31 = vld [vmem:[%s8021_s3 + $0x30] sm:$0xff]   ;;  %v6151_v41 = vld [vmem:[%s8021_s3 + $0x78] sm:$0xff]   ;;  %v2733_v62 = vld [vmem:[#allocation2 + $0x24] sm:$0xe] }
  0x8f   : > { %v2833_v46 = vsel %vm6649_vm14, %v5485_v5, %v2832_v45  ;;  %v2834_v26 = vrot.slane %v2832_v45, 4  ;;  %v878_v56 = vsel %vm6342_vm10, %v612_v8, %v877_v22  ;;  %2983 = vrot.lane.b32.xlu1 %v5500_v47, %s6218_s29  ;;  %v361_v35 = vadd.f32 %v6640_v4, %v323_v43  ;;  %v3200_v22 = vld [vmem:[#allocation2 + $0x38] sm:$0x1]  ;;  %v880_v45 = vld [vmem:[#allocation2 + $0x54] sm:$0xf] }
  0x90   : > { %v392_v60 = vmax.f32 %v360_v48, 0.0  ;;  %879 = vst [vmem:[#allocation2 + $0x50] sm:$0x1] %v878_v56  ;;  %v3289_v61 = vshrl.u32 %v3198_v25, 16  ;;  %v3292_v39 = vshll.u32 %v3198_v25, 16  ;;  %v3287_v2 = vsel %vm6309_vm7, %v3282_v55, %v3286_v44 }
  0x91   : > { %v1217_v63 = vld [vmem:[#allocation2 + $0x44] sm:$0x1]  ;;  %v2836_v3 = vsel %vm6649_vm14, %v2834_v26, %v2835_v50  ;;  %v3298_v6 = vshll.u32 %v6737_v51, 16  ;;  %v3302_v29 = vshrl.u32 %v6737_v51, 16  ;;  %v5533_v1 = vcombine.low %v3277_v16, %v3287_v2  ;;  %5821 = vmatpush3.bf16.msra.mxu0 %v6147_v37  ;;  %6107 = vmatpush3.bf16.msra.mxu1 %v6147_v37  ;;  %v6152_v26 = vld [vmem:[%s8021_s3 + $0x38] sm:$0xff]  }
  0x92   : > { %v1391_v18 = vshll.u32 %v1217_v63, 16  ;;  %v393_v24 = vmax.f32 %v361_v35, 0.0  ;;  %v5679_v38 = vpack.c.bf16 %v392_v60, %v392_v60  ;;  %v5501_v9 = vcombine.low %v2833_v46, %v2836_v3  ;;  %5822 = vmatprep.subr.bf16.mxu0 %v6149_v7  ;;  %6100 = vmatprep.subr.bf16.mxu1 %v6149_v7  ;;  %v2734_v46 = vld [vmem:[#allocation2 + $0x28] sm:$0xf]  ;;  %v6155_v63 = vld [vmem:[%s8021_s3 + $0xc0] sm:$0xff]  }
  0x93   : > { %v973_v47 = vld [vmem:[#allocation2 + $0x48] sm:$0x1]  ;;  %v1219_v12 = vld [vmem:[#allocation2 + $0x4c] sm:$0xf]  ;;  %v3291_v13 = vrot.slane %v3289_v61, 4  ;;  %v5761_v52 = vunpack.c.l.bf16 %v6752_v23  ;;  %3674 = vrot.lane.b32.xlu1 %v5533_v1, %s6218_s29  ;;  %v3294_v49 = vrot.slane %v3292_v39, 5  ;;  %v5762_v61 = vunpack.c.h.bf16 %v6752_v23 }
  0x94   : > { %v974_v8 = vsel %vm6342_vm10, 0, %v973_v47  ;;  %v1393_v10 = vrot.slane %v1391_v18, 5  ;;  %v5680_v11 = vpack.c.bf16 %v393_v24, %v393_v24  ;;  %v614_v17 = vshrl.u32 %v5679_v38, 16  ;;  %v2735_v39 = vld [vmem:[#allocation2 + $0x2c] sm:$0x1]  ;;  %v6156_v2 = vld [vmem:[%s8021_s3 + $0x100] sm:$0xff]  }
  0x95   : > { %975 = vst [vmem:[#allocation2 + $0x48] sm:$0x1] %v974_v8  ;;  %v617_v19 = vshll.u32 %v5679_v38, 16  ;;  %v1405_v28 = vshll.u32 %v1219_v12, 16  ;;  %v1409_v30 = vshrl.u32 %v1219_v12, 16  ;;  %v6770_v58 = vrot.slane %v3298_v6, 5  ;;  %5823 = vmatpush3.bf16.msra.mxu0 %v6150_v31  ;;  %6108 = vmatpush3.bf16.msra.mxu1 %v6150_v31 }
  0x96   : > { %v1394_v32 = vsel %vm6309_vm7, %v6712_v15, %v1393_v10  ;;  %v616_v20 = vrot.slane %v614_v17, 7  ;;  %v622_v34 = vshrl.u32 %v5680_v11, 16  ;;  %v625_v5 = vshll.u32 %v5680_v11, 16  ;;  %5824 = vmatprep.subr.bf16.mxu0 %v6151_v41  ;;  %6101 = vmatprep.subr.bf16.mxu1 %v6151_v41  ;;  %v884_v7 = vld [vmem:[#allocation2 + $0x5c] sm:$0x1] }
  0x97   : > { %v6786_v44 = vcombine.low %v1384_v40, %v1394_v32  ;;  %v1022_v25 = vld [vmem:[#allocation2 + $0x50] sm:$0x1]  ;;  %v6788_v15 = vrot.slane %v1405_v28, 5  ;;  %v1411_v14 = vrot.slane %v1409_v30, 4  ;;  %v3295_v16 = vor.u32 %v3294_v49, %v3291_v13  ;;  %2985 = vrot.lane.b32.xlu1 %v5501_v9, %s6218_s29  ;;  %v6824_v31 = vld [vmem:[#allocation2 + $0x40] sm:$0xf] }
  0x98   : > { %v619_v43 = vor.u32 %v617_v19, %v616_v20  ;;  %v620_v48 = vrot.slane %v616_v20, 4  ;;  %v624_v50 = vrot.slane %v622_v34, 7  ;;  %v1023_v51 = vsel %vm6380_vm11, 0, %v1022_v25  ;;  %v3201_v19 = vld [vmem:[#allocation2 + $0x3c] sm:$0xf] }
  0x99   : > { %1024 = vst [vmem:[#allocation2 + $0x50] sm:$0x1] %v1023_v51  ;;  %v1412_v53 = vor.u32 %v1411_v14, %v6788_v15  ;;  %v3296_v57 = vrot.slane %v3295_v16, 4  ;;  %v3304_v40 = vrot.slane %v3302_v29, 4  ;;  %v3308_v55 = vshll.u32 %v3200_v22, 16  ;;  %5825 = vmatpush3.bf16.msra.mxu0 %v6152_v26  ;;  %6109 = vmatpush3.bf16.msra.mxu1 %v6152_v26 }
  0x9a   : > { %v627_v56 = vor.u32 %v625_v5, %v624_v50  ;;  %v629_v35 = vrot.slane %v624_v50, 4  ;;  %v881_v60 = vsel %vm6321_vm9, %v619_v43, %v880_v45  ;;  %v324_v47 = vmul.f32 %v6627_v42, %v5761_v52  ;;  %6054 = vmatprep.subr.bf16.mxu0 %v6156_v2  ;;  %5922 = vmatprep.subr.bf16.mxu1 %v6155_v63  ;;  %v887_v63 = vld [vmem:[#allocation2 + $0x60] sm:$0xf] }
  0x9b   : > { %882 = vst [vmem:[#allocation2 + $0x54] sm:$0xf] %v881_v60  ;;  %v6806_v29 = vrot.slane %v1412_v53, 4  ;;  %v3301_v23 = vsel %vm6309_vm7, %v3296_v57, %v6770_v58  ;;  %v3305_v37 = vor.u32 %v3304_v40, %v6770_v58  ;;  %v3310_v38 = vrot.slane %v3308_v55, 5 }
  0x9c   : > { %v6129_v3 = vld [vmem:[#allocation2 + $0x48] sm:$0xff]   ;;  %v628_v18 = vsel %vm6315_vm8, %v620_v48, %v627_v56  ;;  %v325_v9 = vmul.f32 %v6627_v42, %v5762_v61  ;;  %v362_v12 = vadd.f32 %v6640_v4, %v324_v47  ;;  %v5486_v13 = vrot.slane %v2733_v62, 9 }
  0x9d   : > { %v1218_v6 = vld [vmem:[#allocation2 + $0x48] sm:$0xf]  ;;  %2161 = vrot.lane.b32.xlu0 %v6129_v3, %s6218_s29  ;;  %883 = vst.msk [vmem:[#allocation2 + $0x58] sm:$0xf] %vm832_vm0, %v628_v18  ;;  %v3306_v8 = vrot.slane %v3305_v37, 4  ;;  %v2839_v11 = vrot.slane %v2734_v46, 5  ;;  %v885_v58 = vsel %vm6342_vm10, %v629_v35, %v884_v7 }
  0x9e   : > { %v1396_v1 = vshrl.u32 %v1218_v6, 16  ;;  %v1399_v24 = vshll.u32 %v1218_v6, 16  ;;  %v2842_v17 = vrot.slane %v2735_v39, 5  ;;  %v363_v30 = vadd.f32 %v6640_v4, %v325_v9  ;;  %886 = vst [vmem:[#allocation2 + $0x5c] sm:$0x1] %v885_v58 }
  0x9f   : > { %v3311_v28 = vsel %vm6309_vm7, %v3306_v8, %v3310_v38  ;;  %v394_v49 = vmax.f32 %v362_v12, 0.0  ;;  %v2840_v5 = vsel %vm6649_vm14, %v5486_v13, %v2839_v11  ;;  %v2841_v22 = vrot.slane %v2839_v11, 4  ;;  %v5802_v38 = vld [vmem:[%s6273_s24 + $0x40] sm:$0xff]   ;;  %v891_v12 = vld [vmem:[#allocation2 + $0x68] sm:$0x1] }
  0xa0   : > { %v1398_v52 = vrot.slane %v1396_v1, 4  ;;  %v1401_v10 = vrot.slane %v1399_v24, 5  ;;  %v1220_v32 = vld [vmem:[#allocation2 + $0x50] sm:$0x1]  ;;  %v5534_v34 = vcombine.low %v3301_v23, %v3311_v28  ;;  %v395_v45 = vmax.f32 %v363_v30, 0.0 }
  0xa1   : > { %1693 = vrot.lane.b32.xlu0 %v6786_v44, %s6218_s29  ;;  %v1415_v41 = vshll.u32 %v1220_v32, 16  ;;  %v5681_v25 = vpack.c.bf16 %v394_v49, %v394_v49  ;;  %v3313_v14 = vshrl.u32 %v3201_v19, 16  ;;  %v2843_v48 = vsel %vm6649_vm14, %v2841_v22, %v2842_v17  ;;  %v3203_v23 = vld [vmem:[#allocation2 + $0x44] sm:$0x1]  ;;  %v2736_v49 = vld [vmem:[#allocation2 + $0x30] sm:$0xe] }
  0xa2   : > { %v1402_v20 = vor.u32 %v1401_v10, %v1398_v52  ;;  %v976_v16 = vld [vmem:[#allocation2 + $0x54] sm:$0x1]  ;;  %3676 = vrot.lane.b32.xlu1 %v5534_v34, %s6218_s29  ;;  %v3316_v50 = vshll.u32 %v3201_v19, 16  ;;  %v3322_v51 = vshll.u32 %v6824_v31, 16  ;;  %v5682_v57 = vpack.c.bf16 %v395_v45, %v395_v45 }
  0xa3   : > { %v977_v62 = vsel %vm6342_vm10, 0, %v976_v16  ;;  %v1417_v53 = vrot.slane %v1415_v41, 5  ;;  %v631_v44 = vshrl.u32 %v5681_v25, 16  ;;  %v634_v55 = vshll.u32 %v5681_v25, 16  ;;  %v2737_v58 = vld [vmem:[#allocation2 + $0x34] sm:$0xf] }
  0xa4   : > { %v1403_v43 = vrot.slane %v1402_v20, 4  ;;  %978 = vst [vmem:[#allocation2 + $0x54] sm:$0x1] %v977_v62  ;;  %v5502_v46 = vcombine.low %v2840_v5, %v2843_v48  ;;  %v1222_v26 = vld [vmem:[#allocation2 + $0x58] sm:$0xf]  ;;  %v3315_v56 = vrot.slane %v3313_v14, 4  ;;  %v5765_v30 = vunpack.c.l.bf16 %v5802_v38 }
  0xa5   : > { %v1418_v35 = vsel %vm6309_vm7, %v6806_v29, %v1417_v53  ;;  %v633_v60 = vrot.slane %v631_v44, 7  ;;  %v639_v61 = vshrl.u32 %v5682_v57, 16  ;;  %v642_v39 = vshll.u32 %v5682_v57, 16  ;;  %v1025_v1 = vld [vmem:[#allocation2 + $0x5c] sm:$0x1] }
  0xa6   : > { %v1408_v40 = vsel %vm6309_vm7, %v1403_v43, %v6788_v15  ;;  %2987 = vrot.lane.b32.xlu1 %v5502_v46, %s6218_s29  ;;  %v1429_v3 = vshll.u32 %v1222_v26, 16  ;;  %v1433_v6 = vshrl.u32 %v1222_v26, 16  ;;  %v3318_v15 = vrot.slane %v3316_v50, 5  ;;  %v2738_v16 = vld [vmem:[#allocation2 + $0x38] sm:$0x1] }
  0xa7   : > { %v5410_v2 = vcombine.low %v1408_v40, %v1418_v35  ;;  %v636_v37 = vor.u32 %v634_v55, %v633_v60  ;;  %v637_v47 = vrot.slane %v633_v60, 4  ;;  %v641_v18 = vrot.slane %v639_v61, 7  ;;  %v3204_v62 = vld [vmem:[#allocation2 + $0x48] sm:$0xf] }
  0xa8   : > { %v3324_v24 = vrot.slane %v3322_v51, 5  ;;  %v1026_v29 = vsel %vm6380_vm11, 0, %v1025_v1  ;;  %v6846_v7 = vrot.slane %v1429_v3, 5  ;;  %v1435_v8 = vrot.slane %v1433_v6, 4 }
  0xa9   : > { %v3319_v9 = vor.u32 %v3318_v15, %v3315_v56  ;;  %v644_v13 = vor.u32 %v642_v39, %v641_v18  ;;  %v646_v52 = vrot.slane %v641_v18, 4  ;;  %v888_v10 = vsel %vm6321_vm9, %v636_v37, %v887_v63  ;;  %1027 = vst [vmem:[#allocation2 + $0x5c] sm:$0x1] %v1026_v29 }
  0xaa   : > { %v3326_v11 = vshrl.u32 %v6824_v31, 16  ;;  %889 = vst [vmem:[#allocation2 + $0x60] sm:$0xf] %v888_v10  ;;  %v1436_v17 = vor.u32 %v1435_v8, %v6846_v7  ;;  %v3332_v28 = vshll.u32 %v3203_v23, 16  ;;  %v5766_v22 = vunpack.c.h.bf16 %v5802_v38  ;;  %v3205_v38 = vld [vmem:[#allocation2 + $0x4c] sm:$0xf] }
  0xab   : > { %v3320_v19 = vrot.slane %v3319_v9, 4  ;;  %v6130_v32 = vld [vmem:[#allocation2 + $0x54] sm:$0xff]   ;;  %v645_v20 = vsel %vm6315_vm8, %v637_v47, %v644_v13  ;;  %v892_v41 = vsel %vm6342_vm10, %v646_v52, %v891_v12  ;;  %v326_v50 = vmul.f32 %v6627_v42, %v5765_v30 }
  0xac   : > { %v1221_v34 = vld [vmem:[#allocation2 + $0x54] sm:$0xf]  ;;  %v3328_v5 = vrot.slane %v3326_v11, 4  ;;  %890 = vst.msk [vmem:[#allocation2 + $0x64] sm:$0xf] %vm832_vm0, %v645_v20  ;;  %v1437_v25 = vrot.slane %v1436_v17, 4  ;;  %2163 = vrot.lane.b32.xlu0 %v6130_v32, %s6218_s29  ;;  %v327_v51 = vmul.f32 %v6627_v42, %v5766_v22 }
  0xad   : > { %v1420_v31 = vshrl.u32 %v1221_v34, 16  ;;  %v1423_v45 = vshll.u32 %v1221_v34, 16  ;;  %v3325_v14 = vsel %vm6309_vm7, %v3320_v19, %v3324_v24  ;;  %893 = vst [vmem:[#allocation2 + $0x68] sm:$0x1] %v892_v41  ;;  %v3334_v48 = vrot.slane %v3332_v28, 5 }
  0xae   : > { %v3329_v43 = vor.u32 %v3328_v5, %v3324_v24  ;;  %v5487_v44 = vrot.slane %v2736_v49, 9  ;;  %v2846_v40 = vrot.slane %v2737_v58, 5  ;;  %v364_v46 = vadd.f32 %v6640_v4, %v326_v50  ;;  %v3206_v58 = vld [vmem:[#allocation2 + $0x50] sm:$0x1] }
  0xaf   : > { %v1422_v53 = vrot.slane %v1420_v31, 4  ;;  %v1425_v57 = vrot.slane %v1423_v45, 5  ;;  %v365_v26 = vadd.f32 %v6640_v4, %v327_v51  ;;  %v2849_v56 = vrot.slane %v2738_v16, 5  ;;  %v5803_v45 = vld [vmem:[%s6273_s24 + $0x48] sm:$0xff]  }
  0xb0   : > { %v3330_v55 = vrot.slane %v3329_v43, 4  ;;  %v1223_v35 = vld [vmem:[#allocation2 + $0x5c] sm:$0x1]  ;;  %v2847_v61 = vsel %vm6649_vm14, %v5487_v44, %v2846_v40  ;;  %v2848_v39 = vrot.slane %v2846_v40, 4  ;;  %v3337_v63 = vshrl.u32 %v3204_v62, 16  ;;  %1695 = vrot.lane.b32.xlu0 %v5410_v2, %s6218_s29 }
  0xb1   : > { %v1426_v60 = vor.u32 %v1425_v57, %v1422_v53  ;;  %v979_v3 = vld [vmem:[#allocation2 + $0x60] sm:$0x1]  ;;  %v1439_v6 = vshll.u32 %v1223_v35, 16  ;;  %v396_v15 = vmax.f32 %v364_v46, 0.0  ;;  %v397_v37 = vmax.f32 %v365_v26, 0.0 }
  0xb2   : > { %v3335_v23 = vsel %vm6309_vm7, %v3330_v55, %v3334_v48  ;;  %v980_v47 = vsel %vm6342_vm10, 0, %v979_v3  ;;  %v2850_v24 = vsel %vm6649_vm14, %v2848_v39, %v2849_v56  ;;  %v3339_v11 = vrot.slane %v3337_v63, 4  ;;  %v2739_v57 = vld [vmem:[#allocation2 + $0x3c] sm:$0xe]  ;;  %v2740_v63 = vld [vmem:[#allocation2 + $0x40] sm:$0xf] }
  0xb3   : > { %v1427_v18 = vrot.slane %v1426_v60, 4  ;;  %v5535_v1 = vcombine.low %v3325_v14, %v3335_v23  ;;  %981 = vst [vmem:[#allocation2 + $0x60] sm:$0x1] %v980_v47  ;;  %v1441_v29 = vrot.slane %v1439_v6, 5  ;;  %v5683_v8 = vpack.c.bf16 %v396_v15, %v396_v15  ;;  %v1225_v10 = vld [vmem:[#allocation2 + $0x64] sm:$0xf] }
  0xb4   : > { %v5684_v2 = vpack.c.bf16 %v397_v37, %v397_v37  ;;  %v5503_v9 = vcombine.low %v2847_v61, %v2850_v24  ;;  %v1028_v12 = vld [vmem:[#allocation2 + $0x68] sm:$0x1]  ;;  %v3340_v17 = vshll.u32 %v3204_v62, 16  ;;  %v1457_v34 = vshrl.u32 %v1225_v10, 16  ;;  %v894_v14 = vld [vmem:[#allocation2 + $0x6c] sm:$0xf] }
  0xb5   : > { %v1432_v13 = vsel %vm6309_vm7, %v1427_v18, %v6846_v7  ;;  %3678 = vrot.lane.b32.xlu1 %v5535_v1, %s6218_s29  ;;  %v1029_v52 = vsel %vm6380_vm11, 0, %v1028_v12  ;;  %v1442_v19 = vsel %vm6309_vm7, %v1437_v25, %v1441_v29  ;;  %v648_v28 = vshrl.u32 %v5683_v8, 16  ;;  %v898_v3 = vld [vmem:[#allocation2 + $0x74] sm:$0x1]  ;;  %v2741_v29 = vld [vmem:[#allocation2 + $0x44] sm:$0x1] }
  0xb6   : > { %v651_v30 = vshll.u32 %v5683_v8, 16  ;;  %v656_v49 = vshrl.u32 %v5684_v2, 16  ;;  %1030 = vst [vmem:[#allocation2 + $0x68] sm:$0x1] %v1029_v52  ;;  %v5411_v32 = vcombine.low %v1432_v13, %v1442_v19  ;;  %v659_v20 = vshll.u32 %v5684_v2, 16 }
  0xb7   : > { %v1453_v7 = vshll.u32 %v1225_v10, 16  ;;  %v650_v5 = vrot.slane %v648_v28, 7  ;;  %v3342_v41 = vrot.slane %v3340_v17, 5  ;;  %v3346_v31 = vshll.u32 %v3205_v38, 16  ;;  %v3207_v13 = vld [vmem:[#allocation2 + $0x54] sm:$0xf] }
  0xb8   : > { %v658_v22 = vrot.slane %v656_v49, 7  ;;  %v1459_v25 = vrot.slane %v1457_v34, 4  ;;  %v3350_v43 = vshrl.u32 %v3205_v38, 16  ;;  %v3356_v48 = vshll.u32 %v3206_v58, 16 }
  0xb9   : > { %2989 = vrot.lane.b32.xlu1 %v5503_v9, %s6218_s29  ;;  %v6883_v16 = vrot.slane %v1453_v7, 5  ;;  %v653_v50 = vor.u32 %v651_v30, %v650_v5  ;;  %v654_v51 = vrot.slane %v650_v5, 4  ;;  %v3343_v46 = vor.u32 %v3342_v41, %v3339_v11 }
  0xba   : > { %v661_v62 = vor.u32 %v659_v20, %v658_v22  ;;  %v663_v53 = vrot.slane %v658_v22, 4  ;;  %v6131_v44 = vld [vmem:[#allocation2 + $0x60] sm:$0xff]   ;;  %v3348_v26 = vrot.slane %v3346_v31, 5  ;;  %v5769_v56 = vunpack.c.l.bf16 %v5803_v45 }
  0xbb   : > { %v1224_v40 = vld [vmem:[#allocation2 + $0x60] sm:$0xf]  ;;  %v1460_v55 = vor.u32 %v1459_v25, %v6883_v16  ;;  %v895_v60 = vsel %vm6321_vm9, %v653_v50, %v894_v14  ;;  %2165 = vrot.lane.b32.xlu0 %v6131_v44, %s6218_s29  ;;  %v3344_v15 = vrot.slane %v3343_v46, 4  ;;  %v3352_v37 = vrot.slane %v3350_v43, 4  ;;  %v3208_v44 = vld [vmem:[#allocation2 + $0x58] sm:$0xf] }
  0xbc   : > { %v662_v35 = vsel %vm6315_vm8, %v654_v51, %v661_v62  ;;  %v1444_v61 = vshrl.u32 %v1224_v40, 16  ;;  %v1447_v39 = vshll.u32 %v1224_v40, 16  ;;  %896 = vst [vmem:[#allocation2 + $0x6c] sm:$0xf] %v895_v60  ;;  %v3358_v47 = vrot.slane %v3356_v48, 5 }
  0xbd   : > { %897 = vst.msk [vmem:[#allocation2 + $0x70] sm:$0xf] %vm832_vm0, %v662_v35  ;;  %v1226_v6 = vld [vmem:[#allocation2 + $0x68] sm:$0x1]  ;;  %v1461_v23 = vrot.slane %v1460_v55, 4  ;;  %v5770_v38 = vunpack.c.h.bf16 %v5803_v45  ;;  %v3349_v8 = vsel %vm6309_vm7, %v3344_v15, %v3348_v26  ;;  %v3353_v2 = vor.u32 %v3352_v37, %v3348_v26 }
  0xbe   : > { %v1446_v18 = vrot.slane %v1444_v61, 4  ;;  %v1449_v1 = vrot.slane %v1447_v39, 5  ;;  %v1463_v24 = vshll.u32 %v1226_v6, 16  ;;  %v328_v9 = vmul.f32 %v6627_v42, %v5769_v56  ;;  %v3209_v40 = vld [vmem:[#allocation2 + $0x5c] sm:$0x1] }
  0xbf   : > { %v5488_v12 = vrot.slane %v2739_v57, 9  ;;  %v329_v11 = vmul.f32 %v6627_v42, %v5770_v38  ;;  %v2853_v17 = vrot.slane %v2740_v63, 5  ;;  %1697 = vrot.lane.b32.xlu0 %v5411_v32, %s6218_s29  ;;  %v3354_v19 = vrot.slane %v3353_v2, 4  ;;  %v901_v61 = vld [vmem:[#allocation2 + $0x78] sm:$0xf] }
  0xc0   : > { %v1450_v52 = vor.u32 %v1449_v1, %v1446_v18  ;;  %v1465_v10 = vrot.slane %v1463_v24, 5  ;;  %v366_v28 = vadd.f32 %v6640_v4, %v328_v9  ;;  %v2856_v30 = vrot.slane %v2741_v29, 5  ;;  %v5804_v29 = vld [vmem:[%s6273_s24 + $0x50] sm:$0xff]  }
  0xc1   : > { %v899_v49 = vsel %vm6342_vm10, %v663_v53, %v898_v3  ;;  %v367_v7 = vadd.f32 %v6640_v4, %v329_v11  ;;  %v2854_v34 = vsel %vm6649_vm14, %v5488_v12, %v2853_v17  ;;  %v3359_v42 = vsel %vm6309_vm7, %v3354_v19, %v3358_v47  ;;  %v6919_v3 = vpop.permute.xlu0 %2151 }
  0xc2   : > { %v1451_v58 = vrot.slane %v1450_v52, 4  ;;  %v1466_v20 = vsel %vm6309_vm7, %v1461_v23, %v1465_v10  ;;  %900 = vst [vmem:[#allocation2 + $0x74] sm:$0x1] %v899_v49  ;;  %v398_v32 = vmax.f32 %v366_v28, 0.0  ;;  %v2855_v5 = vrot.slane %v2853_v17, 4 }
  0xc3   : > { %v3361_v22 = vshrl.u32 %v3207_v13, 16  ;;  %v982_v41 = vld [vmem:[#allocation2 + $0x6c] sm:$0x1]  ;;  %v5536_v45 = vcombine.low %v3349_v8, %v3359_v42  ;;  %v399_v14 = vmax.f32 %v367_v7, 0.0  ;;  %v3364_v25 = vshll.u32 %v3207_v13, 16 }
  0xc4   : > { %v1456_v31 = vsel %vm6309_vm7, %v1451_v58, %v6883_v16  ;;  %v983_v4 = vsel %vm6342_vm10, 0, %v982_v41  ;;  %v5685_v48 = vpack.c.bf16 %v398_v32, %v398_v32  ;;  %v2857_v50 = vsel %vm6649_vm14, %v2855_v5, %v2856_v30  ;;  %v1228_v51 = vld [vmem:[#allocation2 + $0x70] sm:$0xf]  ;;  %v2742_v8 = vld [vmem:[#allocation2 + $0x48] sm:$0xe] }
  0xc5   : > { %v6912_v43 = vcombine.low %v1456_v31, %v1466_v20  ;;  %984 = vst [vmem:[#allocation2 + $0x6c] sm:$0x1] %v983_v4  ;;  %3680 = vrot.lane.b32.xlu1 %v5536_v45, %s6218_s29  ;;  %v5686_v62 = vpack.c.bf16 %v399_v14, %v399_v14  ;;  %v5504_v53 = vcombine.low %v2854_v34, %v2857_v50  ;;  %v1477_v57 = vshll.u32 %v1228_v51, 16  ;;  %v2743_v52 = vld [vmem:[#allocation2 + $0x4c] sm:$0xf]  ;;  %v6934_v41 = vpop.permute.xlu0 %2175 }
  0xc6   : > { %v1481_v16 = vshrl.u32 %v1228_v51, 16  ;;  %v665_v55 = vshrl.u32 %v5685_v48, 16  ;;  %v668_v46 = vshll.u32 %v5685_v48, 16  ;;  %v3363_v26 = vrot.slane %v3361_v22, 4  ;;  %v2744_v28 = vld [vmem:[#allocation2 + $0x50] sm:$0x1] }
  0xc7   : > { %v3366_v56 = vrot.slane %v3364_v25, 5  ;;  %v673_v35 = vshrl.u32 %v5686_v62, 16  ;;  %v676_v60 = vshll.u32 %v5686_v62, 16  ;;  %v6917_v39 = vrot.slane %v1477_v57, 5  ;;  %v6206_v45 = vld [vmem:[%s8019_s1] ss:$0 sm:$0xff] }
  0xc8   : > { %v1483_v63 = vrot.slane %v1481_v16, 4  ;;  %v667_v6 = vrot.slane %v665_v55, 7  ;;  %v3370_v37 = vshll.u32 %v3208_v44, 16  ;;  %v3374_v47 = vshrl.u32 %v3208_v44, 16  ;;  %v905_v48 = vld [vmem:[#allocation2 + $0x80] sm:$0x1] }
  0xc9   : > { %v1031_v23 = vld [vmem:[#allocation2 + $0x74] sm:$0x1]  ;;  %v3367_v15 = vor.u32 %v3366_v56, %v3363_v26  ;;  %v675_v18 = vrot.slane %v673_v35, 7  ;;  %2991 = vrot.lane.b32.xlu1 %v5504_v53, %s6218_s29  ;;  %v3380_v38 = vshll.u32 %v3209_v40, 16  ;;  %v5773_v34 = vunpack.c.l.bf16 %v5804_v29  ;;  %v3210_v50 = vld [vmem:[#allocation2 + $0x60] sm:$0xf] }
  0xca   : > { %v1032_v1 = vsel %vm6380_vm11, 0, %v1031_v23  ;;  %v1484_v24 = vor.u32 %v1483_v63, %v6917_v39  ;;  %v670_v2 = vor.u32 %v668_v46, %v667_v6  ;;  %v671_v9 = vrot.slane %v667_v6, 4  ;;  %v6207_v44 = vld [vmem:[%s8020_s2] ss:$0 sm:$0xff] }
  0xcb   : > { %1033 = vst [vmem:[#allocation2 + $0x74] sm:$0x1] %v1032_v1  ;;  %v3368_v12 = vrot.slane %v3367_v15, 4  ;;  %v3372_v13 = vrot.slane %v3370_v37, 5  ;;  %v678_v10 = vor.u32 %v676_v60, %v675_v18  ;;  %v680_v11 = vrot.slane %v675_v18, 4 }
  0xcc   : > { %v6926_v17 = vrot.slane %v1484_v24, 4  ;;  %v3376_v19 = vrot.slane %v3374_v47, 4  ;;  %v6132_v30 = vld [vmem:[#allocation2 + $0x6c] sm:$0xff]   ;;  %v902_v49 = vsel %vm6321_vm9, %v670_v2, %v901_v61  ;;  %v3382_v7 = vrot.slane %v3380_v38, 5  ;;  %v6954_v24 = vpop.permute.xlu0 %2153 }
  0xcd   : > { %v1227_v58 = vld [vmem:[#allocation2 + $0x6c] sm:$0xf]  ;;  %v3373_v20 = vsel %vm6309_vm7, %v3368_v12, %v3372_v13  ;;  %v679_v42 = vsel %vm6315_vm8, %v671_v9, %v678_v10  ;;  %903 = vst [vmem:[#allocation2 + $0x78] sm:$0xf] %v902_v49  ;;  %2167 = vrot.lane.b32.xlu0 %v6132_v30, %s6218_s29  ;;  %v5774_v31 = vunpack.c.h.bf16 %v5804_v29  ;;  %v330_v14 = vmul.f32 %v6206_v45, %v5773_v34  ;;  %v3211_v9 = vld [vmem:[#allocation2 + $0x64] sm:$0xf]  ;;  %v6957_v12 = vpop.permute.xlu1 %1683 }
  0xce   : > { %v1468_v32 = vshrl.u32 %v1227_v58, 16  ;;  %v1471_v5 = vshll.u32 %v1227_v58, 16  ;;  %v3377_v22 = vor.u32 %v3376_v19, %v3372_v13  ;;  %904 = vst.msk [vmem:[#allocation2 + $0x7c] sm:$0xf] %vm832_vm0, %v679_v42  ;;  %v5489_v25 = vrot.slane %v2742_v8, 9  ;;  %8038 = vst [vmem:[#allocation5_spill] sm:$0xff] %v6954_v24 }
  0xcf   : > { %v2860_v4 = vrot.slane %v2743_v52, 5  ;;  %v2863_v57 = vrot.slane %v2744_v28, 5  ;;  %v331_v16 = vmul.f32 %v6206_v45, %v5774_v31  ;;  %v368_v40 = vadd.f32 %v6207_v44, %v330_v14  ;;  %v3212_v49 = vld [vmem:[#allocation2 + $0x68] sm:$0x1] }
  0xd0   : > { %v1470_v51 = vrot.slane %v1468_v32, 4  ;;  %v1473_v62 = vrot.slane %v1471_v5, 5  ;;  %v3378_v53 = vrot.slane %v3377_v22, 4  ;;  %v906_v60 = vsel %vm6342_vm10, %v680_v11, %v905_v48  ;;  %v2745_v32 = vld [vmem:[#allocation2 + $0x54] sm:$0xe] }
  0xd1   : > { %v2861_v55 = vsel %vm6649_vm14, %v5489_v25, %v2860_v4  ;;  %v2862_v46 = vrot.slane %v2860_v4, 4  ;;  %v3385_v61 = vshrl.u32 %v3210_v50, 16  ;;  %1699 = vrot.lane.b32.xlu0 %v6912_v43, %s6218_s29  ;;  %v369_v23 = vadd.f32 %v6207_v44, %v331_v16  ;;  %907 = vst [vmem:[#allocation2 + $0x80] sm:$0x1] %v906_v60  ;;  %v2746_v16 = vld [vmem:[#allocation2 + $0x58] sm:$0xf] }
  0xd2   : > { %v1229_v26 = vld [vmem:[#allocation2 + $0x74] sm:$0x1]  ;;  %v1474_v56 = vor.u32 %v1473_v62, %v1470_v51  ;;  %v3383_v35 = vsel %vm6309_vm7, %v3378_v53, %v3382_v7  ;;  %v400_v15 = vmax.f32 %v368_v40, 0.0  ;;  %v3388_v1 = vshll.u32 %v3210_v50, 16  ;;  %v2747_v44 = vld [vmem:[#allocation2 + $0x5c] sm:$0x1] }
  0xd3   : > { %v1487_v63 = vshll.u32 %v1229_v26, 16  ;;  %v5537_v6 = vcombine.low %v3373_v20, %v3383_v35  ;;  %v2864_v47 = vsel %vm6649_vm14, %v2862_v46, %v2863_v57  ;;  %v3387_v18 = vrot.slane %v3385_v61, 4  ;;  %v908_v20 = vld [vmem:[#allocation2 + $0x84] sm:$0xf]  ;;  %v912_v40 = vld [vmem:[#allocation2 + $0x8c] sm:$0x1] }
  0xd4   : > { %v1475_v37 = vrot.slane %v1474_v56, 4  ;;  %v985_v38 = vld [vmem:[#allocation2 + $0x78] sm:$0x1]  ;;  %v401_v8 = vmax.f32 %v369_v23, 0.0  ;;  %v5687_v2 = vpack.c.bf16 %v400_v15, %v400_v15  ;;  %v5505_v43 = vcombine.low %v2861_v55, %v2864_v47  ;;  %v3213_v35 = vld [vmem:[#allocation2 + $0x6c] sm:$0xf] }
  0xd5   : > { %v1489_v29 = vrot.slane %v1487_v63, 5  ;;  %3682 = vrot.lane.b32.xlu1 %v5537_v6, %s6218_s29  ;;  %v986_v13 = vsel %vm6342_vm10, 0, %v985_v38  ;;  %v1231_v52 = vld [vmem:[#allocation2 + $0x7c] sm:$0xf]  ;;  %v3390_v10 = vrot.slane %v3388_v1, 5  ;;  %v3394_v45 = vshll.u32 %v3211_v9, 16 }
  0xd6   : > { %987 = vst [vmem:[#allocation2 + $0x78] sm:$0x1] %v986_v13  ;;  %v1480_v11 = vsel %vm6309_vm7, %v1475_v37, %v6917_v39  ;;  %v5688_v19 = vpack.c.bf16 %v401_v8, %v401_v8  ;;  %v682_v28 = vshrl.u32 %v5687_v2, 16  ;;  %v685_v30 = vshll.u32 %v5687_v2, 16  ;;  %v6968_v39 = vpop.permute.xlu1 %1707 }
  0xd7   : > { %v1490_v58 = vsel %vm6309_vm7, %v6926_v17, %v1489_v29  ;;  %v1501_v7 = vshll.u32 %v1231_v52, 16  ;;  %v1505_v34 = vshrl.u32 %v1231_v52, 16  ;;  %v3391_v42 = vor.u32 %v3390_v10, %v3387_v18  ;;  %v6972_v17 = vpop.permute.xlu0 %1685 }
  0xd8   : > { %v684_v5 = vrot.slane %v682_v28, 7  ;;  %v690_v22 = vshrl.u32 %v5688_v19, 16  ;;  %v693_v31 = vshll.u32 %v5688_v19, 16  ;;  %v1034_v14 = vld [vmem:[#allocation2 + $0x80] sm:$0x1]  ;;  %v3398_v50 = vshrl.u32 %v3211_v9, 16 }
  0xd9   : > { %2993 = vrot.lane.b32.xlu1 %v5505_v43, %s6218_s29  ;;  %v6970_v25 = vrot.slane %v1501_v7, 5  ;;  %v1507_v4 = vrot.slane %v1505_v34, 4  ;;  %v3392_v48 = vrot.slane %v3391_v42, 4  ;;  %v1035_v57 = vsel %vm6380_vm11, 0, %v1034_v14  ;;  %v3214_v43 = vld [vmem:[#allocation2 + $0x70] sm:$0xf] }
  0xda   : > { %v687_v51 = vor.u32 %v685_v30, %v684_v5  ;;  %v688_v62 = vrot.slane %v684_v5, 4  ;;  %v692_v53 = vrot.slane %v690_v22, 7  ;;  %1036 = vst [vmem:[#allocation2 + $0x80] sm:$0x1] %v1035_v57  ;;  %v3396_v46 = vrot.slane %v3394_v45, 5  ;;  %v6985_v0 = vpop.permute.xlu1 %2177 }
  0xdb   : > { %v1508_v55 = vor.u32 %v1507_v4, %v6970_v25  ;;  %v3400_v26 = vrot.slane %v3398_v50, 4  ;;  %v3404_v56 = vshll.u32 %v3212_v49, 16  ;;  %v5490_v6 = vrot.slane %v2745_v32, 9  ;;  %8039 = vst [vmem:[#allocation6_spill] sm:$0xff] %v6985_v0  ;;  %v6991_v19 = vpop.permute.xlu0 %2155  ;;  %v2748_v45 = vld [vmem:[#allocation2 + $0x60] sm:$0xe] }
  0xdc   : > { %v695_v60 = vor.u32 %v693_v31, %v692_v53  ;;  %v697_v61 = vrot.slane %v692_v53, 4  ;;  %v909_v63 = vsel %vm6321_vm9, %v687_v51, %v908_v20  ;;  %v5413_v15 = vcombine.low %v1480_v11, %v1490_v58  ;;  %v3215_v11 = vld [vmem:[#allocation2 + $0x74] sm:$0x1]  ;;  %8040 = vst [vmem:[#allocation7_spill] sm:$0xff] %v6991_v19  ;;  %v2749_v51 = vld [vmem:[#allocation2 + $0x64] sm:$0xf] }
  0xdd   : > { %v6133_v23 = vld [vmem:[#allocation2 + $0x78] sm:$0xff]   ;;  %910 = vst [vmem:[#allocation2 + $0x84] sm:$0xf] %v909_v63  ;;  %v6979_v47 = vrot.slane %v1508_v55, 4  ;;  %v3397_v18 = vsel %vm6309_vm7, %v3392_v48, %v3396_v46  ;;  %v3401_v1 = vor.u32 %v3400_v26, %v3396_v46  ;;  %v3406_v2 = vrot.slane %v3404_v56, 5 }
  0xde   : > { %v1230_v37 = vld [vmem:[#allocation2 + $0x78] sm:$0xf]  ;;  %v696_v38 = vsel %vm6315_vm8, %v688_v62, %v695_v60  ;;  %2169 = vrot.lane.b32.xlu0 %v6133_v23, %s6218_s29  ;;  %v2867_v13 = vrot.slane %v2746_v16, 5  ;;  %v2870_v52 = vrot.slane %v2747_v44, 5  ;;  %v913_v10 = vsel %vm6342_vm10, %v697_v61, %v912_v40  ;;  %v2750_v40 = vld [vmem:[#allocation2 + $0x68] sm:$0x1]  ;;  %v7001_v55 = vpop.permute.xlu1 %1709 }
  0xdf   : > { %v1492_v29 = vshrl.u32 %v1230_v37, 16  ;;  %v1495_v8 = vshll.u32 %v1230_v37, 16  ;;  %911 = vst.msk [vmem:[#allocation2 + $0x88] sm:$0xf] %vm832_vm0, %v696_v38  ;;  %v3402_v9 = vrot.slane %v3401_v1, 4  ;;  %v3409_v30 = vshrl.u32 %v3213_v35, 16  ;;  %v7006_v61 = vpop.permute.xlu0 %1687 }
  0xe0   : > { %914 = vst [vmem:[#allocation2 + $0x8c] sm:$0x1] %v913_v10  ;;  %v3412_v49 = vshll.u32 %v3213_v35, 16  ;;  %v2868_v20 = vsel %vm6649_vm14, %v5490_v6, %v2867_v13  ;;  %v2869_v7 = vrot.slane %v2867_v13, 4  ;;  %v3418_v34 = vshll.u32 %v3214_v43, 16 }
  0xe1   : > { %v1494_v59 = vrot.slane %v1492_v29, 4  ;;  %v1497_v28 = vrot.slane %v1495_v8, 5  ;;  %v3407_v58 = vsel %vm6309_vm7, %v3402_v9, %v3406_v2  ;;  %v1232_v42 = vld [vmem:[#allocation2 + $0x80] sm:$0x1]  ;;  %v3411_v22 = vrot.slane %v3409_v30, 4 }
  0xe2   : > { %v5538_v5 = vcombine.low %v3397_v18, %v3407_v58  ;;  %v3414_v31 = vrot.slane %v3412_v49, 5  ;;  %1701 = vrot.lane.b32.xlu0 %v5413_v15, %s6218_s29  ;;  %v1511_v14 = vshll.u32 %v1232_v42, 16  ;;  %v2871_v4 = vsel %vm6649_vm14, %v2869_v7, %v2870_v52  ;;  %v3216_v60 = vld [vmem:[#allocation2 + $0x78] sm:$0xf]  ;;  %v7023_v30 = vpop.permute.xlu1 %2179  ;;  %v947_v49 = vld [vmem:[#allocation2 + $0xc8] sm:$0x1] }
  0xe3   : > { %v1498_v32 = vor.u32 %v1497_v28, %v1494_v59  ;;  %v3420_v48 = vrot.slane %v3418_v34, 5  ;;  %v3422_v50 = vshrl.u32 %v3214_v43, 16  ;;  %v5506_v57 = vcombine.low %v2868_v20, %v2871_v4  ;;  %v3217_v43 = vld [vmem:[#allocation2 + $0x7c] sm:$0xf]  ;;  %8041 = vst [vmem:[#allocation8_spill] sm:$0xff] %v7023_v30  ;;  %v6192_v30 = vld [vmem:[#allocation2 + $0x60] sm:$0xff]  }
  0xe4   : > { %v988_v62 = vld [vmem:[#allocation2 + $0x84] sm:$0x1]  ;;  %3684 = vrot.lane.b32.xlu1 %v5538_v5, %s6218_s29  ;;  %v3415_v16 = vor.u32 %v3414_v31, %v3411_v22  ;;  %v3428_v44 = vshll.u32 %v3215_v11, 16  ;;  %v782_v46 = vrot.slane %v6579_v36, 4  ;;  %v1513_v56 = vrot.slane %v1511_v14, 5  ;;  %v7028_v5 = vpop.permute.xlu0 %2157  ;;  %3182 = vst.msk [vmem:[#allocation3 + $0x108] sm:$0xff] %vm1183_vm15, %v6192_v30 }
  0xe5   : > { %v1499_v53 = vrot.slane %v1498_v32, 4  ;;  %v989_v26 = vsel %vm6342_vm10, 0, %v988_v62  ;;  %v3424_v35 = vrot.slane %v3422_v50, 4  ;;  %v5491_v15 = vrot.slane %v2748_v45, 9  ;;  %v2751_v42 = vld [vmem:[#allocation2 + $0x6c] sm:$0xe] }
  0xe6   : > { %990 = vst [vmem:[#allocation2 + $0x84] sm:$0x1] %v989_v26  ;;  %v1234_v6 = vld [vmem:[#allocation2 + $0x88] sm:$0xf]  ;;  %v3416_v23 = vrot.slane %v3415_v16, 4  ;;  %v3430_v38 = vrot.slane %v3428_v44, 5  ;;  %v1514_v29 = vsel %vm6309_vm7, %v6979_v47, %v1513_v56  ;;  %v948_v16 = vsel %vm6342_vm10, %v782_v46, %v947_v49 }
  0xe7   : > { %v1504_v63 = vsel %vm6309_vm7, %v1499_v53, %v6970_v25  ;;  %v1037_v37 = vld [vmem:[#allocation2 + $0x8c] sm:$0x1]  ;;  %v1525_v18 = vshll.u32 %v1234_v6, 16  ;;  %v1529_v1 = vshrl.u32 %v1234_v6, 16  ;;  %v3425_v36 = vor.u32 %v3424_v35, %v3420_v48  ;;  %v2752_v32 = vld [vmem:[#allocation2 + $0x70] sm:$0xf] }
  0xe8   : > { %2995 = vrot.lane.b32.xlu1 %v5506_v57, %s6218_s29  ;;  %v1038_v8 = vsel %vm6380_vm11, 0, %v1037_v37  ;;  %v3421_v25 = vsel %vm6309_vm7, %v3416_v23, %v3420_v48  ;;  %v2874_v2 = vrot.slane %v2749_v51, 5  ;;  %v2877_v10 = vrot.slane %v2750_v40, 5  ;;  %8042 = vst [vmem:[#allocation9_spill] sm:$0xff] %v7028_v5  ;;  %v3218_v45 = vld [vmem:[#allocation2 + $0x80] sm:$0x1] }
  0xe9   : > { %1039 = vst [vmem:[#allocation2 + $0x8c] sm:$0x1] %v1038_v8  ;;  %v7019_v9 = vrot.slane %v1525_v18, 5  ;;  %v1531_v13 = vrot.slane %v1529_v1, 4  ;;  %v3426_v52 = vrot.slane %v3425_v36, 4  ;;  %v3433_v59 = vshrl.u32 %v3216_v60, 16  ;;  %v7045_v36 = vpop.permute.xlu1 %1711 }
  0xea   : > { %v2875_v11 = vsel %vm6649_vm14, %v5491_v15, %v2874_v2  ;;  %v2876_v47 = vrot.slane %v2874_v2, 4  ;;  %v3436_v28 = vshll.u32 %v3216_v60, 16  ;;  %v3442_v7 = vshll.u32 %v3217_v43, 16  ;;  %v7032_v48 = vld [vmem:[#allocation2 + $0x74] sm:$0x1]  ;;  %v7050_v2 = vpop.permute.xlu0 %1689 }
  0xeb   : > { %v1532_v58 = vor.u32 %v1531_v13, %v7019_v9  ;;  %v3431_v20 = vsel %vm6309_vm7, %v3426_v52, %v3430_v38  ;;  %v3446_v34 = vshrl.u32 %v3217_v43, 16  ;;  %v3435_v14 = vrot.slane %v3433_v59, 4  ;;  %v7041_v35 = vld [vmem:[#allocation2 + $0x88] sm:$0xf]  ;;  %949 = vst [vmem:[#allocation2 + $0xc8] sm:$0x1] %v948_v16 }
  0xec   : > { %v5539_v22 = vcombine.low %v3421_v25, %v3431_v20  ;;  %v2878_v31 = vsel %vm6649_vm14, %v2876_v47, %v2877_v10  ;;  %v3438_v4 = vrot.slane %v3436_v28, 5  ;;  %v5414_v51 = vcombine.low %v1504_v63, %v1514_v29  ;;  %v6135_v43 = vld [vmem:[#allocation2 + $0x90] sm:$0xff]   ;;  %v7056_v47 = vld [vmem:[#allocation2 + $0x78] sm:$0xe]  ;;  %v7060_v20 = vld [vmem:[#allocation2 + $0x7c] sm:$0xf] }
  0xed   : > { %v6134_v50 = vld [vmem:[#allocation2 + $0x84] sm:$0xff]   ;;  %v7034_v53 = vrot.slane %v1532_v58, 4  ;;  %v5507_v57 = vcombine.low %v2875_v11, %v2878_v31  ;;  %v7039_v56 = vrot.slane %v3442_v7, 5  ;;  %v3448_v60 = vrot.slane %v3446_v34, 4  ;;  %v7062_v7 = vld [vmem:[#allocation2 + $0x80] sm:$0x1] }
  0xee   : > { %v1233_v62 = vld [vmem:[#allocation2 + $0x84] sm:$0xf]  ;;  %3686 = vrot.lane.b32.xlu1 %v5539_v22, %s6218_s29  ;;  %v3439_v26 = vor.u32 %v3438_v4, %v3435_v14  ;;  %2171 = vrot.lane.b32.xlu0 %v6134_v50, %s6218_s29  ;;  %v3452_v63 = vshll.u32 %v3218_v45, 16  ;;  %v5492_v6 = vrot.slane %v2751_v42, 9  ;;  %v2881_v23 = vrot.slane %v2752_v32, 5  ;;  %v6153_v42 = vld [vmem:[#allocation2 + $0x90] sm:$0xff]  }
  0xef   : > { %v1516_v44 = vshrl.u32 %v1233_v62, 16  ;;  %v1519_v40 = vshll.u32 %v1233_v62, 16  ;;  %v3219_v15 = vld [vmem:[#allocation2 + $0x84] sm:$0xf]  ;;  %v2884_v1 = vrot.slane %v7032_v48, 5  ;;  %v3449_v29 = vor.u32 %v3448_v60, %v7039_v56  ;;  %v6154_v32 = vld [vmem:[#allocation2 + $0xc] sm:$0xff]  }
  0xf0   : > { %v1235_v37 = vld [vmem:[#allocation2 + $0x8c] sm:$0x1]  ;;  %v3440_v18 = vrot.slane %v3439_v26, 4  ;;  %v3454_v8 = vrot.slane %v3452_v63, 5  ;;  %v2882_v25 = vsel %vm6649_vm14, %v5492_v6, %v2881_v23  ;;  %v2883_v10 = vrot.slane %v2881_v23, 4  ;;  %v6148_v34 = vld [vmem:[#allocation2] sm:$0xff]  }
  0xf1   : > { %v1518_v33 = vrot.slane %v1516_v44, 4  ;;  %v1521_v46 = vrot.slane %v1519_v40, 5  ;;  %v1535_v38 = vshll.u32 %v1235_v37, 16  ;;  %v3457_v11 = vshrl.u32 %v3219_v15, 16  ;;  %v6157_v22 = vld [vmem:[#allocation2 + $0x9c] sm:$0xff]   ;;  %v6162_v45 = vld [vmem:[#allocation2 + $0xa8] sm:$0xff]  }
  0xf2   : > { %2997 = vrot.lane.b32.xlu1 %v5507_v57, %s6218_s29  ;;  %v3445_v52 = vsel %vm6309_vm7, %v3440_v18, %v7039_v56  ;;  %1703 = vrot.lane.b32.xlu0 %v5414_v51, %s6218_s29  ;;  %v3450_v28 = vrot.slane %v3449_v29, 4  ;;  %v3460_v49 = vshll.u32 %v3219_v15, 16  ;;  %v3466_v58 = vshll.u32 %v7041_v35, 16  ;;  %v6159_v31 = vld [vmem:[#allocation2 + $0x18] sm:$0xff]   ;;  %v6165_v14 = vld [vmem:[#allocation2 + $0x24] sm:$0xff]   ;;  %v6171_v48 = vld [vmem:[#allocation2 + $0x30] sm:$0xff]  }
  0xf3   : > { %v1522_v13 = vor.u32 %v1521_v46, %v1518_v33  ;;  %v1537_v59 = vrot.slane %v1535_v38, 5  ;;  %v6168_v4 = vld [vmem:[#allocation2 + $0xb4] sm:$0xff]   ;;  %v6178_v51 = vld [vmem:[#allocation2 + $0x3c] sm:$0xff]   ;;  %v6179_v62 = vld [vmem:[#allocation2 + $0x24] sm:$0xff]   ;;  %v2885_v23 = vsel %vm6649_vm14, %v2883_v10, %v2884_v1  ;;  %v3459_v37 = vrot.slane %v3457_v11, 4  ;;  %1184 = vst.msk [vmem:[#allocation3] sm:$0xff] %vm1183_vm15, %v6148_v34 }
  0xf4   : > { %v6172_v50 = vld [vmem:[#allocation2 + $0x18] sm:$0xff]   ;;  %v6182_v57 = vld [vmem:[#allocation2 + $0x48] sm:$0xff]   ;;  %v6183_v16 = vld [vmem:[#allocation2 + $0x30] sm:$0xff]   ;;  %v3470_v33 = vshrl.u32 %v7041_v35, 16  ;;  %v3455_v29 = vsel %vm6309_vm7, %v3450_v28, %v3454_v8  ;;  %v5508_v21 = vcombine.low %v2882_v25, %v2885_v23  ;;  %v3462_v5 = vrot.slane %v3460_v49, 5  ;;  %1196 = vst.msk [vmem:[#allocation3 + $0x1e0] sm:$0xff] %vm1183_vm15, %v6153_v42 }
  0xf5   : > { %v6184_v44 = vld [vmem:[#allocation2 + $0x54] sm:$0xff]   ;;  %v6185_v40 = vld [vmem:[#allocation2 + $0x3c] sm:$0xff]   ;;  %v6188_v56 = vld [vmem:[#allocation2 + $0x48] sm:$0xff]   ;;  %v1523_v6 = vrot.slane %v1522_v13, 4  ;;  %v1538_v38 = vsel %vm6309_vm7, %v7034_v53, %v1537_v59  ;;  %v7079_v11 = vcombine.low %v3445_v52, %v3455_v29  ;;  %v7081_v19 = vrot.slane %v3466_v58, 5  ;;  %v7089_v25 = vpop.permute.xlu1 %2181  ;;  %1185 = vst.msk [vmem:[#allocation3 + $0x28] sm:$0xff] %vm1183_vm15, %v6154_v32 }
  0xf6   : > { %v6187_v26 = vld [vmem:[#allocation2 + $0x60] sm:$0xff]   ;;  %v6189_v60 = vld [vmem:[#allocation2 + $0x6c] sm:$0xff]   ;;  %v6190_v63 = vld [vmem:[#allocation2 + $0x54] sm:$0xff]   ;;  %v3472_v0 = vrot.slane %v3470_v33, 4  ;;  %8043 = vst [vmem:[#allocation10_spill] sm:$0xff] %v7089_v25  ;;  %2173 = vrot.lane.b32.xlu0 %v6135_v43, %s6218_s29  ;;  %2999 = vrot.lane.b32.xlu1 %v5508_v21, %s6218_s29  ;;  %v3463_v49 = vor.u32 %v3462_v5, %v3459_v37  ;;  %v5493_v52 = vrot.slane %v7056_v47, 9  ;;  %v7094_v58 = vpop.permute.xlu0 %2159 }
  0xf7   : > { %v3221_v15 = vld [vmem:[#allocation2 + $0x8c] sm:$0x1]  ;;  %v7067_v46 = vld [vmem:[#allocation2] sm:$0xe]  ;;  %v6191_v18 = vld [vmem:[#allocation2 + $0x78] sm:$0xff]   ;;  %v1528_v35 = vsel %vm6309_vm7, %v1523_v6, %v7019_v9  ;;  %v2888_v23 = vrot.slane %v7060_v20, 5 }
  0xf8   : > { %v7074_v13 = vld [vmem:[#allocation2 + $0x4] sm:$0xf]  ;;  %v6195_v10 = vld [vmem:[#allocation2 + $0x6c] sm:$0xff]   ;;  %v7083_v53 = vld [vmem:[#allocation2 + $0x8] sm:$0x1]  ;;  %v5415_v28 = vcombine.low %v1528_v35, %v1538_v38  ;;  %v3476_v9 = vshll.u32 %v3221_v15, 16  ;;  %v3473_v6 = vor.u32 %v3472_v0, %v7081_v19 }
  0xf9   : > { %v6194_v1 = vld [vmem:[#allocation2 + $0x84] sm:$0xff]   ;;  %v7085_v59 = vld [vmem:[#allocation2 + $0x90] sm:$0xe]  ;;  %v7087_v8 = vld [vmem:[#allocation2 + $0x94] sm:$0xf]  ;;  %v2891_v33 = vrot.slane %v7062_v7, 5  ;;  %v2889_v47 = vsel %vm6649_vm14, %v5493_v52, %v2888_v23 }
  0xfa   : > { %v6196_v29 = vld [vmem:[#allocation2 + $0x78] sm:$0xff]   ;;  %v3464_v25 = vrot.slane %v3463_v49, 4  ;;  %v3478_v24 = vrot.slane %v3476_v9, 5  ;;  %vm1731_vm1 = vcmask 1048064   ;;  %v5420_v43 = vrot.slane %v7067_v46, 9  ;;  %1197 = vst.msk [vmem:[#allocation3 + $0x208] sm:$0xff] %vm1183_vm15, %v6157_v22  ;;  %1705 = vrot.lane.b32.xlu0 %v5415_v28, %s6218_s29 }
  0xfb   : > { %v7101_v21 = vld [vmem:[#allocation2 + $0x98] sm:$0x1]  ;;  %v7103_v5 = vld [vmem:[#allocation2 + $0x90] sm:$0xf]  ;;  %1186 = vst.msk [vmem:[#allocation3 + $0x50] sm:$0xff] %vm1183_vm15, %v6159_v31  ;;  %1198 = vst.msk [vmem:[#allocation3 + $0x230] sm:$0xff] %vm1183_vm15, %v6162_v45 }
  0xfc   : > { %1187 = vst.msk [vmem:[#allocation3 + $0x78] sm:$0xff] %vm1183_vm15, %v6165_v14  ;;  %1199 = vst.msk [vmem:[#allocation3 + $0x258] sm:$0xff] %vm1183_vm15, %v6168_v4  ;;  %v3474_v0 = vrot.slane %v3473_v6, 4  ;;  %v2890_v20 = vrot.slane %v2888_v23, 4  ;;  %v1849_v7 = vrot.slane %v7074_v13, 5 }
  0xfd   : > { %1188 = vst.msk [vmem:[#allocation3 + $0xa0] sm:$0xff] %vm1183_vm15, %v6171_v48  ;;  %3176 = vst.msk [vmem:[#allocation3 + $0x18] sm:$0xff] %vm1183_vm15, %v6172_v50  ;;  %v3223_v34 = vld [vmem:[#allocation2 + $0x94] sm:$0xf]  ;;  %v3224_v42 = vld [vmem:[#allocation2 + $0x98] sm:$0x1] }
  0xfe   : > { %1189 = vst.msk [vmem:[#allocation3 + $0xc8] sm:$0xff] %vm1183_vm15, %v6178_v51  ;;  %3177 = vst.msk [vmem:[#allocation3 + $0x40] sm:$0xff] %vm1183_vm15, %v6179_v62  ;;  %v2757_v30 = vld [vmem:[#allocation2 + $0x84] sm:$0xe]  ;;  %v2892_v32 = vsel %vm6649_vm14, %v2890_v20, %v2891_v33  ;;  %v1850_v22 = vsel %vm6649_vm14, %v5420_v43, %v1849_v7  ;;  %v2758_v48 = vld [vmem:[#allocation2 + $0x88] sm:$0xf]  ;;  %3688 = vrot.lane.b32.xlu0 %v7079_v11, %s6218_s29 }
  0xff   : > { %1190 = vst.msk [vmem:[#allocation3 + $0xf0] sm:$0xff] %vm1183_vm15, %v6182_v57  ;;  %3178 = vst.msk [vmem:[#allocation3 + $0x68] sm:$0xff] %vm1183_vm15, %v6183_v16  ;;  %v5509_v45 = vcombine.low %v2889_v47, %v2892_v32  ;;  %v2759_v50 = vld [vmem:[#allocation2 + $0x8c] sm:$0x1]  ;;  %v1751_v51 = vld [vmem:[#allocation2 + $0xc] sm:$0xe] }
 0x100   : > { %1191 = vst.msk [vmem:[#allocation3 + $0x118] sm:$0xff] %vm1183_vm15, %v6184_v44  ;;  %3179 = vst.msk [vmem:[#allocation3 + $0x90] sm:$0xff] %vm1183_vm15, %v6185_v40  ;;  %v1936_v62 = vrot.slane %v7101_v21, 5  ;;  %v3481_v57 = vshrl.u32 %v7103_v5, 16  ;;  %v3484_v16 = vshll.u32 %v7103_v5, 16  ;;  %v3494_v15 = vshrl.u32 %v3223_v34, 16 }
 0x101   : > { %1192 = vst.msk [vmem:[#allocation3 + $0x140] sm:$0xff] %vm1183_vm15, %v6187_v26  ;;  %3180 = vst.msk [vmem:[#allocation3 + $0xb8] sm:$0xff] %vm1183_vm15, %v6188_v56  ;;  %v1752_v44 = vld [vmem:[#allocation2 + $0x10] sm:$0xf]  ;;  %v1753_v40 = vld [vmem:[#allocation2 + $0x14] sm:$0x1]  ;;  %3001 = vrot.lane.b32.xlu1 %v5509_v45, %s6218_s29 }
 0x102   : > { %1193 = vst.msk [vmem:[#allocation3 + $0x168] sm:$0xff] %vm1183_vm15, %v6189_v60  ;;  %3181 = vst.msk [vmem:[#allocation3 + $0xe0] sm:$0xff] %vm1183_vm15, %v6190_v63  ;;  %v6197_v56 = vld [vmem:[#allocation2 + $0x84] sm:$0xff]   ;;  %v3490_v63 = vshll.u32 %v3223_v34, 16  ;;  %v3500_v37 = vshll.u32 %v3224_v42, 16  ;;  %v3486_v38 = vrot.slane %v3484_v16, 5 }
 0x103   : > { %1194 = vst.msk [vmem:[#allocation3 + $0x190] sm:$0xff] %vm1183_vm15, %v6191_v18  ;;  %1195 = vst.msk [vmem:[#allocation3 + $0x1b8] sm:$0xff] %vm1183_vm15, %v6194_v1  ;;  %v3483_v18 = vrot.slane %v3481_v57, 4  ;;  %v5494_v13 = vrot.slane %v2757_v30, 9  ;;  %v1787_v1 = vld [vmem:[#allocation2 + $0x9c] sm:$0xe] }
 0x104   : > { %3183 = vst.msk [vmem:[#allocation3 + $0x130] sm:$0xff] %vm1183_vm15, %v6195_v10  ;;  %3184 = vst.msk [vmem:[#allocation3 + $0x158] sm:$0xff] %vm1183_vm15, %v6196_v29  ;;  %v3492_v35 = vrot.slane %v3490_v63, 5  ;;  %v3496_v11 = vrot.slane %v3494_v15, 4  ;;  %v2898_v28 = vrot.slane %v2759_v50, 5  ;;  %v5421_v49 = vrot.slane %v1751_v51, 9 }
 0x105   : > { %1732 = vst.msk [vmem:[#allocation3] sm:$0xff] %vm1731_vm1, %v6957_v12  ;;  %1744 = vst.msk [vmem:[#allocation3 + $0x1e0] sm:$0xff] %vm1731_vm1, %v6968_v39  ;;  %v1714_v12 = vpop.permute.xlu1 %1713  ;;  %v3469_v39 = vsel %vm6309_vm7, %v3464_v25, %v7081_v19  ;;  %v1851_v19 = vrot.slane %v1849_v7, 4  ;;  %v2895_v25 = vrot.slane %v2758_v48, 5  ;;  %v1789_v9 = vld [vmem:[#allocation2 + $0xa4] sm:$0x1] }
 0x106   : > { %1733 = vst.msk [vmem:[#allocation3 + $0x28] sm:$0xff] %vm1731_vm1, %v6972_v17  ;;  %1745 = vst.msk [vmem:[#allocation3 + $0x208] sm:$0xff] %vm1731_vm1, %v7001_v55  ;;  %v1852_v17 = vrot.slane %v7083_v53, 5  ;;  %v5432_v55 = vrot.slane %v7085_v59, 9  ;;  %v3502_v53 = vrot.slane %v3500_v37, 5  ;;  %v3497_v6 = vor.u32 %v3496_v11, %v3492_v35  ;;  %v6176_v37 = vld [vmem:[%s8021_s3 + $0x108] sm:$0xff]  }
 0x107   : > { %1734 = vst.msk [vmem:[#allocation3 + $0x50] sm:$0xff] %vm1731_vm1, %v7006_v61  ;;  %1746 = vst.msk [vmem:[#allocation3 + $0x230] sm:$0xff] %vm1731_vm1, %v7045_v36  ;;  %v1933_v61 = vrot.slane %v7087_v8, 5  ;;  %v1692_v36 = vpop.permute.xlu0 %1691  ;;  %v1788_v59 = vld [vmem:[#allocation2 + $0xa0] sm:$0xf]  ;;  %v3487_v8 = vor.u32 %v3486_v38, %v3483_v18  ;;  %v1856_v23 = vrot.slane %v1752_v44, 5  ;;  %v2896_v21 = vsel %vm6649_vm14, %v5494_v13, %v2895_v25 }
 0x108   : > { %1735 = vst.msk [vmem:[#allocation3 + $0x78] sm:$0xff] %vm1731_vm1, %v7050_v2  ;;  %1747 = vst.msk [vmem:[#allocation3 + $0x258] sm:$0xff] %vm1731_vm1, %v1714_v12  ;;  %v3479_v2 = vsel %vm6309_vm7, %v3474_v0, %v3478_v24  ;;  %v1853_v24 = vsel %vm6649_vm14, %v1851_v19, %v1852_v17  ;;  %v1859_v33 = vrot.slane %v1753_v40, 5  ;;  %v5433_v29 = vrot.slane %v1787_v1, 9  ;;  %v3225_v43 = vld [vmem:[#allocation2 + $0x9c] sm:$0xf] }
 0x109   : > { %1736 = vst.msk [vmem:[#allocation3 + $0xa0] sm:$0xff] %vm1731_vm1, %v1692_v36  ;;  %v5541_v31 = vcombine.low %v3469_v39, %v3479_v2  ;;  %v1934_v14 = vsel %vm6649_vm14, %v5432_v55, %v1933_v61  ;;  %v1935_v4 = vrot.slane %v1933_v61, 4  ;;  %v3673_v26 = vpop.permute.xlu1 %3672  ;;  %v5436_v60 = vcombine.low %v1850_v22, %v1853_v24  ;;  %v3226_v47 = vld [vmem:[#allocation2 + $0xa0] sm:$0xf]  ;;  %v3227_v12 = vld [vmem:[#allocation2 + $0xa4] sm:$0x1] }
 0x10a   : > { %3720 = vst.msk [vmem:[#allocation3 + $0x18] sm:$0xff] %vm1731_vm1, %v3673_v26  ;;  %v2897_v5 = vrot.slane %v2895_v25, 4  ;;  %v1940_v0 = vrot.slane %v1788_v59, 5  ;;  %v3498_v20 = vrot.slane %v3497_v6, 4  ;;  %v1857_v7 = vsel %vm6649_vm14, %v5421_v49, %v1856_v23  ;;  %v2760_v61 = vld [vmem:[#allocation2 + $0x90] sm:$0xe] }
 0x10b   : > { %v1937_v46 = vsel %vm6649_vm14, %v1935_v4, %v1936_v62  ;;  %3185 = vst.msk [vmem:[#allocation3 + $0x180] sm:$0xff] %vm1183_vm15, %v6197_v56  ;;  %2023 = vst.msk [vmem:[#allocation3 + $0x8] sm:$0xff] %vm1183_vm15, %v5436_v60  ;;  %3690 = vrot.lane.b32.xlu0 %v5541_v31, %s6218_s29  ;;  %v1858_v34 = vrot.slane %v1856_v23, 4  ;;  %v1943_v42 = vrot.slane %v1789_v9, 5  ;;  %v2761_v30 = vld [vmem:[#allocation2 + $0x94] sm:$0xf] }
 0x10c   : > { %v5448_v10 = vcombine.low %v1934_v14, %v1937_v46  ;;  %2199 = vst.msk [vmem:[#allocation3 + $0x8] sm:$0xff] %vm1731_vm1, %v6919_v3  ;;  %v3488_v3 = vrot.slane %v3487_v8, 4  ;;  %v1941_v17 = vsel %vm6649_vm14, %v5433_v29, %v1940_v0  ;;  %v1942_v55 = vrot.slane %v1940_v0, 4  ;;  %v2762_v31 = vld [vmem:[#allocation2 + $0x98] sm:$0x1]  ;;  %v6198_v14 = vld [vmem:[#allocation2 + $0x90] sm:$0xff]  }
 0x10d   : > { %v7178_v52 = vpop.permute.xlu1 %2983  ;;  %v3503_v2 = vsel %vm6309_vm7, %v3498_v20, %v3502_v53  ;;  %v1860_v22 = vsel %vm6649_vm14, %v1858_v34, %v1859_v33  ;;  %v3505_v19 = vshrl.u32 %v3225_v43, 16  ;;  %v7198_v45 = vld [vmem:[#allocation2 + $0x18] sm:$0xe]  ;;  %v3508_v24 = vshll.u32 %v3225_v43, 16  ;;  %v1755_v62 = vld [vmem:[#allocation2 + $0x1c] sm:$0xf] }
 0x10e   : > { %2035 = vst.msk [vmem:[#allocation3 + $0x1e8] sm:$0xff] %vm1183_vm15, %v5448_v10  ;;  %v3493_v39 = vsel %vm6309_vm7, %v3488_v3, %v3492_v35  ;;  %v5437_v48 = vcombine.low %v1857_v7, %v1860_v22  ;;  %v4024_v50 = vld [vmem:[#allocation3] sm:$0xff]  ;;  %v1944_v51 = vsel %vm6649_vm14, %v1942_v55, %v1943_v42  ;;  %v7203_v57 = vld [vmem:[#allocation2 + $0x20] sm:$0x1]  ;;  %v7205_v16 = vld [vmem:[#allocation2 + $0xa8] sm:$0xe] }
 0x10f   : > { %2211 = vst.msk [vmem:[#allocation3 + $0x1e8] sm:$0xff] %vm1731_vm1, %v6934_v41  ;;  %v2899_v41 = vsel %vm6649_vm14, %v2897_v5, %v2898_v28  ;;  %v5542_v4 = vcombine.low %v3493_v39, %v3503_v2  ;;  %v5449_v40 = vcombine.low %v1941_v17, %v1944_v51  ;;  %v3507_v26 = vrot.slane %v3505_v19, 4  ;;  %v1791_v63 = vld [vmem:[#allocation2 + $0xac] sm:$0xf]  ;;  %v7208_v15 = vld [vmem:[#allocation2 + $0xb0] sm:$0x1] }
 0x110   : > { %v5510_v32 = vcombine.low %v2896_v21, %v2899_v41  ;;  %v3514_v56 = vshll.u32 %v3226_v47, 16  ;;  %v3518_v60 = vshrl.u32 %v3226_v47, 16  ;;  %3186 = vst.msk [vmem:[#allocation3 + $0x1a8] sm:$0xff] %vm1183_vm15, %v6198_v14  ;;  %2024 = vst.msk [vmem:[#allocation3 + $0x30] sm:$0xff] %vm1183_vm15, %v5437_v48  ;;  %v3510_v46 = vrot.slane %v3508_v24, 5  ;;  %v4084_v1 = vld [vmem:[#allocation3 + $0x1e0] sm:$0xff] }
 0x111   : > { %v3675_v36 = vpop.permute.xlu1 %3674  ;;  %3692 = vrot.lane.b32.xlu0 %v5542_v4, %s6218_s29  ;;  %v3524_v18 = vshll.u32 %v3227_v12, 16  ;;  %v5495_v38 = vrot.slane %v2760_v61, 9  ;;  %v2902_v13 = vrot.slane %v2761_v30, 5  ;;  %v6158_v10 = vld [vmem:[%s8021_s3 + $0x80] sm:$0xff]   ;;  %2036 = vst.msk [vmem:[#allocation3 + $0x210] sm:$0xff] %vm1183_vm15, %v5449_v40  ;;  %v2905_v59 = vrot.slane %v2762_v31, 5  ;;  %v7261_v31 = vpop.permute.xlu0 %2161 }
 0x112   : > { %3721 = vst.msk [vmem:[#allocation3 + $0x40] sm:$0xff] %vm1731_vm1, %v3675_v36  ;;  %3003 = vrot.lane.b32.xlu1 %v5510_v32, %s6218_s29  ;;  %v8044_v35 = vld [vmem:[#allocation5_spill] sm:$0xff]  ;;  %v3516_v11 = vrot.slane %v3514_v56, 5  ;;  %v3520_v53 = vrot.slane %v3518_v60, 4  ;;  %v5422_v8 = vrot.slane %v7198_v45, 9  ;;  %v6160_v28 = vld [vmem:[%s8021_s3 + $0xc8] sm:$0xff]   ;;  %v3511_v6 = vor.u32 %v3510_v46, %v3507_v26 }
 0x113   : > { %v4025_v44 = vld [vmem:[#allocation3 + $0x8] sm:$0xff]  ;;  %2200 = vst.msk [vmem:[#allocation3 + $0x30] sm:$0xff] %vm1731_vm1, %v8044_v35  ;;  %v7226_v49 = vld [vmem:[#allocation2 + $0xa8] sm:$0xf]  ;;  %v3526_v23 = vrot.slane %v3524_v18, 5  ;;  %v2903_v33 = vsel %vm6649_vm14, %v5495_v38, %v2902_v13  ;;  %v2904_v29 = vrot.slane %v2902_v13, 4 }
 0x114   : > { %4472 = vmatprep.mubr.bf16.mxu0 %v4025_v44  ;;  %v8045_v9 = vld [vmem:[#allocation6_spill] sm:$0xff]  ;;  %v6208_v43 = vld [vmem:[%s8021_s3 + $0x100] sm:$0xff]   ;;  %v3521_v5 = vor.u32 %v3520_v53, %v3516_v11  ;;  %v1863_v0 = vrot.slane %v1755_v62, 5  ;;  %v1866_v47 = vrot.slane %v7203_v57, 5  ;;  %v5434_v20 = vrot.slane %v7205_v16, 9  ;;  %v7245_v7 = vld [vmem:[%s8021_s3 + $0x110] sm:$0xff]  }
 0x115   : > { %4473 = vmatmul.mubr.bf16.vlgmr.msra.gmra.mrb[0].mxu0 %v4024_v50  ;;  %2212 = vst.msk [vmem:[#allocation3 + $0x210] sm:$0xff] %vm1731_vm1, %v8045_v9  ;;  %v6161_v3 = vld [vmem:[%s8021_s3 + $0x88] sm:$0xff]   ;;  %v3512_v34 = vrot.slane %v3511_v6, 4  ;;  %v2906_v42 = vsel %vm6649_vm14, %v2904_v29, %v2905_v59  ;;  %v1947_v12 = vrot.slane %v1791_v63, 5  ;;  %v1950_v39 = vrot.slane %v7208_v15, 5  ;;  %v6163_v41 = vld [vmem:[%s8021_s3 + $0xd0] sm:$0xff]   ;;  %v7253_v17 = vpop.permute.xlu1 %2985 }
 0x116   : > { %v4085_v25 = vld [vmem:[#allocation3 + $0x1e8] sm:$0xff]  ;;  %6055 = vmatpush3.bf16.msra.mxu0 %v6208_v43  ;;  %v7238_v21 = vld [vmem:[#allocation2 + $0xac] sm:$0xf]  ;;  %v3522_v55 = vrot.slane %v3521_v5, 4  ;;  %v5511_v61 = vcombine.low %v2903_v33, %v2906_v42  ;;  %v1864_v30 = vsel %vm6649_vm14, %v5422_v8, %v1863_v0  ;;  %v1865_v36 = vrot.slane %v1863_v0, 4  ;;  %v6164_v56 = vld [vmem:[%s8021_s3 + $0x90] sm:$0xff]   ;;  %v1694_v8 = vpop.permute.xlu0 %1693 }
 0x117   : > { %4568 = vmatprep.mubr.bf16.mxu1 %v4085_v25  ;;  %6056 = vmatprep.subr.bf16.mxu0 %v6176_v37  ;;  %v3230_v2 = vld [vmem:[#allocation2 + $0xb0] sm:$0x1]  ;;  %v7257_v32 = vld [vmem:[#allocation2 + $0x9c] sm:$0xe]  ;;  %v2764_v22 = vld [vmem:[#allocation2 + $0xa0] sm:$0xf]  ;;  %v3517_v45 = vsel %vm6309_vm7, %v3512_v34, %v3516_v11  ;;  %v1948_v14 = vsel %vm6649_vm14, %v5434_v20, %v1947_v12 }
 0x118   : > { %4569 = vmatmul.mubr.bf16.vlgmr.msra.gmra.mrb[0].mxu1 %v4084_v1  ;;  %v7259_v19 = vld [vmem:[#allocation2 + $0xa4] sm:$0x1]  ;;  %v1949_v4 = vrot.slane %v1947_v12, 4  ;;  %v3529_v48 = vshrl.u32 %v7226_v49, 16  ;;  %v7268_v50 = vld [vmem:[#allocation2 + $0x24] sm:$0xe]  ;;  %v3527_v24 = vsel %vm6309_vm7, %v3522_v55, %v3526_v23  ;;  %3005 = vrot.lane.b32.xlu1 %v5511_v61, %s6218_s29  ;;  %v1867_v62 = vsel %vm6649_vm14, %v1865_v36, %v1866_v47 }
 0x119   : > { %5923 = vmatpush3.bf16.msra.mxu1 %v6158_v10  ;;  %v7270_v51 = vld [vmem:[#allocation2 + $0x28] sm:$0xf]  ;;  %v4029_v57 = vld [vmem:[#allocation3 + $0x28] sm:$0xff]  ;;  %v3532_v16 = vshll.u32 %v7226_v49, 16  ;;  %v3538_v44 = vshll.u32 %v7238_v21, 16  ;;  %v7288_v60 = vld [vmem:[%s8021_s3 + $0x118] sm:$0xff]   ;;  %v5543_v63 = vcombine.low %v3517_v45, %v3527_v24  ;;  %v5438_v15 = vcombine.low %v1864_v30, %v1867_v62  ;;  %v3677_v6 = vpop.permute.xlu1 %3676 }
 0x11a   : > { %5924 = vmatprep.subr.bf16.mxu1 %v6160_v28  ;;  %6057 = vmatpush3.bf16.msra.mxu0 %v6176_v37  ;;  %v7279_v40 = vld [vmem:[#allocation2 + $0x2c] sm:$0x1]  ;;  %v4089_v26 = vld [vmem:[#allocation3 + $0x208] sm:$0xff]  ;;  %v1951_v46 = vsel %vm6649_vm14, %v1949_v4, %v1950_v39  ;;  %v3531_v18 = vrot.slane %v3529_v48, 4  ;;  %v6166_v38 = vld [vmem:[%s8021_s3 + $0xd8] sm:$0xff]   ;;  %v3542_v11 = vshrl.u32 %v7238_v21, 16 }
 0x11b   : > { %6058 = vmatprep.subr.bf16.mxu0 %v7245_v7  ;;  %v4030_v37 = vld [vmem:[#allocation3 + $0x30] sm:$0xff]  ;;  %v5450_v13 = vcombine.low %v1948_v14, %v1951_v46  ;;  %v3534_v10 = vrot.slane %v3532_v16, 5  ;;  %v7295_v35 = vrot.slane %v3538_v44, 5  ;;  %v1793_v53 = vld [vmem:[#allocation2 + $0xb4] sm:$0xe]  ;;  %3694 = vrot.lane.b32.xlu0 %v5543_v63, %s6218_s29  ;;  %2025 = vst.msk [vmem:[#allocation3 + $0x58] sm:$0xff] %vm1183_vm15, %v5438_v15 }
 0x11c   : > { %4480 = vmatprep.mubr.bf16.mxu0 %v4030_v37  ;;  %v4090_v1 = vld [vmem:[#allocation3 + $0x210] sm:$0xff]  ;;  %v1794_v59 = vld [vmem:[#allocation2 + $0xb8] sm:$0xf]  ;;  %v3548_v25 = vshll.u32 %v3230_v2, 16  ;;  %v5496_v28 = vrot.slane %v7257_v32, 9  ;;  %v2909_v49 = vrot.slane %v2764_v22, 5 }
 0x11d   : > { %5925 = vmatpush3.bf16.msra.mxu1 %v6161_v3  ;;  %4481 = vmatmul.mubr.bf16.gmra.mrb[4].mxu0 %v4029_v57  ;;  %v2912_v9 = vrot.slane %v7259_v19, 5  ;;  %1737 = vst.msk [vmem:[#allocation3 + $0xc8] sm:$0xff] %vm1731_vm1, %v1694_v8  ;;  %v8046_v23 = vld [vmem:[#allocation7_spill] sm:$0xff]  ;;  %v3535_v33 = vor.u32 %v3534_v10, %v3531_v18  ;;  %v3544_v29 = vrot.slane %v3542_v11, 4  ;;  %v5423_v43 = vrot.slane %v7268_v50, 9  ;;  %3722 = vst.msk [vmem:[#allocation3 + $0x68] sm:$0xff] %vm1731_vm1, %v3677_v6 }
 0x11e   : > { %5926 = vmatprep.subr.bf16.mxu1 %v6163_v41  ;;  %2201 = vst.msk [vmem:[#allocation3 + $0x58] sm:$0xff] %vm1731_vm1, %v8046_v23  ;;  %4576 = vmatprep.mubr.bf16.mxu1 %v4090_v1  ;;  %v1870_v3 = vrot.slane %v7270_v51, 5  ;;  %v1795_v21 = vld [vmem:[#allocation2 + $0xbc] sm:$0x1]  ;;  %v3550_v47 = vrot.slane %v3548_v25, 5  ;;  %v2910_v20 = vsel %vm6649_vm14, %v5496_v28, %v2909_v49  ;;  %v2911_v34 = vrot.slane %v2909_v49, 4 }
 0x11f   : > { %2037 = vst.msk [vmem:[#allocation3 + $0x238] sm:$0xff] %vm1183_vm15, %v5450_v13  ;;  %6059 = vmatpush3.bf16.msra.mxu0 %v7245_v7  ;;  %v6199_v5 = vld [vmem:[#allocation2 + $0x9c] sm:$0xff]   ;;  %v1873_v42 = vrot.slane %v7279_v40, 5  ;;  %v6200_v39 = vld [vmem:[#allocation2 + $0xa8] sm:$0xff]   ;;  %v3536_v7 = vrot.slane %v3535_v33, 4  ;;  %v3545_v41 = vor.u32 %v3544_v29, %v7295_v35  ;;  %v5435_v32 = vrot.slane %v1793_v53, 9 }
 0x120   : > { %v8047_v0 = vld [vmem:[#allocation8_spill] sm:$0xff]  ;;  %4577 = vmatmul.mubr.bf16.gmra.mrb[4].mxu1 %v4089_v26  ;;  %6060 = vmatprep.subr.bf16.mxu0 %v7288_v60  ;;  %v1871_v55 = vsel %vm6649_vm14, %v5423_v43, %v1870_v3  ;;  %v1872_v61 = vrot.slane %v1870_v3, 4  ;;  %v3231_v30 = vld [vmem:[#allocation2 + $0xb4] sm:$0xf]  ;;  %3187 = vst.msk [vmem:[#allocation3 + $0x1d0] sm:$0xff] %vm1183_vm15, %v6199_v5  ;;  %v2913_v2 = vsel %vm6649_vm14, %v2911_v34, %v2912_v9  ;;  %v1954_v22 = vrot.slane %v1794_v59, 5 }
 0x121   : > { %2213 = vst.msk [vmem:[#allocation3 + $0x238] sm:$0xff] %vm1731_vm1, %v8047_v0  ;;  %v6167_v12 = vld [vmem:[%s8021_s3 + $0x98] sm:$0xff]   ;;  %5927 = vmatpush3.bf16.msra.mxu1 %v6164_v56  ;;  %v1957_v19 = vrot.slane %v1795_v21, 5  ;;  %v6169_v14 = vld [vmem:[%s8021_s3 + $0xe0] sm:$0xff]   ;;  %v3541_v4 = vsel %vm6309_vm7, %v3536_v7, %v7295_v35  ;;  %v3546_v48 = vrot.slane %v3545_v41, 4  ;;  %v5512_v50 = vcombine.low %v2910_v20, %v2913_v2  ;;  %v6173_v37 = vld [vmem:[%s8021_s3 + $0xe8] sm:$0xff]   ;;  %v7364_v7 = vpop.permute.xlu0 %2163 }
 0x122   : > { %v3232_v36 = vld [vmem:[#allocation2 + $0xb8] sm:$0xf]  ;;  %5928 = vmatprep.subr.bf16.mxu1 %v6166_v38  ;;  %v3233_v45 = vld [vmem:[#allocation2 + $0xbc] sm:$0x1]  ;;  %3188 = vst.msk [vmem:[#allocation3 + $0x1f8] sm:$0xff] %vm1183_vm15, %v6200_v39  ;;  %v1874_v51 = vsel %vm6649_vm14, %v1872_v61, %v1873_v42  ;;  %v6170_v16 = vld [vmem:[%s8021_s3 + $0xa0] sm:$0xff]   ;;  %v1955_v40 = vsel %vm6649_vm14, %v5435_v32, %v1954_v22 }
 0x123   : > { %v2766_v24 = vld [vmem:[#allocation2 + $0xa8] sm:$0xe]  ;;  %v2767_v62 = vld [vmem:[#allocation2 + $0xac] sm:$0xf]  ;;  %v7334_v57 = vld [vmem:[#allocation2 + $0xb0] sm:$0x1]  ;;  %6061 = vmatpush3.bf16.msra.mxu0 %v7288_v60  ;;  %v5439_v44 = vcombine.low %v1871_v55, %v1874_v51  ;;  %v3551_v46 = vsel %vm6309_vm7, %v3546_v48, %v3550_v47  ;;  %3007 = vrot.lane.b32.xlu1 %v5512_v50, %s6218_s29 }
 0x124   : > { %v1956_v26 = vrot.slane %v1954_v22, 4  ;;  %v3553_v56 = vshrl.u32 %v3231_v30, 16  ;;  %v1760_v63 = vld [vmem:[#allocation2 + $0x30] sm:$0xe]  ;;  %v1761_v15 = vld [vmem:[#allocation2 + $0x34] sm:$0xf]  ;;  %v5544_v35 = vcombine.low %v3541_v4, %v3551_v46 }
 0x125   : > { %v4034_v18 = vld [vmem:[#allocation3 + $0x50] sm:$0xff]  ;;  %5929 = vmatpush3.bf16.msra.mxu1 %v6167_v12  ;;  %v3556_v60 = vshll.u32 %v3231_v30, 16  ;;  %v3562_v38 = vshll.u32 %v3232_v36, 16  ;;  %v3566_v13 = vshrl.u32 %v3232_v36, 16  ;;  %v7348_v1 = vld [vmem:[#allocation2 + $0x38] sm:$0x1] }
 0x126   : > { %v1052_v10 = vld [vmem:[#allocation2 + $0xc8] sm:$0x1]  ;;  %2026 = vst.msk [vmem:[#allocation3 + $0x80] sm:$0xff] %vm1183_vm15, %v5439_v44  ;;  %v4035_v11 = vld [vmem:[#allocation3 + $0x58] sm:$0xff]  ;;  %v1958_v53 = vsel %vm6649_vm14, %v1956_v26, %v1957_v19  ;;  %v3555_v59 = vrot.slane %v3553_v56, 4  ;;  %v3572_v8 = vshll.u32 %v3233_v45, 16  ;;  %5930 = vmatprep.subr.bf16.mxu1 %v6169_v14  ;;  %3696 = vrot.lane.b32.xlu0 %v5544_v35, %s6218_s29  ;;  %v7373_v19 = vpop.permute.xlu1 %2987 }
 0x127   : > { %v4094_v25 = vld [vmem:[#allocation3 + $0x230] sm:$0xff]  ;;  %v8048_v28 = vld [vmem:[#allocation9_spill] sm:$0xff]  ;;  %4488 = vmatprep.mubr.bf16.mxu0 %v4035_v11  ;;  %v5451_v49 = vcombine.low %v1955_v40, %v1958_v53  ;;  %v3558_v6 = vrot.slane %v3556_v60, 5  ;;  %v3564_v23 = vrot.slane %v3562_v38, 5  ;;  %v3568_v33 = vrot.slane %v3566_v13, 4  ;;  %v6175_v0 = vld [vmem:[%s8021_s3 + $0xf0] sm:$0xff]   ;;  %v1696_v60 = vpop.permute.xlu0 %1695 }
 0x128   : > { %2202 = vst.msk [vmem:[#allocation3 + $0x80] sm:$0xff] %vm1731_vm1, %v8048_v28  ;;  %v4095_v9 = vld [vmem:[#allocation3 + $0x238] sm:$0xff]  ;;  %4489 = vmatmul.mubr.bf16.gmra.mrb[8].mxu0 %v4034_v18  ;;  %v3574_v29 = vrot.slane %v3572_v8, 5  ;;  %v5497_v43 = vrot.slane %v2766_v24, 9  ;;  %v2916_v3 = vrot.slane %v2767_v62, 5  ;;  %v2919_v21 = vrot.slane %v7334_v57, 5 }
 0x129   : > { %v6174_v5 = vld [vmem:[%s8021_s3 + $0xa8] sm:$0xff]   ;;  %2038 = vst.msk [vmem:[#allocation3 + $0x260] sm:$0xff] %vm1183_vm15, %v5451_v49  ;;  %4584 = vmatprep.mubr.bf16.mxu1 %v4095_v9  ;;  %v3559_v47 = vor.u32 %v3558_v6, %v3555_v59  ;;  %v3569_v20 = vor.u32 %v3568_v33, %v3564_v23  ;;  %v5424_v34 = vrot.slane %v1760_v63, 9  ;;  %v1877_v42 = vrot.slane %v1761_v15, 5  ;;  %5931 = vmatpush3.bf16.msra.mxu1 %v6170_v16  ;;  %v3234_v12 = vld [vmem:[#allocation2 + $0xc0] sm:$0xf] }
 0x12a   : > { %v3235_v39 = vld [vmem:[#allocation2 + $0xc4] sm:$0xf]  ;;  %v8049_v41 = vld [vmem:[#allocation10_spill] sm:$0xff]  ;;  %v2917_v55 = vsel %vm6649_vm14, %v5497_v43, %v2916_v3  ;;  %v2918_v61 = vrot.slane %v2916_v3, 4  ;;  %v1880_v30 = vrot.slane %v7348_v1, 5  ;;  %4585 = vmatmul.mubr.bf16.gmra.mrb[8].mxu1 %v4094_v25  ;;  %5932 = vmatprep.subr.bf16.mxu1 %v6173_v37  ;;  %v1053_v2 = vsel %vm6380_vm11, 0, %v1052_v10 }
 0x12b   : > { %2214 = vst.msk [vmem:[#allocation3 + $0x260] sm:$0xff] %vm1731_vm1, %v8049_v41  ;;  %v2769_v32 = vld [vmem:[#allocation2 + $0xb4] sm:$0xe]  ;;  %v2770_v22 = vld [vmem:[#allocation2 + $0xb8] sm:$0xf]  ;;  %v3560_v14 = vrot.slane %v3559_v47, 4  ;;  %v1878_v48 = vsel %vm6649_vm14, %v5424_v34, %v1877_v42 }
 0x12c   : > { %v6201_v45 = vld [vmem:[#allocation2 + $0xb4] sm:$0xff]   ;;  %v3570_v4 = vrot.slane %v3569_v20, 4  ;;  %v1879_v50 = vrot.slane %v1877_v42, 4  ;;  %1054 = vst [vmem:[#allocation2 + $0xc8] sm:$0x1] %v1053_v2  ;;  %v2920_v16 = vsel %vm6649_vm14, %v2918_v61, %v2919_v21  ;;  %v3577_v40 = vshrl.u32 %v3234_v12, 16 }
 0x12d   : > { %v7377_v51 = vld [vmem:[#allocation2 + $0xbc] sm:$0x1]  ;;  %v1763_v24 = vld [vmem:[#allocation2 + $0x3c] sm:$0xe]  ;;  %v1764_v62 = vld [vmem:[#allocation2 + $0x40] sm:$0xf]  ;;  %v3565_v15 = vsel %vm6309_vm7, %v3560_v14, %v3564_v23  ;;  %v5513_v46 = vcombine.low %v2917_v55, %v2920_v16  ;;  %5933 = vmatpush3.bf16.msra.mxu1 %v6174_v5 }
 0x12e   : > { %v6177_v57 = vld [vmem:[%s8021_s3 + $0xb0] sm:$0xff]   ;;  %v3580_v26 = vshll.u32 %v3234_v12, 16  ;;  %v3586_v56 = vshll.u32 %v3235_v39, 16  ;;  %v7384_v63 = vld [vmem:[#allocation2 + $0x44] sm:$0x1]  ;;  %3189 = vst.msk [vmem:[#allocation3 + $0x220] sm:$0xff] %vm1183_vm15, %v6201_v45  ;;  %v3575_v37 = vsel %vm6309_vm7, %v3570_v4, %v3574_v29  ;;  %v1881_v18 = vsel %vm6649_vm14, %v1879_v50, %v1880_v30  ;;  %5934 = vmatprep.subr.bf16.mxu1 %v6175_v0  ;;  %v3679_v29 = vpop.permute.xlu1 %3678 }
 0x12f   : > { %v4039_v44 = vld [vmem:[#allocation3 + $0x78] sm:$0xff]  ;;  %v5545_v38 = vcombine.low %v3565_v15, %v3575_v37  ;;  %v5440_v13 = vcombine.low %v1878_v48, %v1881_v18  ;;  %v4040_v1 = vld [vmem:[#allocation3 + $0x80] sm:$0xff]  ;;  %v3579_v10 = vrot.slane %v3577_v40, 4  ;;  %1738 = vst.msk [vmem:[#allocation3 + $0xf0] sm:$0xff] %vm1731_vm1, %v1696_v60  ;;  %3009 = vrot.lane.b32.xlu1 %v5513_v46, %s6218_s29  ;;  %v3590_v59 = vshrl.u32 %v3235_v39, 16  ;;  %v6202_v43 = vld [vmem:[#allocation2 + $0xc0] sm:$0xff]  }
 0x130   : > { %v3582_v35 = vrot.slane %v3580_v26, 5  ;;  %v6180_v11 = vld [vmem:[%s8021_s3 + $0xf8] sm:$0xff]   ;;  %4496 = vmatprep.mubr.bf16.mxu0 %v4040_v1  ;;  %v7398_v53 = vrot.slane %v3586_v56, 5  ;;  %v5498_v8 = vrot.slane %v2769_v32, 9  ;;  %v2923_v25 = vrot.slane %v2770_v22, 5  ;;  %v4099_v33 = vld [vmem:[#allocation3 + $0x258] sm:$0xff] }
 0x131   : > { %v2216_v28 = vld [vmem:[#allocation2 + $0x10] sm:$0xf]  ;;  %3698 = vrot.lane.b32.xlu0 %v5545_v38, %s6218_s29  ;;  %2027 = vst.msk [vmem:[#allocation3 + $0xa8] sm:$0xff] %vm1183_vm15, %v5440_v13  ;;  %4497 = vmatmul.mubr.bf16.gmra.mrb[12].mxu0 %v4039_v44  ;;  %v2926_v9 = vrot.slane %v7377_v51, 5  ;;  %v5425_v6 = vrot.slane %v1763_v24, 9  ;;  %v1884_v23 = vrot.slane %v1764_v62, 5 }
 0x132   : > { %v3583_v49 = vor.u32 %v3582_v35, %v3579_v10  ;;  %2203 = vst.msk [vmem:[#allocation3 + $0xa8] sm:$0xff] %vm1731_vm1, %v7094_v58  ;;  %v4100_v3 = vld [vmem:[#allocation3 + $0x260] sm:$0xff]  ;;  %v3592_v21 = vrot.slane %v3590_v59, 4  ;;  %v2924_v5 = vsel %vm6649_vm14, %v5498_v8, %v2923_v25  ;;  %v2925_v0 = vrot.slane %v2923_v25, 4  ;;  %v2217_v20 = vld [vmem:[#allocation2 + $0x14] sm:$0x1]  ;;  %5935 = vmatpush3.bf16.msra.mxu1 %v6177_v57  ;;  %v7432_v59 = vpop.permute.xlu0 %2165 }
 0x133   : > { %v1887_v47 = vrot.slane %v7384_v63, 5  ;;  %v6181_v34 = vld [vmem:[%s8021_s3 + $0xb8] sm:$0xff]   ;;  %v4027_v42 = vld [vmem:[#allocation3 + $0x18] sm:$0xff]  ;;  %3723 = vst.msk [vmem:[#allocation3 + $0x90] sm:$0xff] %vm1731_vm1, %v3679_v29  ;;  %4592 = vmatprep.mubr.bf16.mxu1 %v4100_v3  ;;  %v3236_v12 = vld [vmem:[#allocation2 + $0xc8] sm:$0x1]  ;;  %v1885_v39 = vsel %vm6649_vm14, %v5425_v6, %v1884_v23  ;;  %5936 = vmatprep.subr.bf16.mxu1 %v6180_v11 }
 0x134   : > { %v3584_v58 = vrot.slane %v3583_v49, 4  ;;  %v1886_v41 = vrot.slane %v1884_v23, 4  ;;  %v2273_v55 = vshll.u32 %v2216_v28, 16  ;;  %3190 = vst.msk [vmem:[#allocation3 + $0x248] sm:$0xff] %vm1183_vm15, %v6202_v43  ;;  %v3593_v61 = vor.u32 %v3592_v21, %v7398_v53  ;;  %v2215_v32 = vld [vmem:[#allocation2 + $0xc] sm:$0xf]  ;;  %4593 = vmatmul.mubr.bf16.gmra.mrb[12].mxu1 %v4099_v33 }
 0x135   : > { %v3596_v30 = vshll.u32 %v3236_v12, 16  ;;  %v2927_v36 = vsel %vm6649_vm14, %v2925_v0, %v2926_v9  ;;  %v2277_v2 = vshrl.u32 %v2216_v28, 16  ;;  %v3237_v22 = vld [vmem:[#allocation2 + $0xcc] sm:$0xf]  ;;  %4633 = vmatprep.mubr.bf16.mxu1 %v4027_v42  ;;  %v3238_v50 = vld [vmem:[#allocation2 + $0xd0] sm:$0xf] }
 0x136   : > { %v3589_v45 = vsel %vm6309_vm7, %v3584_v58, %v7398_v53  ;;  %v5514_v14 = vcombine.low %v2924_v5, %v2927_v36  ;;  %v1888_v4 = vsel %vm6649_vm14, %v1886_v41, %v1887_v47  ;;  %v7423_v48 = vrot.slane %v2273_v55, 5  ;;  %v4044_v16 = vld [vmem:[#allocation3 + $0xa0] sm:$0xff]  ;;  %5937 = vmatpush3.bf16.msra.mxu1 %v6181_v34  ;;  %v3239_v44 = vld [vmem:[#allocation2 + $0xd4] sm:$0x1]  ;;  %v2772_v40 = vld [vmem:[#allocation2 + $0xc0] sm:$0xe]  ;;  %v7440_v34 = vpop.permute.xlu1 %2989 }
 0x137   : > { %v3594_v51 = vrot.slane %v3593_v61, 4  ;;  %v3598_v24 = vrot.slane %v3596_v30, 5  ;;  %v5441_v62 = vcombine.low %v1885_v39, %v1888_v4  ;;  %v2279_v57 = vrot.slane %v2277_v2, 4  ;;  %v2773_v37 = vld [vmem:[#allocation2 + $0xc4] sm:$0xf]  ;;  %v6203_v8 = vld [vmem:[#allocation2 + $0xcc] sm:$0xff]   ;;  %v1698_v61 = vpop.permute.xlu0 %1697 }
 0x138   : > { %3011 = vrot.lane.b32.xlu1 %v5514_v14, %s6218_s29  ;;  %v2283_v26 = vshll.u32 %v2217_v20, 16  ;;  %v2264_v56 = vshrl.u32 %v2215_v32, 16  ;;  %v2267_v63 = vshll.u32 %v2215_v32, 16  ;;  %v3601_v15 = vshrl.u32 %v3237_v22, 16  ;;  %v2774_v46 = vld [vmem:[#allocation2 + $0xc8] sm:$0x1] }
 0x139   : > { %v3599_v18 = vsel %vm6309_vm7, %v3594_v51, %v3598_v24  ;;  %2028 = vst.msk [vmem:[#allocation3 + $0xd0] sm:$0xff] %vm1183_vm15, %v5441_v62  ;;  %v2280_v60 = vor.u32 %v2279_v57, %v7423_v48  ;;  %v3604_v38 = vshll.u32 %v3237_v22, 16  ;;  %v3610_v13 = vshll.u32 %v3238_v50, 16  ;;  %v4045_v53 = vld [vmem:[#allocation3 + $0xa8] sm:$0xff]  ;;  %v1766_v6 = vld [vmem:[#allocation2 + $0x48] sm:$0xe] }
 0x13a   : > { %v5546_v1 = vcombine.low %v3589_v45, %v3599_v18  ;;  %2204 = vst.msk [vmem:[#allocation3 + $0xd0] sm:$0xff] %vm1731_vm1, %v7261_v31  ;;  %v2285_v10 = vrot.slane %v2283_v26, 5  ;;  %v2266_v35 = vrot.slane %v2264_v56, 4  ;;  %v2269_v11 = vrot.slane %v2267_v63, 5  ;;  %4504 = vmatprep.mubr.bf16.mxu0 %v4045_v53  ;;  %v1767_v43 = vld [vmem:[#allocation2 + $0x4c] sm:$0xf] }
 0x13b   : > { %v2281_v25 = vrot.slane %v2280_v60, 4  ;;  %v3603_v28 = vrot.slane %v3601_v15, 4  ;;  %v3606_v49 = vrot.slane %v3604_v38, 5  ;;  %v7434_v9 = vrot.slane %v3610_v13, 5  ;;  %4505 = vmatmul.mubr.bf16.gmra.mrb[16].mxu0 %v4044_v16  ;;  %3191 = vst.msk [vmem:[#allocation3 + $0x270] sm:$0xff] %vm1183_vm15, %v6203_v8  ;;  %v4049_v22 = vld [vmem:[#allocation3 + $0xc8] sm:$0xff]  ;;  %v3681_v38 = vpop.permute.xlu1 %3680 }
 0x13c   : > { %3700 = vrot.lane.b32.xlu0 %v5546_v1, %s6218_s29  ;;  %v2270_v23 = vor.u32 %v2269_v11, %v2266_v35  ;;  %v3614_v33 = vshrl.u32 %v3238_v50, 16  ;;  %v3620_v31 = vshll.u32 %v3239_v44, 16  ;;  %v5499_v29 = vrot.slane %v2772_v40, 9  ;;  %v1768_v47 = vld [vmem:[#allocation2 + $0x50] sm:$0x1]  ;;  %1739 = vst.msk [vmem:[#allocation3 + $0x118] sm:$0xff] %vm1731_vm1, %v1698_v61 }
 0x13d   : > { %v2286_v3 = vsel %vm6309_vm7, %v2281_v25, %v2285_v10  ;;  %v3607_v21 = vor.u32 %v3606_v49, %v3603_v28  ;;  %v2930_v5 = vrot.slane %v2773_v37, 5  ;;  %v2933_v0 = vrot.slane %v2774_v46, 5  ;;  %v2218_v20 = vld [vmem:[#allocation2 + $0x18] sm:$0xf]  ;;  %v2219_v41 = vld [vmem:[#allocation2 + $0x1c] sm:$0xf] }
 0x13e   : > { %v2271_v42 = vrot.slane %v2270_v23, 4  ;;  %v3616_v12 = vrot.slane %v3614_v33, 4  ;;  %v3622_v58 = vrot.slane %v3620_v31, 5  ;;  %v5426_v39 = vrot.slane %v1766_v6, 9  ;;  %v2220_v55 = vld [vmem:[#allocation2 + $0x20] sm:$0x1] }
 0x13f   : > { %v3608_v30 = vrot.slane %v3607_v21, 4  ;;  %v2931_v36 = vsel %vm6649_vm14, %v5499_v29, %v2930_v5  ;;  %v2932_v2 = vrot.slane %v2930_v5, 4  ;;  %v1891_v32 = vrot.slane %v1767_v43, 5  ;;  %v1769_v45 = vld [vmem:[#allocation2 + $0x54] sm:$0xe]  ;;  %3724 = vst.msk [vmem:[#allocation3 + $0xb8] sm:$0xff] %vm1731_vm1, %v3681_v38 }
 0x140   : > { %v1770_v14 = vld [vmem:[#allocation2 + $0x58] sm:$0xf]  ;;  %v2276_v4 = vsel %vm6309_vm7, %v2271_v42, %v7423_v48  ;;  %v3617_v50 = vor.u32 %v3616_v12, %v7434_v9  ;;  %v1894_v51 = vrot.slane %v1768_v47, 5  ;;  %v2288_v24 = vshrl.u32 %v2218_v20, 16  ;;  %v1771_v15 = vld [vmem:[#allocation2 + $0x5c] sm:$0x1] }
 0x141   : > { %v5468_v62 = vcombine.low %v2276_v4, %v2286_v3  ;;  %v3613_v57 = vsel %vm6309_vm7, %v3608_v30, %v7434_v9  ;;  %v2934_v16 = vsel %vm6649_vm14, %v2932_v2, %v2933_v0  ;;  %v1892_v44 = vsel %vm6649_vm14, %v5426_v39, %v1891_v32  ;;  %v4050_v40 = vld [vmem:[#allocation3 + $0xd0] sm:$0xff]  ;;  %v2221_v11 = vld [vmem:[#allocation2 + $0x24] sm:$0xf]  ;;  %v1772_v21 = vld [vmem:[#allocation2 + $0x60] sm:$0xe] }
 0x142   : > { %v3618_v26 = vrot.slane %v3617_v50, 4  ;;  %v5515_v56 = vcombine.low %v2931_v36, %v2934_v16  ;;  %v1893_v63 = vrot.slane %v1891_v32, 4  ;;  %v2290_v48 = vrot.slane %v2288_v24, 4  ;;  %4512 = vmatprep.mubr.bf16.mxu0 %v4050_v40  ;;  %v2222_v53 = vld [vmem:[#allocation2 + $0x28] sm:$0xf]  ;;  %v4032_v30 = vld [vmem:[#allocation3 + $0x40] sm:$0xff] }
 0x143   : > { %2711 = vst.msk [vmem:[#allocation3 + $0x10] sm:$0xff] %vm1183_vm15, %v5468_v62  ;;  %v2291_v37 = vshll.u32 %v2218_v20, 16  ;;  %v2297_v46 = vshll.u32 %v2219_v41, 16  ;;  %v2301_v18 = vshrl.u32 %v2219_v41, 16  ;;  %v2307_v60 = vshll.u32 %v2220_v55, 16  ;;  %4513 = vmatmul.mubr.bf16.gmra.mrb[20].mxu0 %v4049_v22 }
 0x144   : > { %3031 = vst.msk [vmem:[#allocation3 + $0x10] sm:$0xff] %vm1731_vm1, %v7178_v52  ;;  %v3623_v13 = vsel %vm6309_vm7, %v3618_v26, %v3622_v58  ;;  %3013 = vrot.lane.b32.xlu1 %v5515_v56, %s6218_s29  ;;  %v1895_v1 = vsel %vm6649_vm14, %v1893_v63, %v1894_v51  ;;  %v5427_v10 = vrot.slane %v1769_v45, 9  ;;  %v1898_v35 = vrot.slane %v1770_v14, 5  ;;  %v2223_v52 = vld [vmem:[#allocation2 + $0x2c] sm:$0x1]  ;;  %v7478_v26 = vpop.permute.xlu1 %2991 }
 0x145   : > { %v5547_v8 = vcombine.low %v3613_v57, %v3623_v13  ;;  %v5442_v25 = vcombine.low %v1892_v44, %v1895_v1  ;;  %v2293_v28 = vrot.slane %v2291_v37, 5  ;;  %v2299_v49 = vrot.slane %v2297_v46, 5  ;;  %v1773_v42 = vld [vmem:[#allocation2 + $0x64] sm:$0xf]  ;;  %v1774_v55 = vld [vmem:[#allocation2 + $0x68] sm:$0x1]  ;;  %v2168_v44 = vpop.permute.xlu0 %2167 }
 0x146   : > { %v2303_v9 = vrot.slane %v2301_v18, 4  ;;  %v2309_v6 = vrot.slane %v2307_v60, 5  ;;  %v1899_v23 = vsel %vm6649_vm14, %v5427_v10, %v1898_v35  ;;  %v1900_v33 = vrot.slane %v1898_v35, 4  ;;  %v2224_v22 = vld [vmem:[#allocation2 + $0x30] sm:$0xf]  ;;  %v4054_v60 = vld [vmem:[#allocation3 + $0xf0] sm:$0xff] }
 0x147   : > { %3702 = vrot.lane.b32.xlu0 %v5547_v8, %s6218_s29  ;;  %2029 = vst.msk [vmem:[#allocation3 + $0xf8] sm:$0xff] %vm1183_vm15, %v5442_v25  ;;  %v2294_v31 = vor.u32 %v2293_v28, %v2290_v48  ;;  %v1901_v29 = vrot.slane %v1771_v15, 5  ;;  %v2312_v43 = vshrl.u32 %v2221_v11, 16  ;;  %v2315_v3 = vshll.u32 %v2221_v11, 16  ;;  %v2225_v51 = vld [vmem:[#allocation2 + $0x34] sm:$0xf] }
 0x148   : > { %2205 = vst.msk [vmem:[#allocation3 + $0xf8] sm:$0xff] %vm1731_vm1, %v7364_v7  ;;  %v2304_v5 = vor.u32 %v2303_v9, %v2299_v49  ;;  %v2321_v0 = vshll.u32 %v2222_v53, 16  ;;  %v2325_v47 = vshrl.u32 %v2222_v53, 16  ;;  %v2331_v20 = vshll.u32 %v2223_v52, 16  ;;  %v2226_v40 = vld [vmem:[#allocation2 + $0x38] sm:$0x1] }
 0x149   : > { %v2295_v12 = vrot.slane %v2294_v31, 4  ;;  %v1902_v58 = vsel %vm6649_vm14, %v1900_v33, %v1901_v29  ;;  %v2314_v39 = vrot.slane %v2312_v43, 4  ;;  %v2317_v41 = vrot.slane %v2315_v3, 5  ;;  %v1775_v37 = vld [vmem:[#allocation2 + $0x6c] sm:$0xe]  ;;  %v1700_v9 = vpop.permute.xlu0 %1699  ;;  %s5351_s29 = sshll.u32 %s6255_s19, 5 }
 0x14a   : > { %v2305_v61 = vrot.slane %v2304_v5, 4  ;;  %v5443_v36 = vcombine.low %v1899_v23, %v1902_v58  ;;  %v2323_v2 = vrot.slane %v2321_v0, 5  ;;  %v2327_v32 = vrot.slane %v2325_v47, 4  ;;  %v1776_v46 = vld [vmem:[#allocation2 + $0x70] sm:$0xf]  ;;  %1740 = vst.msk [vmem:[#allocation3 + $0x140] sm:$0xff] %vm1731_vm1, %v1700_v9  ;;  %v3683_v47 = vpop.permute.xlu1 %3682 }
 0x14b   : > { %v2300_v7 = vsel %vm6309_vm7, %v2295_v12, %v2299_v49  ;;  %v4026_v45 = vld [vmem:[#allocation3 + $0x10] sm:$0xff]  ;;  %v2318_v14 = vor.u32 %v2317_v41, %v2314_v39  ;;  %v2333_v4 = vrot.slane %v2331_v20, 5  ;;  %v5428_v50 = vrot.slane %v1772_v21, 9  ;;  %v1777_v10 = vld [vmem:[#allocation2 + $0x74] sm:$0x1]  ;;  %3725 = vst.msk [vmem:[#allocation3 + $0xe0] sm:$0xff] %vm1731_vm1, %v3683_v47 }
 0x14c   : > { %v2310_v24 = vsel %vm6309_vm7, %v2305_v61, %v2309_v6  ;;  %4634 = vmatmul.mubr.bf16.vlgmr.msra.gmra.mrb[16].mxu1 %v4026_v45  ;;  %2030 = vst.msk [vmem:[#allocation3 + $0x120] sm:$0xff] %vm1183_vm15, %v5443_v36  ;;  %v2328_v62 = vor.u32 %v2327_v32, %v2323_v2  ;;  %v1905_v57 = vrot.slane %v1773_v42, 5  ;;  %v1908_v16 = vrot.slane %v1774_v55, 5  ;;  %v2227_v6 = vld [vmem:[#allocation2 + $0x3c] sm:$0xf]  ;;  %v4037_v32 = vld [vmem:[#allocation3 + $0x68] sm:$0xff] }
 0x14d   : > { %v5469_v56 = vcombine.low %v2300_v7, %v2310_v24  ;;  %4641 = vmatprep.mubr.bf16.mxu1 %v4032_v30  ;;  %2206 = vst.msk [vmem:[#allocation3 + $0x120] sm:$0xff] %vm1731_vm1, %v7432_v59  ;;  %v2319_v63 = vrot.slane %v2318_v14, 4  ;;  %v2336_v48 = vshrl.u32 %v2224_v22, 16  ;;  %v2339_v15 = vshll.u32 %v2224_v22, 16  ;;  %v2228_v43 = vld [vmem:[#allocation2 + $0x40] sm:$0xf] }
 0x14e   : > { %v2329_v18 = vrot.slane %v2328_v62, 4  ;;  %v1906_v38 = vsel %vm6649_vm14, %v5428_v50, %v1905_v57  ;;  %v1907_v13 = vrot.slane %v1905_v57, 4  ;;  %v2345_v1 = vshll.u32 %v2225_v51, 16  ;;  %v2229_v0 = vld [vmem:[#allocation2 + $0x44] sm:$0x1]  ;;  %p228_p4 = scmp.lt.s32.totalorder %s5351_s29, 63 }
 0x14f   : > { %2712 = vst.msk [vmem:[#allocation3 + $0x38] sm:$0xff] %vm1183_vm15, %v5469_v56  ;;  %v2324_v35 = vsel %vm6309_vm7, %v2319_v63, %v2323_v2  ;;  %v4055_v11 = vld [vmem:[#allocation3 + $0xf8] sm:$0xff]  ;;  %v2338_v59 = vrot.slane %v2336_v48, 4  ;;  %v2341_v53 = vrot.slane %v2339_v15, 5  ;;  %v2349_v8 = vshrl.u32 %v2225_v51, 16 }
 0x150   : > { %3032 = vst.msk [vmem:[#allocation3 + $0x38] sm:$0xff] %vm1731_vm1, %v7253_v17  ;;  %v2334_v25 = vsel %vm6309_vm7, %v2329_v18, %v2333_v4  ;;  %4520 = vmatprep.mubr.bf16.mxu0 %v4055_v11  ;;  %v1909_v28 = vsel %vm6649_vm14, %v1907_v13, %v1908_v16  ;;  %v2347_v49 = vrot.slane %v2345_v1, 5  ;;  %v2355_v52 = vshll.u32 %v2226_v40, 16  ;;  %v1778_v39 = vld [vmem:[#allocation2 + $0x78] sm:$0xe]  ;;  %s8052_s29 = smov (!%p228_p4, %s5351_s29), 63 }
 0x151   : > { %v5470_v23 = vcombine.low %v2324_v35, %v2334_v25  ;;  %4521 = vmatmul.mubr.bf16.gmra.mrb[24].mxu0 %v4054_v60  ;;  %v5444_v33 = vcombine.low %v1906_v38, %v1909_v28  ;;  %v2342_v31 = vor.u32 %v2341_v53, %v2338_v59  ;;  %v2351_v29 = vrot.slane %v2349_v8, 4  ;;  %v1779_v2 = vld [vmem:[#allocation2 + $0x7c] sm:$0xf]  ;;  %v1780_v4 = vld [vmem:[#allocation2 + $0x80] sm:$0x1]  ;;  %s5352_s19 = sshll.u32 %s8052_s29, 2 }
 0x152   : > { %v2357_v17 = vrot.slane %v2355_v52, 5  ;;  %v5429_v3 = vrot.slane %v1775_v37, 9  ;;  %v1912_v21 = vrot.slane %v1776_v46, 5  ;;  %v1915_v5 = vrot.slane %v1777_v10, 5  ;;  %v2230_v57 = vld [vmem:[#allocation2 + $0x48] sm:$0xf]  ;;  %s7826_s6 = scalar_lea.vmem %s8022_s4, %s5352_s19 }
 0x153   : > { %2713 = vst.msk [vmem:[#allocation3 + $0x60] sm:$0xff] %vm1183_vm15, %v5470_v23  ;;  %2031 = vst.msk [vmem:[#allocation3 + $0x148] sm:$0xff] %vm1183_vm15, %v5444_v33  ;;  %v2343_v20 = vrot.slane %v2342_v31, 4  ;;  %v2352_v42 = vor.u32 %v2351_v29, %v2347_v49  ;;  %v2360_v12 = vshrl.u32 %v2227_v6, 16  ;;  %v2363_v58 = vshll.u32 %v2227_v6, 16 }
 0x154   : > { %3033 = vst.msk [vmem:[#allocation3 + $0x60] sm:$0xff] %vm1731_vm1, %v7373_v19  ;;  %2207 = vst.msk [vmem:[#allocation3 + $0x148] sm:$0xff] %vm1731_vm1, %v2168_v44  ;;  %v4060_v41 = vld [vmem:[#allocation3 + $0x120] sm:$0xff]  ;;  %v1913_v55 = vsel %vm6649_vm14, %v5429_v3, %v1912_v21  ;;  %v1914_v61 = vrot.slane %v1912_v21, 4  ;;  %v2369_v30 = vshll.u32 %v2228_v43, 16  ;;  %v2373_v36 = vshrl.u32 %v2228_v43, 16  ;;  %v2170_v21 = vpop.permute.xlu0 %2169 }
 0x155   : > { %v2348_v22 = vsel %vm6309_vm7, %v2343_v20, %v2347_v49  ;;  %v2353_v7 = vrot.slane %v2352_v42, 4  ;;  %4528 = vmatprep.mubr.bf16.mxu0 %v4060_v41  ;;  %v2362_v45 = vrot.slane %v2360_v12, 4  ;;  %v2365_v14 = vrot.slane %v2363_v58, 5  ;;  %v4059_v19 = vld [vmem:[#allocation3 + $0x118] sm:$0xff]  ;;  %v2231_v48 = vld [vmem:[#allocation2 + $0x4c] sm:$0xf] }
 0x156   : > { %v1916_v50 = vsel %vm6649_vm14, %v1914_v61, %v1915_v5  ;;  %v2371_v51 = vrot.slane %v2369_v30, 5  ;;  %v2375_v24 = vrot.slane %v2373_v36, 4  ;;  %v2379_v62 = vshll.u32 %v2229_v0, 16  ;;  %v2232_v60 = vld [vmem:[#allocation2 + $0x50] sm:$0x1]  ;;  %v4042_v58 = vld [vmem:[#allocation3 + $0x90] sm:$0xff] }
 0x157   : > { %v4031_v16 = vld [vmem:[#allocation3 + $0x38] sm:$0xff]  ;;  %v2358_v44 = vsel %vm6309_vm7, %v2353_v7, %v2357_v17  ;;  %v5445_v40 = vcombine.low %v1913_v55, %v1916_v50  ;;  %v2366_v56 = vor.u32 %v2365_v14, %v2362_v45  ;;  %v5430_v63 = vrot.slane %v1778_v39, 9  ;;  %v1781_v35 = vld [vmem:[#allocation2 + $0x84] sm:$0xe]  ;;  %v1782_v25 = vld [vmem:[#allocation2 + $0x88] sm:$0xf]  ;;  %v7520_v17 = vpop.permute.xlu1 %2993 }
 0x158   : > { %4642 = vmatmul.mubr.bf16.gmra.mrb[20].mxu1 %v4031_v16  ;;  %v5471_v15 = vcombine.low %v2348_v22, %v2358_v44  ;;  %v2376_v37 = vor.u32 %v2375_v24, %v2371_v51  ;;  %v2381_v46 = vrot.slane %v2379_v62, 5  ;;  %v1919_v18 = vrot.slane %v1779_v2, 5  ;;  %v1783_v23 = vld [vmem:[#allocation2 + $0x8c] sm:$0x1]  ;;  %v2234_v42 = vld [vmem:[#allocation2 + $0x58] sm:$0xf] }
 0x159   : > { %4649 = vmatprep.mubr.bf16.mxu1 %v4037_v32  ;;  %4529 = vmatmul.mubr.bf16.gmra.mrb[28].mxu0 %v4059_v19  ;;  %2032 = vst.msk [vmem:[#allocation3 + $0x170] sm:$0xff] %vm1183_vm15, %v5445_v40  ;;  %v2367_v38 = vrot.slane %v2366_v56, 4  ;;  %v1922_v13 = vrot.slane %v1780_v4, 5  ;;  %v2384_v1 = vshrl.u32 %v2230_v57, 16  ;;  %v2387_v10 = vshll.u32 %v2230_v57, 16  ;;  %v4064_v39 = vld [vmem:[#allocation3 + $0x140] sm:$0xff] }
 0x15a   : > { %2714 = vst.msk [vmem:[#allocation3 + $0x88] sm:$0xff] %vm1183_vm15, %v5471_v15  ;;  %v2377_v11 = vrot.slane %v2376_v37, 4  ;;  %v1920_v59 = vsel %vm6649_vm14, %v5430_v63, %v1919_v18  ;;  %v1921_v53 = vrot.slane %v1919_v18, 4  ;;  %v2393_v8 = vshll.u32 %v2231_v48, 16  ;;  %v2235_v12 = vld [vmem:[#allocation2 + $0x5c] sm:$0x1] }
 0x15b   : > { %3034 = vst.msk [vmem:[#allocation3 + $0x88] sm:$0xff] %vm1731_vm1, %v7440_v34  ;;  %v2372_v28 = vsel %vm6309_vm7, %v2367_v38, %v2371_v51  ;;  %v4065_v49 = vld [vmem:[#allocation3 + $0x148] sm:$0xff]  ;;  %v2386_v52 = vrot.slane %v2384_v1, 4  ;;  %v2389_v9 = vrot.slane %v2387_v10, 5  ;;  %v2397_v6 = vshrl.u32 %v2231_v48, 16  ;;  %v4036_v3 = vld [vmem:[#allocation3 + $0x60] sm:$0xff]  ;;  %v1702_v51 = vpop.permute.xlu0 %1701  ;;  %v3685_v44 = vpop.permute.xlu1 %3684 }
 0x15c   : > { %v2382_v33 = vsel %vm6309_vm7, %v2377_v11, %v2381_v46  ;;  %4536 = vmatprep.mubr.bf16.mxu0 %v4065_v49  ;;  %v1923_v31 = vsel %vm6649_vm14, %v1921_v53, %v1922_v13  ;;  %v2395_v29 = vrot.slane %v2393_v8, 5  ;;  %v2403_v43 = vshll.u32 %v2232_v60, 16  ;;  %v2233_v34 = vld [vmem:[#allocation2 + $0x54] sm:$0xf]  ;;  %2208 = vst.msk [vmem:[#allocation3 + $0x170] sm:$0xff] %vm1731_vm1, %v2170_v21  ;;  %1741 = vst.msk [vmem:[#allocation3 + $0x168] sm:$0xff] %vm1731_vm1, %v1702_v51 }
 0x15d   : > { %v5472_v5 = vcombine.low %v2372_v28, %v2382_v33  ;;  %v5446_v0 = vcombine.low %v1920_v59, %v1923_v31  ;;  %v2390_v47 = vor.u32 %v2389_v9, %v2386_v52  ;;  %v2399_v20 = vrot.slane %v2397_v6, 4  ;;  %v2236_v7 = vld [vmem:[#allocation2 + $0x60] sm:$0xf]  ;;  %v2237_v50 = vld [vmem:[#allocation2 + $0x64] sm:$0xf]  ;;  %3726 = vst.msk [vmem:[#allocation3 + $0x108] sm:$0xff] %vm1731_vm1, %v3685_v44 }
 0x15e   : > { %v2405_v41 = vrot.slane %v2403_v43, 5  ;;  %v5431_v55 = vrot.slane %v1781_v35, 9  ;;  %v1926_v61 = vrot.slane %v1782_v25, 5  ;;  %v1929_v30 = vrot.slane %v1783_v23, 5  ;;  %v2238_v46 = vld [vmem:[#allocation2 + $0x68] sm:$0x1] }
 0x15f   : > { %2715 = vst.msk [vmem:[#allocation3 + $0xb0] sm:$0xff] %vm1183_vm15, %v5472_v5  ;;  %2033 = vst.msk [vmem:[#allocation3 + $0x198] sm:$0xff] %vm1183_vm15, %v5446_v0  ;;  %v2391_v36 = vrot.slane %v2390_v47, 4  ;;  %v2400_v2 = vor.u32 %v2399_v20, %v2395_v29  ;;  %v2408_v32 = vshrl.u32 %v2233_v34, 16  ;;  %v2411_v22 = vshll.u32 %v2233_v34, 16  ;;  %v4047_v52 = vld [vmem:[#allocation3 + $0xb8] sm:$0xff]  ;;  %v2996_v6 = vpop.permute.xlu1 %2995 }
 0x160   : > { %4650 = vmatmul.mubr.bf16.gmra.mrb[24].mxu1 %v4036_v3  ;;  %3035 = vst.msk [vmem:[#allocation3 + $0xb0] sm:$0xff] %vm1731_vm1, %v7478_v26  ;;  %v1927_v45 = vsel %vm6649_vm14, %v5431_v55, %v1926_v61  ;;  %v1928_v14 = vrot.slane %v1926_v61, 4  ;;  %v2417_v4 = vshll.u32 %v2234_v42, 16  ;;  %v2421_v19 = vshrl.u32 %v2234_v42, 16  ;;  %v2239_v60 = vld [vmem:[#allocation2 + $0x6c] sm:$0xf]  ;;  %v2172_v44 = vpop.permute.xlu0 %2171 }
 0x161   : > { %4657 = vmatprep.mubr.bf16.mxu1 %v4042_v58  ;;  %4537 = vmatmul.mubr.bf16.gmra.mrb[32].mxu0 %v4064_v39  ;;  %v2396_v24 = vsel %vm6309_vm7, %v2391_v36, %v2395_v29  ;;  %v2401_v62 = vrot.slane %v2400_v2, 4  ;;  %v2410_v57 = vrot.slane %v2408_v32, 4  ;;  %v2413_v16 = vrot.slane %v2411_v22, 5  ;;  %v2240_v35 = vld [vmem:[#allocation2 + $0x70] sm:$0xf]  ;;  %2209 = vst.msk [vmem:[#allocation3 + $0x198] sm:$0xff] %vm1731_vm1, %v2172_v44 }
 0x162   : > { %v1930_v26 = vsel %vm6649_vm14, %v1928_v14, %v1929_v30  ;;  %v2419_v40 = vrot.slane %v2417_v4, 5  ;;  %v2423_v56 = vrot.slane %v2421_v19, 4  ;;  %v2427_v63 = vshll.u32 %v2235_v12, 16  ;;  %v4041_v11 = vld [vmem:[#allocation3 + $0x88] sm:$0xff]  ;;  %v2241_v49 = vld [vmem:[#allocation2 + $0x74] sm:$0x1] }
 0x163   : > { %v2406_v48 = vsel %vm6309_vm7, %v2401_v62, %v2405_v41  ;;  %v5447_v15 = vcombine.low %v1927_v45, %v1930_v26  ;;  %v2414_v37 = vor.u32 %v2413_v16, %v2410_v57  ;;  %v2432_v18 = vshrl.u32 %v2236_v7, 16  ;;  %v4070_v59 = vld [vmem:[#allocation3 + $0x170] sm:$0xff]  ;;  %v3736_v21 = vld [vmem:[#allocation2 + $0x18] sm:$0xe]  ;;  %v3737_v42 = vld [vmem:[#allocation2 + $0x1c] sm:$0xf]  ;;  %v3687_v51 = vpop.permute.xlu1 %3686 }
 0x164   : > { %v5473_v38 = vcombine.low %v2396_v24, %v2406_v48  ;;  %v2424_v13 = vor.u32 %v2423_v56, %v2419_v40  ;;  %v2429_v1 = vrot.slane %v2427_v63, 5  ;;  %v2435_v10 = vshll.u32 %v2236_v7, 16  ;;  %4544 = vmatprep.mubr.bf16.mxu0 %v4070_v59  ;;  %v3738_v12 = vld [vmem:[#allocation2 + $0x20] sm:$0x1]  ;;  %v3739_v61 = vld [vmem:[#allocation2 + $0x24] sm:$0xe] }
 0x165   : > { %2034 = vst.msk [vmem:[#allocation3 + $0x1c0] sm:$0xff] %vm1183_vm15, %v5447_v15  ;;  %v2415_v53 = vrot.slane %v2414_v37, 4  ;;  %v2434_v8 = vrot.slane %v2432_v18, 4  ;;  %v2441_v25 = vshll.u32 %v2237_v50, 16  ;;  %v2445_v28 = vshrl.u32 %v2237_v50, 16  ;;  %v4069_v58 = vld [vmem:[#allocation3 + $0x168] sm:$0xff] }
 0x166   : > { %2716 = vst.msk [vmem:[#allocation3 + $0xd8] sm:$0xff] %vm1183_vm15, %v5473_v38  ;;  %v2425_v9 = vrot.slane %v2424_v13, 4  ;;  %v2437_v23 = vrot.slane %v2435_v10, 5  ;;  %v2451_v33 = vshll.u32 %v2238_v46, 16  ;;  %v2456_v31 = vshrl.u32 %v2239_v60, 16  ;;  %v4052_v37 = vld [vmem:[#allocation3 + $0xe0] sm:$0xff] }
 0x167   : > { %3036 = vst.msk [vmem:[#allocation3 + $0xd8] sm:$0xff] %vm1731_vm1, %v7520_v17  ;;  %v2420_v29 = vsel %vm6309_vm7, %v2415_v53, %v2419_v40  ;;  %v2443_v43 = vrot.slane %v2441_v25, 5  ;;  %v2447_v34 = vrot.slane %v2445_v28, 4  ;;  %v2459_v3 = vshll.u32 %v2239_v60, 16  ;;  %v3740_v30 = vld [vmem:[#allocation2 + $0x28] sm:$0xf] }
 0x168   : > { %4658 = vmatmul.mubr.bf16.gmra.mrb[28].mxu1 %v4041_v11  ;;  %v2430_v5 = vsel %vm6309_vm7, %v2425_v9, %v2429_v1  ;;  %v2438_v0 = vor.u32 %v2437_v23, %v2434_v8  ;;  %v2453_v47 = vrot.slane %v2451_v33, 5  ;;  %v2458_v20 = vrot.slane %v2456_v31, 4  ;;  %v3741_v7 = vld [vmem:[#allocation2 + $0x2c] sm:$0x1]  ;;  %v2242_v45 = vld [vmem:[#allocation2 + $0x78] sm:$0xf]  ;;  %v2998_v8 = vpop.permute.xlu1 %2997  ;;  %v1704_v23 = vpop.permute.xlu0 %1703 }
 0x169   : > { %4665 = vmatprep.mubr.bf16.mxu1 %v4047_v52  ;;  %v5474_v39 = vcombine.low %v2420_v29, %v2430_v5  ;;  %v2448_v17 = vor.u32 %v2447_v34, %v2443_v43  ;;  %v2461_v41 = vrot.slane %v2459_v3, 5  ;;  %v2465_v55 = vshll.u32 %v2240_v35, 16  ;;  %4545 = vmatmul.mubr.bf16.gmra.mrb[36].mxu0 %v4069_v58  ;;  %v4046_v26 = vld [vmem:[#allocation3 + $0xb0] sm:$0xff]  ;;  %3727 = vst.msk [vmem:[#allocation3 + $0x130] sm:$0xff] %vm1731_vm1, %v3687_v51  ;;  %v2243_v15 = vld [vmem:[#allocation2 + $0x7c] sm:$0xf] }
 0x16a   : > { %v2439_v36 = vrot.slane %v2438_v0, 4  ;;  %v2469_v2 = vshrl.u32 %v2240_v35, 16  ;;  %v2475_v32 = vshll.u32 %v2241_v49, 16  ;;  %v5548_v22 = vrot.slane %v3736_v21, 9  ;;  %v2244_v13 = vld [vmem:[#allocation2 + $0x80] sm:$0x1] }
 0x16b   : > { %2717 = vst.msk [vmem:[#allocation3 + $0x100] sm:$0xff] %vm1183_vm15, %v5474_v39  ;;  %v2449_v14 = vrot.slane %v2448_v17, 4  ;;  %v2462_v4 = vor.u32 %v2461_v41, %v2458_v20  ;;  %v2467_v19 = vrot.slane %v2465_v55, 5  ;;  %v3834_v50 = vrot.slane %v3737_v42, 5  ;;  %v3742_v59 = vld [vmem:[#allocation2 + $0x30] sm:$0xe] }
 0x16c   : > { %3037 = vst.msk [vmem:[#allocation3 + $0x100] sm:$0xff] %vm1731_vm1, %v2996_v6  ;;  %v2444_v24 = vsel %vm6309_vm7, %v2439_v36, %v2443_v43  ;;  %v2471_v62 = vrot.slane %v2469_v2, 4  ;;  %v2477_v57 = vrot.slane %v2475_v32, 5  ;;  %v3837_v16 = vrot.slane %v3738_v12, 5  ;;  %v3743_v53 = vld [vmem:[#allocation2 + $0x34] sm:$0xf]  ;;  %v2174_v36 = vpop.permute.xlu0 %2173 }
 0x16d   : > { %v2454_v40 = vsel %vm6309_vm7, %v2449_v14, %v2453_v47  ;;  %v2463_v56 = vrot.slane %v2462_v4, 4  ;;  %v3835_v63 = vsel %vm6649_vm14, %v5548_v22, %v3834_v50  ;;  %v3836_v48 = vrot.slane %v3834_v50, 4  ;;  %v3744_v9 = vld [vmem:[#allocation2 + $0x38] sm:$0x1]  ;;  %v3745_v6 = vld [vmem:[#allocation2 + $0x3c] sm:$0xe]  ;;  %v3000_v22 = vpop.permute.xlu1 %2999 }
 0x16e   : > { %v5475_v46 = vcombine.low %v2444_v24, %v2454_v40  ;;  %v2472_v18 = vor.u32 %v2471_v62, %v2467_v19  ;;  %v5549_v60 = vrot.slane %v3739_v61, 9  ;;  %v3841_v38 = vrot.slane %v3740_v30, 5  ;;  %v3746_v34 = vld [vmem:[#allocation2 + $0x40] sm:$0xf]  ;;  %1742 = vst.msk [vmem:[#allocation3 + $0x190] sm:$0xff] %vm1731_vm1, %v1704_v23  ;;  %v4051_v2 = vld [vmem:[#allocation3 + $0xd8] sm:$0xff] }
 0x16f   : > { %v2468_v1 = vsel %vm6309_vm7, %v2463_v56, %v2467_v19  ;;  %v3838_v10 = vsel %vm6649_vm14, %v3836_v48, %v3837_v16  ;;  %v3844_v35 = vrot.slane %v3741_v7, 5  ;;  %v2480_v11 = vshrl.u32 %v2242_v45, 16  ;;  %v3747_v47 = vld [vmem:[#allocation2 + $0x44] sm:$0x1]  ;;  %v2246_v30 = vld [vmem:[#allocation2 + $0x88] sm:$0xf] }
 0x170   : > { %4666 = vmatmul.mubr.bf16.gmra.mrb[32].mxu1 %v4046_v26  ;;  %2718 = vst.msk [vmem:[#allocation3 + $0x128] sm:$0xff] %vm1183_vm15, %v5475_v46  ;;  %v2473_v25 = vrot.slane %v2472_v18, 4  ;;  %v5564_v28 = vcombine.low %v3835_v63, %v3838_v10  ;;  %v3842_v49 = vsel %vm6649_vm14, %v5549_v60, %v3841_v38  ;;  %v3843_v52 = vrot.slane %v3841_v38, 4  ;;  %v2245_v39 = vld [vmem:[#allocation2 + $0x84] sm:$0xf]  ;;  %v4075_v32 = vld [vmem:[#allocation3 + $0x198] sm:$0xff]  ;;  %v1706_v18 = vpop.permute.xlu0 %1705 }
 0x171   : > { %4673 = vmatprep.mubr.bf16.mxu1 %v4052_v37  ;;  %3038 = vst.msk [vmem:[#allocation3 + $0x128] sm:$0xff] %vm1731_vm1, %v2998_v8  ;;  %v2482_v33 = vrot.slane %v2480_v11, 4  ;;  %v2483_v31 = vshll.u32 %v2242_v45, 16  ;;  %v2489_v29 = vshll.u32 %v2243_v15, 16  ;;  %v2493_v43 = vshrl.u32 %v2243_v15, 16  ;;  %2210 = vst.msk [vmem:[#allocation3 + $0x1c0] sm:$0xff] %vm1731_vm1, %v2174_v36  ;;  %4552 = vmatprep.mubr.bf16.mxu0 %v4075_v32 }
 0x172   : > { %v2478_v3 = vsel %vm6309_vm7, %v2473_v25, %v2477_v57  ;;  %4008 = vst.msk [vmem:[#allocation3 + $0x20] sm:$0xff] %vm1183_vm15, %v5564_v28  ;;  %v3845_v21 = vsel %vm6649_vm14, %v3843_v52, %v3844_v35  ;;  %v2499_v5 = vshll.u32 %v2244_v13, 16  ;;  %v5550_v0 = vrot.slane %v3742_v59, 9  ;;  %v4057_v19 = vld [vmem:[#allocation3 + $0x108] sm:$0xff]  ;;  %v2247_v62 = vld [vmem:[#allocation2 + $0x8c] sm:$0x1] }
 0x173   : > { %v5476_v20 = vcombine.low %v2468_v1, %v2478_v3  ;;  %v5565_v42 = vcombine.low %v3842_v49, %v3845_v21  ;;  %v2485_v12 = vrot.slane %v2483_v31, 5  ;;  %v2491_v58 = vrot.slane %v2489_v29, 5  ;;  %v3748_v56 = vld [vmem:[#allocation2 + $0x48] sm:$0xe]  ;;  %v3749_v46 = vld [vmem:[#allocation2 + $0x4c] sm:$0xf] }
 0x174   : > { %v2495_v17 = vrot.slane %v2493_v43, 4  ;;  %v2501_v41 = vrot.slane %v2499_v5, 5  ;;  %v3848_v55 = vrot.slane %v3743_v53, 5  ;;  %v3851_v61 = vrot.slane %v3744_v9, 5  ;;  %v3750_v35 = vld [vmem:[#allocation2 + $0x50] sm:$0x1] }
 0x175   : > { %2719 = vst.msk [vmem:[#allocation3 + $0x150] sm:$0xff] %vm1183_vm15, %v5476_v20  ;;  %4009 = vst.msk [vmem:[#allocation3 + $0x48] sm:$0xff] %vm1183_vm15, %v5565_v42  ;;  %v2486_v7 = vor.u32 %v2485_v12, %v2482_v33  ;;  %v5551_v45 = vrot.slane %v3745_v6, 9  ;;  %v3855_v14 = vrot.slane %v3746_v34, 5  ;;  %v3858_v4 = vrot.slane %v3747_v47, 5  ;;  %v4074_v60 = vld [vmem:[#allocation3 + $0x190] sm:$0xff]  ;;  %v3002_v47 = vpop.permute.xlu1 %3001 }
 0x176   : > { %3039 = vst.msk [vmem:[#allocation3 + $0x150] sm:$0xff] %vm1731_vm1, %v3000_v22  ;;  %v2496_v50 = vor.u32 %v2495_v17, %v2491_v58  ;;  %v3849_v51 = vsel %vm6649_vm14, %v5550_v0, %v3848_v55  ;;  %v3850_v24 = vrot.slane %v3848_v55, 4  ;;  %v2504_v57 = vshrl.u32 %v2245_v39, 16  ;;  %v3751_v11 = vld [vmem:[#allocation2 + $0x54] sm:$0xe]  ;;  %1743 = vst.msk [vmem:[#allocation3 + $0x1b8] sm:$0xff] %vm1731_vm1, %v1706_v18  ;;  %4553 = vmatmul.mubr.bf16.gmra.mrb[40].mxu0 %v4074_v60  ;;  %v3689_v0 = vpop.permute.xlu0 %3688 }
 0x177   : > { %v2487_v16 = vrot.slane %v2486_v7, 4  ;;  %v3856_v44 = vsel %vm6649_vm14, %v5551_v45, %v3855_v14  ;;  %v3857_v26 = vrot.slane %v3855_v14, 4  ;;  %v2507_v40 = vshll.u32 %v2245_v39, 16  ;;  %v3752_v28 = vld [vmem:[#allocation2 + $0x58] sm:$0xf]  ;;  %v4062_v17 = vld [vmem:[#allocation3 + $0x130] sm:$0xff] }
 0x178   : > { %4674 = vmatmul.mubr.bf16.gmra.mrb[36].mxu1 %v4051_v2  ;;  %v2497_v63 = vrot.slane %v2496_v50, 4  ;;  %v3852_v48 = vsel %vm6649_vm14, %v3850_v24, %v3851_v61  ;;  %v2506_v15 = vrot.slane %v2504_v57, 4  ;;  %v2513_v37 = vshll.u32 %v2246_v30, 16  ;;  %v3753_v49 = vld [vmem:[#allocation2 + $0x5c] sm:$0x1]  ;;  %3728 = vst.msk [vmem:[#allocation3 + $0x158] sm:$0xff] %vm1731_vm1, %v3689_v0 }
 0x179   : > { %4681 = vmatprep.mubr.bf16.mxu1 %v4057_v19  ;;  %v2492_v38 = vsel %vm6309_vm7, %v2487_v16, %v2491_v58  ;;  %v5566_v13 = vcombine.low %v3849_v51, %v3852_v48  ;;  %v3859_v1 = vsel %vm6649_vm14, %v3857_v26, %v3858_v4  ;;  %v2509_v10 = vrot.slane %v2507_v40, 5  ;;  %v2248_v33 = vld [vmem:[#allocation2 + $0x90] sm:$0xf]  ;;  %v2249_v3 = vld [vmem:[#allocation2 + $0x94] sm:$0xf]  ;;  %v4056_v21 = vld [vmem:[#allocation3 + $0x100] sm:$0xff] }
 0x17a   : > { %v2502_v59 = vsel %vm6309_vm7, %v2497_v63, %v2501_v41  ;;  %v5567_v53 = vcombine.low %v3856_v44, %v3859_v1  ;;  %v7586_v8 = vrot.slane %v2513_v37, 5  ;;  %v2517_v25 = vshrl.u32 %v2246_v30, 16  ;;  %v4080_v5 = vld [vmem:[#allocation3 + $0x1c0] sm:$0xff]  ;;  %v3754_v7 = vld [vmem:[#allocation2 + $0x60] sm:$0xe] }
 0x17b   : > { %v5477_v52 = vcombine.low %v2492_v38, %v2502_v59  ;;  %4010 = vst.msk [vmem:[#allocation3 + $0x70] sm:$0xff] %vm1183_vm15, %v5566_v13  ;;  %v2510_v9 = vor.u32 %v2509_v10, %v2506_v15  ;;  %v2523_v6 = vshll.u32 %v2247_v62, 16  ;;  %v5552_v23 = vrot.slane %v3748_v56, 9  ;;  %v2250_v39 = vld [vmem:[#allocation2 + $0x98] sm:$0x1]  ;;  %4560 = vmatprep.mubr.bf16.mxu0 %v4080_v5 }
 0x17c   : > { %4011 = vst.msk [vmem:[#allocation3 + $0x98] sm:$0xff] %vm1183_vm15, %v5567_v53  ;;  %v2519_v31 = vrot.slane %v2517_v25, 4  ;;  %v3862_v29 = vrot.slane %v3749_v46, 5  ;;  %v3865_v43 = vrot.slane %v3750_v35, 5  ;;  %v5553_v34 = vrot.slane %v3751_v11, 9  ;;  %v4028_v14 = vld [vmem:[#allocation3 + $0x20] sm:$0xff] }
 0x17d   : > { %2720 = vst.msk [vmem:[#allocation3 + $0x178] sm:$0xff] %vm1183_vm15, %v5477_v52  ;;  %v2511_v20 = vrot.slane %v2510_v9, 4  ;;  %v2525_v42 = vrot.slane %v2523_v6, 5  ;;  %v3869_v12 = vrot.slane %v3752_v28, 5  ;;  %v3872_v58 = vrot.slane %v3753_v49, 5  ;;  %v4079_v62 = vld [vmem:[#allocation3 + $0x1b8] sm:$0xff]  ;;  %v3691_v57 = vpop.permute.xlu0 %3690 }
 0x17e   : > { %3040 = vst.msk [vmem:[#allocation3 + $0x178] sm:$0xff] %vm1731_vm1, %v3002_v47  ;;  %v2520_v41 = vor.u32 %v2519_v31, %v7586_v8  ;;  %v3863_v55 = vsel %vm6649_vm14, %v5552_v23, %v3862_v29  ;;  %v3864_v61 = vrot.slane %v3862_v29, 4  ;;  %v2528_v30 = vshrl.u32 %v2248_v33, 16  ;;  %v3755_v45 = vld [vmem:[#allocation2 + $0x64] sm:$0xf]  ;;  %4561 = vmatmul.mubr.bf16.gmra.mrb[44].mxu0 %v4079_v62  ;;  %3729 = vst.msk [vmem:[#allocation3 + $0x180] sm:$0xff] %vm1731_vm1, %v3691_v57 }
 0x17f   : > { %v2516_v36 = vsel %vm6309_vm7, %v2511_v20, %v7586_v8  ;;  %v3870_v2 = vsel %vm6649_vm14, %v5553_v34, %v3869_v12  ;;  %v3871_v32 = vrot.slane %v3869_v12, 4  ;;  %v2531_v22 = vshll.u32 %v2248_v33, 16  ;;  %v3756_v24 = vld [vmem:[#allocation2 + $0x68] sm:$0x1]  ;;  %v3757_v56 = vld [vmem:[#allocation2 + $0x6c] sm:$0xe]  ;;  %6062 = vmatprep.mubr.msk.bf16.mxu0 %vm1183_vm15, %v4028_v14 }
 0x180   : > { %4682 = vmatmul.mubr.bf16.gmra.mrb[40].mxu1 %v4056_v21  ;;  %v2521_v4 = vrot.slane %v2520_v41, 4  ;;  %v3866_v19 = vsel %vm6649_vm14, %v3864_v61, %v3865_v43  ;;  %v2530_v50 = vrot.slane %v2528_v30, 4  ;;  %v2537_v51 = vshll.u32 %v2249_v3, 16  ;;  %v3758_v46 = vld [vmem:[#allocation2 + $0x70] sm:$0xf]  ;;  %v4061_v8 = vld [vmem:[#allocation3 + $0x128] sm:$0xff] }
 0x181   : > { %4689 = vmatprep.mubr.bf16.mxu1 %v4062_v17  ;;  %v5568_v16 = vcombine.low %v3863_v55, %v3866_v19  ;;  %v3873_v44 = vsel %vm6649_vm14, %v3871_v32, %v3872_v58  ;;  %v2533_v26 = vrot.slane %v2531_v22, 5  ;;  %v2541_v40 = vshrl.u32 %v2249_v3, 16  ;;  %v3759_v18 = vld [vmem:[#allocation2 + $0x74] sm:$0x1]  ;;  %v2251_v10 = vld [vmem:[#allocation2 + $0x9c] sm:$0xf] }
 0x182   : > { %v2526_v63 = vsel %vm6309_vm7, %v2521_v4, %v2525_v42  ;;  %v5569_v48 = vcombine.low %v3870_v2, %v3873_v44  ;;  %v2539_v15 = vrot.slane %v2537_v51, 5  ;;  %v2547_v37 = vshll.u32 %v2250_v39, 16  ;;  %v2252_v9 = vld [vmem:[#allocation2 + $0xa0] sm:$0xf]  ;;  %v4067_v23 = vld [vmem:[#allocation3 + $0x158] sm:$0xff]  ;;  %v4038_v12 = vld [vmem:[#allocation3 + $0x70] sm:$0xff] }
 0x183   : > { %v5478_v60 = vcombine.low %v2516_v36, %v2526_v63  ;;  %4012 = vst.msk [vmem:[#allocation3 + $0xc0] sm:$0xff] %vm1183_vm15, %v5568_v16  ;;  %v2534_v38 = vor.u32 %v2533_v26, %v2530_v50  ;;  %v2543_v13 = vrot.slane %v2541_v40, 4  ;;  %v5554_v1 = vrot.slane %v3754_v7, 9  ;;  %v4033_v6 = vld [vmem:[#allocation3 + $0x48] sm:$0xff]  ;;  %v3760_v3 = vld [vmem:[#allocation2 + $0x78] sm:$0xe]  ;;  %v3693_v58 = vpop.permute.xlu0 %3692 }
 0x184   : > { %4013 = vst.msk [vmem:[#allocation3 + $0xe8] sm:$0xff] %vm1183_vm15, %v5569_v48  ;;  %v2549_v35 = vrot.slane %v2547_v37, 5  ;;  %v3876_v11 = vrot.slane %v3755_v45, 5  ;;  %v3879_v59 = vrot.slane %v3756_v24, 5  ;;  %v5555_v53 = vrot.slane %v3757_v56, 9  ;;  %v3004_v5 = vpop.permute.xlu1 %3003  ;;  %v4066_v48 = vld [vmem:[#allocation3 + $0x150] sm:$0xff] }
 0x185   : > { %2721 = vst.msk [vmem:[#allocation3 + $0x1a0] sm:$0xff] %vm1183_vm15, %v5478_v60  ;;  %v2535_v25 = vrot.slane %v2534_v38, 4  ;;  %v2544_v28 = vor.u32 %v2543_v13, %v2539_v15  ;;  %v3883_v49 = vrot.slane %v3758_v46, 5  ;;  %v3886_v52 = vrot.slane %v3759_v18, 5  ;;  %v2253_v29 = vld [vmem:[#allocation2 + $0xa4] sm:$0x1] }
 0x186   : > { %v3877_v33 = vsel %vm6649_vm14, %v5554_v1, %v3876_v11  ;;  %v3878_v31 = vrot.slane %v3876_v11, 4  ;;  %v2552_v43 = vshrl.u32 %v2251_v10, 16  ;;  %v2555_v34 = vshll.u32 %v2251_v10, 16  ;;  %v3761_v21 = vld [vmem:[#allocation2 + $0x7c] sm:$0xf]  ;;  %3041 = vst.msk [vmem:[#allocation3 + $0x1a0] sm:$0xff] %vm1731_vm1, %v3004_v5  ;;  %6063 = vmatmul.mubr.msk.bf16.vlgmr.msra.gmra.mrb[48].mxu0 %vm1183_vm15, %v4033_v6 }
 0x187   : > { %v2540_v0 = vsel %vm6309_vm7, %v2535_v25, %v2539_v15  ;;  %v2545_v47 = vrot.slane %v2544_v28, 4  ;;  %v3884_v20 = vsel %vm6649_vm14, %v5555_v53, %v3883_v49  ;;  %v3885_v42 = vrot.slane %v3883_v49, 4  ;;  %v3762_v61 = vld [vmem:[#allocation2 + $0x80] sm:$0x1]  ;;  %3730 = vst.msk [vmem:[#allocation3 + $0x1a8] sm:$0xff] %vm1731_vm1, %v3693_v58  ;;  %6066 = vmatprep.mubr.msk.bf16.mxu0 %vm1183_vm15, %v4038_v12  ;;  %v4072_v38 = vld [vmem:[#allocation3 + $0x180] sm:$0xff] }
 0x188   : > { %4690 = vmatmul.mubr.bf16.gmra.mrb[44].mxu1 %v4061_v8  ;;  %v3880_v39 = vsel %vm6649_vm14, %v3878_v31, %v3879_v59  ;;  %v2554_v17 = vrot.slane %v2552_v43, 4  ;;  %v2557_v41 = vrot.slane %v2555_v34, 5  ;;  %v2561_v55 = vshll.u32 %v2252_v9, 16  ;;  %v3763_v22 = vld [vmem:[#allocation2 + $0x84] sm:$0xe]  ;;  %v4043_v59 = vld [vmem:[#allocation3 + $0x98] sm:$0xff] }
 0x189   : > { %4697 = vmatprep.mubr.bf16.mxu1 %v4067_v23  ;;  %v2550_v30 = vsel %vm6309_vm7, %v2545_v47, %v2549_v35  ;;  %v5570_v36 = vcombine.low %v3877_v33, %v3880_v39  ;;  %v3887_v2 = vsel %vm6649_vm14, %v3885_v42, %v3886_v52  ;;  %v2565_v32 = vshrl.u32 %v2252_v9, 16  ;;  %v3764_v7 = vld [vmem:[#allocation2 + $0x88] sm:$0xf]  ;;  %v3765_v50 = vld [vmem:[#allocation2 + $0x8c] sm:$0x1] }
 0x18a   : > { %v5479_v45 = vcombine.low %v2540_v0, %v2550_v30  ;;  %v5571_v14 = vcombine.low %v3884_v20, %v3887_v2  ;;  %v2558_v4 = vor.u32 %v2557_v41, %v2554_v17  ;;  %v2563_v19 = vrot.slane %v2561_v55, 5  ;;  %v2254_v16 = vld [vmem:[#allocation2 + $0xa8] sm:$0xf]  ;;  %v2255_v63 = vld [vmem:[#allocation2 + $0xac] sm:$0xf]  ;;  %v3006_v53 = vpop.permute.xlu1 %3005  ;;  %v4048_v9 = vld [vmem:[#allocation3 + $0xc0] sm:$0xff] }
 0x18b   : > { %4014 = vst.msk [vmem:[#allocation3 + $0x110] sm:$0xff] %vm1183_vm15, %v5570_v36  ;;  %v2567_v51 = vrot.slane %v2565_v32, 4  ;;  %v2571_v24 = vshll.u32 %v2253_v29, 16  ;;  %v5556_v62 = vrot.slane %v3760_v3, 9  ;;  %v3890_v57 = vrot.slane %v3761_v21, 5 }
 0x18c   : > { %2722 = vst.msk [vmem:[#allocation3 + $0x1c8] sm:$0xff] %vm1183_vm15, %v5479_v45  ;;  %4015 = vst.msk [vmem:[#allocation3 + $0x138] sm:$0xff] %vm1183_vm15, %v5571_v14  ;;  %v2559_v44 = vrot.slane %v2558_v4, 4  ;;  %v3893_v26 = vrot.slane %v3762_v61, 5  ;;  %v5557_v40 = vrot.slane %v3763_v22, 9  ;;  %v3897_v56 = vrot.slane %v3764_v7, 5 }
 0x18d   : > { %v2568_v15 = vor.u32 %v2567_v51, %v2563_v19  ;;  %v2573_v37 = vrot.slane %v2571_v24, 5  ;;  %v3891_v46 = vsel %vm6649_vm14, %v5556_v62, %v3890_v57  ;;  %v3892_v18 = vrot.slane %v3890_v57, 4  ;;  %v2256_v60 = vld [vmem:[#allocation2 + $0xb0] sm:$0x1]  ;;  %v3766_v11 = vld [vmem:[#allocation2 + $0x90] sm:$0xe]  ;;  %v3695_v47 = vpop.permute.xlu0 %3694 }
 0x18e   : > { %v2564_v13 = vsel %vm6309_vm7, %v2559_v44, %v2563_v19  ;;  %v3898_v1 = vsel %vm6649_vm14, %v5557_v40, %v3897_v56  ;;  %v3899_v10 = vrot.slane %v3897_v56, 4  ;;  %v3900_v35 = vrot.slane %v3765_v50, 5  ;;  %v3767_v52 = vld [vmem:[#allocation2 + $0x94] sm:$0xf]  ;;  %3042 = vst.msk [vmem:[#allocation3 + $0x1c8] sm:$0xff] %vm1731_vm1, %v3006_v53  ;;  %6067 = vmatmul.mubr.msk.bf16.gmra.mrb[52].mxu0 %vm1183_vm15, %v4043_v59  ;;  %3731 = vst.msk [vmem:[#allocation3 + $0x1d0] sm:$0xff] %vm1731_vm1, %v3695_v47 }
 0x18f   : > { %v2569_v8 = vrot.slane %v2568_v15, 4  ;;  %v3894_v25 = vsel %vm6649_vm14, %v3892_v18, %v3893_v26  ;;  %v2576_v28 = vshrl.u32 %v2254_v16, 16  ;;  %v2579_v49 = vshll.u32 %v2254_v16, 16  ;;  %v3768_v29 = vld [vmem:[#allocation2 + $0x98] sm:$0x1]  ;;  %6070 = vmatprep.mubr.msk.bf16.mxu0 %vm1183_vm15, %v4048_v9  ;;  %v4071_v45 = vld [vmem:[#allocation3 + $0x178] sm:$0xff] }
 0x190   : > { %4698 = vmatmul.mubr.bf16.gmra.mrb[48].mxu1 %v4066_v48  ;;  %v5572_v6 = vcombine.low %v3891_v46, %v3894_v25  ;;  %v3901_v23 = vsel %vm6649_vm14, %v3899_v10, %v3900_v35  ;;  %v2585_v33 = vshll.u32 %v2255_v63, 16  ;;  %v2589_v31 = vshrl.u32 %v2255_v63, 16  ;;  %v3769_v5 = vld [vmem:[#allocation2 + $0x9c] sm:$0xe]  ;;  %v3770_v0 = vld [vmem:[#allocation2 + $0xa0] sm:$0xf] }
 0x191   : > { %4705 = vmatprep.mubr.bf16.mxu1 %v4072_v38  ;;  %v2574_v43 = vsel %vm6309_vm7, %v2569_v8, %v2573_v37  ;;  %v5573_v34 = vcombine.low %v3898_v1, %v3901_v23  ;;  %v2578_v3 = vrot.slane %v2576_v28, 4  ;;  %v2581_v21 = vrot.slane %v2579_v49, 5  ;;  %v3771_v39 = vld [vmem:[#allocation2 + $0xa4] sm:$0x1]  ;;  %v2257_v30 = vld [vmem:[#allocation2 + $0xb4] sm:$0xf] }
 0x192   : > { %v5480_v20 = vcombine.low %v2564_v13, %v2574_v43  ;;  %4016 = vst.msk [vmem:[#allocation3 + $0x160] sm:$0xff] %vm1183_vm15, %v5572_v6  ;;  %v2587_v42 = vrot.slane %v2585_v33, 5  ;;  %v2591_v12 = vrot.slane %v2589_v31, 4  ;;  %v2595_v58 = vshll.u32 %v2256_v60, 16  ;;  %v2258_v7 = vld [vmem:[#allocation2 + $0xb8] sm:$0xf] }
 0x193   : > { %4017 = vst.msk [vmem:[#allocation3 + $0x188] sm:$0xff] %vm1183_vm15, %v5573_v34  ;;  %v2582_v17 = vor.u32 %v2581_v21, %v2578_v3  ;;  %v5558_v41 = vrot.slane %v3766_v11, 9  ;;  %v3904_v55 = vrot.slane %v3767_v52, 5  ;;  %v3907_v61 = vrot.slane %v3768_v29, 5  ;;  %v2259_v51 = vld [vmem:[#allocation2 + $0xbc] sm:$0x1] }
 0x194   : > { %2723 = vst.msk [vmem:[#allocation3 + $0x1f0] sm:$0xff] %vm1183_vm15, %v5480_v20  ;;  %v2592_v36 = vor.u32 %v2591_v12, %v2587_v42  ;;  %v2597_v2 = vrot.slane %v2595_v58, 5  ;;  %v5559_v32 = vrot.slane %v3769_v5, 9  ;;  %v3911_v22 = vrot.slane %v3770_v0, 5  ;;  %v3772_v24 = vld [vmem:[#allocation2 + $0xa8] sm:$0xe] }
 0x195   : > { %v2583_v14 = vrot.slane %v2582_v17, 4  ;;  %v3905_v4 = vsel %vm6649_vm14, %v5558_v41, %v3904_v55  ;;  %v3906_v19 = vrot.slane %v3904_v55, 4  ;;  %v3914_v50 = vrot.slane %v3771_v39, 5  ;;  %v4077_v62 = vld [vmem:[#allocation3 + $0x1a8] sm:$0xff]  ;;  %v3773_v40 = vld [vmem:[#allocation2 + $0xac] sm:$0xf]  ;;  %v3008_v11 = vpop.permute.xlu1 %3007 }
 0x196   : > { %v2593_v57 = vrot.slane %v2592_v36, 4  ;;  %v3912_v16 = vsel %vm6649_vm14, %v5559_v32, %v3911_v22  ;;  %v3913_v44 = vrot.slane %v3911_v22, 4  ;;  %v2600_v26 = vshrl.u32 %v2257_v30, 16  ;;  %v4053_v56 = vld [vmem:[#allocation3 + $0xe8] sm:$0xff]  ;;  %v3774_v46 = vld [vmem:[#allocation2 + $0xb0] sm:$0x1] }
 0x197   : > { %v2588_v63 = vsel %vm6309_vm7, %v2583_v14, %v2587_v42  ;;  %v3908_v48 = vsel %vm6649_vm14, %v3906_v19, %v3907_v61  ;;  %v2603_v15 = vshll.u32 %v2257_v30, 16  ;;  %v2609_v37 = vshll.u32 %v2258_v7, 16  ;;  %v4058_v18 = vld [vmem:[#allocation3 + $0x110] sm:$0xff]  ;;  %v3775_v10 = vld [vmem:[#allocation2 + $0xb4] sm:$0xe]  ;;  %6071 = vmatmul.mubr.msk.bf16.gmra.mrb[56].mxu0 %vm1183_vm15, %v4053_v56  ;;  %3043 = vst.msk [vmem:[#allocation3 + $0x1f0] sm:$0xff] %vm1731_vm1, %v3008_v11 }
 0x198   : > { %4706 = vmatmul.mubr.bf16.gmra.mrb[52].mxu1 %v4071_v45  ;;  %v2598_v60 = vsel %vm6309_vm7, %v2593_v57, %v2597_v2  ;;  %v5574_v38 = vcombine.low %v3905_v4, %v3908_v48  ;;  %v3915_v13 = vsel %vm6649_vm14, %v3913_v44, %v3914_v50  ;;  %v2602_v1 = vrot.slane %v2600_v26, 4  ;;  %v3776_v35 = vld [vmem:[#allocation2 + $0xb8] sm:$0xf]  ;;  %v3777_v6 = vld [vmem:[#allocation2 + $0xbc] sm:$0x1]  ;;  %6074 = vmatprep.mubr.msk.bf16.mxu0 %vm1183_vm15, %v4058_v18  ;;  %v3697_v34 = vpop.permute.xlu0 %3696  ;;  %v4082_v41 = vld [vmem:[#allocation3 + $0x1d0] sm:$0xff] }
 0x199   : > { %4713 = vmatprep.mubr.bf16.mxu1 %v4077_v62  ;;  %v5481_v59 = vcombine.low %v2588_v63, %v2598_v60  ;;  %v5575_v53 = vcombine.low %v3912_v16, %v3915_v13  ;;  %v2605_v8 = vrot.slane %v2603_v15, 5  ;;  %v7662_v25 = vrot.slane %v2609_v37, 5  ;;  %v2260_v43 = vld [vmem:[#allocation2 + $0xc0] sm:$0xf]  ;;  %v2261_v47 = vld [vmem:[#allocation2 + $0xc4] sm:$0xf] }
 0x19a   : > { %4018 = vst.msk [vmem:[#allocation3 + $0x1b0] sm:$0xff] %vm1183_vm15, %v5574_v38  ;;  %v2613_v28 = vshrl.u32 %v2258_v7, 16  ;;  %v2619_v49 = vshll.u32 %v2259_v51, 16  ;;  %v5560_v52 = vrot.slane %v3772_v24, 9  ;;  %v3918_v9 = vrot.slane %v3773_v40, 5  ;;  %v4076_v20 = vld [vmem:[#allocation3 + $0x1a0] sm:$0xff] }
 0x19b   : > { %2724 = vst.msk [vmem:[#allocation3 + $0x218] sm:$0xff] %vm1183_vm15, %v5481_v59  ;;  %4019 = vst.msk [vmem:[#allocation3 + $0x1d8] sm:$0xff] %vm1183_vm15, %v5575_v53  ;;  %v2606_v23 = vor.u32 %v2605_v8, %v2602_v1  ;;  %v3921_v33 = vrot.slane %v3774_v46, 5  ;;  %v5561_v31 = vrot.slane %v3775_v10, 9  ;;  %v3925_v29 = vrot.slane %v3776_v35, 5  ;;  %v4063_v32 = vld [vmem:[#allocation3 + $0x138] sm:$0xff] }
 0x19c   : > { %v2615_v3 = vrot.slane %v2613_v28, 4  ;;  %v2621_v21 = vrot.slane %v2619_v49, 5  ;;  %v3919_v5 = vsel %vm6649_vm14, %v5560_v52, %v3918_v9  ;;  %v3920_v0 = vrot.slane %v3918_v9, 4  ;;  %3732 = vst.msk [vmem:[#allocation3 + $0x1f8] sm:$0xff] %vm1731_vm1, %v3697_v34  ;;  %v2262_v17 = vld [vmem:[#allocation2 + $0xc8] sm:$0x1] }
 0x19d   : > { %v2607_v42 = vrot.slane %v2606_v23, 4  ;;  %v3926_v12 = vsel %vm6649_vm14, %v5561_v31, %v3925_v29  ;;  %v3927_v58 = vrot.slane %v3925_v29, 4  ;;  %v3928_v39 = vrot.slane %v3777_v6, 5  ;;  %v3778_v2 = vld [vmem:[#allocation2 + $0xc0] sm:$0xe]  ;;  %v4068_v50 = vld [vmem:[#allocation3 + $0x160] sm:$0xff] }
 0x19e   : > { %v2616_v55 = vor.u32 %v2615_v3, %v7662_v25  ;;  %v3922_v61 = vsel %vm6649_vm14, %v3920_v0, %v3921_v33  ;;  %v2624_v30 = vshrl.u32 %v2260_v43, 16  ;;  %v2627_v36 = vshll.u32 %v2260_v43, 16  ;;  %v3779_v4 = vld [vmem:[#allocation2 + $0xc4] sm:$0xf]  ;;  %v3780_v19 = vld [vmem:[#allocation2 + $0xc8] sm:$0x1] }
 0x19f   : > { %v2612_v22 = vsel %vm6309_vm7, %v2607_v42, %v7662_v25  ;;  %v5576_v7 = vcombine.low %v3919_v5, %v3922_v61  ;;  %v3929_v45 = vsel %vm6649_vm14, %v3927_v58, %v3928_v39  ;;  %v2633_v14 = vshll.u32 %v2261_v47, 16  ;;  %v3781_v16 = vld [vmem:[#allocation2 + $0xcc] sm:$0xe]  ;;  %v3782_v63 = vld [vmem:[#allocation2 + $0xd0] sm:$0xf]  ;;  %6075 = vmatmul.mubr.msk.bf16.gmra.mrb[60].mxu0 %vm1183_vm15, %v4063_v32  ;;  %v4081_v8 = vld [vmem:[#allocation3 + $0x1c8] sm:$0xff] }
 0x1a0   : > { %4714 = vmatmul.mubr.bf16.gmra.mrb[56].mxu1 %v4076_v20  ;;  %v2617_v51 = vrot.slane %v2616_v55, 4  ;;  %v5577_v24 = vcombine.low %v3926_v12, %v3929_v45  ;;  %v2626_v62 = vrot.slane %v2624_v30, 4  ;;  %v2629_v57 = vrot.slane %v2627_v36, 5  ;;  %v3783_v18 = vld [vmem:[#allocation2 + $0xd4] sm:$0x1]  ;;  %6078 = vmatprep.mubr.msk.bf16.mxu0 %vm1183_vm15, %v4068_v50  ;;  %v4073_v33 = vld [vmem:[#allocation3 + $0x188] sm:$0xff] }
 0x1a1   : > { %4721 = vmatprep.mubr.bf16.mxu1 %v4082_v41  ;;  %4020 = vst.msk [vmem:[#allocation3 + $0x200] sm:$0xff] %vm1183_vm15, %v5576_v7  ;;  %v2635_v44 = vrot.slane %v2633_v14, 5  ;;  %v2637_v26 = vshrl.u32 %v2261_v47, 16  ;;  %v2643_v40 = vshll.u32 %v2262_v17, 16  ;;  %v5562_v56 = vrot.slane %v3778_v2, 9  ;;  %v3010_v60 = vpop.permute.xlu1 %3009  ;;  %v4078_v34 = vld [vmem:[#allocation3 + $0x1b0] sm:$0xff] }
 0x1a2   : > { %v2622_v48 = vsel %vm6309_vm7, %v2617_v51, %v2621_v21  ;;  %4021 = vst.msk [vmem:[#allocation3 + $0x228] sm:$0xff] %vm1183_vm15, %v5577_v24  ;;  %v2630_v15 = vor.u32 %v2629_v57, %v2626_v62  ;;  %v3932_v37 = vrot.slane %v3779_v4, 5  ;;  %v3935_v46 = vrot.slane %v3780_v19, 5  ;;  %v4086_v27 = vld [vmem:[#allocation3 + $0x1f0] sm:$0xff]  ;;  %v4083_v54 = vld [vmem:[#allocation3 + $0x1d8] sm:$0xff] }
 0x1a3   : > { %v5482_v38 = vcombine.low %v2612_v22, %v2622_v48  ;;  %v2639_v13 = vrot.slane %v2637_v26, 4  ;;  %v5563_v1 = vrot.slane %v3781_v16, 9  ;;  %v3699_v10 = vpop.permute.xlu0 %3698  ;;  %3044 = vst.msk [vmem:[#allocation3 + $0x218] sm:$0xff] %vm1731_vm1, %v3010_v60  ;;  %v3939_v53 = vrot.slane %v3782_v63, 5  ;;  %v4087_v52 = vld [vmem:[#allocation3 + $0x1f8] sm:$0xff] }
 0x1a4   : > { %v2631_v35 = vrot.slane %v2630_v15, 4  ;;  %v3933_v11 = vsel %vm6649_vm14, %v5562_v56, %v3932_v37  ;;  %v3934_v59 = vrot.slane %v3932_v37, 4  ;;  %3733 = vst.msk [vmem:[#allocation3 + $0x220] sm:$0xff] %vm1731_vm1, %v3699_v10  ;;  %v2645_v28 = vrot.slane %v2643_v40, 5 }
 0x1a5   : > { %2725 = vst.msk [vmem:[#allocation3 + $0x240] sm:$0xff] %vm1183_vm15, %v5482_v38  ;;  %v2640_v25 = vor.u32 %v2639_v13, %v2635_v44  ;;  %v3942_v49 = vrot.slane %v3783_v18, 5  ;;  %v3940_v6 = vsel %vm6649_vm14, %v5563_v1, %v3939_v53  ;;  %v3941_v23 = vrot.slane %v3939_v53, 4 }
 0x1a6   : > { %v3936_v9 = vsel %vm6649_vm14, %v3934_v59, %v3935_v46  ;;  %v2636_v31 = vsel %vm6309_vm7, %v2631_v35, %v2635_v44 }
 0x1a7   : > { %v2641_v29 = vrot.slane %v2640_v25, 4  ;;  %v5578_v43 = vcombine.low %v3933_v11, %v3936_v9  ;;  %v3943_v3 = vsel %vm6649_vm14, %v3941_v23, %v3942_v49  ;;  %6079 = vmatmul.mubr.msk.bf16.gmra.mrb[64].mxu0 %vm1183_vm15, %v4073_v33 }
 0x1a8   : > { %4722 = vmatmul.mubr.bf16.gmra.mrb[60].mxu1 %v4081_v8  ;;  %v5579_v5 = vcombine.low %v3940_v6, %v3943_v3  ;;  %6082 = vmatprep.mubr.msk.bf16.mxu0 %vm1183_vm15, %v4078_v34  ;;  %v4088_v12 = vld [vmem:[#allocation3 + $0x200] sm:$0xff] }
 0x1a9   : > { %4729 = vmatprep.mubr.bf16.mxu1 %v4087_v52  ;;  %v2646_v21 = vsel %vm6309_vm7, %v2641_v29, %v2645_v28  ;;  %4022 = vst.msk [vmem:[#allocation3 + $0x250] sm:$0xff] %vm1183_vm15, %v5578_v43  ;;  %v4093_v41 = vld [vmem:[#allocation3 + $0x228] sm:$0xff] }
 0x1aa   : > { %v3012_v0 = vpop.permute.xlu1 %3011  ;;  %v5483_v47 = vcombine.low %v2636_v31, %v2646_v21  ;;  %4023 = vst.msk [vmem:[#allocation3 + $0x278] sm:$0xff] %vm1183_vm15, %v5579_v5  ;;  %v4091_v58 = vld [vmem:[#allocation3 + $0x218] sm:$0xff] }
 0x1ab   : > { %3045 = vst.msk [vmem:[#allocation3 + $0x240] sm:$0xff] %vm1731_vm1, %v3012_v0  ;;  %v4092_v42 = vld [vmem:[#allocation3 + $0x220] sm:$0xff] }
 0x1ac   : > { %2726 = vst.msk [vmem:[#allocation3 + $0x268] sm:$0xff] %vm1183_vm15, %v5483_v47 }
 0x1ae   : > { %v3701_v20 = vpop.permute.xlu0 %3700 }
 0x1af   : > { %3734 = vst.msk [vmem:[#allocation3 + $0x248] sm:$0xff] %vm1731_vm1, %v3701_v20  ;;  %6083 = vmatmul.mubr.msk.bf16.gmra.mrb[68].mxu0 %vm1183_vm15, %v4083_v54 }
 0x1b0   : > { %4730 = vmatmul.mubr.bf16.gmra.mrb[64].mxu1 %v4086_v27  ;;  %6086 = vmatprep.mubr.msk.bf16.mxu0 %vm1183_vm15, %v4088_v12  ;;  %v4098_v55 = vld [vmem:[#allocation3 + $0x250] sm:$0xff] }
 0x1b1   : > { %4737 = vmatprep.mubr.bf16.mxu1 %v4092_v42  ;;  %v4103_v36 = vld [vmem:[#allocation3 + $0x278] sm:$0xff] }
 0x1b2   : > { %v4096_v30 = vld [vmem:[#allocation3 + $0x240] sm:$0xff] }
 0x1b6   : > { %v3014_v39 = vpop.permute.xlu1 %3013  ;;  %v4097_v17 = vld [vmem:[#allocation3 + $0x248] sm:$0xff] }
 0x1b7   : > { %3046 = vst.msk [vmem:[#allocation3 + $0x268] sm:$0xff] %vm1731_vm1, %v3014_v39  ;;  %6087 = vmatmul.mubr.msk.bf16.gmra.mrb[72].mxu0 %vm1183_vm15, %v4093_v41 }
 0x1b8   : > { %4738 = vmatmul.mubr.bf16.gmra.mrb[68].mxu1 %v4091_v58  ;;  %6090 = vmatprep.mubr.msk.bf16.mxu0 %vm1183_vm15, %v4098_v55 }
 0x1b9   : > { %v3703_v61 = vpop.permute.xlu0 %3702  ;;  %4745 = vmatprep.mubr.bf16.mxu1 %v4097_v17 }
 0x1ba   : > { %3735 = vst.msk [vmem:[#allocation3 + $0x270] sm:$0xff] %vm1731_vm1, %v3703_v61 }
 0x1be   : > { %v4101_v32 = vld [vmem:[#allocation3 + $0x268] sm:$0xff] }
 0x1bf   : > { %6091 = vmatmul.mubr.msk.bf16.gmra.mrb[76].mxu0 %vm1183_vm15, %v4103_v36 }
 0x1c0   : > { %4746 = vmatmul.mubr.bf16.gmra.mrb[72].mxu1 %v4096_v30 }
 0x1c1   : > { %v4102_v2 = vld [vmem:[#allocation3 + $0x270] sm:$0xff] }
 0x1c2   : > { %4753 = vmatprep.mubr.bf16.mxu1 %v4102_v2 }
 0x1c8   : > { %4754 = vmatmul.mubr.bf16.gmra.mrb[76].mxu1 %v4101_v32 }
 0x1e8   : > { %v5826_v22 = vpop.f32.mrb[0].mxu0 }
 0x1e9   : > { %v5827_v7 = vpop.f32.mrb[1].mxu0 }
 0x1ea   : > { %v7718_v45 = vadd.f32 %v5827_v7, %v5826_v22  ;;  %v5829_v14 = vpop.f32.mrb[2].mxu0 }
 0x1eb   : > { %v5898_v4 = vpop.f32.mrb[0].mxu1  ;;  %v5830_v19 = vpop.f32.mrb[3].mxu0 }
 0x1ec   : > { %v5899_v50 = vpop.f32.mrb[1].mxu1  ;;  %v5831_v51 = vadd.f32 %v5830_v19, %v5829_v14 }
 0x1ed   : > { %v7720_v24 = vadd.f32 %v5899_v50, %v5898_v4  ;;  %v5901_v62 = vpop.f32.mrb[2].mxu1 }
 0x1ee   : > { %v5902_v57 = vpop.f32.mrb[3].mxu1 }
 0x1ef   : > { %v7722_v16 = vadd.f32 %v5902_v57, %v5901_v62 }
 0x1f0   : > { %v5832_v44 = vpop.f32.mrb[4].mxu0 }
 0x1f1   : > { %v5833_v26 = vpop.f32.mrb[5].mxu0 }
 0x1f2   : > { %v7724_v40 = vadd.f32 %v5833_v26, %v5832_v44  ;;  %v5835_v56 = vpop.f32.mrb[6].mxu0 }
 0x1f3   : > { %v5904_v63 = vpop.f32.mrb[4].mxu1  ;;  %v5836_v48 = vpop.f32.mrb[7].mxu0 }
 0x1f4   : > { %v5905_v15 = vpop.f32.mrb[5].mxu1  ;;  %v7726_v37 = vadd.f32 %v5836_v48, %v5835_v56 }
 0x1f5   : > { %v7728_v46 = vadd.f32 %v5905_v15, %v5904_v63  ;;  %v5907_v18 = vpop.f32.mrb[6].mxu1 }
 0x1f6   : > { %v5908_v60 = vpop.f32.mrb[7].mxu1 }
 0x1f7   : > { %v7730_v38 = vadd.f32 %v5908_v60, %v5907_v18 }
 0x1fb   : > { %v5838_v13 = vpop.f32.mrb[8].mxu0 }
 0x1fc   : > { %v5839_v1 = vpop.f32.mrb[9].mxu0 }
 0x1fd   : > { %v7732_v10 = vadd.f32 %v5839_v1, %v5838_v13  ;;  %v5841_v35 = vpop.f32.mrb[10].mxu0  ;;  %v5910_v11 = vpop.f32.mrb[8].mxu1 }
 0x1fe   : > { %v5842_v59 = vpop.f32.mrb[11].mxu0  ;;  %v5911_v53 = vpop.f32.mrb[9].mxu1 }
 0x1ff   : > { %v7734_v8 = vadd.f32 %v5842_v59, %v5841_v35  ;;  %v7736_v25 = vadd.f32 %v5911_v53, %v5910_v11  ;;  %v5913_v28 = vpop.f32.mrb[10].mxu1 }
 0x200   : > { %v5914_v49 = vpop.f32.mrb[11].mxu1 }
 0x201   : > { %v7738_v52 = vadd.f32 %v5914_v49, %v5913_v28 }
 0x204   : > { %v5844_v9 = vpop.f32.mrb[12].mxu0 }
 0x205   : > { %v5845_v6 = vpop.f32.mrb[13].mxu0 }
 0x206   : > { %v7740_v23 = vadd.f32 %v5845_v6, %v5844_v9  ;;  %v5847_v33 = vpop.f32.mrb[14].mxu0 }
 0x207   : > { %v5848_v31 = vpop.f32.mrb[15].mxu0  ;;  %v5916_v29 = vpop.f32.mrb[12].mxu1 }
 0x208   : > { %v7742_v43 = vadd.f32 %v5848_v31, %v5847_v33  ;;  %v5917_v34 = vpop.f32.mrb[13].mxu1 }
 0x209   : > { %v7744_v3 = vadd.f32 %v5917_v34, %v5916_v29  ;;  %v5919_v21 = vpop.f32.mrb[14].mxu1 }
 0x20a   : > { %v5920_v5 = vpop.f32.mrb[15].mxu1 }
 0x20b   : > { %v7746_v0 = vadd.f32 %v5920_v5, %v5919_v21 }
 0x20e   : > { %v5850_v47 = vpop.f32.mrb[16].mxu0 }
 0x20f   : > { %v5851_v27 = vpop.f32.mrb[17].mxu0 }
 0x210   : > { %v7748_v20 = vadd.f32 %v5851_v27, %v5850_v47  ;;  %v5853_v42 = vpop.f32.mrb[18].mxu0 }
 0x211   : > { %v5854_v54 = vpop.f32.mrb[19].mxu0 }
 0x212   : > { %v7750_v12 = vadd.f32 %v5854_v54, %v5853_v42 }
 0x216   : > { %v5856_v58 = vpop.f32.mrb[20].mxu0 }
 0x217   : > { %v5857_v39 = vpop.f32.mrb[21].mxu0 }
 0x218   : > { %v7752_v17 = vadd.f32 %v5857_v39, %v5856_v58  ;;  %v5859_v41 = vpop.f32.mrb[22].mxu0 }
 0x219   : > { %v5860_v55 = vpop.f32.mrb[23].mxu0 }
 0x21a   : > { %v7754_v61 = vadd.f32 %v5860_v55, %v5859_v41 }
 0x21f   : > { %v5938_v30 = vpop.f32.mrb[16].mxu1 }
 0x220   : > { %v5939_v36 = vpop.f32.mrb[17].mxu1 }
 0x221   : > { %v5940_v2 = vadd.f32 %v5939_v36, %v5938_v30  ;;  %v5941_v32 = vpop.f32.mrb[18].mxu1 }
 0x222   : > { %v5942_v22 = vpop.f32.mrb[19].mxu1 }
 0x223   : > { %v5943_v7 = vadd.f32 %v5942_v22, %v5941_v32  ;;  %v7757_v14 = vadd.f32 %v5940_v2, %v7718_v45 }
 0x224   : > { %v5862_v4 = vpop.f32.mrb[24].mxu0 }
 0x225   : > { %v5863_v19 = vpop.f32.mrb[25].mxu0  ;;  %v7759_v50 = vadd.f32 %v5943_v7, %v5831_v51 }
 0x226   : > { %v7761_v62 = vadd.f32 %v5863_v19, %v5862_v4  ;;  %v5865_v57 = vpop.f32.mrb[26].mxu0 }
 0x227   : > { %v5866_v44 = vpop.f32.mrb[27].mxu0 }
 0x228   : > { %v7763_v26 = vadd.f32 %v5866_v44, %v5865_v57 }
 0x22b   : > { %v5944_v56 = vpop.f32.mrb[20].mxu1 }
 0x22c   : > { %v5945_v63 = vpop.f32.mrb[21].mxu1  ;;  %v5868_v48 = vpop.f32.mrb[28].mxu0 }
 0x22d   : > { %v5946_v15 = vadd.f32 %v5945_v63, %v5944_v56  ;;  %v5947_v18 = vpop.f32.mrb[22].mxu1  ;;  %v5869_v60 = vpop.f32.mrb[29].mxu0 }
 0x22e   : > { %v5948_v13 = vpop.f32.mrb[23].mxu1  ;;  %v7765_v1 = vadd.f32 %v5869_v60, %v5868_v48  ;;  %v5871_v45 = vpop.f32.mrb[30].mxu0 }
 0x22f   : > { %v5949_v35 = vadd.f32 %v5948_v13, %v5947_v18  ;;  %v5872_v11 = vpop.f32.mrb[31].mxu0  ;;  %v7768_v51 = vadd.f32 %v5946_v15, %v7724_v40 }
 0x230   : > { %v7770_v59 = vadd.f32 %v5872_v11, %v5871_v45 }
 0x231   : > { %v7773_v53 = vadd.f32 %v5949_v35, %v7726_v37 }
 0x233   : > { %v5950_v28 = vpop.f32.mrb[24].mxu1 }
 0x234   : > { %v5951_v49 = vpop.f32.mrb[25].mxu1  ;;  %v5874_v9 = vpop.f32.mrb[32].mxu0 }
 0x235   : > { %v5952_v6 = vadd.f32 %v5951_v49, %v5950_v28  ;;  %v5953_v33 = vpop.f32.mrb[26].mxu1  ;;  %v5875_v31 = vpop.f32.mrb[33].mxu0 }
 0x236   : > { %v5954_v29 = vpop.f32.mrb[27].mxu1  ;;  %v7775_v34 = vadd.f32 %v5875_v31, %v5874_v9  ;;  %v5877_v21 = vpop.f32.mrb[34].mxu0 }
 0x237   : > { %v5955_v5 = vadd.f32 %v5954_v29, %v5953_v33  ;;  %v5878_v47 = vpop.f32.mrb[35].mxu0  ;;  %v7778_v40 = vadd.f32 %v5952_v6, %v7732_v10 }
 0x238   : > { %v7780_v27 = vadd.f32 %v5878_v47, %v5877_v21 }
 0x239   : > { %v7783_v37 = vadd.f32 %v5955_v5, %v7734_v8 }
 0x23b   : > { %v5956_v42 = vpop.f32.mrb[28].mxu1 }
 0x23c   : > { %v5957_v54 = vpop.f32.mrb[29].mxu1  ;;  %v5880_v41 = vpop.f32.mrb[36].mxu0 }
 0x23d   : > { %v5958_v58 = vadd.f32 %v5957_v54, %v5956_v42  ;;  %v5959_v39 = vpop.f32.mrb[30].mxu1  ;;  %v5881_v30 = vpop.f32.mrb[37].mxu0 }
 0x23e   : > { %v5960_v55 = vpop.f32.mrb[31].mxu1  ;;  %v7785_v2 = vadd.f32 %v5881_v30, %v5880_v41  ;;  %v5883_v32 = vpop.f32.mrb[38].mxu0 }
 0x23f   : > { %v5961_v36 = vadd.f32 %v5960_v55, %v5959_v39  ;;  %v7788_v22 = vadd.f32 %v5958_v58, %v7740_v23  ;;  %v5884_v10 = vpop.f32.mrb[39].mxu0 }
 0x240   : > { %v7790_v7 = vadd.f32 %v5884_v10, %v5883_v32 }
 0x241   : > { %v7793_v8 = vadd.f32 %v5961_v36, %v7742_v43 }
 0x243   : > { %v5962_v4 = vpop.f32.mrb[32].mxu1 }
 0x244   : > { %v5963_v19 = vpop.f32.mrb[33].mxu1 }
 0x245   : > { %v5964_v57 = vadd.f32 %v5963_v19, %v5962_v4  ;;  %v5965_v44 = vpop.f32.mrb[34].mxu1 }
 0x246   : > { %v5966_v56 = vpop.f32.mrb[35].mxu1 }
 0x247   : > { %v5967_v63 = vadd.f32 %v5966_v56, %v5965_v44  ;;  %v7796_v48 = vadd.f32 %v5964_v57, %v7748_v20 }
 0x249   : > { %v7799_v15 = vadd.f32 %v5967_v63, %v7750_v12  ;;  %v5886_v45 = vpop.f32.mrb[40].mxu0 }
 0x24a   : > { %v5887_v35 = vpop.f32.mrb[41].mxu0 }
 0x24b   : > { %v5968_v23 = vpop.f32.mrb[36].mxu1  ;;  %v7801_v28 = vadd.f32 %v5887_v35, %v5886_v45  ;;  %v5889_v49 = vpop.f32.mrb[42].mxu0 }
 0x24c   : > { %v5969_v18 = vpop.f32.mrb[37].mxu1  ;;  %v5890_v6 = vpop.f32.mrb[43].mxu0 }
 0x24d   : > { %v5970_v60 = vadd.f32 %v5969_v18, %v5968_v23  ;;  %v5971_v13 = vpop.f32.mrb[38].mxu1  ;;  %v7806_v20 = vadd.f32 %v5890_v6, %v5889_v49 }
 0x24e   : > { %v5972_v43 = vpop.f32.mrb[39].mxu1 }
 0x24f   : > { %v5973_v11 = vadd.f32 %v5972_v43, %v5971_v13  ;;  %v7804_v9 = vadd.f32 %v5970_v60, %v7752_v17 }
 0x251   : > { %v7810_v12 = vadd.f32 %v5973_v11, %v7754_v61  ;;  %v5892_v5 = vpop.f32.mrb[44].mxu0 }
 0x252   : > { %v5893_v42 = vpop.f32.mrb[45].mxu0 }
 0x253   : > { %v5974_v33 = vpop.f32.mrb[40].mxu1  ;;  %v7812_v58 = vadd.f32 %v5893_v42, %v5892_v5  ;;  %v5895_v17 = vpop.f32.mrb[46].mxu0 }
 0x254   : > { %v5975_v31 = vpop.f32.mrb[41].mxu1  ;;  %v5896_v41 = vpop.f32.mrb[47].mxu0 }
 0x255   : > { %v5976_v29 = vadd.f32 %v5975_v31, %v5974_v33  ;;  %v5977_v21 = vpop.f32.mrb[42].mxu1  ;;  %v7817_v55 = vadd.f32 %v5896_v41, %v5895_v17 }
 0x256   : > { %v5978_v47 = vpop.f32.mrb[43].mxu1 }
 0x257   : > { %v5979_v54 = vadd.f32 %v5978_v47, %v5977_v21  ;;  %v7815_v39 = vadd.f32 %v5976_v29, %v7761_v62 }
 0x259   : > { %v7820_v61 = vadd.f32 %v5979_v54, %v7763_v26  ;;  %v6064_v4 = vpop.f32.mrb[48].mxu0 }
 0x25a   : > { %v4805_v57 = vadd.f32 %v6064_v4, %v7768_v51  ;;  %v4796_v44 = vpop.f32.mrb[49].mxu0 }
 0x25b   : > { %v5980_v30 = vpop.f32.mrb[44].mxu1  ;;  %v4797_v62 = vadd.f32 %v4796_v44, %v7757_v14  ;;  %v6065_v26 = vpop.f32.mrb[50].mxu0 }
 0x25c   : > { %v5981_v36 = vpop.f32.mrb[45].mxu1  ;;  %v5701_v23 = vpack.c.bf16 %v4805_v57, %v4805_v57  ;;  %v4808_v18 = vadd.f32 %v6065_v26, %v7773_v53  ;;  %v4799_v51 = vpop.f32.mrb[51].mxu0  ;;  %v5154_v43 = vmul.f32 %v4805_v57, %v4805_v57  ;;  %v5086_v29 = vsel %vm1183_vm15, %v4805_v57, 0.0 }
 0x25d   : > { %v5982_v32 = vadd.f32 %v5981_v36, %v5980_v30  ;;  %v5983_v10 = vpop.f32.mrb[46].mxu1  ;;  %v5699_v60 = vpack.c.bf16 %v4797_v62, %v4797_v62  ;;  %v5152_v13 = vmul.f32 %v4797_v62, %v4797_v62  ;;  %v4800_v45 = vadd.f32 %v4799_v51, %v7759_v50 }
 0x25e   : > { %v5984_v19 = vpop.f32.mrb[47].mxu1  ;;  %5053 = vst.msk [vmem:[%s7826_s6 + $0x8] sm:$0xf] %vm832_vm0, %v5701_v23  ;;  %v5702_v35 = vpack.c.bf16 %v4808_v18, %v4808_v18  ;;  %v5083_v14 = vsel %vm1183_vm15, %v4797_v62, 0.0  ;;  %v5155_v53 = vmul.f32 %v4808_v18, %v4808_v18  ;;  %v5088_v44 = vsel %vm1183_vm15, %v4808_v18, 0.0 }
 0x25f   : > { %v5985_v56 = vadd.f32 %v5984_v19, %v5983_v10  ;;  %v7830_v63 = vadd.f32 %v5982_v32, %v7765_v1  ;;  %5051 = vst.msk [vmem:[%s7826_s6] sm:$0xf] %vm832_vm0, %v5699_v60  ;;  %v5700_v1 = vpack.c.bf16 %v4800_v45, %v4800_v45  ;;  %v5084_v11 = vsel %vm1183_vm15, %v4800_v45, 0.0 }
 0x260   : > { %v5153_v49 = vmul.f32 %v4800_v45, %v4800_v45  ;;  %5054 = vst.msk [vmem:[%s7826_s6 + $0xc] sm:$0xf] %vm832_vm0, %v5702_v35  ;;  %v5085_v33 = vadd.f32 %v5084_v11, %v5083_v14  ;;  %v5184_v21 = vsel %vm1183_vm15, %v5152_v13, 0.0 }
 0x261   : > { %v7843_v50 = vadd.f32 %v5985_v56, %v7770_v59  ;;  %5052 = vst.msk [vmem:[%s7826_s6 + $0x4] sm:$0xf] %vm832_vm0, %v5700_v1  ;;  %v6068_v54 = vpop.f32.mrb[52].mxu0  ;;  %v5187_v59 = vsel %vm1183_vm15, %v5154_v43, 0.0  ;;  %v5189_v56 = vsel %vm1183_vm15, %v5155_v53, 0.0 }
 0x262   : > { %v5185_v5 = vsel %vm1183_vm15, %v5153_v49, 0.0  ;;  %v5087_v17 = vadd.f32 %v5086_v29, %v5085_v33  ;;  %v4821_v36 = vadd.f32 %v6068_v54, %v7788_v22  ;;  %v4812_v32 = vpop.f32.mrb[53].mxu0 }
 0x263   : > { %v5986_v6 = vpop.f32.mrb[48].mxu1  ;;  %v5186_v41 = vadd.f32 %v5185_v5, %v5184_v21  ;;  %v4813_v4 = vadd.f32 %v4812_v32, %v7778_v40  ;;  %v6069_v19 = vpop.f32.mrb[54].mxu0 }
 0x264   : > { %v5987_v31 = vpop.f32.mrb[49].mxu1  ;;  %v5705_v26 = vpack.c.bf16 %v4821_v36, %v4821_v36  ;;  %v4815_v23 = vpop.f32.mrb[55].mxu0  ;;  %v5089_v51 = vadd.f32 %v5088_v44, %v5087_v17  ;;  %v5158_v40 = vmul.f32 %v4821_v36, %v4821_v36  ;;  %v4824_v43 = vadd.f32 %v6069_v19, %v7793_v8 }
 0x265   : > { %v5988_v47 = vadd.f32 %v5987_v31, %v5986_v6  ;;  %v5989_v42 = vpop.f32.mrb[50].mxu1  ;;  %v5188_v62 = vadd.f32 %v5187_v59, %v5186_v41  ;;  %v5703_v22 = vpack.c.bf16 %v4813_v4, %v4813_v4  ;;  %v5090_v60 = vsel %vm1183_vm15, %v4813_v4, 0.0 }
 0x266   : > { %v5990_v30 = vpop.f32.mrb[51].mxu1  ;;  %v5156_v13 = vmul.f32 %v4813_v4, %v4813_v4  ;;  %5057 = vst.msk [vmem:[%s7826_s6 + $0x18] sm:$0xf] %vm832_vm0, %v5705_v26  ;;  %v5091_v18 = vadd.f32 %v5090_v60, %v5089_v51  ;;  %v5094_v11 = vsel %vm1183_vm15, %v4821_v36, 0.0  ;;  %v5706_v6 = vpack.c.bf16 %v4824_v43, %v4824_v43 }
 0x267   : > { %v5991_v10 = vadd.f32 %v5990_v30, %v5989_v42  ;;  %v7854_v57 = vadd.f32 %v5988_v47, %v7775_v34  ;;  %v5190_v45 = vadd.f32 %v5189_v56, %v5188_v62  ;;  %v4816_v34 = vadd.f32 %v4815_v23, %v7783_v37  ;;  %5055 = vst.msk [vmem:[%s7826_s6 + $0x10] sm:$0xf] %vm832_vm0, %v5703_v22 }
 0x268   : > { %v5191_v35 = vsel %vm1183_vm15, %v5156_v13, 0.0  ;;  %v5195_v5 = vsel %vm1183_vm15, %v5158_v40, 0.0  ;;  %5058 = vst.msk [vmem:[%s7826_s6 + $0x1c] sm:$0xf] %vm832_vm0, %v5706_v6  ;;  %v5159_v47 = vmul.f32 %v4824_v43, %v4824_v43 }
 0x269   : > { %v7867_v1 = vadd.f32 %v5991_v10, %v7780_v27  ;;  %v5192_v49 = vadd.f32 %v5191_v35, %v5190_v45  ;;  %v5704_v33 = vpack.c.bf16 %v4816_v34, %v4816_v34  ;;  %v5092_v8 = vsel %vm1183_vm15, %v4816_v34, 0.0 }
 0x26a   : > { %v5157_v37 = vmul.f32 %v4816_v34, %v4816_v34  ;;  %v6072_v21 = vpop.f32.mrb[56].mxu0  ;;  %v5093_v27 = vadd.f32 %v5092_v8, %v5091_v18  ;;  %v5096_v10 = vsel %vm1183_vm15, %v4824_v43, 0.0  ;;  %v5197_v60 = vsel %vm1183_vm15, %v5159_v47, 0.0 }
 0x26b   : > { %v5992_v14 = vpop.f32.mrb[52].mxu1  ;;  %v4837_v54 = vadd.f32 %v6072_v21, %v7804_v9  ;;  %v4828_v17 = vpop.f32.mrb[57].mxu0  ;;  %5056 = vst.msk [vmem:[%s7826_s6 + $0x14] sm:$0xf] %vm832_vm0, %v5704_v33 }
 0x26c   : > { %v5993_v53 = vpop.f32.mrb[53].mxu1  ;;  %v5193_v41 = vsel %vm1183_vm15, %v5157_v37, 0.0  ;;  %v4829_v36 = vadd.f32 %v4828_v17, %v7796_v48  ;;  %v6073_v32 = vpop.f32.mrb[58].mxu0  ;;  %v5095_v4 = vadd.f32 %v5094_v11, %v5093_v27 }
 0x26d   : > { %v5994_v31 = vadd.f32 %v5993_v53, %v5992_v14  ;;  %v5995_v29 = vpop.f32.mrb[54].mxu1  ;;  %v5194_v19 = vadd.f32 %v5193_v41, %v5192_v49  ;;  %v5709_v44 = vpack.c.bf16 %v4837_v54, %v4837_v54  ;;  %v4831_v9 = vpop.f32.mrb[59].mxu0  ;;  %v5162_v56 = vmul.f32 %v4837_v54, %v4837_v54 }
 0x26e   : > { %v5996_v42 = vpop.f32.mrb[55].mxu1  ;;  %v5707_v62 = vpack.c.bf16 %v4829_v36, %v4829_v36  ;;  %v5098_v26 = vsel %vm1183_vm15, %v4829_v36, 0.0  ;;  %v5160_v23 = vmul.f32 %v4829_v36, %v4829_v36  ;;  %v5097_v48 = vadd.f32 %v5096_v10, %v5095_v4 }
 0x26f   : > { %v5997_v30 = vadd.f32 %v5996_v42, %v5995_v29  ;;  %v7880_v59 = vadd.f32 %v5994_v31, %v7785_v2  ;;  %v5196_v22 = vadd.f32 %v5195_v5, %v5194_v19  ;;  %5061 = vst.msk [vmem:[%s7826_s6 + $0x28] sm:$0xf] %vm832_vm0, %v5709_v44  ;;  %v4840_v51 = vadd.f32 %v6073_v32, %v7810_v12 }
 0x270   : > { %v4832_v2 = vadd.f32 %v4831_v9, %v7799_v15  ;;  %5059 = vst.msk [vmem:[%s7826_s6 + $0x20] sm:$0xf] %vm832_vm0, %v5707_v62  ;;  %v5199_v13 = vsel %vm1183_vm15, %v5160_v23, 0.0  ;;  %v5102_v43 = vsel %vm1183_vm15, %v4837_v54, 0.0  ;;  %v5099_v34 = vadd.f32 %v5098_v26, %v5097_v48 }
 0x271   : > { %v7893_v45 = vadd.f32 %v5997_v30, %v7790_v7  ;;  %v5198_v18 = vadd.f32 %v5197_v60, %v5196_v22  ;;  %v5710_v35 = vpack.c.bf16 %v4840_v51, %v4840_v51  ;;  %v5203_v15 = vsel %vm1183_vm15, %v5162_v56, 0.0 }
 0x272   : > { %v5708_v14 = vpack.c.bf16 %v4832_v2, %v4832_v2  ;;  %v5100_v11 = vsel %vm1183_vm15, %v4832_v2, 0.0  ;;  %v5161_v49 = vmul.f32 %v4832_v2, %v4832_v2  ;;  %v6076_v53 = vpop.f32.mrb[60].mxu0  ;;  %v5163_v21 = vmul.f32 %v4840_v51, %v4840_v51 }
 0x273   : > { %v5998_v40 = vpop.f32.mrb[56].mxu1  ;;  %v5200_v33 = vadd.f32 %v5199_v13, %v5198_v18  ;;  %5062 = vst.msk [vmem:[%s7826_s6 + $0x2c] sm:$0xf] %vm832_vm0, %v5710_v35  ;;  %v5101_v7 = vadd.f32 %v5100_v11, %v5099_v34  ;;  %v4853_v31 = vadd.f32 %v6076_v53, %v7830_v63  ;;  %v4844_v29 = vpop.f32.mrb[61].mxu0  ;;  %v5104_v54 = vsel %vm1183_vm15, %v4840_v51, 0.0 }
 0x274   : > { %v5999_v12 = vpop.f32.mrb[57].mxu1  ;;  %5060 = vst.msk [vmem:[%s7826_s6 + $0x24] sm:$0xf] %vm832_vm0, %v5708_v14  ;;  %v5201_v5 = vsel %vm1183_vm15, %v5161_v49, 0.0  ;;  %v4845_v27 = vadd.f32 %v4844_v29, %v7815_v39  ;;  %v6077_v42 = vpop.f32.mrb[62].mxu0  ;;  %v5205_v56 = vsel %vm1183_vm15, %v5163_v21, 0.0 }
 0x275   : > { %v6001_v6 = vpop.f32.mrb[58].mxu1  ;;  %v6000_v8 = vadd.f32 %v5999_v12, %v5998_v40  ;;  %v5103_v17 = vadd.f32 %v5102_v43, %v5101_v7  ;;  %v5202_v41 = vadd.f32 %v5201_v5, %v5200_v33  ;;  %v5713_v30 = vpack.c.bf16 %v4853_v31, %v4853_v31  ;;  %v4847_v36 = vpop.f32.mrb[63].mxu0 }
 0x276   : > { %v6002_v37 = vpop.f32.mrb[59].mxu1  ;;  %v5166_v32 = vmul.f32 %v4853_v31, %v4853_v31  ;;  %v5711_v63 = vpack.c.bf16 %v4845_v27, %v4845_v27  ;;  %v5106_v10 = vsel %vm1183_vm15, %v4845_v27, 0.0  ;;  %v5164_v4 = vmul.f32 %v4845_v27, %v4845_v27 }
 0x277   : > { %v6003_v47 = vadd.f32 %v6002_v37, %v6001_v6  ;;  %v5204_v19 = vadd.f32 %v5203_v15, %v5202_v41  ;;  %5065 = vst.msk [vmem:[%s7826_s6 + $0x38] sm:$0xf] %vm832_vm0, %v5713_v30  ;;  %v5105_v44 = vadd.f32 %v5104_v54, %v5103_v17  ;;  %v4856_v9 = vadd.f32 %v6077_v42, %v7843_v50 }
 0x278   : > { %v4848_v39 = vadd.f32 %v4847_v36, %v7820_v61  ;;  %5063 = vst.msk [vmem:[%s7826_s6 + $0x30] sm:$0xf] %vm832_vm0, %v5711_v63  ;;  %v5207_v62 = vsel %vm1183_vm15, %v5164_v4, 0.0  ;;  %v7916_v23 = vadd.f32 %v6000_v8, %v7801_v28  ;;  %v5110_v48 = vsel %vm1183_vm15, %v4853_v31, 0.0 }
 0x279   : > { %v7919_v22 = vadd.f32 %v6003_v47, %v7806_v20  ;;  %v5107_v51 = vadd.f32 %v5106_v10, %v5105_v44  ;;  %v5206_v50 = vadd.f32 %v5205_v56, %v5204_v19  ;;  %v5714_v2 = vpack.c.bf16 %v4856_v9, %v4856_v9 }
 0x27a   : > { %v5211_v60 = vsel %vm1183_vm15, %v5166_v32, 0.0  ;;  %v5712_v13 = vpack.c.bf16 %v4848_v39, %v4848_v39  ;;  %v5108_v40 = vsel %vm1183_vm15, %v4848_v39, 0.0  ;;  %v5165_v43 = vmul.f32 %v4848_v39, %v4848_v39  ;;  %v6080_v18 = vpop.f32.mrb[64].mxu0 }
 0x27b   : > { %v6004_v26 = vpop.f32.mrb[60].mxu1  ;;  %v5208_v28 = vadd.f32 %v5207_v62, %v5206_v50  ;;  %5066 = vst.msk [vmem:[%s7826_s6 + $0x3c] sm:$0xf] %vm832_vm0, %v5714_v2  ;;  %v5109_v20 = vadd.f32 %v5108_v40, %v5107_v51  ;;  %v4869_v15 = vadd.f32 %v6080_v18, %v7880_v59  ;;  %v4860_v14 = vpop.f32.mrb[65].mxu0  ;;  %v5167_v11 = vmul.f32 %v4856_v9, %v4856_v9 }
 0x27c   : > { %v6005_v61 = vpop.f32.mrb[61].mxu1  ;;  %5064 = vst.msk [vmem:[%s7826_s6 + $0x34] sm:$0xf] %vm832_vm0, %v5712_v13  ;;  %v5209_v49 = vsel %vm1183_vm15, %v5165_v43, 0.0  ;;  %v4861_v53 = vadd.f32 %v4860_v14, %v7854_v57  ;;  %v6081_v33 = vpop.f32.mrb[66].mxu0  ;;  %v5112_v7 = vsel %vm1183_vm15, %v4856_v9, 0.0 }
 0x27d   : > { %v6007_v34 = vpop.f32.mrb[62].mxu1  ;;  %v6006_v35 = vadd.f32 %v6005_v61, %v6004_v26  ;;  %v5111_v8 = vadd.f32 %v5110_v48, %v5109_v20  ;;  %v5210_v37 = vadd.f32 %v5209_v49, %v5208_v28  ;;  %v5717_v31 = vpack.c.bf16 %v4869_v15, %v4869_v15  ;;  %v4863_v29 = vpop.f32.mrb[67].mxu0 }
 0x27e   : > { %v6008_v12 = vpop.f32.mrb[63].mxu1  ;;  %v5170_v21 = vmul.f32 %v4869_v15, %v4869_v15  ;;  %v5715_v59 = vpack.c.bf16 %v4861_v53, %v4861_v53  ;;  %v5114_v5 = vsel %vm1183_vm15, %v4861_v53, 0.0  ;;  %v5168_v47 = vmul.f32 %v4861_v53, %v4861_v53 }
 0x27f   : > { %v6009_v6 = vadd.f32 %v6008_v12, %v6007_v34  ;;  %v5212_v27 = vadd.f32 %v5211_v60, %v5210_v37  ;;  %5069 = vst.msk [vmem:[%s7826_s6 + $0x48] sm:$0xf] %vm832_vm0, %v5717_v31  ;;  %v5113_v42 = vadd.f32 %v5112_v7, %v5111_v8  ;;  %v4872_v54 = vadd.f32 %v6081_v33, %v7893_v45 }
 0x280   : > { %v4864_v57 = vadd.f32 %v4863_v29, %v7867_v1  ;;  %v5213_v17 = vsel %vm1183_vm15, %v5167_v11, 0.0  ;;  %5067 = vst.msk [vmem:[%s7826_s6 + $0x40] sm:$0xf] %vm832_vm0, %v5715_v59  ;;  %v5215_v41 = vsel %vm1183_vm15, %v5168_v47, 0.0  ;;  %v4724_v36 = vadd.f32 %v6006_v35, %v7812_v58 }
 0x281   : > { %v4727_v32 = vadd.f32 %v6009_v6, %v7817_v55  ;;  %v5118_v63 = vsel %vm1183_vm15, %v4869_v15, 0.0  ;;  %v5115_v10 = vadd.f32 %v5114_v5, %v5113_v42  ;;  %v5214_v4 = vadd.f32 %v5213_v17, %v5212_v27 }
 0x282   : > { %v5718_v19 = vpack.c.bf16 %v4872_v54, %v4872_v54  ;;  %v5219_v1 = vsel %vm1183_vm15, %v5170_v21, 0.0  ;;  %v5716_v44 = vpack.c.bf16 %v4864_v57, %v4864_v57  ;;  %v5116_v9 = vsel %vm1183_vm15, %v4864_v57, 0.0  ;;  %v6084_v62 = vpop.f32.mrb[68].mxu0 }
 0x283   : > { %v6010_v30 = vpop.f32.mrb[64].mxu1  ;;  %v5169_v39 = vmul.f32 %v4864_v57, %v4864_v57  ;;  %v5216_v26 = vadd.f32 %v5215_v41, %v5214_v4  ;;  %v5117_v58 = vadd.f32 %v5116_v9, %v5115_v10  ;;  %v4885_v51 = vadd.f32 %v6084_v62, %v4724_v36  ;;  %v4876_v50 = vpop.f32.mrb[69].mxu0 }
 0x284   : > { %v6011_v45 = vpop.f32.mrb[65].mxu1  ;;  %5070 = vst.msk [vmem:[%s7826_s6 + $0x4c] sm:$0xf] %vm832_vm0, %v5718_v19  ;;  %v5171_v2 = vmul.f32 %v4872_v54, %v4872_v54  ;;  %5068 = vst.msk [vmem:[%s7826_s6 + $0x44] sm:$0xf] %vm832_vm0, %v5716_v44  ;;  %v4877_v13 = vadd.f32 %v4876_v50, %v7916_v23  ;;  %v6085_v40 = vpop.f32.mrb[70].mxu0 }
 0x285   : > { %v6013_v56 = vpop.f32.mrb[66].mxu1  ;;  %v6012_v55 = vadd.f32 %v6011_v45, %v6010_v30  ;;  %v5217_v61 = vsel %vm1183_vm15, %v5169_v39, 0.0  ;;  %v5120_v43 = vsel %vm1183_vm15, %v4872_v54, 0.0  ;;  %v5119_v34 = vadd.f32 %v5118_v63, %v5117_v58  ;;  %v4879_v20 = vpop.f32.mrb[71].mxu0 }
 0x286   : > { %v6014_v48 = vpop.f32.mrb[67].mxu1  ;;  %v5218_v18 = vadd.f32 %v5217_v61, %v5216_v26  ;;  %v5721_v28 = vpack.c.bf16 %v4885_v51, %v4885_v51  ;;  %v5174_v35 = vmul.f32 %v4885_v51, %v4885_v51  ;;  %v5719_v12 = vpack.c.bf16 %v4877_v13, %v4877_v13 }
 0x287   : > { %v6015_v60 = vadd.f32 %v6014_v48, %v6013_v56  ;;  %v5122_v15 = vsel %vm1183_vm15, %v4877_v13, 0.0  ;;  %v5172_v14 = vmul.f32 %v4877_v13, %v4877_v13  ;;  %v5121_v49 = vadd.f32 %v5120_v43, %v5119_v34 }
 0x288   : > { %v5220_v11 = vadd.f32 %v5219_v1, %v5218_v18  ;;  %5073 = vst.msk [vmem:[%s7826_s6 + $0x58] sm:$0xf] %vm832_vm0, %v5721_v28  ;;  %v4888_v6 = vadd.f32 %v6085_v40, %v4727_v32  ;;  %v4880_v23 = vadd.f32 %v4879_v20, %v7919_v22  ;;  %v5221_v53 = vsel %vm1183_vm15, %v5171_v2, 0.0  ;;  %5071 = vst.msk [vmem:[%s7826_s6 + $0x50] sm:$0xf] %vm832_vm0, %v5719_v12 }
 0x289   : > { %v5223_v33 = vsel %vm1183_vm15, %v5172_v14, 0.0  ;;  %v4732_v8 = vadd.f32 %v6012_v55, %v7720_v24  ;;  %v4735_v37 = vadd.f32 %v6015_v60, %v7722_v16  ;;  %v5123_v31 = vadd.f32 %v5122_v15, %v5121_v49 }
 0x28a   : > { %v5222_v29 = vadd.f32 %v5221_v53, %v5220_v11  ;;  %v5722_v21 = vpack.c.bf16 %v4888_v6, %v4888_v6  ;;  %v5126_v5 = vsel %vm1183_vm15, %v4885_v51, 0.0  ;;  %v5720_v22 = vpack.c.bf16 %v4880_v23, %v4880_v23  ;;  %v6088_v54 = vpop.f32.mrb[72].mxu0 }
 0x28b   : > { %v6016_v7 = vpop.f32.mrb[68].mxu1  ;;  %v5124_v47 = vsel %vm1183_vm15, %v4880_v23, 0.0  ;;  %v5173_v27 = vmul.f32 %v4880_v23, %v4880_v23  ;;  %v5227_v57 = vsel %vm1183_vm15, %v5174_v35, 0.0  ;;  %v4892_v30 = vpop.f32.mrb[73].mxu0  ;;  %v5128_v36 = vsel %vm1183_vm15, %v4888_v6, 0.0 }
 0x28c   : > { %v6017_v59 = vpop.f32.mrb[69].mxu1  ;;  %v5224_v17 = vadd.f32 %v5223_v33, %v5222_v29  ;;  %5074 = vst.msk [vmem:[%s7826_s6 + $0x5c] sm:$0xf] %vm832_vm0, %v5722_v21  ;;  %v5125_v24 = vadd.f32 %v5124_v47, %v5123_v31  ;;  %5072 = vst.msk [vmem:[%s7826_s6 + $0x54] sm:$0xf] %vm832_vm0, %v5720_v22  ;;  %v4893_v10 = vadd.f32 %v4892_v30, %v4732_v8  ;;  %v6089_v4 = vpop.f32.mrb[74].mxu0 }
 0x28d   : > { %v6019_v42 = vpop.f32.mrb[70].mxu1  ;;  %v6018_v16 = vadd.f32 %v6017_v59, %v6016_v7  ;;  %v5225_v32 = vsel %vm1183_vm15, %v5173_v27, 0.0  ;;  %v5175_v19 = vmul.f32 %v4888_v6, %v4888_v6  ;;  %v4895_v9 = vpop.f32.mrb[75].mxu0 }
 0x28e   : > { %v6020_v41 = vpop.f32.mrb[71].mxu1  ;;  %v5127_v45 = vadd.f32 %v5126_v5, %v5125_v24  ;;  %v5226_v1 = vadd.f32 %v5225_v32, %v5224_v17  ;;  %v5723_v39 = vpack.c.bf16 %v4893_v10, %v4893_v10  ;;  %v5130_v56 = vsel %vm1183_vm15, %v4893_v10, 0.0 }
 0x28f   : > { %v6021_v63 = vadd.f32 %v6020_v41, %v6019_v42  ;;  %v4740_v44 = vadd.f32 %v6018_v16, %v7728_v46  ;;  %v5176_v62 = vmul.f32 %v4893_v10, %v4893_v10  ;;  %v4896_v51 = vadd.f32 %v4895_v9, %v4735_v37 }
 0x290   : > { %v5228_v58 = vadd.f32 %v5227_v57, %v5226_v1  ;;  %v5129_v48 = vadd.f32 %v5128_v36, %v5127_v45  ;;  %5075 = vst.msk [vmem:[%s7826_s6 + $0x60] sm:$0xf] %vm832_vm0, %v5723_v39  ;;  %v5229_v61 = vsel %vm1183_vm15, %v5175_v19, 0.0 }
 0x291   : > { %v4743_v26 = vadd.f32 %v6021_v63, %v7730_v38  ;;  %v4901_v55 = vadd.f32 %v6088_v54, %v4740_v44  ;;  %v5231_v13 = vsel %vm1183_vm15, %v5176_v62, 0.0  ;;  %v5724_v20 = vpack.c.bf16 %v4896_v51, %v4896_v51 }
 0x292   : > { %v5131_v46 = vadd.f32 %v5130_v56, %v5129_v48  ;;  %v5230_v43 = vadd.f32 %v5229_v61, %v5228_v58  ;;  %v6092_v18 = vpop.f32.mrb[76].mxu0  ;;  %v5132_v35 = vsel %vm1183_vm15, %v4896_v51, 0.0  ;;  %v5177_v12 = vmul.f32 %v4896_v51, %v4896_v51 }
 0x293   : > { %v4904_v50 = vadd.f32 %v6089_v4, %v4743_v26  ;;  %v6022_v2 = vpop.f32.mrb[72].mxu1  ;;  %v5725_v60 = vpack.c.bf16 %v4901_v55, %v4901_v55  ;;  %v5178_v28 = vmul.f32 %v4901_v55, %v4901_v55  ;;  %v4908_v14 = vpop.f32.mrb[77].mxu0  ;;  %v5134_v53 = vsel %vm1183_vm15, %v4901_v55, 0.0  ;;  %5076 = vst.msk [vmem:[%s7826_s6 + $0x64] sm:$0xf] %vm832_vm0, %v5724_v20 }
 0x294   : > { %v6023_v40 = vpop.f32.mrb[73].mxu1  ;;  %v5232_v11 = vadd.f32 %v5231_v13, %v5230_v43  ;;  %v5133_v49 = vadd.f32 %v5132_v35, %v5131_v46  ;;  %v6093_v23 = vpop.f32.mrb[78].mxu0  ;;  %v5233_v7 = vsel %vm1183_vm15, %v5177_v12, 0.0 }
 0x295   : > { %v5726_v34 = vpack.c.bf16 %v4904_v50, %v4904_v50  ;;  %v6025_v38 = vpop.f32.mrb[74].mxu1  ;;  %5077 = vst.msk [vmem:[%s7826_s6 + $0x68] sm:$0xf] %vm832_vm0, %v5725_v60  ;;  %v6024_v6 = vadd.f32 %v6023_v40, %v6022_v2  ;;  %v5179_v33 = vmul.f32 %v4904_v50, %v4904_v50  ;;  %v4911_v37 = vpop.f32.mrb[79].mxu0  ;;  %v5235_v59 = vsel %vm1183_vm15, %v5178_v28, 0.0 }
 0x296   : > { %v6026_v15 = vpop.f32.mrb[75].mxu1  ;;  %v5135_v31 = vadd.f32 %v5134_v53, %v5133_v49  ;;  %v5234_v29 = vadd.f32 %v5233_v7, %v5232_v11  ;;  %v5136_v5 = vsel %vm1183_vm15, %v4904_v50, 0.0 }
 0x297   : > { %5078 = vst.msk [vmem:[%s7826_s6 + $0x6c] sm:$0xf] %vm832_vm0, %v5726_v34  ;;  %v6027_v8 = vadd.f32 %v6026_v15, %v6025_v38  ;;  %v4748_v21 = vadd.f32 %v6024_v6, %v7736_v25  ;;  %v5237_v57 = vsel %vm1183_vm15, %v5179_v33, 0.0 }
 0x298   : > { %v5236_v47 = vadd.f32 %v5235_v59, %v5234_v29  ;;  %v5137_v42 = vadd.f32 %v5136_v5, %v5135_v31 }
 0x299   : > { %v4751_v22 = vadd.f32 %v6027_v8, %v7738_v52  ;;  %v4909_v27 = vadd.f32 %v4908_v14, %v4748_v21 }
 0x29a   : > { %v5238_v30 = vadd.f32 %v5237_v57, %v5236_v47 }
 0x29b   : > { %v6028_v54 = vpop.f32.mrb[76].mxu1  ;;  %v4912_v17 = vadd.f32 %v4911_v37, %v4751_v22  ;;  %v5727_v16 = vpack.c.bf16 %v4909_v27, %v4909_v27  ;;  %v5138_v41 = vsel %vm1183_vm15, %v4909_v27, 0.0  ;;  %v5180_v25 = vmul.f32 %v4909_v27, %v4909_v27 }
 0x29c   : > { %v6029_v24 = vpop.f32.mrb[77].mxu1  ;;  %v5139_v32 = vadd.f32 %v5138_v41, %v5137_v42 }
 0x29d   : > { %v6031_v36 = vpop.f32.mrb[78].mxu1  ;;  %v5728_v63 = vpack.c.bf16 %v4912_v17, %v4912_v17  ;;  %v5140_v52 = vsel %vm1183_vm15, %v4912_v17, 0.0  ;;  %v5181_v10 = vmul.f32 %v4912_v17, %v4912_v17  ;;  %5079 = vst.msk [vmem:[%s7826_s6 + $0x70] sm:$0xf] %vm832_vm0, %v5727_v16  ;;  %v5239_v19 = vsel %vm1183_vm15, %v5180_v25, 0.0 }
 0x29e   : > { %v6032_v4 = vpop.f32.mrb[79].mxu1  ;;  %v6030_v45 = vadd.f32 %v6029_v24, %v6028_v54  ;;  %v5240_v44 = vadd.f32 %v5239_v19, %v5238_v30  ;;  %v5141_v9 = vadd.f32 %v5140_v52, %v5139_v32 }
 0x29f   : > { %v6033_v1 = vadd.f32 %v6032_v4, %v6031_v36  ;;  %5080 = vst.msk [vmem:[%s7826_s6 + $0x74] sm:$0xf] %vm832_vm0, %v5728_v63  ;;  %v5241_v39 = vsel %vm1183_vm15, %v5181_v10, 0.0 }
 0x2a0   : > { %v4756_v56 = vadd.f32 %v6030_v45, %v7744_v3  ;;  %v5242_v26 = vadd.f32 %v5241_v39, %v5240_v44 }
 0x2a1   : > { %v4759_v62 = vadd.f32 %v6033_v1, %v7746_v0 }
 0x2a2   : > { %v4917_v58 = vadd.f32 %v6092_v18, %v4756_v56 }
 0x2a3   : > { %v4920_v55 = vadd.f32 %v6093_v23, %v4759_v62 }
 0x2a4   : > { %v5729_v48 = vpack.c.bf16 %v4917_v58, %v4917_v58  ;;  %v5142_v51 = vsel %vm1183_vm15, %v4917_v58, 0.0  ;;  %v5182_v50 = vmul.f32 %v4917_v58, %v4917_v58 }
 0x2a5   : > { %v5730_v2 = vpack.c.bf16 %v4920_v55, %v4920_v55  ;;  %v5143_v61 = vadd.f32 %v5142_v51, %v5141_v9  ;;  %v5144_v60 = vsel %vm1183_vm15, %v4920_v55, 0.0  ;;  %v5183_v46 = vmul.f32 %v4920_v55, %v4920_v55 }
 0x2a6   : > { %5081 = vst.msk [vmem:[%s7826_s6 + $0x78] sm:$0xf] %vm832_vm0, %v5729_v48  ;;  %v5243_v13 = vsel %vm1183_vm15, %v5182_v50, 0.0 }
 0x2a7   : > { %5082 = vst.msk [vmem:[%s7826_s6 + $0x7c] sm:$0xf] %vm832_vm0, %v5730_v2  ;;  %v5244_v3 = vadd.f32 %v5243_v13, %v5242_v26  ;;  %v5145_v0 = vadd.f32 %v5144_v60, %v5143_v61  ;;  %v5245_v40 = vsel %vm1183_vm15, %v5183_v46, 0.0  ;;  %vm5255_vm0 = vcmask 517120  }
 0x2a9   : > { %v5146_v43 = vrot.slane %v5145_v0, 4  ;;  %v5246_v34 = vadd.f32 %v5245_v40, %v5244_v3 }
 0x2ab   : > { %v5147_v38 = vadd.f32 %v5146_v43, %v5145_v0  ;;  %v5247_v18 = vrot.slane %v5246_v34, 4 }
 0x2ad   : > { %v5148_v28 = vrot.slane %v5147_v38, 2  ;;  %v5248_v20 = vadd.f32 %v5247_v18, %v5246_v34 }
 0x2af   : > { %v5149_v35 = vadd.f32 %v5148_v28, %v5147_v38  ;;  %v5249_v12 = vrot.slane %v5248_v20, 2 }
 0x2b1   : > { %v5150_v15 = vrot.slane %v5149_v35, 1  ;;  %v5250_v14 = vadd.f32 %v5249_v12, %v5248_v20 }
 0x2b3   : > { %v5251_v11 = vrot.slane %v5250_v14, 1  ;;  %v5151_v49 = vadd.f32 %v5150_v15, %v5149_v35 }
 0x2b5   : > { %v5252_v6 = vadd.f32 %v5251_v11, %v5250_v14 }
 0x2b7   : > { %v5254_v23 = vsel %vm5253_vm2, %v5151_v49, %v5252_v6 }
 0x2b8   : > { %5256 = vst.msk [vmem:[%s236_s10] sm:$0x3] %vm5255_vm0, %v5254_v23 }
 0x2b9 PF: > { %s16_s18 = sadd.s32 1, %s6215_s18  }
 0x2ba   : > { %p13_p5 = scmp.ge.s32.totalorder %s16_s18, 4  }
 0x2bc   :  { %15 = sbr.rel (!%p13_p5) target bundleno = 1 (0x1), region = 81 }

</bundles_post_ra>
